<compile_context>
chip_gen: v7x
topology: tpu7x:2x2x1
jax: 0.10.0
libtpu: 0.0.40
codegen_flags: <defaults>
</compile_context>

<pallas_src>
import jax
import jax.numpy as jnp
from jax.experimental import pallas as pl
from jax.experimental.pallas import tpu as pltpu

EPS = 1e-5
MXU_M = 128  # target matmul M per block (keeps f32 accumulators in-register)


# --------------------------------------------------------------------------
# helpers
# --------------------------------------------------------------------------
def _pick_row_tile(H, W):
    """Rows per grid step so that TH*W ~= MXU_M and TH divides H."""
    th = max(1, min(H, MXU_M // max(W, 1)))
    while H % th:
        th -= 1
    if (th * W) % 8 != 0 and th != H:
        th = H  # keep the output BlockSpec legal (full dim always allowed)
    return th


def _interp_matrix(n_in, n_out):
    """1-D bilinear interpolation matrix, align_corners=True (n_out, n_in)."""
    if n_in == 1:
        return jnp.ones((n_out, 1), jnp.float32)
    pos = jnp.arange(n_out, dtype=jnp.float32) * (n_in - 1) / max(n_out - 1, 1)
    i0 = jnp.clip(jnp.floor(pos).astype(jnp.int32), 0, n_in - 1)
    i1 = jnp.clip(i0 + 1, 0, n_in - 1)
    f = pos - i0.astype(jnp.float32)
    rows = jnp.arange(n_out)
    m = jnp.zeros((n_out, n_in), jnp.float32)
    m = m.at[rows, i0].add(1.0 - f)
    m = m.at[rows, i1].add(f)
    return m


def _upsample_pad_operator(H1, W1, H2, W2):
    """(H2*W2, H1*W1) operator = bilinear-2x upsample + F.pad zero rows/cols."""
    uh = _interp_matrix(H1, 2 * H1)
    uw = _interp_matrix(W1, 2 * W1)
    dY, dX = H2 - 2 * H1, W2 - 2 * W1
    uhp = jnp.zeros((H2, H1), jnp.float32).at[dY // 2:dY // 2 + 2 * H1].set(uh)
    uwp = jnp.zeros((W2, W1), jnp.float32).at[dX // 2:dX // 2 + 2 * W1].set(uw)
    return jnp.kron(uhp, uwp)


# --------------------------------------------------------------------------
# fully fused Up kernel:
#   upsample+pad (matmul) -> concat-split conv1 + BN + ReLU (VMEM resident)
#   -> conv2 + BN + ReLU -> output block
# --------------------------------------------------------------------------
def _make_up_kernel(H, W, TH, Cs, Cu, Cmid, Cout):
    """Flat (row-major) layout: position i = r*W + c.

    Each padded VMEM scratch holds an image with 2 zero "rows of W" on top and
    bottom (1 halo row + 1 guard row each side), so the tap (dy, dx) for output
    rows [r0, r0+TH) is the contiguous slice flat[(r0+dy+1)*W + dx-1 : +TH*W].
    The wrapped column for dx=0 / dx=2 is killed by a per-position mask.
    """
    M = TH * W
    n_tiles = H // TH

    def fill(pad_ref, interior):
        z = jnp.zeros((2 * W, pad_ref.shape[-1]), pad_ref.dtype)
        pad_ref[pl.ds(0, 2 * W), :] = z
        pad_ref[pl.ds(2 * W, H * W), :] = interior.astype(pad_ref.dtype)
        pad_ref[pl.ds((H + 2) * W, 2 * W), :] = z

    def conv_tile(pairs, r0, mask_l, mask_r, cout):
        """3x3 conv for TH output rows starting at r0 (static int or traced)."""
        acc = jnp.zeros((M, cout), jnp.float32)
        for dy in range(3):
            row_base = (r0 + dy + 1) * W
            if not isinstance(row_base, int):
                row_base = pl.multiple_of(row_base, W)
            for dx in range(3):
                start = row_base + (dx - 1)
                y = None
                for pad_ref, w_ref in pairs:
                    patch = pad_ref[pl.ds(start, M), :].astype(jnp.bfloat16)
                    part = jnp.dot(patch, w_ref[dy, dx],
                                   preferred_element_type=jnp.float32)
                    y = part if y is None else y + part
                if dx == 0:
                    y = y * mask_l        # col -1 tap invalid at c == 0
                elif dx == 2:
                    y = y * mask_r        # col +1 tap invalid at c == W-1
                acc = acc + y
        return acc

    def kernel(skip_ref, small_ref, up_op_ref,
               w1s_ref, w1u_ref, sc1_ref, sh1_ref,
               w2_ref, sc2_ref, sh2_ref,
               o_ref, pad_skip, pad_up, pad_mid):
        col = jax.lax.broadcasted_iota(jnp.int32, (M, 1), 0) % W
        mask_l = (col > 0).astype(jnp.float32)
        mask_r = (col < W - 1).astype(jnp.float32)

        @pl.when(pl.program_id(1) == 0)
        def _():
            # per-image setup: halo-padded skip, fused upsample+pad, full conv1
            fill(pad_skip, skip_ref[0])
            up = jnp.dot(up_op_ref[...], small_ref[0],
                         preferred_element_type=jnp.float32)
            fill(pad_up, up)
            z = jnp.zeros((2 * W, Cmid), pad_mid.dtype)
            pad_mid[pl.ds(0, 2 * W), :] = z
            pad_mid[pl.ds((H + 2) * W, 2 * W), :] = z
            sc1 = sc1_ref[...]
            sh1 = sh1_ref[...]
            for ti in range(n_tiles):                       # static unroll
                acc1 = conv_tile([(pad_skip, w1s_ref), (pad_up, w1u_ref)],
                                 ti * TH, mask_l, mask_r, Cmid)
                out1 = jnp.maximum(acc1 * sc1 + sh1, 0.0)
                pad_mid[pl.ds((ti * TH + 2) * W, M), :] = out1.astype(
                    pad_mid.dtype)

        # conv2 + BN + ReLU for this grid step's row tile
        r0 = pl.program_id(1) * TH
        acc2 = conv_tile([(pad_mid, w2_ref)], r0, mask_l, mask_r, Cout)
        out2 = jnp.maximum(acc2 * sc2_ref[...] + sh2_ref[...], 0.0)
        o_ref[0] = out2.astype(o_ref.dtype)

    return kernel


def up_pallas(x_skip, x_small, w1, scale1, shift1, w2, scale2, shift2,
              out_dtype=jnp.float32):
    """Fused Up block on NHWC inputs.

    x_skip: (N, H, W, Cs)  encoder skip (torch x2)
    x_small: (N, H1, W1, Cu)  low-res feature (torch x1)
    w1: (3, 3, Cs + Cu, Cmid) HWIO, channel order matching torch.cat([x2, x1]).
    w2: (3, 3, Cmid, Cout) HWIO.
    """
    N, H, W, Cs = x_skip.shape
    _, H1, W1, Cu = x_small.shape
    Cmid = w1.shape[-1]
    Cout = w2.shape[-1]
    assert w1.shape == (3, 3, Cs + Cu, Cmid)
    assert w2.shape == (3, 3, Cmid, Cout)
    TH = _pick_row_tile(H, W)

    up_op = _upsample_pad_operator(H1, W1, H, W)            # (H*W, H1*W1) f32
    skip_flat = x_skip.reshape(N, H * W, Cs).astype(jnp.bfloat16)
    small_flat = x_small.reshape(N, H1 * W1, Cu).astype(jnp.float32)
    w1_skip = w1[:, :, :Cs, :].astype(jnp.bfloat16)
    w1_up = w1[:, :, Cs:, :].astype(jnp.bfloat16)
    w2_b = w2.astype(jnp.bfloat16)

    kernel = _make_up_kernel(H, W, TH, Cs, Cu, Cmid, Cout)
    out = pl.pallas_call(
        kernel,
        out_shape=jax.ShapeDtypeStruct((N, H * W, Cout), out_dtype),
        grid=(N, H // TH),
        in_specs=[
            pl.BlockSpec((1, H * W, Cs), lambda n, t: (n, 0, 0)),
            pl.BlockSpec((1, H1 * W1, Cu), lambda n, t: (n, 0, 0)),
            pl.BlockSpec((H * W, H1 * W1), lambda n, t: (0, 0)),
            pl.BlockSpec((3, 3, Cs, Cmid), lambda n, t: (0, 0, 0, 0)),
            pl.BlockSpec((3, 3, Cu, Cmid), lambda n, t: (0, 0, 0, 0)),
            pl.BlockSpec((1, Cmid), lambda n, t: (0, 0)),
            pl.BlockSpec((1, Cmid), lambda n, t: (0, 0)),
            pl.BlockSpec((3, 3, Cmid, Cout), lambda n, t: (0, 0, 0, 0)),
            pl.BlockSpec((1, Cout), lambda n, t: (0, 0)),
            pl.BlockSpec((1, Cout), lambda n, t: (0, 0)),
        ],
        out_specs=pl.BlockSpec((1, TH * W, Cout), lambda n, t: (n, t, 0)),
        scratch_shapes=[
            pltpu.VMEM(((H + 4) * W, Cs), jnp.float32),    # halo-padded skip
            pltpu.VMEM(((H + 4) * W, Cu), jnp.float32),    # halo-padded upsample
            pltpu.VMEM(((H + 4) * W, Cmid), jnp.float32),  # halo-padded conv1 out
        ],
        compiler_params=pltpu.CompilerParams(
            dimension_semantics=("parallel", "arbitrary")),
    )(skip_flat, small_flat, up_op, w1_skip, w1_up,
      scale1.reshape(1, Cmid).astype(jnp.float32),
      shift1.reshape(1, Cmid).astype(jnp.float32),
      w2_b,
      scale2.reshape(1, Cout).astype(jnp.float32),
      shift2.reshape(1, Cout).astype(jnp.float32))
    return out.reshape(N, H, W, Cout)


# --------------------------------------------------------------------------
# parameters (Conv2d + BatchNorm2d, eval-mode) and forward pass
# --------------------------------------------------------------------------
def _conv_bn_init(key, cin, cout):
    kw, kb, kg, kbe, km, kv = jax.random.split(key, 6)
    w = jax.random.normal(kw, (3, 3, cin, cout), jnp.float32) * (2.0 / (9 * cin)) ** 0.5
    b = jax.random.normal(kb, (cout,), jnp.float32) * 0.01
    gamma = 1.0 + 0.2 * jax.random.uniform(kg, (cout,), jnp.float32, -1.0, 1.0)
    beta = 0.1 * jax.random.normal(kbe, (cout,), jnp.float32)
    mean = 0.1 * jax.random.normal(km, (cout,), jnp.float32)
    var = 1.0 + 0.2 * jax.random.uniform(kv, (cout,), jnp.float32, -1.0, 1.0)
    return dict(w=w, b=b, gamma=gamma, beta=beta, mean=mean, var=var)


def init_up_params(key, in_channels, out_channels):
    k1, k2 = jax.random.split(key)
    return {"conv1": _conv_bn_init(k1, in_channels, out_channels),
            "conv2": _conv_bn_init(k2, out_channels, out_channels)}


def _fold_bn(p):
    scale = p["gamma"] / jnp.sqrt(p["var"] + EPS)
    shift = (p["b"] - p["mean"]) * scale + p["beta"]
    return p["w"], scale, shift


def up_forward(x1_nchw, x2_nchw, params):
    """Pallas forward of Up.forward(x1, x2); inputs/outputs are NCHW like PyTorch."""
    x1 = jnp.transpose(x1_nchw, (0, 2, 3, 1))   # NCHW -> NHWC
    x2 = jnp.transpose(x2_nchw, (0, 2, 3, 1))
    w1, s1, b1 = _fold_bn(params["conv1"])
    w2, s2, b2 = _fold_bn(params["conv2"])
    h = up_pallas(x2, x1, w1, s1, b1, w2, s2, b2, out_dtype=jnp.float32)
    return jnp.transpose(h, (0, 3, 1, 2))       # NHWC -> NCHW


# --------------------------------------------------------------------------
# pure-JAX reference (f32) for a correctness check
# --------------------------------------------------------------------------
def up_forward_reference(x1_nchw, x2_nchw, params):
    x1 = jnp.transpose(x1_nchw, (0, 2, 3, 1))
    x2 = jnp.transpose(x2_nchw, (0, 2, 3, 1))
    _, H1, W1, _ = x1.shape
    _, H2, W2, _ = x2.shape
    uh = _interp_matrix(H1, 2 * H1)
    uw = _interp_matrix(W1, 2 * W1)
    xu = jnp.einsum("oh,pw,nhwc->nopc", uh, uw, x1)
    dY, dX = H2 - 2 * H1, W2 - 2 * W1
    xu = jnp.pad(xu, ((0, 0), (dY // 2, dY - dY // 2),
                      (dX // 2, dX - dX // 2), (0, 0)))
    x = jnp.concatenate([x2, xu], axis=-1)
    for p in (params["conv1"], params["conv2"]):
        x = jax.lax.conv_general_dilated(
            x, p["w"], (1, 1), "SAME",
            dimension_numbers=("NHWC", "HWIO", "NHWC"),
            precision=jax.lax.Precision.HIGHEST)
        x = x + p["b"]
        x = p["gamma"] * (x - p["mean"]) / jnp.sqrt(p["var"] + EPS) + p["beta"]
        x = jnp.maximum(x, 0.0)
    return jnp.transpose(x, (0, 3, 1, 2))


# --------------------------------------------------------------------------
if __name__ == "__main__":
    key = jax.random.PRNGKey(0)
    kx1, kx2, kp = jax.random.split(key, 3)

    C_up, C_skip, C_out = 64, 64, 64
    x1 = jax.random.normal(kx1, (2, C_up, 8, 8), jnp.float32)      # low-res feature
    x2 = jax.random.normal(kx2, (2, C_skip, 16, 16), jnp.float32)  # encoder skip
    params = init_up_params(kp, C_skip + C_up, C_out)

    fwd = jax.jit(up_forward)
    out = jax.block_until_ready(fwd(x1, x2, params))
    assert out.shape == (2, C_out, 16, 16), out.shape
    assert bool(jnp.all(jnp.isfinite(out)))

    ref = jax.block_until_ready(jax.jit(up_forward_reference)(x1, x2, params))
    tol = 3e-2 * float(jnp.max(jnp.abs(ref))) + 1e-2
    err = float(jnp.max(jnp.abs(out - ref)))
    assert err <= tol, (err, tol)

    print("KERNEL_OK")
</pallas_src>

<mosaic_0001>
module attributes {stable_mosaic.version = 11 : i64} {
  func.func private @main(%arg0: i32) attributes {dimension_semantics = [#tpu.dimension_semantics<core_parallel>], iteration_bounds = array<i64: 2>, tpu.core_type = #tpu.core_type<sc_scalar_subcore>, window_params = []} {
    return
  }
}

module attributes {stable_mosaic.version = 11 : i64} {
  func.func private @main(%arg0: i32) attributes {dimension_semantics = [#tpu.dimension_semantics<core_parallel>], iteration_bounds = array<i64: 2>, tpu.core_type = #tpu.core_type<sc_scalar_subcore>, window_params = []} {
    return
  }
}

module attributes {stable_mosaic.version = 11 : i64} {
  func.func @kernel(%arg0: i32, %arg1: i32, %arg2: memref<1x256x64xbf16, #tpu.memory_space<vmem>>, %arg3: memref<1x64x64xf32, #tpu.memory_space<vmem>>, %arg4: memref<256x64xf32, #tpu.memory_space<vmem>>, %arg5: memref<3x3x64x64xbf16, #tpu.memory_space<vmem>>, %arg6: memref<3x3x64x64xbf16, #tpu.memory_space<vmem>>, %arg7: memref<1x64xf32, #tpu.memory_space<vmem>>, %arg8: memref<1x64xf32, #tpu.memory_space<vmem>>, %arg9: memref<3x3x64x64xbf16, #tpu.memory_space<vmem>>, %arg10: memref<1x64xf32, #tpu.memory_space<vmem>>, %arg11: memref<1x64xf32, #tpu.memory_space<vmem>>, %arg12: memref<1x128x64xf32, #tpu.memory_space<vmem>>, %arg13: memref<320x64xf32, #tpu.memory_space<vmem>>, %arg14: memref<320x64xf32, #tpu.memory_space<vmem>>, %arg15: memref<320x64xf32, #tpu.memory_space<vmem>>) attributes {dimension_semantics = [#tpu.dimension_semantics<parallel>, #tpu.dimension_semantics<arbitrary>], iteration_bounds = array<i64: 2, 2>, scalar_prefetch = 0 : i64, scratch_operands = 3 : i64, tpu.core_type = #tpu.core_type<tc>, window_params = [{transform_indices = @transform_0, window_bounds = array<i64: 1, 256, 64>}, {transform_indices = @transform_1, window_bounds = array<i64: 1, 64, 64>}, {pipeline_mode = #tpu.pipeline_mode<synchronous>, transform_indices = @transform_2, window_bounds = array<i64: 256, 64>}, {pipeline_mode = #tpu.pipeline_mode<synchronous>, transform_indices = @transform_3, window_bounds = array<i64: 3, 3, 64, 64>}, {pipeline_mode = #tpu.pipeline_mode<synchronous>, transform_indices = @transform_4, window_bounds = array<i64: 3, 3, 64, 64>}, {pipeline_mode = #tpu.pipeline_mode<synchronous>, transform_indices = @transform_5, window_bounds = array<i64: 1, 64>}, {pipeline_mode = #tpu.pipeline_mode<synchronous>, transform_indices = @transform_6, window_bounds = array<i64: 1, 64>}, {pipeline_mode = #tpu.pipeline_mode<synchronous>, transform_indices = @transform_7, window_bounds = array<i64: 3, 3, 64, 64>}, {pipeline_mode = #tpu.pipeline_mode<synchronous>, transform_indices = @transform_8, window_bounds = array<i64: 1, 64>}, {pipeline_mode = #tpu.pipeline_mode<synchronous>, transform_indices = @transform_9, window_bounds = array<i64: 1, 64>}, {transform_indices = @transform_10, window_bounds = array<i64: 1, 128, 64>}]} {
    %0 = tpu.iota {dimensions = array<i32: 0>} : vector<128x1xi32>
    %c16_i32 = arith.constant 16 : i32
    %c0_i32 = arith.constant 0 : i32
    %1 = arith.cmpi eq, %c16_i32, %c0_i32 : i32
    %c1_i32 = arith.constant 1 : i32
    %2 = arith.select %1, %c1_i32, %c16_i32 : i32
    %3 = vector.broadcast %2 : i32 to vector<128x1xi32>
    %4 = arith.remsi %0, %3 : vector<128x1xi32>
    %c0_i32_0 = arith.constant 0 : i32
    %5 = vector.broadcast %c0_i32_0 : i32 to vector<128x1xi32>
    %6 = arith.cmpi ne, %4, %5 : vector<128x1xi32>
    %c0_i32_1 = arith.constant 0 : i32
    %7 = vector.broadcast %c0_i32_1 : i32 to vector<128x1xi32>
    %8 = arith.cmpi slt, %4, %7 : vector<128x1xi32>
    %c0_i32_2 = arith.constant 0 : i32
    %9 = arith.cmpi slt, %2, %c0_i32_2 : i32
    %10 = vector.broadcast %9 : i1 to vector<128x1xi1>
    %11 = vector.broadcast %10 : vector<128x1xi1> to vector<128x1xi1>
    %12 = arith.xori %8, %11 : vector<128x1xi1>
    %13 = arith.andi %12, %6 : vector<128x1xi1>
    %14 = vector.broadcast %2 : i32 to vector<128x1xi32>
    %15 = arith.addi %4, %14 : vector<128x1xi32>
    %16 = arith.select %13, %15, %4 : vector<128x1xi1>, vector<128x1xi32>
    %c0_i32_3 = arith.constant 0 : i32
    %17 = vector.broadcast %c0_i32_3 : i32 to vector<128x1xi32>
    %18 = arith.cmpi sgt, %16, %17 : vector<128x1xi32>
    %19 = arith.extui %18 : vector<128x1xi1> to vector<128x1xi32>
    %20 = arith.sitofp %19 : vector<128x1xi32> to vector<128x1xf32>
    %c15_i32 = arith.constant 15 : i32
    %21 = vector.broadcast %c15_i32 : i32 to vector<128x1xi32>
    %22 = arith.cmpi slt, %16, %21 : vector<128x1xi32>
    %23 = arith.extui %22 : vector<128x1xi1> to vector<128x1xi32>
    %24 = arith.sitofp %23 : vector<128x1xi32> to vector<128x1xf32>
    %c0_i32_4 = arith.constant 0 : i32
    %25 = arith.cmpi eq, %arg1, %c0_i32_4 : i32
    %26 = arith.extui %25 : i1 to i32
    %c0_i32_5 = arith.constant 0 : i32
    %27 = arith.cmpi ne, %26, %c0_i32_5 : i32
    scf.if %27 {
      %c0_81 = arith.constant 0 : index
      %c0_82 = arith.constant 0 : index
      %c0_83 = arith.constant 0 : index
      %137 = vector.load %arg2[%c0_81, %c0_82, %c0_83] : memref<1x256x64xbf16, #tpu.memory_space<vmem>>, vector<1x256x64xbf16>
      %138 = vector.shape_cast %137 : vector<1x256x64xbf16> to vector<256x64xbf16>
      %cst_84 = arith.constant 0.000000e+00 : f32
      %139 = vector.broadcast %cst_84 : f32 to vector<32x64xf32>
      %c0_85 = arith.constant 0 : index
      %c0_86 = arith.constant 0 : index
      %140 = vector.load %arg13[%c0_85, %c0_86] : memref<320x64xf32, #tpu.memory_space<vmem>>, vector<32x64xf32>
      tpu.vector_store %arg13[%c0_85, %c0_86], %139 {strides = array<i32>} : memref<320x64xf32, #tpu.memory_space<vmem>>, vector<32x64xf32>,
      %141 = arith.extf %138 : vector<256x64xbf16> to vector<256x64xf32>
      %c32 = arith.constant 32 : index
      %c0_87 = arith.constant 0 : index
      %142 = vector.load %arg13[%c32, %c0_87] : memref<320x64xf32, #tpu.memory_space<vmem>>, vector<256x64xf32>
      tpu.vector_store %arg13[%c32, %c0_87], %141 {strides = array<i32>} : memref<320x64xf32, #tpu.memory_space<vmem>>, vector<256x64xf32>,
      %c288 = arith.constant 288 : index
      %c0_88 = arith.constant 0 : index
      %143 = vector.load %arg13[%c288, %c0_88] : memref<320x64xf32, #tpu.memory_space<vmem>>, vector<32x64xf32>
      tpu.vector_store %arg13[%c288, %c0_88], %139 {strides = array<i32>} : memref<320x64xf32, #tpu.memory_space<vmem>>, vector<32x64xf32>,
      %c0_89 = arith.constant 0 : index
      %c0_90 = arith.constant 0 : index
      %144 = vector.load %arg4[%c0_89, %c0_90] : memref<256x64xf32, #tpu.memory_space<vmem>>, vector<256x64xf32>
      %c0_91 = arith.constant 0 : index
      %c0_92 = arith.constant 0 : index
      %c0_93 = arith.constant 0 : index
      %145 = vector.load %arg3[%c0_91, %c0_92, %c0_93] : memref<1x64x64xf32, #tpu.memory_space<vmem>>, vector<1x64x64xf32>
      %146 = vector.shape_cast %145 : vector<1x64x64xf32> to vector<64x64xf32>
      %cst_94 = arith.constant dense<0.000000e+00> : vector<256x64xf32>
      %147 = tpu.matmul %144, %146, %cst_94 {dimension_numbers = #tpu.dot_dimension_numbers<[1], [0], [0], [1], [0, 0, 1, 1], [], []>} : vector<256x64xf32>, vector<64x64xf32>, vector<256x64xf32> -> vector<256x64xf32>
      %cst_95 = arith.constant 0.000000e+00 : f32
      %148 = vector.broadcast %cst_95 : f32 to vector<32x64xf32>
      %c0_96 = arith.constant 0 : index
      %c0_97 = arith.constant 0 : index
      %149 = vector.load %arg14[%c0_96, %c0_97] : memref<320x64xf32, #tpu.memory_space<vmem>>, vector<32x64xf32>
      tpu.vector_store %arg14[%c0_96, %c0_97], %148 {strides = array<i32>} : memref<320x64xf32, #tpu.memory_space<vmem>>, vector<32x64xf32>,
      %c32_98 = arith.constant 32 : index
      %c0_99 = arith.constant 0 : index
      %150 = vector.load %arg14[%c32_98, %c0_99] : memref<320x64xf32, #tpu.memory_space<vmem>>, vector<256x64xf32>
      tpu.vector_store %arg14[%c32_98, %c0_99], %147 {strides = array<i32>} : memref<320x64xf32, #tpu.memory_space<vmem>>, vector<256x64xf32>,
      %c288_100 = arith.constant 288 : index
      %c0_101 = arith.constant 0 : index
      %151 = vector.load %arg14[%c288_100, %c0_101] : memref<320x64xf32, #tpu.memory_space<vmem>>, vector<32x64xf32>
      tpu.vector_store %arg14[%c288_100, %c0_101], %148 {strides = array<i32>} : memref<320x64xf32, #tpu.memory_space<vmem>>, vector<32x64xf32>,
      %cst_102 = arith.constant 0.000000e+00 : f32
      %152 = vector.broadcast %cst_102 : f32 to vector<32x64xf32>
      %c0_103 = arith.constant 0 : index
      %c0_104 = arith.constant 0 : index
      %153 = vector.load %arg15[%c0_103, %c0_104] : memref<320x64xf32, #tpu.memory_space<vmem>>, vector<32x64xf32>
      tpu.vector_store %arg15[%c0_103, %c0_104], %152 {strides = array<i32>} : memref<320x64xf32, #tpu.memory_space<vmem>>, vector<32x64xf32>,
      %c288_105 = arith.constant 288 : index
      %c0_106 = arith.constant 0 : index
      %154 = vector.load %arg15[%c288_105, %c0_106] : memref<320x64xf32, #tpu.memory_space<vmem>>, vector<32x64xf32>
      tpu.vector_store %arg15[%c288_105, %c0_106], %152 {strides = array<i32>} : memref<320x64xf32, #tpu.memory_space<vmem>>, vector<32x64xf32>,
      %c0_107 = arith.constant 0 : index
      %c0_108 = arith.constant 0 : index
      %155 = vector.load %arg7[%c0_107, %c0_108] : memref<1x64xf32, #tpu.memory_space<vmem>>, vector<1x64xf32>
      %c0_109 = arith.constant 0 : index
      %c0_110 = arith.constant 0 : index
      %156 = vector.load %arg8[%c0_109, %c0_110] : memref<1x64xf32, #tpu.memory_space<vmem>>, vector<1x64xf32>
      %cst_111 = arith.constant 0.000000e+00 : f32
      %157 = vector.broadcast %cst_111 : f32 to vector<128x64xf32>
      %c15 = arith.constant 15 : index
      %c0_112 = arith.constant 0 : index
      %158 = vector.load %arg13[%c15, %c0_112] : memref<320x64xf32, #tpu.memory_space<vmem>>, vector<128x64xf32>
      %159 = arith.truncf %158 : vector<128x64xf32> to vector<128x64xbf16>
      %c0_113 = arith.constant 0 : index
      %c0_114 = arith.constant 0 : index
      %c0_115 = arith.constant 0 : index
      %c0_116 = arith.constant 0 : index
      %160 = vector.load %arg5[%c0_113, %c0_114, %c0_115, %c0_116] : memref<3x3x64x64xbf16, #tpu.memory_space<vmem>>, vector<1x1x64x64xbf16>
      %161 = vector.shape_cast %160 : vector<1x1x64x64xbf16> to vector<64x64xbf16>
      %cst_117 = arith.constant dense<0.000000e+00> : vector<128x64xf32>
      %162 = tpu.matmul %159, %161, %cst_117 {dimension_numbers = #tpu.dot_dimension_numbers<[1], [0], [0], [1], [0, 0, 1, 1], [], []>} : vector<128x64xbf16>, vector<64x64xbf16>, vector<128x64xf32> -> vector<128x64xf32>
      %c15_118 = arith.constant 15 : index
      %c0_119 = arith.constant 0 : index
      %163 = vector.load %arg14[%c15_118, %c0_119] : memref<320x64xf32, #tpu.memory_space<vmem>>, vector<128x64xf32>
      %164 = arith.truncf %163 : vector<128x64xf32> to vector<128x64xbf16>
      %c0_120 = arith.constant 0 : index
      %c0_121 = arith.constant 0 : index
      %c0_122 = arith.constant 0 : index
      %c0_123 = arith.constant 0 : index
      %165 = vector.load %arg6[%c0_120, %c0_121, %c0_122, %c0_123] : memref<3x3x64x64xbf16, #tpu.memory_space<vmem>>, vector<1x1x64x64xbf16>
      %166 = vector.shape_cast %165 : vector<1x1x64x64xbf16> to vector<64x64xbf16>
      %cst_124 = arith.constant dense<0.000000e+00> : vector<128x64xf32>
      %167 = tpu.matmul %164, %166, %cst_124 {dimension_numbers = #tpu.dot_dimension_numbers<[1], [0], [0], [1], [0, 0, 1, 1], [], []>} : vector<128x64xbf16>, vector<64x64xbf16>, vector<128x64xf32> -> vector<128x64xf32>
      %168 = arith.addf %162, %167 : vector<128x64xf32>
      %169 = vector.broadcast %20 : vector<128x1xf32> to vector<128x64xf32>
      %170 = arith.mulf %168, %169 : vector<128x64xf32>
      %171 = arith.addf %157, %170 : vector<128x64xf32>
      %c16 = arith.constant 16 : index
      %c0_125 = arith.constant 0 : index
      %172 = vector.load %arg13[%c16, %c0_125] : memref<320x64xf32, #tpu.memory_space<vmem>>, vector<128x64xf32>
      %173 = arith.truncf %172 : vector<128x64xf32> to vector<128x64xbf16>
      %c0_126 = arith.constant 0 : index
      %c1_127 = arith.constant 1 : index
      %c0_128 = arith.constant 0 : index
      %c0_129 = arith.constant 0 : index
      %174 = vector.load %arg5[%c0_126, %c1_127, %c0_128, %c0_129] : memref<3x3x64x64xbf16, #tpu.memory_space<vmem>>, vector<1x1x64x64xbf16>
      %175 = vector.shape_cast %174 : vector<1x1x64x64xbf16> to vector<64x64xbf16>
      %cst_130 = arith.constant dense<0.000000e+00> : vector<128x64xf32>
      %176 = tpu.matmul %173, %175, %cst_130 {dimension_numbers = #tpu.dot_dimension_numbers<[1], [0], [0], [1], [0, 0, 1, 1], [], []>} : vector<128x64xbf16>, vector<64x64xbf16>, vector<128x64xf32> -> vector<128x64xf32>
      %c16_131 = arith.constant 16 : index
      %c0_132 = arith.constant 0 : index
      %177 = vector.load %arg14[%c16_131, %c0_132] : memref<320x64xf32, #tpu.memory_space<vmem>>, vector<128x64xf32>
      %178 = arith.truncf %177 : vector<128x64xf32> to vector<128x64xbf16>
      %c0_133 = arith.constant 0 : index
      %c1_134 = arith.constant 1 : index
      %c0_135 = arith.constant 0 : index
      %c0_136 = arith.constant 0 : index
      %179 = vector.load %arg6[%c0_133, %c1_134, %c0_135, %c0_136] : memref<3x3x64x64xbf16, #tpu.memory_space<vmem>>, vector<1x1x64x64xbf16>
      %180 = vector.shape_cast %179 : vector<1x1x64x64xbf16> to vector<64x64xbf16>
      %cst_137 = arith.constant dense<0.000000e+00> : vector<128x64xf32>
      %181 = tpu.matmul %178, %180, %cst_137 {dimension_numbers = #tpu.dot_dimension_numbers<[1], [0], [0], [1], [0, 0, 1, 1], [], []>} : vector<128x64xbf16>, vector<64x64xbf16>, vector<128x64xf32> -> vector<128x64xf32>
      %182 = arith.addf %176, %181 : vector<128x64xf32>
      %183 = arith.addf %171, %182 : vector<128x64xf32>
      %c17 = arith.constant 17 : index
      %c0_138 = arith.constant 0 : index
      %184 = vector.load %arg13[%c17, %c0_138] : memref<320x64xf32, #tpu.memory_space<vmem>>, vector<128x64xf32>
      %185 = arith.truncf %184 : vector<128x64xf32> to vector<128x64xbf16>
      %c0_139 = arith.constant 0 : index
      %c2_140 = arith.constant 2 : index
      %c0_141 = arith.constant 0 : index
      %c0_142 = arith.constant 0 : index
      %186 = vector.load %arg5[%c0_139, %c2_140, %c0_141, %c0_142] : memref<3x3x64x64xbf16, #tpu.memory_space<vmem>>, vector<1x1x64x64xbf16>
      %187 = vector.shape_cast %186 : vector<1x1x64x64xbf16> to vector<64x64xbf16>
      %cst_143 = arith.constant dense<0.000000e+00> : vector<128x64xf32>
      %188 = tpu.matmul %185, %187, %cst_143 {dimension_numbers = #tpu.dot_dimension_numbers<[1], [0], [0], [1], [0, 0, 1, 1], [], []>} : vector<128x64xbf16>, vector<64x64xbf16>, vector<128x64xf32> -> vector<128x64xf32>
      %c17_144 = arith.constant 17 : index
      %c0_145 = arith.constant 0 : index
      %189 = vector.load %arg14[%c17_144, %c0_145] : memref<320x64xf32, #tpu.memory_space<vmem>>, vector<128x64xf32>
      %190 = arith.truncf %189 : vector<128x64xf32> to vector<128x64xbf16>
      %c0_146 = arith.constant 0 : index
      %c2_147 = arith.constant 2 : index
      %c0_148 = arith.constant 0 : index
      %c0_149 = arith.constant 0 : index
      %191 = vector.load %arg6[%c0_146, %c2_147, %c0_148, %c0_149] : memref<3x3x64x64xbf16, #tpu.memory_space<vmem>>, vector<1x1x64x64xbf16>
      %192 = vector.shape_cast %191 : vector<1x1x64x64xbf16> to vector<64x64xbf16>
      %cst_150 = arith.constant dense<0.000000e+00> : vector<128x64xf32>
      %193 = tpu.matmul %190, %192, %cst_150 {dimension_numbers = #tpu.dot_dimension_numbers<[1], [0], [0], [1], [0, 0, 1, 1], [], []>} : vector<128x64xbf16>, vector<64x64xbf16>, vector<128x64xf32> -> vector<128x64xf32>
      %194 = arith.addf %188, %193 : vector<128x64xf32>
      %195 = vector.broadcast %24 : vector<128x1xf32> to vector<128x64xf32>
      %196 = arith.mulf %194, %195 : vector<128x64xf32>
      %197 = arith.addf %183, %196 : vector<128x64xf32>
      %c31 = arith.constant 31 : index
      %c0_151 = arith.constant 0 : index
      %198 = vector.load %arg13[%c31, %c0_151] : memref<320x64xf32, #tpu.memory_space<vmem>>, vector<128x64xf32>
      %199 = arith.truncf %198 : vector<128x64xf32> to vector<128x64xbf16>
      %c1_152 = arith.constant 1 : index
      %c0_153 = arith.constant 0 : index
      %c0_154 = arith.constant 0 : index
      %c0_155 = arith.constant 0 : index
      %200 = vector.load %arg5[%c1_152, %c0_153, %c0_154, %c0_155] : memref<3x3x64x64xbf16, #tpu.memory_space<vmem>>, vector<1x1x64x64xbf16>
      %201 = vector.shape_cast %200 : vector<1x1x64x64xbf16> to vector<64x64xbf16>
      %cst_156 = arith.constant dense<0.000000e+00> : vector<128x64xf32>
      %202 = tpu.matmul %199, %201, %cst_156 {dimension_numbers = #tpu.dot_dimension_numbers<[1], [0], [0], [1], [0, 0, 1, 1], [], []>} : vector<128x64xbf16>, vector<64x64xbf16>, vector<128x64xf32> -> vector<128x64xf32>
      %c31_157 = arith.constant 31 : index
      %c0_158 = arith.constant 0 : index
      %203 = vector.load %arg14[%c31_157, %c0_158] : memref<320x64xf32, #tpu.memory_space<vmem>>, vector<128x64xf32>
      %204 = arith.truncf %203 : vector<128x64xf32> to vector<128x64xbf16>
      %c1_159 = arith.constant 1 : index
      %c0_160 = arith.constant 0 : index
      %c0_161 = arith.constant 0 : index
      %c0_162 = arith.constant 0 : index
      %205 = vector.load %arg6[%c1_159, %c0_160, %c0_161, %c0_162] : memref<3x3x64x64xbf16, #tpu.memory_space<vmem>>, vector<1x1x64x64xbf16>
      %206 = vector.shape_cast %205 : vector<1x1x64x64xbf16> to vector<64x64xbf16>
      %cst_163 = arith.constant dense<0.000000e+00> : vector<128x64xf32>
      %207 = tpu.matmul %204, %206, %cst_163 {dimension_numbers = #tpu.dot_dimension_numbers<[1], [0], [0], [1], [0, 0, 1, 1], [], []>} : vector<128x64xbf16>, vector<64x64xbf16>, vector<128x64xf32> -> vector<128x64xf32>
      %208 = arith.addf %202, %207 : vector<128x64xf32>
      %209 = vector.broadcast %20 : vector<128x1xf32> to vector<128x64xf32>
      %210 = arith.mulf %208, %209 : vector<128x64xf32>
      %211 = arith.addf %197, %210 : vector<128x64xf32>
      %c32_164 = arith.constant 32 : index
      %c0_165 = arith.constant 0 : index
      %212 = vector.load %arg13[%c32_164, %c0_165] : memref<320x64xf32, #tpu.memory_space<vmem>>, vector<128x64xf32>
      %213 = arith.truncf %212 : vector<128x64xf32> to vector<128x64xbf16>
      %c1_166 = arith.constant 1 : index
      %c1_167 = arith.constant 1 : index
      %c0_168 = arith.constant 0 : index
      %c0_169 = arith.constant 0 : index
      %214 = vector.load %arg5[%c1_166, %c1_167, %c0_168, %c0_169] : memref<3x3x64x64xbf16, #tpu.memory_space<vmem>>, vector<1x1x64x64xbf16>
      %215 = vector.shape_cast %214 : vector<1x1x64x64xbf16> to vector<64x64xbf16>
      %cst_170 = arith.constant dense<0.000000e+00> : vector<128x64xf32>
      %216 = tpu.matmul %213, %215, %cst_170 {dimension_numbers = #tpu.dot_dimension_numbers<[1], [0], [0], [1], [0, 0, 1, 1], [], []>} : vector<128x64xbf16>, vector<64x64xbf16>, vector<128x64xf32> -> vector<128x64xf32>
      %c32_171 = arith.constant 32 : index
      %c0_172 = arith.constant 0 : index
      %217 = vector.load %arg14[%c32_171, %c0_172] : memref<320x64xf32, #tpu.memory_space<vmem>>, vector<128x64xf32>
      %218 = arith.truncf %217 : vector<128x64xf32> to vector<128x64xbf16>
      %c1_173 = arith.constant 1 : index
      %c1_174 = arith.constant 1 : index
      %c0_175 = arith.constant 0 : index
      %c0_176 = arith.constant 0 : index
      %219 = vector.load %arg6[%c1_173, %c1_174, %c0_175, %c0_176] : memref<3x3x64x64xbf16, #tpu.memory_space<vmem>>, vector<1x1x64x64xbf16>
      %220 = vector.shape_cast %219 : vector<1x1x64x64xbf16> to vector<64x64xbf16>
      %cst_177 = arith.constant dense<0.000000e+00> : vector<128x64xf32>
      %221 = tpu.matmul %218, %220, %cst_177 {dimension_numbers = #tpu.dot_dimension_numbers<[1], [0], [0], [1], [0, 0, 1, 1], [], []>} : vector<128x64xbf16>, vector<64x64xbf16>, vector<128x64xf32> -> vector<128x64xf32>
      %222 = arith.addf %216, %221 : vector<128x64xf32>
      %223 = arith.addf %211, %222 : vector<128x64xf32>
      %c33 = arith.constant 33 : index
      %c0_178 = arith.constant 0 : index
      %224 = vector.load %arg13[%c33, %c0_178] : memref<320x64xf32, #tpu.memory_space<vmem>>, vector<128x64xf32>
      %225 = arith.truncf %224 : vector<128x64xf32> to vector<128x64xbf16>
      %c1_179 = arith.constant 1 : index
      %c2_180 = arith.constant 2 : index
      %c0_181 = arith.constant 0 : index
      %c0_182 = arith.constant 0 : index
      %226 = vector.load %arg5[%c1_179, %c2_180, %c0_181, %c0_182] : memref<3x3x64x64xbf16, #tpu.memory_space<vmem>>, vector<1x1x64x64xbf16>
      %227 = vector.shape_cast %226 : vector<1x1x64x64xbf16> to vector<64x64xbf16>
      %cst_183 = arith.constant dense<0.000000e+00> : vector<128x64xf32>
      %228 = tpu.matmul %225, %227, %cst_183 {dimension_numbers = #tpu.dot_dimension_numbers<[1], [0], [0], [1], [0, 0, 1, 1], [], []>} : vector<128x64xbf16>, vector<64x64xbf16>, vector<128x64xf32> -> vector<128x64xf32>
      %c33_184 = arith.constant 33 : index
      %c0_185 = arith.constant 0 : index
      %229 = vector.load %arg14[%c33_184, %c0_185] : memref<320x64xf32, #tpu.memory_space<vmem>>, vector<128x64xf32>
      %230 = arith.truncf %229 : vector<128x64xf32> to vector<128x64xbf16>
      %c1_186 = arith.constant 1 : index
      %c2_187 = arith.constant 2 : index
      %c0_188 = arith.constant 0 : index
      %c0_189 = arith.constant 0 : index
      %231 = vector.load %arg6[%c1_186, %c2_187, %c0_188, %c0_189] : memref<3x3x64x64xbf16, #tpu.memory_space<vmem>>, vector<1x1x64x64xbf16>
      %232 = vector.shape_cast %231 : vector<1x1x64x64xbf16> to vector<64x64xbf16>
      %cst_190 = arith.constant dense<0.000000e+00> : vector<128x64xf32>
      %233 = tpu.matmul %230, %232, %cst_190 {dimension_numbers = #tpu.dot_dimension_numbers<[1], [0], [0], [1], [0, 0, 1, 1], [], []>} : vector<128x64xbf16>, vector<64x64xbf16>, vector<128x64xf32> -> vector<128x64xf32>
      %234 = arith.addf %228, %233 : vector<128x64xf32>
      %235 = vector.broadcast %24 : vector<128x1xf32> to vector<128x64xf32>
      %236 = arith.mulf %234, %235 : vector<128x64xf32>
      %237 = arith.addf %223, %236 : vector<128x64xf32>
      %c47 = arith.constant 47 : index
      %c0_191 = arith.constant 0 : index
      %238 = vector.load %arg13[%c47, %c0_191] : memref<320x64xf32, #tpu.memory_space<vmem>>, vector<128x64xf32>
      %239 = arith.truncf %238 : vector<128x64xf32> to vector<128x64xbf16>
      %c2_192 = arith.constant 2 : index
      %c0_193 = arith.constant 0 : index
      %c0_194 = arith.constant 0 : index
      %c0_195 = arith.constant 0 : index
      %240 = vector.load %arg5[%c2_192, %c0_193, %c0_194, %c0_195] : memref<3x3x64x64xbf16, #tpu.memory_space<vmem>>, vector<1x1x64x64xbf16>
      %241 = vector.shape_cast %240 : vector<1x1x64x64xbf16> to vector<64x64xbf16>
      %cst_196 = arith.constant dense<0.000000e+00> : vector<128x64xf32>
      %242 = tpu.matmul %239, %241, %cst_196 {dimension_numbers = #tpu.dot_dimension_numbers<[1], [0], [0], [1], [0, 0, 1, 1], [], []>} : vector<128x64xbf16>, vector<64x64xbf16>, vector<128x64xf32> -> vector<128x64xf32>
      %c47_197 = arith.constant 47 : index
      %c0_198 = arith.constant 0 : index
      %243 = vector.load %arg14[%c47_197, %c0_198] : memref<320x64xf32, #tpu.memory_space<vmem>>, vector<128x64xf32>
      %244 = arith.truncf %243 : vector<128x64xf32> to vector<128x64xbf16>
      %c2_199 = arith.constant 2 : index
      %c0_200 = arith.constant 0 : index
      %c0_201 = arith.constant 0 : index
      %c0_202 = arith.constant 0 : index
      %245 = vector.load %arg6[%c2_199, %c0_200, %c0_201, %c0_202] : memref<3x3x64x64xbf16, #tpu.memory_space<vmem>>, vector<1x1x64x64xbf16>
      %246 = vector.shape_cast %245 : vector<1x1x64x64xbf16> to vector<64x64xbf16>
      %cst_203 = arith.constant dense<0.000000e+00> : vector<128x64xf32>
      %247 = tpu.matmul %244, %246, %cst_203 {dimension_numbers = #tpu.dot_dimension_numbers<[1], [0], [0], [1], [0, 0, 1, 1], [], []>} : vector<128x64xbf16>, vector<64x64xbf16>, vector<128x64xf32> -> vector<128x64xf32>
      %248 = arith.addf %242, %247 : vector<128x64xf32>
      %249 = vector.broadcast %20 : vector<128x1xf32> to vector<128x64xf32>
      %250 = arith.mulf %248, %249 : vector<128x64xf32>
      %251 = arith.addf %237, %250 : vector<128x64xf32>
      %c48 = arith.constant 48 : index
      %c0_204 = arith.constant 0 : index
      %252 = vector.load %arg13[%c48, %c0_204] : memref<320x64xf32, #tpu.memory_space<vmem>>, vector<128x64xf32>
      %253 = arith.truncf %252 : vector<128x64xf32> to vector<128x64xbf16>
      %c2_205 = arith.constant 2 : index
      %c1_206 = arith.constant 1 : index
      %c0_207 = arith.constant 0 : index
      %c0_208 = arith.constant 0 : index
      %254 = vector.load %arg5[%c2_205, %c1_206, %c0_207, %c0_208] : memref<3x3x64x64xbf16, #tpu.memory_space<vmem>>, vector<1x1x64x64xbf16>
      %255 = vector.shape_cast %254 : vector<1x1x64x64xbf16> to vector<64x64xbf16>
      %cst_209 = arith.constant dense<0.000000e+00> : vector<128x64xf32>
      %256 = tpu.matmul %253, %255, %cst_209 {dimension_numbers = #tpu.dot_dimension_numbers<[1], [0], [0], [1], [0, 0, 1, 1], [], []>} : vector<128x64xbf16>, vector<64x64xbf16>, vector<128x64xf32> -> vector<128x64xf32>
      %c48_210 = arith.constant 48 : index
      %c0_211 = arith.constant 0 : index
      %257 = vector.load %arg14[%c48_210, %c0_211] : memref<320x64xf32, #tpu.memory_space<vmem>>, vector<128x64xf32>
      %258 = arith.truncf %257 : vector<128x64xf32> to vector<128x64xbf16>
      %c2_212 = arith.constant 2 : index
      %c1_213 = arith.constant 1 : index
      %c0_214 = arith.constant 0 : index
      %c0_215 = arith.constant 0 : index
      %259 = vector.load %arg6[%c2_212, %c1_213, %c0_214, %c0_215] : memref<3x3x64x64xbf16, #tpu.memory_space<vmem>>, vector<1x1x64x64xbf16>
      %260 = vector.shape_cast %259 : vector<1x1x64x64xbf16> to vector<64x64xbf16>
      %cst_216 = arith.constant dense<0.000000e+00> : vector<128x64xf32>
      %261 = tpu.matmul %258, %260, %cst_216 {dimension_numbers = #tpu.dot_dimension_numbers<[1], [0], [0], [1], [0, 0, 1, 1], [], []>} : vector<128x64xbf16>, vector<64x64xbf16>, vector<128x64xf32> -> vector<128x64xf32>
      %262 = arith.addf %256, %261 : vector<128x64xf32>
      %263 = arith.addf %251, %262 : vector<128x64xf32>
      %c49 = arith.constant 49 : index
      %c0_217 = arith.constant 0 : index
      %264 = vector.load %arg13[%c49, %c0_217] : memref<320x64xf32, #tpu.memory_space<vmem>>, vector<128x64xf32>
      %265 = arith.truncf %264 : vector<128x64xf32> to vector<128x64xbf16>
      %c2_218 = arith.constant 2 : index
      %c2_219 = arith.constant 2 : index
      %c0_220 = arith.constant 0 : index
      %c0_221 = arith.constant 0 : index
      %266 = vector.load %arg5[%c2_218, %c2_219, %c0_220, %c0_221] : memref<3x3x64x64xbf16, #tpu.memory_space<vmem>>, vector<1x1x64x64xbf16>
      %267 = vector.shape_cast %266 : vector<1x1x64x64xbf16> to vector<64x64xbf16>
      %cst_222 = arith.constant dense<0.000000e+00> : vector<128x64xf32>
      %268 = tpu.matmul %265, %267, %cst_222 {dimension_numbers = #tpu.dot_dimension_numbers<[1], [0], [0], [1], [0, 0, 1, 1], [], []>} : vector<128x64xbf16>, vector<64x64xbf16>, vector<128x64xf32> -> vector<128x64xf32>
      %c49_223 = arith.constant 49 : index
      %c0_224 = arith.constant 0 : index
      %269 = vector.load %arg14[%c49_223, %c0_224] : memref<320x64xf32, #tpu.memory_space<vmem>>, vector<128x64xf32>
      %270 = arith.truncf %269 : vector<128x64xf32> to vector<128x64xbf16>
      %c2_225 = arith.constant 2 : index
      %c2_226 = arith.constant 2 : index
      %c0_227 = arith.constant 0 : index
      %c0_228 = arith.constant 0 : index
      %271 = vector.load %arg6[%c2_225, %c2_226, %c0_227, %c0_228] : memref<3x3x64x64xbf16, #tpu.memory_space<vmem>>, vector<1x1x64x64xbf16>
      %272 = vector.shape_cast %271 : vector<1x1x64x64xbf16> to vector<64x64xbf16>
      %cst_229 = arith.constant dense<0.000000e+00> : vector<128x64xf32>
      %273 = tpu.matmul %270, %272, %cst_229 {dimension_numbers = #tpu.dot_dimension_numbers<[1], [0], [0], [1], [0, 0, 1, 1], [], []>} : vector<128x64xbf16>, vector<64x64xbf16>, vector<128x64xf32> -> vector<128x64xf32>
      %274 = arith.addf %268, %273 : vector<128x64xf32>
      %275 = vector.broadcast %24 : vector<128x1xf32> to vector<128x64xf32>
      %276 = arith.mulf %274, %275 : vector<128x64xf32>
      %277 = arith.addf %263, %276 : vector<128x64xf32>
      %278 = vector.broadcast %155 : vector<1x64xf32> to vector<128x64xf32>
      %279 = arith.mulf %277, %278 : vector<128x64xf32>
      %280 = vector.broadcast %156 : vector<1x64xf32> to vector<128x64xf32>
      %281 = arith.addf %279, %280 : vector<128x64xf32>
      %cst_230 = arith.constant 0.000000e+00 : f32
      %282 = vector.broadcast %cst_230 : f32 to vector<128x64xf32>
      %283 = arith.maximumf %281, %282 : vector<128x64xf32>
      %c32_231 = arith.constant 32 : index
      %c0_232 = arith.constant 0 : index
      %284 = vector.load %arg15[%c32_231, %c0_232] : memref<320x64xf32, #tpu.memory_space<vmem>>, vector<128x64xf32>
      tpu.vector_store %arg15[%c32_231, %c0_232], %283 {strides = array<i32>} : memref<320x64xf32, #tpu.memory_space<vmem>>, vector<128x64xf32>,
      %cst_233 = arith.constant 0.000000e+00 : f32
      %285 = vector.broadcast %cst_233 : f32 to vector<128x64xf32>
      %c143 = arith.constant 143 : index
      %c0_234 = arith.constant 0 : index
      %286 = vector.load %arg13[%c143, %c0_234] : memref<320x64xf32, #tpu.memory_space<vmem>>, vector<128x64xf32>
      %287 = arith.truncf %286 : vector<128x64xf32> to vector<128x64xbf16>
      %c0_235 = arith.constant 0 : index
      %c0_236 = arith.constant 0 : index
      %c0_237 = arith.constant 0 : index
      %c0_238 = arith.constant 0 : index
      %288 = vector.load %arg5[%c0_235, %c0_236, %c0_237, %c0_238] : memref<3x3x64x64xbf16, #tpu.memory_space<vmem>>, vector<1x1x64x64xbf16>
      %289 = vector.shape_cast %288 : vector<1x1x64x64xbf16> to vector<64x64xbf16>
      %cst_239 = arith.constant dense<0.000000e+00> : vector<128x64xf32>
      %290 = tpu.matmul %287, %289, %cst_239 {dimension_numbers = #tpu.dot_dimension_numbers<[1], [0], [0], [1], [0, 0, 1, 1], [], []>} : vector<128x64xbf16>, vector<64x64xbf16>, vector<128x64xf32> -> vector<128x64xf32>
      %c143_240 = arith.constant 143 : index
      %c0_241 = arith.constant 0 : index
      %291 = vector.load %arg14[%c143_240, %c0_241] : memref<320x64xf32, #tpu.memory_space<vmem>>, vector<128x64xf32>
      %292 = arith.truncf %291 : vector<128x64xf32> to vector<128x64xbf16>
      %c0_242 = arith.constant 0 : index
      %c0_243 = arith.constant 0 : index
      %c0_244 = arith.constant 0 : index
      %c0_245 = arith.constant 0 : index
      %293 = vector.load %arg6[%c0_242, %c0_243, %c0_244, %c0_245] : memref<3x3x64x64xbf16, #tpu.memory_space<vmem>>, vector<1x1x64x64xbf16>
      %294 = vector.shape_cast %293 : vector<1x1x64x64xbf16> to vector<64x64xbf16>
      %cst_246 = arith.constant dense<0.000000e+00> : vector<128x64xf32>
      %295 = tpu.matmul %292, %294, %cst_246 {dimension_numbers = #tpu.dot_dimension_numbers<[1], [0], [0], [1], [0, 0, 1, 1], [], []>} : vector<128x64xbf16>, vector<64x64xbf16>, vector<128x64xf32> -> vector<128x64xf32>
      %296 = arith.addf %290, %295 : vector<128x64xf32>
      %297 = vector.broadcast %20 : vector<128x1xf32> to vector<128x64xf32>
      %298 = arith.mulf %296, %297 : vector<128x64xf32>
      %299 = arith.addf %285, %298 : vector<128x64xf32>
      %c144 = arith.constant 144 : index
      %c0_247 = arith.constant 0 : index
      %300 = vector.load %arg13[%c144, %c0_247] : memref<320x64xf32, #tpu.memory_space<vmem>>, vector<128x64xf32>
      %301 = arith.truncf %300 : vector<128x64xf32> to vector<128x64xbf16>
      %c0_248 = arith.constant 0 : index
      %c1_249 = arith.constant 1 : index
      %c0_250 = arith.constant 0 : index
      %c0_251 = arith.constant 0 : index
      %302 = vector.load %arg5[%c0_248, %c1_249, %c0_250, %c0_251] : memref<3x3x64x64xbf16, #tpu.memory_space<vmem>>, vector<1x1x64x64xbf16>
      %303 = vector.shape_cast %302 : vector<1x1x64x64xbf16> to vector<64x64xbf16>
      %cst_252 = arith.constant dense<0.000000e+00> : vector<128x64xf32>
      %304 = tpu.matmul %301, %303, %cst_252 {dimension_numbers = #tpu.dot_dimension_numbers<[1], [0], [0], [1], [0, 0, 1, 1], [], []>} : vector<128x64xbf16>, vector<64x64xbf16>, vector<128x64xf32> -> vector<128x64xf32>
      %c144_253 = arith.constant 144 : index
      %c0_254 = arith.constant 0 : index
      %305 = vector.load %arg14[%c144_253, %c0_254] : memref<320x64xf32, #tpu.memory_space<vmem>>, vector<128x64xf32>
      %306 = arith.truncf %305 : vector<128x64xf32> to vector<128x64xbf16>
      %c0_255 = arith.constant 0 : index
      %c1_256 = arith.constant 1 : index
      %c0_257 = arith.constant 0 : index
      %c0_258 = arith.constant 0 : index
      %307 = vector.load %arg6[%c0_255, %c1_256, %c0_257, %c0_258] : memref<3x3x64x64xbf16, #tpu.memory_space<vmem>>, vector<1x1x64x64xbf16>
      %308 = vector.shape_cast %307 : vector<1x1x64x64xbf16> to vector<64x64xbf16>
      %cst_259 = arith.constant dense<0.000000e+00> : vector<128x64xf32>
      %309 = tpu.matmul %306, %308, %cst_259 {dimension_numbers = #tpu.dot_dimension_numbers<[1], [0], [0], [1], [0, 0, 1, 1], [], []>} : vector<128x64xbf16>, vector<64x64xbf16>, vector<128x64xf32> -> vector<128x64xf32>
      %310 = arith.addf %304, %309 : vector<128x64xf32>
      %311 = arith.addf %299, %310 : vector<128x64xf32>
      %c145 = arith.constant 145 : index
      %c0_260 = arith.constant 0 : index
      %312 = vector.load %arg13[%c145, %c0_260] : memref<320x64xf32, #tpu.memory_space<vmem>>, vector<128x64xf32>
      %313 = arith.truncf %312 : vector<128x64xf32> to vector<128x64xbf16>
      %c0_261 = arith.constant 0 : index
      %c2_262 = arith.constant 2 : index
      %c0_263 = arith.constant 0 : index
      %c0_264 = arith.constant 0 : index
      %314 = vector.load %arg5[%c0_261, %c2_262, %c0_263, %c0_264] : memref<3x3x64x64xbf16, #tpu.memory_space<vmem>>, vector<1x1x64x64xbf16>
      %315 = vector.shape_cast %314 : vector<1x1x64x64xbf16> to vector<64x64xbf16>
      %cst_265 = arith.constant dense<0.000000e+00> : vector<128x64xf32>
      %316 = tpu.matmul %313, %315, %cst_265 {dimension_numbers = #tpu.dot_dimension_numbers<[1], [0], [0], [1], [0, 0, 1, 1], [], []>} : vector<128x64xbf16>, vector<64x64xbf16>, vector<128x64xf32> -> vector<128x64xf32>
      %c145_266 = arith.constant 145 : index
      %c0_267 = arith.constant 0 : index
      %317 = vector.load %arg14[%c145_266, %c0_267] : memref<320x64xf32, #tpu.memory_space<vmem>>, vector<128x64xf32>
      %318 = arith.truncf %317 : vector<128x64xf32> to vector<128x64xbf16>
      %c0_268 = arith.constant 0 : index
      %c2_269 = arith.constant 2 : index
      %c0_270 = arith.constant 0 : index
      %c0_271 = arith.constant 0 : index
      %319 = vector.load %arg6[%c0_268, %c2_269, %c0_270, %c0_271] : memref<3x3x64x64xbf16, #tpu.memory_space<vmem>>, vector<1x1x64x64xbf16>
      %320 = vector.shape_cast %319 : vector<1x1x64x64xbf16> to vector<64x64xbf16>
      %cst_272 = arith.constant dense<0.000000e+00> : vector<128x64xf32>
      %321 = tpu.matmul %318, %320, %cst_272 {dimension_numbers = #tpu.dot_dimension_numbers<[1], [0], [0], [1], [0, 0, 1, 1], [], []>} : vector<128x64xbf16>, vector<64x64xbf16>, vector<128x64xf32> -> vector<128x64xf32>
      %322 = arith.addf %316, %321 : vector<128x64xf32>
      %323 = vector.broadcast %24 : vector<128x1xf32> to vector<128x64xf32>
      %324 = arith.mulf %322, %323 : vector<128x64xf32>
      %325 = arith.addf %311, %324 : vector<128x64xf32>
      %c159 = arith.constant 159 : index
      %c0_273 = arith.constant 0 : index
      %326 = vector.load %arg13[%c159, %c0_273] : memref<320x64xf32, #tpu.memory_space<vmem>>, vector<128x64xf32>
      %327 = arith.truncf %326 : vector<128x64xf32> to vector<128x64xbf16>
      %c1_274 = arith.constant 1 : index
      %c0_275 = arith.constant 0 : index
      %c0_276 = arith.constant 0 : index
      %c0_277 = arith.constant 0 : index
      %328 = vector.load %arg5[%c1_274, %c0_275, %c0_276, %c0_277] : memref<3x3x64x64xbf16, #tpu.memory_space<vmem>>, vector<1x1x64x64xbf16>
      %329 = vector.shape_cast %328 : vector<1x1x64x64xbf16> to vector<64x64xbf16>
      %cst_278 = arith.constant dense<0.000000e+00> : vector<128x64xf32>
      %330 = tpu.matmul %327, %329, %cst_278 {dimension_numbers = #tpu.dot_dimension_numbers<[1], [0], [0], [1], [0, 0, 1, 1], [], []>} : vector<128x64xbf16>, vector<64x64xbf16>, vector<128x64xf32> -> vector<128x64xf32>
      %c159_279 = arith.constant 159 : index
      %c0_280 = arith.constant 0 : index
      %331 = vector.load %arg14[%c159_279, %c0_280] : memref<320x64xf32, #tpu.memory_space<vmem>>, vector<128x64xf32>
      %332 = arith.truncf %331 : vector<128x64xf32> to vector<128x64xbf16>
      %c1_281 = arith.constant 1 : index
      %c0_282 = arith.constant 0 : index
      %c0_283 = arith.constant 0 : index
      %c0_284 = arith.constant 0 : index
      %333 = vector.load %arg6[%c1_281, %c0_282, %c0_283, %c0_284] : memref<3x3x64x64xbf16, #tpu.memory_space<vmem>>, vector<1x1x64x64xbf16>
      %334 = vector.shape_cast %333 : vector<1x1x64x64xbf16> to vector<64x64xbf16>
      %cst_285 = arith.constant dense<0.000000e+00> : vector<128x64xf32>
      %335 = tpu.matmul %332, %334, %cst_285 {dimension_numbers = #tpu.dot_dimension_numbers<[1], [0], [0], [1], [0, 0, 1, 1], [], []>} : vector<128x64xbf16>, vector<64x64xbf16>, vector<128x64xf32> -> vector<128x64xf32>
      %336 = arith.addf %330, %335 : vector<128x64xf32>
      %337 = vector.broadcast %20 : vector<128x1xf32> to vector<128x64xf32>
      %338 = arith.mulf %336, %337 : vector<128x64xf32>
      %339 = arith.addf %325, %338 : vector<128x64xf32>
      %c160 = arith.constant 160 : index
      %c0_286 = arith.constant 0 : index
      %340 = vector.load %arg13[%c160, %c0_286] : memref<320x64xf32, #tpu.memory_space<vmem>>, vector<128x64xf32>
      %341 = arith.truncf %340 : vector<128x64xf32> to vector<128x64xbf16>
      %c1_287 = arith.constant 1 : index
      %c1_288 = arith.constant 1 : index
      %c0_289 = arith.constant 0 : index
      %c0_290 = arith.constant 0 : index
      %342 = vector.load %arg5[%c1_287, %c1_288, %c0_289, %c0_290] : memref<3x3x64x64xbf16, #tpu.memory_space<vmem>>, vector<1x1x64x64xbf16>
      %343 = vector.shape_cast %342 : vector<1x1x64x64xbf16> to vector<64x64xbf16>
      %cst_291 = arith.constant dense<0.000000e+00> : vector<128x64xf32>
      %344 = tpu.matmul %341, %343, %cst_291 {dimension_numbers = #tpu.dot_dimension_numbers<[1], [0], [0], [1], [0, 0, 1, 1], [], []>} : vector<128x64xbf16>, vector<64x64xbf16>, vector<128x64xf32> -> vector<128x64xf32>
      %c160_292 = arith.constant 160 : index
      %c0_293 = arith.constant 0 : index
      %345 = vector.load %arg14[%c160_292, %c0_293] : memref<320x64xf32, #tpu.memory_space<vmem>>, vector<128x64xf32>
      %346 = arith.truncf %345 : vector<128x64xf32> to vector<128x64xbf16>
      %c1_294 = arith.constant 1 : index
      %c1_295 = arith.constant 1 : index
      %c0_296 = arith.constant 0 : index
      %c0_297 = arith.constant 0 : index
      %347 = vector.load %arg6[%c1_294, %c1_295, %c0_296, %c0_297] : memref<3x3x64x64xbf16, #tpu.memory_space<vmem>>, vector<1x1x64x64xbf16>
      %348 = vector.shape_cast %347 : vector<1x1x64x64xbf16> to vector<64x64xbf16>
      %cst_298 = arith.constant dense<0.000000e+00> : vector<128x64xf32>
      %349 = tpu.matmul %346, %348, %cst_298 {dimension_numbers = #tpu.dot_dimension_numbers<[1], [0], [0], [1], [0, 0, 1, 1], [], []>} : vector<128x64xbf16>, vector<64x64xbf16>, vector<128x64xf32> -> vector<128x64xf32>
      %350 = arith.addf %344, %349 : vector<128x64xf32>
      %351 = arith.addf %339, %350 : vector<128x64xf32>
      %c161 = arith.constant 161 : index
      %c0_299 = arith.constant 0 : index
      %352 = vector.load %arg13[%c161, %c0_299] : memref<320x64xf32, #tpu.memory_space<vmem>>, vector<128x64xf32>
      %353 = arith.truncf %352 : vector<128x64xf32> to vector<128x64xbf16>
      %c1_300 = arith.constant 1 : index
      %c2_301 = arith.constant 2 : index
      %c0_302 = arith.constant 0 : index
      %c0_303 = arith.constant 0 : index
      %354 = vector.load %arg5[%c1_300, %c2_301, %c0_302, %c0_303] : memref<3x3x64x64xbf16, #tpu.memory_space<vmem>>, vector<1x1x64x64xbf16>
      %355 = vector.shape_cast %354 : vector<1x1x64x64xbf16> to vector<64x64xbf16>
      %cst_304 = arith.constant dense<0.000000e+00> : vector<128x64xf32>
      %356 = tpu.matmul %353, %355, %cst_304 {dimension_numbers = #tpu.dot_dimension_numbers<[1], [0], [0], [1], [0, 0, 1, 1], [], []>} : vector<128x64xbf16>, vector<64x64xbf16>, vector<128x64xf32> -> vector<128x64xf32>
      %c161_305 = arith.constant 161 : index
      %c0_306 = arith.constant 0 : index
      %357 = vector.load %arg14[%c161_305, %c0_306] : memref<320x64xf32, #tpu.memory_space<vmem>>, vector<128x64xf32>
      %358 = arith.truncf %357 : vector<128x64xf32> to vector<128x64xbf16>
      %c1_307 = arith.constant 1 : index
      %c2_308 = arith.constant 2 : index
      %c0_309 = arith.constant 0 : index
      %c0_310 = arith.constant 0 : index
      %359 = vector.load %arg6[%c1_307, %c2_308, %c0_309, %c0_310] : memref<3x3x64x64xbf16, #tpu.memory_space<vmem>>, vector<1x1x64x64xbf16>
      %360 = vector.shape_cast %359 : vector<1x1x64x64xbf16> to vector<64x64xbf16>
      %cst_311 = arith.constant dense<0.000000e+00> : vector<128x64xf32>
      %361 = tpu.matmul %358, %360, %cst_311 {dimension_numbers = #tpu.dot_dimension_numbers<[1], [0], [0], [1], [0, 0, 1, 1], [], []>} : vector<128x64xbf16>, vector<64x64xbf16>, vector<128x64xf32> -> vector<128x64xf32>
      %362 = arith.addf %356, %361 : vector<128x64xf32>
      %363 = vector.broadcast %24 : vector<128x1xf32> to vector<128x64xf32>
      %364 = arith.mulf %362, %363 : vector<128x64xf32>
      %365 = arith.addf %351, %364 : vector<128x64xf32>
      %c175 = arith.constant 175 : index
      %c0_312 = arith.constant 0 : index
      %366 = vector.load %arg13[%c175, %c0_312] : memref<320x64xf32, #tpu.memory_space<vmem>>, vector<128x64xf32>
      %367 = arith.truncf %366 : vector<128x64xf32> to vector<128x64xbf16>
      %c2_313 = arith.constant 2 : index
      %c0_314 = arith.constant 0 : index
      %c0_315 = arith.constant 0 : index
      %c0_316 = arith.constant 0 : index
      %368 = vector.load %arg5[%c2_313, %c0_314, %c0_315, %c0_316] : memref<3x3x64x64xbf16, #tpu.memory_space<vmem>>, vector<1x1x64x64xbf16>
      %369 = vector.shape_cast %368 : vector<1x1x64x64xbf16> to vector<64x64xbf16>
      %cst_317 = arith.constant dense<0.000000e+00> : vector<128x64xf32>
      %370 = tpu.matmul %367, %369, %cst_317 {dimension_numbers = #tpu.dot_dimension_numbers<[1], [0], [0], [1], [0, 0, 1, 1], [], []>} : vector<128x64xbf16>, vector<64x64xbf16>, vector<128x64xf32> -> vector<128x64xf32>
      %c175_318 = arith.constant 175 : index
      %c0_319 = arith.constant 0 : index
      %371 = vector.load %arg14[%c175_318, %c0_319] : memref<320x64xf32, #tpu.memory_space<vmem>>, vector<128x64xf32>
      %372 = arith.truncf %371 : vector<128x64xf32> to vector<128x64xbf16>
      %c2_320 = arith.constant 2 : index
      %c0_321 = arith.constant 0 : index
      %c0_322 = arith.constant 0 : index
      %c0_323 = arith.constant 0 : index
      %373 = vector.load %arg6[%c2_320, %c0_321, %c0_322, %c0_323] : memref<3x3x64x64xbf16, #tpu.memory_space<vmem>>, vector<1x1x64x64xbf16>
      %374 = vector.shape_cast %373 : vector<1x1x64x64xbf16> to vector<64x64xbf16>
      %cst_324 = arith.constant dense<0.000000e+00> : vector<128x64xf32>
      %375 = tpu.matmul %372, %374, %cst_324 {dimension_numbers = #tpu.dot_dimension_numbers<[1], [0], [0], [1], [0, 0, 1, 1], [], []>} : vector<128x64xbf16>, vector<64x64xbf16>, vector<128x64xf32> -> vector<128x64xf32>
      %376 = arith.addf %370, %375 : vector<128x64xf32>
      %377 = vector.broadcast %20 : vector<128x1xf32> to vector<128x64xf32>
      %378 = arith.mulf %376, %377 : vector<128x64xf32>
      %379 = arith.addf %365, %378 : vector<128x64xf32>
      %c176 = arith.constant 176 : index
      %c0_325 = arith.constant 0 : index
      %380 = vector.load %arg13[%c176, %c0_325] : memref<320x64xf32, #tpu.memory_space<vmem>>, vector<128x64xf32>
      %381 = arith.truncf %380 : vector<128x64xf32> to vector<128x64xbf16>
      %c2_326 = arith.constant 2 : index
      %c1_327 = arith.constant 1 : index
      %c0_328 = arith.constant 0 : index
      %c0_329 = arith.constant 0 : index
      %382 = vector.load %arg5[%c2_326, %c1_327, %c0_328, %c0_329] : memref<3x3x64x64xbf16, #tpu.memory_space<vmem>>, vector<1x1x64x64xbf16>
      %383 = vector.shape_cast %382 : vector<1x1x64x64xbf16> to vector<64x64xbf16>
      %cst_330 = arith.constant dense<0.000000e+00> : vector<128x64xf32>
      %384 = tpu.matmul %381, %383, %cst_330 {dimension_numbers = #tpu.dot_dimension_numbers<[1], [0], [0], [1], [0, 0, 1, 1], [], []>} : vector<128x64xbf16>, vector<64x64xbf16>, vector<128x64xf32> -> vector<128x64xf32>
      %c176_331 = arith.constant 176 : index
      %c0_332 = arith.constant 0 : index
      %385 = vector.load %arg14[%c176_331, %c0_332] : memref<320x64xf32, #tpu.memory_space<vmem>>, vector<128x64xf32>
      %386 = arith.truncf %385 : vector<128x64xf32> to vector<128x64xbf16>
      %c2_333 = arith.constant 2 : index
      %c1_334 = arith.constant 1 : index
      %c0_335 = arith.constant 0 : index
      %c0_336 = arith.constant 0 : index
      %387 = vector.load %arg6[%c2_333, %c1_334, %c0_335, %c0_336] : memref<3x3x64x64xbf16, #tpu.memory_space<vmem>>, vector<1x1x64x64xbf16>
      %388 = vector.shape_cast %387 : vector<1x1x64x64xbf16> to vector<64x64xbf16>
      %cst_337 = arith.constant dense<0.000000e+00> : vector<128x64xf32>
      %389 = tpu.matmul %386, %388, %cst_337 {dimension_numbers = #tpu.dot_dimension_numbers<[1], [0], [0], [1], [0, 0, 1, 1], [], []>} : vector<128x64xbf16>, vector<64x64xbf16>, vector<128x64xf32> -> vector<128x64xf32>
      %390 = arith.addf %384, %389 : vector<128x64xf32>
      %391 = arith.addf %379, %390 : vector<128x64xf32>
      %c177 = arith.constant 177 : index
      %c0_338 = arith.constant 0 : index
      %392 = vector.load %arg13[%c177, %c0_338] : memref<320x64xf32, #tpu.memory_space<vmem>>, vector<128x64xf32>
      %393 = arith.truncf %392 : vector<128x64xf32> to vector<128x64xbf16>
      %c2_339 = arith.constant 2 : index
      %c2_340 = arith.constant 2 : index
      %c0_341 = arith.constant 0 : index
      %c0_342 = arith.constant 0 : index
      %394 = vector.load %arg5[%c2_339, %c2_340, %c0_341, %c0_342] : memref<3x3x64x64xbf16, #tpu.memory_space<vmem>>, vector<1x1x64x64xbf16>
      %395 = vector.shape_cast %394 : vector<1x1x64x64xbf16> to vector<64x64xbf16>
      %cst_343 = arith.constant dense<0.000000e+00> : vector<128x64xf32>
      %396 = tpu.matmul %393, %395, %cst_343 {dimension_numbers = #tpu.dot_dimension_numbers<[1], [0], [0], [1], [0, 0, 1, 1], [], []>} : vector<128x64xbf16>, vector<64x64xbf16>, vector<128x64xf32> -> vector<128x64xf32>
      %c177_344 = arith.constant 177 : index
      %c0_345 = arith.constant 0 : index
      %397 = vector.load %arg14[%c177_344, %c0_345] : memref<320x64xf32, #tpu.memory_space<vmem>>, vector<128x64xf32>
      %398 = arith.truncf %397 : vector<128x64xf32> to vector<128x64xbf16>
      %c2_346 = arith.constant 2 : index
      %c2_347 = arith.constant 2 : index
      %c0_348 = arith.constant 0 : index
      %c0_349 = arith.constant 0 : index
      %399 = vector.load %arg6[%c2_346, %c2_347, %c0_348, %c0_349] : memref<3x3x64x64xbf16, #tpu.memory_space<vmem>>, vector<1x1x64x64xbf16>
      %400 = vector.shape_cast %399 : vector<1x1x64x64xbf16> to vector<64x64xbf16>
      %cst_350 = arith.constant dense<0.000000e+00> : vector<128x64xf32>
      %401 = tpu.matmul %398, %400, %cst_350 {dimension_numbers = #tpu.dot_dimension_numbers<[1], [0], [0], [1], [0, 0, 1, 1], [], []>} : vector<128x64xbf16>, vector<64x64xbf16>, vector<128x64xf32> -> vector<128x64xf32>
      %402 = arith.addf %396, %401 : vector<128x64xf32>
      %403 = vector.broadcast %24 : vector<128x1xf32> to vector<128x64xf32>
      %404 = arith.mulf %402, %403 : vector<128x64xf32>
      %405 = arith.addf %391, %404 : vector<128x64xf32>
      %406 = vector.broadcast %155 : vector<1x64xf32> to vector<128x64xf32>
      %407 = arith.mulf %405, %406 : vector<128x64xf32>
      %408 = vector.broadcast %156 : vector<1x64xf32> to vector<128x64xf32>
      %409 = arith.addf %407, %408 : vector<128x64xf32>
      %cst_351 = arith.constant 0.000000e+00 : f32
      %410 = vector.broadcast %cst_351 : f32 to vector<128x64xf32>
      %411 = arith.maximumf %409, %410 : vector<128x64xf32>
      %c160_352 = arith.constant 160 : index
      %c0_353 = arith.constant 0 : index
      %412 = vector.load %arg15[%c160_352, %c0_353] : memref<320x64xf32, #tpu.memory_space<vmem>>, vector<128x64xf32>
      tpu.vector_store %arg15[%c160_352, %c0_353], %411 {strides = array<i32>} : memref<320x64xf32, #tpu.memory_space<vmem>>, vector<128x64xf32>,
    } else {
    }
    %c8_i32 = arith.constant 8 : i32
    %28 = arith.muli %arg1, %c8_i32 : i32
    %cst = arith.constant 0.000000e+00 : f32
    %29 = vector.broadcast %cst : f32 to vector<128x64xf32>
    %c0_i32_6 = arith.constant 0 : i32
    %30 = arith.addi %28, %c0_i32_6 : i32
    %c1_i32_7 = arith.constant 1 : i32
    %31 = arith.addi %30, %c1_i32_7 : i32
    %c16_i32_8 = arith.constant 16 : i32
    %32 = arith.muli %31, %c16_i32_8 : i32
    %33 = tpu.assume_multiple %32, 16 : i32
    %c-1_i32 = arith.constant -1 : i32
    %34 = arith.addi %33, %c-1_i32 : i32
    %35 = arith.index_cast %34 : i32 to index
    %c0 = arith.constant 0 : index
    %36 = vector.load %arg15[%35, %c0] : memref<320x64xf32, #tpu.memory_space<vmem>>, vector<128x64xf32>
    %37 = arith.truncf %36 : vector<128x64xf32> to vector<128x64xbf16>
    %c0_9 = arith.constant 0 : index
    %c0_10 = arith.constant 0 : index
    %c0_11 = arith.constant 0 : index
    %c0_12 = arith.constant 0 : index
    %38 = vector.load %arg9[%c0_9, %c0_10, %c0_11, %c0_12] : memref<3x3x64x64xbf16, #tpu.memory_space<vmem>>, vector<1x1x64x64xbf16>
    %39 = vector.shape_cast %38 : vector<1x1x64x64xbf16> to vector<64x64xbf16>
    %cst_13 = arith.constant dense<0.000000e+00> : vector<128x64xf32>
    %40 = tpu.matmul %37, %39, %cst_13 {dimension_numbers = #tpu.dot_dimension_numbers<[1], [0], [0], [1], [0, 0, 1, 1], [], []>} : vector<128x64xbf16>, vector<64x64xbf16>, vector<128x64xf32> -> vector<128x64xf32>
    %41 = vector.broadcast %20 : vector<128x1xf32> to vector<128x64xf32>
    %42 = arith.mulf %40, %41 : vector<128x64xf32>
    %43 = arith.addf %29, %42 : vector<128x64xf32>
    %c0_i32_14 = arith.constant 0 : i32
    %44 = arith.addi %33, %c0_i32_14 : i32
    %45 = arith.index_cast %44 : i32 to index
    %c0_15 = arith.constant 0 : index
    %46 = vector.load %arg15[%45, %c0_15] : memref<320x64xf32, #tpu.memory_space<vmem>>, vector<128x64xf32>
    %47 = arith.truncf %46 : vector<128x64xf32> to vector<128x64xbf16>
    %c0_16 = arith.constant 0 : index
    %c1 = arith.constant 1 : index
    %c0_17 = arith.constant 0 : index
    %c0_18 = arith.constant 0 : index
    %48 = vector.load %arg9[%c0_16, %c1, %c0_17, %c0_18] : memref<3x3x64x64xbf16, #tpu.memory_space<vmem>>, vector<1x1x64x64xbf16>
    %49 = vector.shape_cast %48 : vector<1x1x64x64xbf16> to vector<64x64xbf16>
    %cst_19 = arith.constant dense<0.000000e+00> : vector<128x64xf32>
    %50 = tpu.matmul %47, %49, %cst_19 {dimension_numbers = #tpu.dot_dimension_numbers<[1], [0], [0], [1], [0, 0, 1, 1], [], []>} : vector<128x64xbf16>, vector<64x64xbf16>, vector<128x64xf32> -> vector<128x64xf32>
    %51 = arith.addf %43, %50 : vector<128x64xf32>
    %c1_i32_20 = arith.constant 1 : i32
    %52 = arith.addi %33, %c1_i32_20 : i32
    %53 = arith.index_cast %52 : i32 to index
    %c0_21 = arith.constant 0 : index
    %54 = vector.load %arg15[%53, %c0_21] : memref<320x64xf32, #tpu.memory_space<vmem>>, vector<128x64xf32>
    %55 = arith.truncf %54 : vector<128x64xf32> to vector<128x64xbf16>
    %c0_22 = arith.constant 0 : index
    %c2 = arith.constant 2 : index
    %c0_23 = arith.constant 0 : index
    %c0_24 = arith.constant 0 : index
    %56 = vector.load %arg9[%c0_22, %c2, %c0_23, %c0_24] : memref<3x3x64x64xbf16, #tpu.memory_space<vmem>>, vector<1x1x64x64xbf16>
    %57 = vector.shape_cast %56 : vector<1x1x64x64xbf16> to vector<64x64xbf16>
    %cst_25 = arith.constant dense<0.000000e+00> : vector<128x64xf32>
    %58 = tpu.matmul %55, %57, %cst_25 {dimension_numbers = #tpu.dot_dimension_numbers<[1], [0], [0], [1], [0, 0, 1, 1], [], []>} : vector<128x64xbf16>, vector<64x64xbf16>, vector<128x64xf32> -> vector<128x64xf32>
    %59 = vector.broadcast %24 : vector<128x1xf32> to vector<128x64xf32>
    %60 = arith.mulf %58, %59 : vector<128x64xf32>
    %61 = arith.addf %51, %60 : vector<128x64xf32>
    %c1_i32_26 = arith.constant 1 : i32
    %62 = arith.addi %28, %c1_i32_26 : i32
    %c1_i32_27 = arith.constant 1 : i32
    %63 = arith.addi %62, %c1_i32_27 : i32
    %c16_i32_28 = arith.constant 16 : i32
    %64 = arith.muli %63, %c16_i32_28 : i32
    %65 = tpu.assume_multiple %64, 16 : i32
    %c-1_i32_29 = arith.constant -1 : i32
    %66 = arith.addi %65, %c-1_i32_29 : i32
    %67 = arith.index_cast %66 : i32 to index
    %c0_30 = arith.constant 0 : index
    %68 = vector.load %arg15[%67, %c0_30] : memref<320x64xf32, #tpu.memory_space<vmem>>, vector<128x64xf32>
    %69 = arith.truncf %68 : vector<128x64xf32> to vector<128x64xbf16>
    %c1_31 = arith.constant 1 : index
    %c0_32 = arith.constant 0 : index
    %c0_33 = arith.constant 0 : index
    %c0_34 = arith.constant 0 : index
    %70 = vector.load %arg9[%c1_31, %c0_32, %c0_33, %c0_34] : memref<3x3x64x64xbf16, #tpu.memory_space<vmem>>, vector<1x1x64x64xbf16>
    %71 = vector.shape_cast %70 : vector<1x1x64x64xbf16> to vector<64x64xbf16>
    %cst_35 = arith.constant dense<0.000000e+00> : vector<128x64xf32>
    %72 = tpu.matmul %69, %71, %cst_35 {dimension_numbers = #tpu.dot_dimension_numbers<[1], [0], [0], [1], [0, 0, 1, 1], [], []>} : vector<128x64xbf16>, vector<64x64xbf16>, vector<128x64xf32> -> vector<128x64xf32>
    %73 = vector.broadcast %20 : vector<128x1xf32> to vector<128x64xf32>
    %74 = arith.mulf %72, %73 : vector<128x64xf32>
    %75 = arith.addf %61, %74 : vector<128x64xf32>
    %c0_i32_36 = arith.constant 0 : i32
    %76 = arith.addi %65, %c0_i32_36 : i32
    %77 = arith.index_cast %76 : i32 to index
    %c0_37 = arith.constant 0 : index
    %78 = vector.load %arg15[%77, %c0_37] : memref<320x64xf32, #tpu.memory_space<vmem>>, vector<128x64xf32>
    %79 = arith.truncf %78 : vector<128x64xf32> to vector<128x64xbf16>
    %c1_38 = arith.constant 1 : index
    %c1_39 = arith.constant 1 : index
    %c0_40 = arith.constant 0 : index
    %c0_41 = arith.constant 0 : index
    %80 = vector.load %arg9[%c1_38, %c1_39, %c0_40, %c0_41] : memref<3x3x64x64xbf16, #tpu.memory_space<vmem>>, vector<1x1x64x64xbf16>
    %81 = vector.shape_cast %80 : vector<1x1x64x64xbf16> to vector<64x64xbf16>
    %cst_42 = arith.constant dense<0.000000e+00> : vector<128x64xf32>
    %82 = tpu.matmul %79, %81, %cst_42 {dimension_numbers = #tpu.dot_dimension_numbers<[1], [0], [0], [1], [0, 0, 1, 1], [], []>} : vector<128x64xbf16>, vector<64x64xbf16>, vector<128x64xf32> -> vector<128x64xf32>
    %83 = arith.addf %75, %82 : vector<128x64xf32>
    %c1_i32_43 = arith.constant 1 : i32
    %84 = arith.addi %65, %c1_i32_43 : i32
    %85 = arith.index_cast %84 : i32 to index
    %c0_44 = arith.constant 0 : index
    %86 = vector.load %arg15[%85, %c0_44] : memref<320x64xf32, #tpu.memory_space<vmem>>, vector<128x64xf32>
    %87 = arith.truncf %86 : vector<128x64xf32> to vector<128x64xbf16>
    %c1_45 = arith.constant 1 : index
    %c2_46 = arith.constant 2 : index
    %c0_47 = arith.constant 0 : index
    %c0_48 = arith.constant 0 : index
    %88 = vector.load %arg9[%c1_45, %c2_46, %c0_47, %c0_48] : memref<3x3x64x64xbf16, #tpu.memory_space<vmem>>, vector<1x1x64x64xbf16>
    %89 = vector.shape_cast %88 : vector<1x1x64x64xbf16> to vector<64x64xbf16>
    %cst_49 = arith.constant dense<0.000000e+00> : vector<128x64xf32>
    %90 = tpu.matmul %87, %89, %cst_49 {dimension_numbers = #tpu.dot_dimension_numbers<[1], [0], [0], [1], [0, 0, 1, 1], [], []>} : vector<128x64xbf16>, vector<64x64xbf16>, vector<128x64xf32> -> vector<128x64xf32>
    %91 = vector.broadcast %24 : vector<128x1xf32> to vector<128x64xf32>
    %92 = arith.mulf %90, %91 : vector<128x64xf32>
    %93 = arith.addf %83, %92 : vector<128x64xf32>
    %c2_i32 = arith.constant 2 : i32
    %94 = arith.addi %28, %c2_i32 : i32
    %c1_i32_50 = arith.constant 1 : i32
    %95 = arith.addi %94, %c1_i32_50 : i32
    %c16_i32_51 = arith.constant 16 : i32
    %96 = arith.muli %95, %c16_i32_51 : i32
    %97 = tpu.assume_multiple %96, 16 : i32
    %c-1_i32_52 = arith.constant -1 : i32
    %98 = arith.addi %97, %c-1_i32_52 : i32
    %99 = arith.index_cast %98 : i32 to index
    %c0_53 = arith.constant 0 : index
    %100 = vector.load %arg15[%99, %c0_53] : memref<320x64xf32, #tpu.memory_space<vmem>>, vector<128x64xf32>
    %101 = arith.truncf %100 : vector<128x64xf32> to vector<128x64xbf16>
    %c2_54 = arith.constant 2 : index
    %c0_55 = arith.constant 0 : index
    %c0_56 = arith.constant 0 : index
    %c0_57 = arith.constant 0 : index
    %102 = vector.load %arg9[%c2_54, %c0_55, %c0_56, %c0_57] : memref<3x3x64x64xbf16, #tpu.memory_space<vmem>>, vector<1x1x64x64xbf16>
    %103 = vector.shape_cast %102 : vector<1x1x64x64xbf16> to vector<64x64xbf16>
    %cst_58 = arith.constant dense<0.000000e+00> : vector<128x64xf32>
    %104 = tpu.matmul %101, %103, %cst_58 {dimension_numbers = #tpu.dot_dimension_numbers<[1], [0], [0], [1], [0, 0, 1, 1], [], []>} : vector<128x64xbf16>, vector<64x64xbf16>, vector<128x64xf32> -> vector<128x64xf32>
    %105 = vector.broadcast %20 : vector<128x1xf32> to vector<128x64xf32>
    %106 = arith.mulf %104, %105 : vector<128x64xf32>
    %107 = arith.addf %93, %106 : vector<128x64xf32>
    %c0_i32_59 = arith.constant 0 : i32
    %108 = arith.addi %97, %c0_i32_59 : i32
    %109 = arith.index_cast %108 : i32 to index
    %c0_60 = arith.constant 0 : index
    %110 = vector.load %arg15[%109, %c0_60] : memref<320x64xf32, #tpu.memory_space<vmem>>, vector<128x64xf32>
    %111 = arith.truncf %110 : vector<128x64xf32> to vector<128x64xbf16>
    %c2_61 = arith.constant 2 : index
    %c1_62 = arith.constant 1 : index
    %c0_63 = arith.constant 0 : index
    %c0_64 = arith.constant 0 : index
    %112 = vector.load %arg9[%c2_61, %c1_62, %c0_63, %c0_64] : memref<3x3x64x64xbf16, #tpu.memory_space<vmem>>, vector<1x1x64x64xbf16>
    %113 = vector.shape_cast %112 : vector<1x1x64x64xbf16> to vector<64x64xbf16>
    %cst_65 = arith.constant dense<0.000000e+00> : vector<128x64xf32>
    %114 = tpu.matmul %111, %113, %cst_65 {dimension_numbers = #tpu.dot_dimension_numbers<[1], [0], [0], [1], [0, 0, 1, 1], [], []>} : vector<128x64xbf16>, vector<64x64xbf16>, vector<128x64xf32> -> vector<128x64xf32>
    %115 = arith.addf %107, %114 : vector<128x64xf32>
    %c1_i32_66 = arith.constant 1 : i32
    %116 = arith.addi %97, %c1_i32_66 : i32
    %117 = arith.index_cast %116 : i32 to index
    %c0_67 = arith.constant 0 : index
    %118 = vector.load %arg15[%117, %c0_67] : memref<320x64xf32, #tpu.memory_space<vmem>>, vector<128x64xf32>
    %119 = arith.truncf %118 : vector<128x64xf32> to vector<128x64xbf16>
    %c2_68 = arith.constant 2 : index
    %c2_69 = arith.constant 2 : index
    %c0_70 = arith.constant 0 : index
    %c0_71 = arith.constant 0 : index
    %120 = vector.load %arg9[%c2_68, %c2_69, %c0_70, %c0_71] : memref<3x3x64x64xbf16, #tpu.memory_space<vmem>>, vector<1x1x64x64xbf16>
    %121 = vector.shape_cast %120 : vector<1x1x64x64xbf16> to vector<64x64xbf16>
    %cst_72 = arith.constant dense<0.000000e+00> : vector<128x64xf32>
    %122 = tpu.matmul %119, %121, %cst_72 {dimension_numbers = #tpu.dot_dimension_numbers<[1], [0], [0], [1], [0, 0, 1, 1], [], []>} : vector<128x64xbf16>, vector<64x64xbf16>, vector<128x64xf32> -> vector<128x64xf32>
    %123 = vector.broadcast %24 : vector<128x1xf32> to vector<128x64xf32>
    %124 = arith.mulf %122, %123 : vector<128x64xf32>
    %125 = arith.addf %115, %124 : vector<128x64xf32>
    %c0_73 = arith.constant 0 : index
    %c0_74 = arith.constant 0 : index
    %126 = vector.load %arg10[%c0_73, %c0_74] : memref<1x64xf32, #tpu.memory_space<vmem>>, vector<1x64xf32>
    %127 = vector.broadcast %126 : vector<1x64xf32> to vector<128x64xf32>
    %128 = arith.mulf %125, %127 : vector<128x64xf32>
    %c0_75 = arith.constant 0 : index
    %c0_76 = arith.constant 0 : index
    %129 = vector.load %arg11[%c0_75, %c0_76] : memref<1x64xf32, #tpu.memory_space<vmem>>, vector<1x64xf32>
    %130 = vector.broadcast %129 : vector<1x64xf32> to vector<128x64xf32>
    %131 = arith.addf %128, %130 : vector<128x64xf32>
    %cst_77 = arith.constant 0.000000e+00 : f32
    %132 = vector.broadcast %cst_77 : f32 to vector<128x64xf32>
    %133 = arith.maximumf %131, %132 : vector<128x64xf32>
    %c0_78 = arith.constant 0 : index
    %c0_79 = arith.constant 0 : index
    %c0_80 = arith.constant 0 : index
    %134 = vector.load %arg12[%c0_78, %c0_79, %c0_80] : memref<1x128x64xf32, #tpu.memory_space<vmem>>, vector<1x128x64xf32>
    %135 = vector.shape_cast %134 : vector<1x128x64xf32> to vector<128x64xf32>
    %136 = vector.shape_cast %133 : vector<128x64xf32> to vector<1x128x64xf32>
    tpu.vector_store %arg12[%c0_78, %c0_79, %c0_80], %136 {strides = array<i32>} : memref<1x128x64xf32, #tpu.memory_space<vmem>>, vector<1x128x64xf32>,
    return
  }
  func.func @transform_0(%arg0: i32, %arg1: i32) -> (i32, i32, i32) {
    %c0_i32 = arith.constant 0 : i32
    %c0_i32_0 = arith.constant 0 : i32
    %c0_i32_1 = arith.constant 0 : i32
    return %arg0, %c0_i32, %c0_i32_0 : i32, i32, i32
  }
  func.func @transform_1(%arg0: i32, %arg1: i32) -> (i32, i32, i32) {
    %c0_i32 = arith.constant 0 : i32
    %c0_i32_0 = arith.constant 0 : i32
    %c0_i32_1 = arith.constant 0 : i32
    return %arg0, %c0_i32, %c0_i32_0 : i32, i32, i32
  }
  func.func @transform_2(%arg0: i32, %arg1: i32) -> (i32, i32) {
    %c0_i32 = arith.constant 0 : i32
    %c0_i32_0 = arith.constant 0 : i32
    %c0_i32_1 = arith.constant 0 : i32
    return %c0_i32, %c0_i32_0 : i32, i32
  }
  func.func @transform_3(%arg0: i32, %arg1: i32) -> (i32, i32, i32, i32) {
    %c0_i32 = arith.constant 0 : i32
    %c0_i32_0 = arith.constant 0 : i32
    %c0_i32_1 = arith.constant 0 : i32
    %c0_i32_2 = arith.constant 0 : i32
    %c0_i32_3 = arith.constant 0 : i32
    return %c0_i32, %c0_i32_0, %c0_i32_1, %c0_i32_2 : i32, i32, i32, i32
  }
  func.func @transform_4(%arg0: i32, %arg1: i32) -> (i32, i32, i32, i32) {
    %c0_i32 = arith.constant 0 : i32
    %c0_i32_0 = arith.constant 0 : i32
    %c0_i32_1 = arith.constant 0 : i32
    %c0_i32_2 = arith.constant 0 : i32
    %c0_i32_3 = arith.constant 0 : i32
    return %c0_i32, %c0_i32_0, %c0_i32_1, %c0_i32_2 : i32, i32, i32, i32
  }
  func.func @transform_5(%arg0: i32, %arg1: i32) -> (i32, i32) {
    %c0_i32 = arith.constant 0 : i32
    %c0_i32_0 = arith.constant 0 : i32
    %c0_i32_1 = arith.constant 0 : i32
    return %c0_i32, %c0_i32_0 : i32, i32
  }
  func.func @transform_6(%arg0: i32, %arg1: i32) -> (i32, i32) {
    %c0_i32 = arith.constant 0 : i32
    %c0_i32_0 = arith.constant 0 : i32
    %c0_i32_1 = arith.constant 0 : i32
    return %c0_i32, %c0_i32_0 : i32, i32
  }
  func.func @transform_7(%arg0: i32, %arg1: i32) -> (i32, i32, i32, i32) {
    %c0_i32 = arith.constant 0 : i32
    %c0_i32_0 = arith.constant 0 : i32
    %c0_i32_1 = arith.constant 0 : i32
    %c0_i32_2 = arith.constant 0 : i32
    %c0_i32_3 = arith.constant 0 : i32
    return %c0_i32, %c0_i32_0, %c0_i32_1, %c0_i32_2 : i32, i32, i32, i32
  }
  func.func @transform_8(%arg0: i32, %arg1: i32) -> (i32, i32) {
    %c0_i32 = arith.constant 0 : i32
    %c0_i32_0 = arith.constant 0 : i32
    %c0_i32_1 = arith.constant 0 : i32
    return %c0_i32, %c0_i32_0 : i32, i32
  }
  func.func @transform_9(%arg0: i32, %arg1: i32) -> (i32, i32) {
    %c0_i32 = arith.constant 0 : i32
    %c0_i32_0 = arith.constant 0 : i32
    %c0_i32_1 = arith.constant 0 : i32
    return %c0_i32, %c0_i32_0 : i32, i32
  }
  func.func @transform_10(%arg0: i32, %arg1: i32) -> (i32, i32, i32) {
    %c0_i32 = arith.constant 0 : i32
    %c0_i32_0 = arith.constant 0 : i32
    return %arg0, %arg1, %c0_i32 : i32, i32, i32
  }
}

</mosaic_0001>

<bundles_post_ra>
// kernel: up_forward.1
= control target key start
LH: loop header
LB: loop body
LE: loop exit
PB: predicated region body
PF: predicated region fallthrough
CT: control target
= control target key end

     0   :  { %s16743_s0 = inlined_call_operand.vmem [shape: bf16[2,256,64], index: 0, kind: input, shape index: {}]   ;;  %s16744_s1 = inlined_call_operand.vmem [shape: f32[2,64,64], index: 1, kind: input, shape index: {}]   ;;  %s16745_s2 = inlined_call_operand.vmem [shape: f32[256,64], index: 2, kind: input, shape index: {}]   ;;  %s16746_s3 = inlined_call_operand.vmem [shape: bf16[3,3,64,64], index: 3, kind: input, shape index: {}]   ;;  %s16747_s4 = inlined_call_operand.vmem [shape: bf16[3,3,64,64], index: 4, kind: input, shape index: {}]   ;;  %s16748_s5 = inlined_call_operand.vmem [shape: f32[1,64], index: 5, kind: input, shape index: {}]   ;;  %s16749_s6 = inlined_call_operand.vmem [shape: f32[1,64], index: 6, kind: input, shape index: {}]   ;;  %s16750_s7 = inlined_call_operand.vmem [shape: bf16[3,3,64,64], index: 7, kind: input, shape index: {}]   ;;  %s16751_s8 = inlined_call_operand.vmem [shape: f32[1,64], index: 8, kind: input, shape index: {}]   ;;  %s16752_s9 = inlined_call_operand.vmem [shape: f32[1,64], index: 9, kind: input, shape index: {}]   ;;  %s16753_s10 = inlined_call_operand.hbm [shape: f32[2,256,64], index: 10, kind: output, shape index: {}]  }
   0x1   :  { %16776 = sst [smem:[#allocation17_spill]] %s16743_s0 }
   0x2   :  { %16777 = sst [smem:[#allocation18_spill]] %s16744_s1 }
   0x3   :  { %15 = vsyncpa [#allocation6], 0 }
   0x4   :  { %17 = vsyncpa [#allocation6 + $0x1], 0  ;;  %s13947_s13 = smov 0   ;;  %s13949_s14 = smov 0  }
   0x5   :  { %s13951_s15 = smov 0   ;;  %s13953_s16 = smov 0  }
   0x6   :  { %s13955_s17 = smov 0   ;;  %s13957_s18 = smov 0  }
   0x7   :  { %s13959_s19 = smov 0   ;;  %s13961_s20 = smov 0  }
   0x8 LB: > { %16778 = sst [smem:[#allocation8_spill]] %s13881_s19  ;;  %s10309_s21 = sadd.s32 4294967295, %s13885_s20   ;;  %s13885_s20 = sphi %s13961_s20, %s23_s20   ;;  %s13881_s19 = sphi %s13959_s19, %s16810_s19   ;;  %s13877_s18 = sphi %s13957_s18, %s16815_s18   ;;  %s13873_s17 = sphi %s13955_s17, %s16808_s17   ;;  %s13869_s16 = sphi %s13953_s16, %s16814_s16   ;;  %s13865_s15 = sphi %s13951_s15, %s16813_s15   ;;  %s13861_s14 = sphi %s13949_s14, %s16812_s14   ;;  %s13857_s13 = sphi %s13947_s13, %s16811_s13  }
   0x9   : > { %s10310_s22 = sadd.s32 4294967294, %s13885_s20   ;;  %s32_s23 = sadd.s32 1, %s13877_s18 }
   0xa   : > { %p33_p0 = scmp.ge.s32.totalorder %s32_s23, 2  ;;  %s35_s24 = sadd.s32 1, %s13881_s19 }
   0xb   : > { %p274_p1 = scmp.ne.s32.totalorder %s13865_s15, %s13861_s14  ;;  %p275_p2 = scmp.eq.s32.totalorder %s10309_s21, 3 }
   0xc   : > { %s16817_s23 = smov (%p33_p0, %s32_s23), 0  ;;  %s16819_s24 = smov (!%p33_p0, %s35_s24), %s13881_s19 }
   0xd   : > { %16779 = sst [smem:[#allocation9_spill]] %s16817_s23  ;;  %s260_s25 = ssub.s32 %s13877_s18, %s16817_s23 }
   0xe   : > { %p13998_p3 = por %p275_p2, %p274_p1  ;;  %p37_p4 = scmp.ge.s32.totalorder %s16819_s24, 2 }
   0xf   : > { %p280_p5 = scmp.ne.s32.totalorder %s13861_s14, %s13857_s13  ;;  %p281_p6 = scmp.eq.s32.totalorder %s10310_s22, 3 }
  0x10   : > { %p10313_p7 = scmp.ge.s32.totalorder %s13885_s20, 1  ;;  %s16821_s24 = smov (%p37_p4, %s16819_s24), 0 }
  0x11   : > { %16781 = sst [smem:[#allocation10_spill]] %s16821_s24  ;;  %p14007_p8 = por %p281_p6, %p280_p5 }
  0x12   : > { %p339_p9 = scmp.lt.s32.totalorder %s13885_s20, 5  ;;  %s259_s28 = ssub.s32 %s13881_s19, %s16821_s24 }
  0x13   : > { %s264_s29 = sadd.s32 1, %s13865_s15  ;;  %s261_s30 = sor.u32 %s260_s25, %s259_s28 }
  0x14   : > { %p340_p10 = pnand %p10313_p7, %p339_p9  ;;  %p262_p11 = scmp.eq.s32.totalorder %s261_s30, 0 }
  0x16   : > { %s14016_s11 = scalar_select %p262_p11, %s13865_s15, %s264_s29  }
  0x17   : > { %343 = sbr.rel (%p340_p10) target bundleno = 1480 (0x5c8), region = 60 }
  0x1e   : > { %s16756_s12 = sand.u32 1, %s13861_s14   ;;  %p382_p12 = scmp.lt.s32.totalorder %s13873_s17, 1  ;;  %v394_v0 = vlaneseq  ;;  %v13887_v33 = vmov 0.0  }
  0x1f   : > { %s14022_s21 = sshll.u32 %s16756_s12, 7  ;;  %s16783_s0 = sld [smem:[#allocation17_spill]] }
  0x20   : > { %v395_v1 = vshrl.u32 %v394_v0, 7  ;;  %s383_s22 = scalar_select %p382_p12, %s13873_s17, 1 }
  0x21   : > { %s16784_s1 = sld [smem:[#allocation18_spill]]  ;;  %s14068_s23 = scalar_lea.vmem [#allocation5], %s14022_s21 }
  0x22   : > { %v396_v2 = vadd.s32 8, %v395_v1  ;;  %v397_v3 = vadd.s32 16, %v395_v1  ;;  %v398_v4 = vadd.s32 24, %v395_v1  ;;  %v399_v5 = vadd.s32 32, %v395_v1  ;;  %s11400_s25 = sshll.u32 %s383_s22, 7  ;;  %s11401_s28 = sshll.u32 %s383_s22, 6 }
  0x23   : > { %v400_v6 = vadd.s32 40, %v395_v1  ;;  %v401_v7 = vadd.s32 48, %v395_v1  ;;  %v402_v8 = vadd.s32 56, %v395_v1  ;;  %v403_v9 = vadd.s32 64, %v395_v1  ;;  %p10335_p13 = scmp.ne.s32.totalorder %s13869_s16, 0 }
  0x24   : > { %v404_v10 = vadd.s32 72, %v395_v1  ;;  %v405_v11 = vadd.s32 80, %v395_v1  ;;  %v406_v12 = vadd.s32 88, %v395_v1  ;;  %v407_v13 = vadd.s32 96, %v395_v1  ;;  %v808_v58 = vld [vmem:[%s16745_s2] sm:$0xff] (!%p10335_p13) }
  0x25   : > { %s14028_s24 = scalar_lea.vmem %s16783_s0, %s11400_s25  ;;  %v408_v14 = vadd.s32 104, %v395_v1  ;;  %v409_v15 = vadd.s32 112, %v395_v1  ;;  %v410_v16 = vadd.s32 120, %v395_v1  ;;  %v415_v17 = vand.u32 15, %v395_v1  ;;  %v824_v62 = vld [vmem:[%s16745_s2 + $0x80] sm:$0xff] (!%p10335_p13) }
  0x26   : > { %v422_v18 = vand.u32 15, %v396_v2  ;;  %v429_v19 = vand.u32 15, %v397_v3  ;;  %v436_v20 = vand.u32 15, %v398_v4  ;;  %v443_v21 = vand.u32 15, %v399_v5  ;;  %v13610_v0 = vld [vmem:[%s16747_s4 + $0x20] sm:$0xff] (!%p10335_p13)   ;;  %v809_v2 = vld [vmem:[%s16745_s2 + $0x8] sm:$0xff] (!%p10335_p13) }
  0x27   : > { %s14033_s19 = scalar_lea.vmem %s16784_s1, %s11401_s28  ;;  %v450_v22 = vand.u32 15, %v400_v6  ;;  %v457_v23 = vand.u32 15, %v401_v7  ;;  %v464_v24 = vand.u32 15, %v402_v8  ;;  %v471_v25 = vand.u32 15, %v403_v9  ;;  %v13609_v1 = vld [vmem:[%s16747_s4] sm:$0xff] (!%p10335_p13)   ;;  %v810_v3 = vld [vmem:[%s16745_s2 + $0x10] sm:$0xff] (!%p10335_p13) }
  0x28   : > { %v478_v26 = vand.u32 15, %v404_v10  ;;  %v485_v27 = vand.u32 15, %v405_v11  ;;  %v492_v28 = vand.u32 15, %v406_v12  ;;  %v499_v29 = vand.u32 15, %v407_v13  ;;  %v840_v50 = vld [vmem:[%s14033_s19] sm:$0xff] (!%p10335_p13)  ;;  %v841_v51 = vld [vmem:[%s14033_s19 + $0x8] sm:$0xff] (!%p10335_p13) }
  0x29   : > { %v506_v30 = vand.u32 15, %v408_v14  ;;  %v513_v31 = vand.u32 15, %v409_v15  ;;  %v520_v32 = vand.u32 15, %v410_v16  ;;  %vm603_vm0 = vcmp.gt.s32.totalorder %v415_v17, 0  ;;  %v842_v52 = vld [vmem:[%s14033_s19 + $0x10] sm:$0xff] (!%p10335_p13)  ;;  %v843_v54 = vld [vmem:[%s14033_s19 + $0x18] sm:$0xff] (!%p10335_p13) }
  0x2a   : > { %vm605_vm1 = vcmp.gt.s32.totalorder %v429_v19, 0  ;;  %vm607_vm2 = vcmp.gt.s32.totalorder %v443_v21, 0  ;;  %vm609_vm3 = vcmp.gt.s32.totalorder %v457_v23, 0  ;;  %vm611_vm4 = vcmp.gt.s32.totalorder %v471_v25, 0  ;;  %v844_v56 = vld [vmem:[%s14033_s19 + $0x20] sm:$0xff] (!%p10335_p13)  ;;  %v845_v57 = vld [vmem:[%s14033_s19 + $0x28] sm:$0xff] (!%p10335_p13) }
  0x2b   : > { %vm613_vm5 = vcmp.gt.s32.totalorder %v485_v27, 0  ;;  %vm615_vm6 = vcmp.gt.s32.totalorder %v499_v29, 0  ;;  %vm617_vm7 = vcmp.gt.s32.totalorder %v513_v31, 0  ;;  %v14035_v34 = vsel %vm603_vm0, 1.0, %v13887_v33  ;;  %702 = sbr.rel (%p10335_p13) target bundleno = 1086 (0x43e), region = 64  ;;  %v846_v60 = vld [vmem:[%s14033_s19 + $0x30] sm:$0xff] (!%p10335_p13) }
  0x2c   : > { %v14037_v35 = vsel %vm605_vm1, 1.0, %v13887_v33  ;;  %v14039_v36 = vsel %vm607_vm2, 1.0, %v13887_v33  ;;  %v14041_v37 = vsel %vm609_vm3, 1.0, %v13887_v33  ;;  %v14043_v38 = vsel %vm611_vm4, 1.0, %v13887_v33  ;;  %v847_v61 = vld [vmem:[%s14033_s19 + $0x38] sm:$0xff] (!%p10335_p13)  ;;  %v825_v4 = vld [vmem:[%s16745_s2 + $0x88] sm:$0xff] (!%p10335_p13) }
  0x2d   : > { %16785 = vst [vmem:[#allocation11_spill] sm:$0xff] %v14037_v35  ;;  %16786 = vst [vmem:[#allocation12_spill] sm:$0xff] %v14039_v36  ;;  %v14045_v39 = vsel %vm613_vm5, 1.0, %v13887_v33  ;;  %v14047_v40 = vsel %vm615_vm6, 1.0, %v13887_v33  ;;  %v14049_v41 = vsel %vm617_vm7, 1.0, %v13887_v33  ;;  %vm652_vm8 = vcmp.lt.s32.totalorder %v422_v18, 15 }
  0x2e   : > { %16787 = vst [vmem:[#allocation13_spill] sm:$0xff] %v14043_v38  ;;  %16788 = vst [vmem:[#allocation14_spill] sm:$0xff] %v14045_v39  ;;  %vm654_vm9 = vcmp.lt.s32.totalorder %v436_v20, 15  ;;  %vm656_vm10 = vcmp.lt.s32.totalorder %v450_v22, 15  ;;  %vm658_vm11 = vcmp.lt.s32.totalorder %v464_v24, 15  ;;  %vm660_vm12 = vcmp.lt.s32.totalorder %v478_v26, 15 }
  0x2f   : > { %16789 = vst [vmem:[#allocation15_spill] sm:$0xff] %v14047_v40  ;;  %16790 = vst [vmem:[#allocation16_spill] sm:$0xff] %v14049_v41  ;;  %vm662_vm13 = vcmp.lt.s32.totalorder %v492_v28, 15  ;;  %vm664_vm14 = vcmp.lt.s32.totalorder %v506_v30, 15  ;;  %vm666_vm15 = vcmp.lt.s32.totalorder %v520_v32, 15  ;;  %v14051_v42 = vsel %vm652_vm8, 1.0, %v13887_v33 }
  0x30   : > { %v14053_v43 = vsel %vm654_vm9, 1.0, %v13887_v33  ;;  %v14055_v44 = vsel %vm656_vm10, 1.0, %v13887_v33  ;;  %v14057_v45 = vsel %vm658_vm11, 1.0, %v13887_v33  ;;  %v14059_v46 = vsel %vm660_vm12, 1.0, %v13887_v33  ;;  %v826_v5 = vld [vmem:[%s16745_s2 + $0x90] sm:$0xff] (!%p10335_p13)  ;;  %v811_v6 = vld [vmem:[%s16745_s2 + $0x18] sm:$0xff] (!%p10335_p13) }
  0x31   : > { %v14061_v47 = vsel %vm662_vm13, 1.0, %v13887_v33  ;;  %v14063_v48 = vsel %vm664_vm14, 1.0, %v13887_v33  ;;  %v14065_v49 = vsel %vm666_vm15, 1.0, %v13887_v33  ;;  %vm735_vm0 = vcmask (!%p10335_p13), 523264   ;;  %v13611_v7 = vld [vmem:[%s16747_s4 + $0x8] sm:$0xff] (!%p10335_p13)   ;;  %v812_v9 = vld [vmem:[%s16745_s2 + $0x20] sm:$0xff] (!%p10335_p13) }
  0x32   : > { %v13214_v53 = vpack.c.bf16 %v841_v51, %v840_v50  ;;  %v13218_v55 = vpack.c.bf16 %v843_v54, %v842_v52  ;;  %12086 = vmatprep.mubr.msk.f32.mxu0 %vm735_vm0, %v808_v58  ;;  %v13222_v59 = vpack.c.bf16 %v845_v57, %v844_v56  ;;  %v13226_v63 = vpack.c.bf16 %v847_v61, %v846_v60  ;;  %v13612_v8 = vld [vmem:[%s16747_s4 + $0x28] sm:$0xff]   ;;  %v827_v10 = vld [vmem:[%s16745_s2 + $0x98] sm:$0xff]  ;;  %v828_v11 = vld [vmem:[%s16745_s2 + $0xa0] sm:$0xff] }
  0x33   : > { %12110 = vmatprep.mubr.msk.f32.mxu1 %vm735_vm0, %v824_v62  ;;  %v13613_v12 = vld [vmem:[%s16747_s4 + $0x10] sm:$0xff]   ;;  %v813_v14 = vld [vmem:[%s16745_s2 + $0x28] sm:$0xff]  ;;  %v815_v18 = vld [vmem:[%s16745_s2 + $0x38] sm:$0xff]  ;;  %v13888_v51 = vmov 0.0  }
  0x34   : > { %13215 = vmatprep.subr.bf16.mxu0 %v13214_v53  ;;  %13230 = vmatprep.subr.bf16.mxu1 %v13214_v53  ;;  %v13614_v13 = vld [vmem:[%s16747_s4 + $0x30] sm:$0xff]   ;;  %v829_v16 = vld [vmem:[%s16745_s2 + $0xa8] sm:$0xff]  ;;  %v816_v19 = vld [vmem:[%s16745_s2 + $0x40] sm:$0xff]  ;;  %1170 = vst.msk [vmem:[#allocation3 + $0x8] sm:$0xff] %vm735_vm0, %v13888_v51 }
  0x35   : > { %13217 = vmatpush3.bf16.msra.mxu0 %v13214_v53  ;;  %13234 = vmatpush3.bf16.msra.mxu1 %v13214_v53  ;;  %v814_v15 = vld [vmem:[%s16745_s2 + $0x30] sm:$0xff]  ;;  %v831_v20 = vld [vmem:[%s16745_s2 + $0xb8] sm:$0xff]  ;;  %v832_v21 = vld [vmem:[%s16745_s2 + $0xc0] sm:$0xff]  ;;  %1171 = vst.msk [vmem:[#allocation3 + $0x10] sm:$0xff] %vm735_vm0, %v13888_v51 }
  0x36   : > { %13219 = vmatprep.subr.bf16.mxu0 %v13218_v55  ;;  %13231 = vmatprep.subr.bf16.mxu1 %v13218_v55  ;;  %v830_v17 = vld [vmem:[%s16745_s2 + $0xb0] sm:$0xff]  ;;  %v817_v22 = vld [vmem:[%s16745_s2 + $0x48] sm:$0xff]  ;;  %v819_v26 = vld [vmem:[%s16745_s2 + $0x58] sm:$0xff]  ;;  %1172 = vst.msk [vmem:[#allocation3 + $0x18] sm:$0xff] %vm735_vm0, %v13888_v51 }
  0x37   : > { %v818_v23 = vld [vmem:[%s16745_s2 + $0x50] sm:$0xff]  ;;  %v833_v24 = vld [vmem:[%s16745_s2 + $0xc8] sm:$0xff]  ;;  %v820_v27 = vld [vmem:[%s16745_s2 + $0x60] sm:$0xff]  ;;  %1209 = vst.msk [vmem:[#allocation4] sm:$0xff] %vm735_vm0, %v13888_v51 }
  0x38   : > { %v834_v25 = vld [vmem:[%s16745_s2 + $0xd0] sm:$0xff]  ;;  %v835_v28 = vld [vmem:[%s16745_s2 + $0xd8] sm:$0xff]  ;;  %v836_v29 = vld [vmem:[%s16745_s2 + $0xe0] sm:$0xff]  ;;  %1210 = vst.msk [vmem:[#allocation4 + $0x8] sm:$0xff] %vm735_vm0, %v13888_v51 }
  0x39   : > { %13221 = vmatpush3.bf16.msra.mxu0 %v13218_v55  ;;  %13235 = vmatpush3.bf16.msra.mxu1 %v13218_v55  ;;  %v821_v30 = vld [vmem:[%s16745_s2 + $0x68] sm:$0xff]  ;;  %v822_v31 = vld [vmem:[%s16745_s2 + $0x70] sm:$0xff]  ;;  %v823_v33 = vld [vmem:[%s16745_s2 + $0x78] sm:$0xff]  ;;  %1211 = vst.msk [vmem:[#allocation4 + $0x10] sm:$0xff] %vm735_vm0, %v13888_v51 }
  0x3a   : > { %13223 = vmatprep.subr.bf16.mxu0 %v13222_v59  ;;  %13232 = vmatprep.subr.bf16.mxu1 %v13222_v59  ;;  %v837_v32 = vld [vmem:[%s16745_s2 + $0xe8] sm:$0xff]  ;;  %v838_v50 = vld [vmem:[%s16745_s2 + $0xf0] sm:$0xff]  ;;  %1212 = vst.msk [vmem:[#allocation4 + $0x18] sm:$0xff] %vm735_vm0, %v13888_v51  ;;  %1213 = vst.msk [vmem:[#allocation4 + $0x120] sm:$0xff] %vm735_vm0, %v13888_v51 }
  0x3b   : > { %1214 = vst.msk [vmem:[#allocation4 + $0x128] sm:$0xff] %vm735_vm0, %v13888_v51  ;;  %1215 = vst.msk [vmem:[#allocation4 + $0x130] sm:$0xff] %vm735_vm0, %v13888_v51  ;;  %v839_v52 = vld [vmem:[%s16745_s2 + $0xf8] sm:$0xff]  ;;  %v14254_v60 = vld [vmem:[%s16746_s3] sm:$0xff]  }
  0x3c   : > { %1216 = vst.msk [vmem:[#allocation4 + $0x138] sm:$0xff] %vm735_vm0, %v13888_v51  ;;  %737 = vst.msk [vmem:[#allocation2 + $0x8] sm:$0xff] %vm735_vm0, %v13888_v51  ;;  %v13615_v53 = vld [vmem:[%s16747_s4 + $0x18] sm:$0xff]   ;;  %v1251_v55 = vld [vmem:[#allocation3 + $0xf] sm:$0xff] }
  0x3d   : > { %13225 = vmatpush3.bf16.msra.mxu0 %v13222_v59  ;;  %13236 = vmatpush3.bf16.msra.mxu1 %v13222_v59  ;;  %738 = vst.msk [vmem:[#allocation2 + $0x10] sm:$0xff] %vm735_vm0, %v13888_v51  ;;  %739 = vst.msk [vmem:[#allocation2 + $0x18] sm:$0xff] %vm735_vm0, %v13888_v51  ;;  %v13616_v54 = vld [vmem:[%s16747_s4 + $0x38] sm:$0xff]   ;;  %v1638_v57 = vld [vmem:[#allocation3 + $0x10] sm:$0xff] }
  0x3e   : > { %13227 = vmatprep.subr.bf16.mxu0 %v13226_v63  ;;  %13233 = vmatprep.subr.bf16.mxu1 %v13226_v63  ;;  %804 = vst.msk [vmem:[#allocation2 + $0x120] sm:$0xff] %vm735_vm0, %v13888_v51  ;;  %805 = vst.msk [vmem:[#allocation2 + $0x128] sm:$0xff] %vm735_vm0, %v13888_v51  ;;  %v1252_v56 = vld [vmem:[#allocation3 + $0x17] sm:$0xff]  ;;  %v14259_v62 = vld [vmem:[%s16746_s3 + $0x20] sm:$0xff]  }
  0x3f   : > { %806 = vst.msk [vmem:[#allocation2 + $0x130] sm:$0xff] %vm735_vm0, %v13888_v51  ;;  %1205 = vst.msk [vmem:[#allocation3 + $0x120] sm:$0xff] %vm735_vm0, %v13888_v51  ;;  %v1267_v58 = vpack.c.bf16 %v1252_v56, %v1251_v55  ;;  %v1639_v59 = vld [vmem:[#allocation3 + $0x18] sm:$0xff] }
  0x40   : > { %1206 = vst.msk [vmem:[#allocation3 + $0x128] sm:$0xff] %vm735_vm0, %v13888_v51  ;;  %1207 = vst.msk [vmem:[#allocation3 + $0x130] sm:$0xff] %vm735_vm0, %v13888_v51  ;;  %v1654_v61 = vpack.c.bf16 %v1639_v59, %v1638_v57 }
  0x41   : > { %13229 = vmatpush3.bf16.msra.mxu0 %v13226_v63  ;;  %13237 = vmatpush3.bf16.msra.mxu1 %v13226_v63  ;;  %v11412_v63 = vld [vmem:[%s14028_s24] sm:$0xff]  }
  0x42   : > { %12182 = vmatprep.subr.bf16.mxu0 %v13610_v0  ;;  %12134 = vmatprep.subr.bf16.mxu1 %v13609_v1 }
  0x44   : > { %12087 = vmatmul.mubr.msk.f32.vlgmr.msra.gmra.mrb[0].mxu0 %vm735_vm0, %v809_v2  ;;  %12111 = vmatmul.mubr.msk.f32.vlgmr.msra.gmra.mrb[0].mxu1 %vm735_vm0, %v825_v4  ;;  %v11475_v2 = vld [vmem:[%s14028_s24 + $0x8] sm:$0xff]  }
  0x45   : > { %12089 = vmatprep.mubr.msk.f32.mxu0 %vm735_vm0, %v810_v3  ;;  %12113 = vmatprep.mubr.msk.f32.mxu1 %vm735_vm0, %v826_v5  ;;  %v11417_v3 = vunpack.c.l.bf16 %v11475_v2  ;;  %v11418_v4 = vunpack.c.h.bf16 %v11475_v2  ;;  %v11476_v5 = vld [vmem:[%s14028_s24 + $0x10] sm:$0xff]  }
  0x46   : > { %12135 = vmatpush3.bf16.msra.mxu1 %v13609_v1  ;;  %12183 = vmatpush3.bf16.msra.mxu0 %v13610_v0  ;;  %v11413_v0 = vunpack.c.l.bf16 %v11412_v63  ;;  %v11414_v1 = vunpack.c.h.bf16 %v11412_v63 }
  0x47   : > { %12136 = vmatprep.subr.bf16.mxu1 %v13611_v7  ;;  %12184 = vmatprep.subr.bf16.mxu0 %v13612_v8  ;;  %774 = vst.msk [vmem:[#allocation2 + $0x30] sm:$0xff] %vm735_vm0, %v11417_v3  ;;  %775 = vst.msk [vmem:[#allocation2 + $0x38] sm:$0xff] %vm735_vm0, %v11418_v4 }
  0x48   : > { %12090 = vmatmul.mubr.msk.f32.gmra.mrb[2].mxu0 %vm735_vm0, %v811_v6  ;;  %12114 = vmatmul.mubr.msk.f32.gmra.mrb[2].mxu1 %vm735_vm0, %v827_v10  ;;  %772 = vst.msk [vmem:[#allocation2 + $0x20] sm:$0xff] %vm735_vm0, %v11413_v0  ;;  %773 = vst.msk [vmem:[#allocation2 + $0x28] sm:$0xff] %vm735_vm0, %v11414_v1  ;;  %v11421_v6 = vunpack.c.l.bf16 %v11476_v5  ;;  %v13621_v1 = vld [vmem:[%s16746_s3 + $0x10] sm:$0xff]  }
  0x49   : > { %12092 = vmatprep.mubr.msk.f32.mxu0 %vm735_vm0, %v812_v9  ;;  %12116 = vmatprep.mubr.msk.f32.mxu1 %vm735_vm0, %v828_v11  ;;  %v11478_v11 = vld [vmem:[%s14028_s24 + $0x20] sm:$0xff]  }
  0x4a   : > { %12137 = vmatpush3.bf16.msra.mxu1 %v13611_v7  ;;  %12185 = vmatpush3.bf16.msra.mxu0 %v13612_v8  ;;  %v11422_v7 = vunpack.c.h.bf16 %v11476_v5  ;;  %776 = vst.msk [vmem:[#allocation2 + $0x40] sm:$0xff] %vm735_vm0, %v11421_v6  ;;  %v11477_v8 = vld [vmem:[%s14028_s24 + $0x18] sm:$0xff]  }
  0x4b   : > { %12138 = vmatprep.subr.bf16.mxu1 %v13613_v12  ;;  %12186 = vmatprep.subr.bf16.mxu0 %v13614_v13  ;;  %v11425_v9 = vunpack.c.l.bf16 %v11477_v8  ;;  %v11426_v10 = vunpack.c.h.bf16 %v11477_v8 }
  0x4c   : > { %12093 = vmatmul.mubr.msk.f32.gmra.mrb[4].mxu0 %vm735_vm0, %v813_v14  ;;  %12117 = vmatmul.mubr.msk.f32.gmra.mrb[4].mxu1 %vm735_vm0, %v829_v16  ;;  %777 = vst.msk [vmem:[#allocation2 + $0x48] sm:$0xff] %vm735_vm0, %v11422_v7  ;;  %v11479_v14 = vld [vmem:[%s14028_s24 + $0x28] sm:$0xff]  }
  0x4d   : > { %12095 = vmatprep.mubr.msk.f32.mxu0 %vm735_vm0, %v814_v15  ;;  %12119 = vmatprep.mubr.msk.f32.mxu1 %vm735_vm0, %v830_v17  ;;  %778 = vst.msk [vmem:[#allocation2 + $0x50] sm:$0xff] %vm735_vm0, %v11425_v9  ;;  %779 = vst.msk [vmem:[#allocation2 + $0x58] sm:$0xff] %vm735_vm0, %v11426_v10  ;;  %v11433_v15 = vunpack.c.l.bf16 %v11479_v14  ;;  %v11434_v16 = vunpack.c.h.bf16 %v11479_v14  ;;  %v11480_v17 = vld [vmem:[%s14028_s24 + $0x30] sm:$0xff]   ;;  %v13623_v9 = vld [vmem:[%s16746_s3 + $0x18] sm:$0xff]  }
  0x4e   : > { %12139 = vmatpush3.bf16.msra.mxu1 %v13613_v12  ;;  %12187 = vmatpush3.bf16.msra.mxu0 %v13614_v13  ;;  %v11429_v12 = vunpack.c.l.bf16 %v11478_v11  ;;  %v11430_v13 = vunpack.c.h.bf16 %v11478_v11  ;;  %v13624_v10 = vld [vmem:[%s16746_s3 + $0x38] sm:$0xff]  }
  0x4f   : > { %12140 = vmatprep.subr.bf16.mxu1 %v13615_v53  ;;  %12188 = vmatprep.subr.bf16.mxu0 %v13616_v54  ;;  %782 = vst.msk [vmem:[#allocation2 + $0x70] sm:$0xff] %vm735_vm0, %v11433_v15  ;;  %783 = vst.msk [vmem:[#allocation2 + $0x78] sm:$0xff] %vm735_vm0, %v11434_v16 }
  0x50   : > { %12096 = vmatmul.mubr.msk.f32.gmra.mrb[6].mxu0 %vm735_vm0, %v815_v18  ;;  %12120 = vmatmul.mubr.msk.f32.gmra.mrb[6].mxu1 %vm735_vm0, %v831_v20  ;;  %780 = vst.msk [vmem:[#allocation2 + $0x60] sm:$0xff] %vm735_vm0, %v11429_v12  ;;  %781 = vst.msk [vmem:[#allocation2 + $0x68] sm:$0xff] %vm735_vm0, %v11430_v13  ;;  %v11437_v18 = vunpack.c.l.bf16 %v11480_v17  ;;  %v11481_v20 = vld [vmem:[%s14028_s24 + $0x38] sm:$0xff]  }
  0x51   : > { %12098 = vmatprep.mubr.msk.f32.mxu0 %vm735_vm0, %v816_v19  ;;  %12122 = vmatprep.mubr.msk.f32.mxu1 %vm735_vm0, %v832_v21  ;;  %v11438_v19 = vunpack.c.h.bf16 %v11480_v17  ;;  %v11441_v21 = vunpack.c.l.bf16 %v11481_v20 }
  0x52   : > { %12141 = vmatpush3.bf16.msra.mxu1 %v13615_v53  ;;  %12189 = vmatpush3.bf16.msra.mxu0 %v13616_v54  ;;  %784 = vst.msk [vmem:[#allocation2 + $0x80] sm:$0xff] %vm735_vm0, %v11437_v18  ;;  %v13619_v53 = vld [vmem:[%s16746_s3 + $0x8] sm:$0xff]  }
  0x53   : > { %12158 = vmatprep.subr.bf16.mxu1 %v14254_v60  ;;  %12206 = vmatprep.subr.bf16.mxu0 %v14259_v62  ;;  %785 = vst.msk [vmem:[#allocation2 + $0x88] sm:$0xff] %vm735_vm0, %v11438_v19  ;;  %786 = vst.msk [vmem:[#allocation2 + $0x90] sm:$0xff] %vm735_vm0, %v11441_v21  ;;  %v13620_v54 = vld [vmem:[%s16746_s3 + $0x28] sm:$0xff]   ;;  %v14359_v21 = vld [vmem:[%s16747_s4 + $0x60] sm:$0xff]  }
  0x54   : > { %12099 = vmatmul.mubr.msk.f32.gmra.mrb[8].mxu0 %vm735_vm0, %v817_v22  ;;  %12123 = vmatmul.mubr.msk.f32.gmra.mrb[8].mxu1 %vm735_vm0, %v833_v24  ;;  %v11442_v22 = vunpack.c.h.bf16 %v11481_v20  ;;  %v14354_v20 = vld [vmem:[%s16747_s4 + $0x40] sm:$0xff]  }
  0x55   : > { %12101 = vmatprep.mubr.msk.f32.mxu0 %vm735_vm0, %v818_v23  ;;  %12125 = vmatprep.mubr.msk.f32.mxu1 %vm735_vm0, %v834_v25 }
  0x56   : > { %787 = vst.msk [vmem:[#allocation2 + $0x98] sm:$0xff] %vm735_vm0, %v11442_v22 }
  0x58   : > { %12102 = vmatmul.mubr.msk.f32.gmra.mrb[10].mxu0 %vm735_vm0, %v819_v26  ;;  %12126 = vmatmul.mubr.msk.f32.gmra.mrb[10].mxu1 %vm735_vm0, %v835_v28 }
  0x59   : > { %12104 = vmatprep.mubr.msk.f32.mxu0 %vm735_vm0, %v820_v27  ;;  %12128 = vmatprep.mubr.msk.f32.mxu1 %vm735_vm0, %v836_v29 }
  0x5c   : > { %12105 = vmatmul.mubr.msk.f32.gmra.mrb[12].mxu0 %vm735_vm0, %v821_v30  ;;  %12129 = vmatmul.mubr.msk.f32.gmra.mrb[12].mxu1 %vm735_vm0, %v837_v32 }
  0x5d   : > { %12107 = vmatprep.mubr.msk.f32.mxu0 %vm735_vm0, %v822_v31  ;;  %12131 = vmatprep.mubr.msk.f32.mxu1 %vm735_vm0, %v838_v50 }
  0x60   : > { %12108 = vmatmul.mubr.msk.f32.gmra.mrb[14].mxu0 %vm735_vm0, %v823_v33  ;;  %12132 = vmatmul.mubr.msk.f32.gmra.mrb[14].mxu1 %vm735_vm0, %v839_v52 }
  0x61   : > { %12142 = vmatprep.mubr.msk.bf16.mxu1 %vm735_vm0, %v1267_v58  ;;  %12190 = vmatprep.mubr.msk.bf16.mxu0 %vm735_vm0, %v1654_v61 }
 0x117   : > { %v12088_v23 = vpop.f32.mrb[0].mxu0  ;;  %v12112_v25 = vpop.f32.mrb[0].mxu1 }
 0x118   : > { %1174 = vst.msk [vmem:[#allocation3 + $0x28] sm:$0xff] %vm735_vm0, %v12088_v23  ;;  %v1010_v24 = vpop.f32.mrb[1].mxu0  ;;  %1190 = vst.msk [vmem:[#allocation3 + $0xa8] sm:$0xff] %vm735_vm0, %v12112_v25  ;;  %v1090_v26 = vpop.f32.mrb[1].mxu1 }
 0x119   : > { %1173 = vst.msk [vmem:[#allocation3 + $0x20] sm:$0xff] %vm735_vm0, %v1010_v24  ;;  %1189 = vst.msk [vmem:[#allocation3 + $0xa0] sm:$0xff] %vm735_vm0, %v1090_v26 }
 0x11b   : > { %v12091_v27 = vpop.f32.mrb[2].mxu0  ;;  %v12115_v17 = vpop.f32.mrb[2].mxu1 }
 0x11c   : > { %1176 = vst.msk [vmem:[#allocation3 + $0x38] sm:$0xff] %vm735_vm0, %v12091_v27  ;;  %v1020_v28 = vpop.f32.mrb[3].mxu0  ;;  %1192 = vst.msk [vmem:[#allocation3 + $0xb8] sm:$0xff] %vm735_vm0, %v12115_v17  ;;  %v1100_v22 = vpop.f32.mrb[3].mxu1 }
 0x11d   : > { %1175 = vst.msk [vmem:[#allocation3 + $0x30] sm:$0xff] %vm735_vm0, %v1020_v28  ;;  %1191 = vst.msk [vmem:[#allocation3 + $0xb0] sm:$0xff] %vm735_vm0, %v1100_v22 }
 0x11f   : > { %v12094_v29 = vpop.f32.mrb[4].mxu0  ;;  %v1641_v30 = vld [vmem:[#allocation3 + $0x28] sm:$0xff] }
 0x120   : > { %1178 = vst.msk [vmem:[#allocation3 + $0x48] sm:$0xff] %vm735_vm0, %v12094_v29  ;;  %v1030_v31 = vpop.f32.mrb[5].mxu0  ;;  %v1253_v32 = vld [vmem:[#allocation3 + $0x1f] sm:$0xff]  ;;  %v1254_v33 = vld [vmem:[#allocation3 + $0x27] sm:$0xff] }
 0x121   : > { %v1640_v50 = vld [vmem:[#allocation3 + $0x20] sm:$0xff]  ;;  %1177 = vst.msk [vmem:[#allocation3 + $0x40] sm:$0xff] %vm735_vm0, %v1030_v31  ;;  %v14297_v51 = vpack.c.bf16 %v1254_v33, %v1253_v32  ;;  %v1219_v33 = vld [vmem:[#allocation2 + $0xf] sm:$0xff] }
 0x122   : > { %v14299_v52 = vpack.c.bf16 %v1641_v30, %v1640_v50 }
 0x123   : > { %v12097_v55 = vpop.f32.mrb[6].mxu0  ;;  %12143 = vmatmul.mubr.msk.bf16.vlgmr.msra.gmra.mrb[16].mxu1 %vm735_vm0, %v14297_v51  ;;  %v1643_v56 = vld [vmem:[#allocation3 + $0x38] sm:$0xff] }
 0x124   : > { %12191 = vmatmul.mubr.msk.bf16.vlgmr.msra.gmra.mrb[16].mxu0 %vm735_vm0, %v14299_v52  ;;  %1180 = vst.msk [vmem:[#allocation3 + $0x58] sm:$0xff] %vm735_vm0, %v12097_v55  ;;  %12159 = vmatpush3.bf16.msra.mxu1 %v14254_v60  ;;  %v1040_v57 = vpop.f32.mrb[7].mxu0  ;;  %v1255_v58 = vld [vmem:[#allocation3 + $0x2f] sm:$0xff]  ;;  %v1256_v59 = vld [vmem:[#allocation3 + $0x37] sm:$0xff] }
 0x125   : > { %12207 = vmatpush3.bf16.msra.mxu0 %v14259_v62  ;;  %v1642_v61 = vld [vmem:[#allocation3 + $0x30] sm:$0xff]  ;;  %1179 = vst.msk [vmem:[#allocation3 + $0x50] sm:$0xff] %vm735_vm0, %v1040_v57  ;;  %v14315_v63 = vpack.c.bf16 %v1256_v59, %v1255_v58  ;;  %12160 = vmatprep.subr.bf16.mxu1 %v13619_v53 }
 0x126   : > { %v14317_v0 = vpack.c.bf16 %v1643_v56, %v1642_v61  ;;  %12208 = vmatprep.subr.bf16.mxu0 %v13620_v54  ;;  %v13622_v60 = vld [vmem:[%s16746_s3 + $0x30] sm:$0xff]   ;;  %v1606_v61 = vld [vmem:[#allocation2 + $0x18] sm:$0xff] }
 0x127   : > { %v12100_v62 = vpop.f32.mrb[8].mxu0  ;;  %12146 = vmatprep.mubr.msk.bf16.mxu1 %vm735_vm0, %v14315_v63  ;;  %v1645_v2 = vld [vmem:[#allocation3 + $0x48] sm:$0xff]  ;;  %v1220_v58 = vld [vmem:[#allocation2 + $0x17] sm:$0xff] }
 0x128   : > { %12194 = vmatprep.mubr.msk.bf16.mxu0 %vm735_vm0, %v14317_v0  ;;  %1182 = vst.msk [vmem:[#allocation3 + $0x68] sm:$0xff] %vm735_vm0, %v12100_v62  ;;  %v1050_v3 = vpop.f32.mrb[9].mxu0  ;;  %v1257_v4 = vld [vmem:[#allocation3 + $0x3f] sm:$0xff]  ;;  %v1258_v5 = vld [vmem:[#allocation3 + $0x47] sm:$0xff]  ;;  %12161 = vmatpush3.bf16.msra.mxu1 %v13619_v53  ;;  %v1605_v59 = vld [vmem:[#allocation2 + $0x10] sm:$0xff] }
 0x129   : > { %v1644_v6 = vld [vmem:[#allocation3 + $0x40] sm:$0xff]  ;;  %12209 = vmatpush3.bf16.msra.mxu0 %v13620_v54  ;;  %1181 = vst.msk [vmem:[#allocation3 + $0x60] sm:$0xff] %vm735_vm0, %v1050_v3  ;;  %v14331_v7 = vpack.c.bf16 %v1258_v5, %v1257_v4  ;;  %12162 = vmatprep.subr.bf16.mxu1 %v13621_v1  ;;  %v1235_v3 = vpack.c.bf16 %v1220_v58, %v1219_v33  ;;  %v1227_v33 = vld [vmem:[#allocation2 + $0x4f] sm:$0xff] }
 0x12a   : > { %v14333_v8 = vpack.c.bf16 %v1645_v2, %v1644_v6  ;;  %12210 = vmatprep.subr.bf16.mxu0 %v13622_v60  ;;  %v1621_v4 = vpack.c.bf16 %v1606_v61, %v1605_v59 }
 0x12b   : > { %v12103_v11 = vpop.f32.mrb[10].mxu0  ;;  %12147 = vmatmul.mubr.msk.bf16.gmra.mrb[20].mxu1 %vm735_vm0, %v14331_v7  ;;  %v1647_v12 = vld [vmem:[#allocation3 + $0x58] sm:$0xff] }
 0x12c   : > { %12195 = vmatmul.mubr.msk.bf16.gmra.mrb[20].mxu0 %vm735_vm0, %v14333_v8  ;;  %1184 = vst.msk [vmem:[#allocation3 + $0x78] sm:$0xff] %vm735_vm0, %v12103_v11  ;;  %v1060_v13 = vpop.f32.mrb[11].mxu0  ;;  %v1259_v14 = vld [vmem:[#allocation3 + $0x4f] sm:$0xff]  ;;  %v1260_v15 = vld [vmem:[#allocation3 + $0x57] sm:$0xff]  ;;  %12163 = vmatpush3.bf16.msra.mxu1 %v13621_v1  ;;  %v1607_v11 = vld [vmem:[#allocation2 + $0x20] sm:$0xff] }
 0x12d   : > { %v1646_v16 = vld [vmem:[#allocation3 + $0x50] sm:$0xff]  ;;  %12211 = vmatpush3.bf16.msra.mxu0 %v13622_v60  ;;  %1183 = vst.msk [vmem:[#allocation3 + $0x70] sm:$0xff] %vm735_vm0, %v1060_v13  ;;  %v14347_v18 = vpack.c.bf16 %v1260_v15, %v1259_v14  ;;  %12164 = vmatprep.subr.bf16.mxu1 %v13623_v9 }
 0x12e   : > { %v14349_v19 = vpack.c.bf16 %v1647_v12, %v1646_v16  ;;  %12212 = vmatprep.subr.bf16.mxu0 %v13624_v10  ;;  %v1608_v12 = vld [vmem:[#allocation2 + $0x28] sm:$0xff]  ;;  %v1224_v14 = vld [vmem:[#allocation2 + $0x37] sm:$0xff] }
 0x12f   : > { %v12106_v23 = vpop.f32.mrb[12].mxu0  ;;  %12150 = vmatprep.mubr.msk.bf16.mxu1 %vm735_vm0, %v14347_v18  ;;  %v1649_v24 = vld [vmem:[#allocation3 + $0x68] sm:$0xff]  ;;  %v1609_v15 = vld [vmem:[#allocation2 + $0x30] sm:$0xff]  ;;  %v1610_v16 = vld [vmem:[#allocation2 + $0x38] sm:$0xff]  ;;  %v14401_v22 = vpack.c.bf16 %v1608_v12, %v1607_v11 }
 0x130   : > { %12198 = vmatprep.mubr.msk.bf16.mxu0 %vm735_vm0, %v14349_v19  ;;  %1186 = vst.msk [vmem:[#allocation3 + $0x88] sm:$0xff] %vm735_vm0, %v12106_v23  ;;  %v1070_v25 = vpop.f32.mrb[13].mxu0  ;;  %v1261_v26 = vld [vmem:[#allocation3 + $0x5f] sm:$0xff]  ;;  %v1262_v27 = vld [vmem:[#allocation3 + $0x67] sm:$0xff]  ;;  %12165 = vmatpush3.bf16.msra.mxu1 %v13623_v9  ;;  %v1223_v13 = vld [vmem:[#allocation2 + $0x2f] sm:$0xff] }
 0x131   : > { %v1648_v28 = vld [vmem:[#allocation3 + $0x60] sm:$0xff]  ;;  %12213 = vmatpush3.bf16.msra.mxu0 %v13624_v10  ;;  %1185 = vst.msk [vmem:[#allocation3 + $0x80] sm:$0xff] %vm735_vm0, %v1070_v25  ;;  %v14369_v29 = vpack.c.bf16 %v1262_v27, %v1261_v26  ;;  %12230 = vmatprep.subr.bf16.mxu1 %v14354_v20  ;;  %v14403_v23 = vpack.c.bf16 %v1224_v14, %v1223_v13  ;;  %v13627_v25 = vld [vmem:[%s16747_s4 + $0x48] sm:$0xff]   ;;  %v1617_v11 = vld [vmem:[#allocation2 + $0x70] sm:$0xff] }
 0x132   : > { %v14371_v30 = vpack.c.bf16 %v1649_v24, %v1648_v28  ;;  %12278 = vmatprep.subr.bf16.mxu0 %v14359_v21  ;;  %v1221_v9 = vld [vmem:[#allocation2 + $0x1f] sm:$0xff]  ;;  %v1222_v10 = vld [vmem:[#allocation2 + $0x27] sm:$0xff]  ;;  %v14405_v24 = vpack.c.bf16 %v1610_v16, %v1609_v15 }
 0x133   : > { %v12109_v31 = vpop.f32.mrb[14].mxu0  ;;  %12151 = vmatmul.mubr.msk.bf16.gmra.mrb[24].mxu1 %vm735_vm0, %v14369_v29  ;;  %v1651_v32 = vld [vmem:[#allocation3 + $0x78] sm:$0xff]  ;;  %v14399_v17 = vpack.c.bf16 %v1222_v10, %v1221_v9  ;;  %v13628_v26 = vld [vmem:[%s16747_s4 + $0x68] sm:$0xff]   ;;  %v13633_v13 = vld [vmem:[%s16746_s3 + $0x40] sm:$0xff]  }
 0x134   : > { %12199 = vmatmul.mubr.msk.bf16.gmra.mrb[24].mxu0 %vm735_vm0, %v14371_v30  ;;  %1188 = vst.msk [vmem:[#allocation3 + $0x98] sm:$0xff] %vm735_vm0, %v12109_v31  ;;  %v1080_v50 = vpop.f32.mrb[15].mxu0  ;;  %v1263_v53 = vld [vmem:[#allocation3 + $0x6f] sm:$0xff]  ;;  %v1264_v54 = vld [vmem:[#allocation3 + $0x77] sm:$0xff]  ;;  %v1225_v27 = vld [vmem:[#allocation2 + $0x3f] sm:$0xff] }
 0x135   : > { %v1650_v55 = vld [vmem:[#allocation3 + $0x70] sm:$0xff]  ;;  %1187 = vst.msk [vmem:[#allocation3 + $0x90] sm:$0xff] %vm735_vm0, %v1080_v50  ;;  %v14381_v56 = vpack.c.bf16 %v1264_v54, %v1263_v53  ;;  %v1226_v28 = vld [vmem:[#allocation2 + $0x47] sm:$0xff]  ;;  %v1618_v12 = vld [vmem:[#allocation2 + $0x78] sm:$0xff] }
 0x136   : > { %v14383_v57 = vpack.c.bf16 %v1651_v32, %v1650_v55  ;;  %v1611_v31 = vld [vmem:[#allocation2 + $0x40] sm:$0xff]  ;;  %v1612_v32 = vld [vmem:[#allocation2 + $0x48] sm:$0xff]  ;;  %v13629_v50 = vld [vmem:[%s16747_s4 + $0x50] sm:$0xff]  }
 0x137   : > { %12154 = vmatprep.mubr.msk.bf16.mxu1 %vm735_vm0, %v14381_v56  ;;  %v1653_v1 = vld [vmem:[#allocation3 + $0x88] sm:$0xff]  ;;  %v13630_v53 = vld [vmem:[%s16747_s4 + $0x70] sm:$0xff]   ;;  %v14431_v58 = vpack.c.bf16 %v1612_v32, %v1611_v31  ;;  %v13634_v14 = vld [vmem:[%s16746_s3 + $0x60] sm:$0xff]   ;;  %v12118_v32 = vpop.f32.mrb[4].mxu1 }
 0x138   : > { %12202 = vmatprep.mubr.msk.bf16.mxu0 %vm735_vm0, %v14383_v57  ;;  %v1265_v60 = vld [vmem:[#allocation3 + $0x7f] sm:$0xff]  ;;  %v1266_v62 = vld [vmem:[#allocation3 + $0x87] sm:$0xff]  ;;  %v1228_v54 = vld [vmem:[#allocation2 + $0x57] sm:$0xff]  ;;  %1194 = vst.msk [vmem:[#allocation3 + $0xc8] sm:$0xff] %vm735_vm0, %v12118_v32 }
 0x139   : > { %v1652_v2 = vld [vmem:[#allocation3 + $0x80] sm:$0xff]  ;;  %v14389_v5 = vpack.c.bf16 %v1266_v62, %v1265_v60  ;;  %v1613_v55 = vld [vmem:[#allocation2 + $0x50] sm:$0xff]  ;;  %v14433_v59 = vpack.c.bf16 %v1228_v54, %v1227_v33  ;;  %v13632_v60 = vld [vmem:[%s16747_s4 + $0x78] sm:$0xff]   ;;  %v1110_v54 = vpop.f32.mrb[5].mxu1 }
 0x13a   : > { %v14391_v6 = vpack.c.bf16 %v1653_v1, %v1652_v2  ;;  %v13631_v1 = vld [vmem:[%s16747_s4 + $0x58] sm:$0xff]   ;;  %v1230_v2 = vld [vmem:[#allocation2 + $0x67] sm:$0xff]  ;;  %v1231_v9 = vld [vmem:[#allocation2 + $0x6f] sm:$0xff]  ;;  %1193 = vst.msk [vmem:[#allocation3 + $0xc0] sm:$0xff] %vm735_vm0, %v1110_v54 }
 0x13b   : > { %12155 = vmatmul.mubr.msk.bf16.gmra.mrb[28].mxu1 %vm735_vm0, %v14389_v5  ;;  %v1229_v62 = vld [vmem:[#allocation2 + $0x5f] sm:$0xff]  ;;  %v1232_v10 = vld [vmem:[#allocation2 + $0x77] sm:$0xff]  ;;  %v1234_v33 = vld [vmem:[#allocation2 + $0x87] sm:$0xff] }
 0x13c   : > { %12203 = vmatmul.mubr.msk.bf16.gmra.mrb[28].mxu0 %vm735_vm0, %v14391_v6  ;;  %12166 = vmatprep.mubr.msk.bf16.mxu1 %vm735_vm0, %v1235_v3  ;;  %v1615_v3 = vld [vmem:[#allocation2 + $0x60] sm:$0xff]  ;;  %v14457_v15 = vpack.c.bf16 %v1230_v2, %v1229_v62  ;;  %v12121_v2 = vpop.f32.mrb[6].mxu1  ;;  %v13636_v32 = vld [vmem:[%s16746_s3 + $0x68] sm:$0xff]  }
 0x13d   : > { %12214 = vmatprep.mubr.msk.bf16.mxu0 %vm735_vm0, %v1621_v4  ;;  %v1616_v4 = vld [vmem:[#allocation2 + $0x68] sm:$0xff]  ;;  %v1233_v31 = vld [vmem:[#allocation2 + $0x7f] sm:$0xff]  ;;  %1196 = vst.msk [vmem:[#allocation3 + $0xd8] sm:$0xff] %vm735_vm0, %v12121_v2  ;;  %v2018_v2 = vld [vmem:[#allocation3 + $0x51] sm:$0xff] }
 0x13e   : > { %v14459_v16 = vpack.c.bf16 %v1616_v4, %v1615_v3  ;;  %v1120_v3 = vpop.f32.mrb[7].mxu1  ;;  %v2013_v4 = vld [vmem:[#allocation3 + $0x29] sm:$0xff] }
 0x13f   : > { %1195 = vst.msk [vmem:[#allocation3 + $0xd0] sm:$0xff] %vm735_vm0, %v1120_v3 }
 0x143   : > { %12167 = vmatmul.mubr.msk.bf16.vlgmr.msra.gmra.mrb[16].mxu1 %vm735_vm0, %v14399_v17 }
 0x144   : > { %12215 = vmatmul.mubr.msk.bf16.vlgmr.msra.gmra.mrb[16].mxu0 %vm735_vm0, %v14401_v22  ;;  %12231 = vmatpush3.bf16.msra.mxu1 %v14354_v20  ;;  %v1614_v20 = vld [vmem:[#allocation2 + $0x58] sm:$0xff] }
 0x145   : > { %12279 = vmatpush3.bf16.msra.mxu0 %v14359_v21  ;;  %12170 = vmatprep.mubr.msk.bf16.mxu1 %vm735_vm0, %v14403_v23  ;;  %v14429_v21 = vpack.c.bf16 %v1226_v28, %v1225_v27  ;;  %v14435_v61 = vpack.c.bf16 %v1614_v20, %v1613_v55  ;;  %v14466_v27 = vpack.c.bf16 %v1618_v12, %v1617_v11  ;;  %v2012_v11 = vld [vmem:[#allocation3 + $0x21] sm:$0xff]  ;;  %v2015_v12 = vld [vmem:[#allocation3 + $0x39] sm:$0xff] }
 0x146   : > { %12218 = vmatprep.mubr.msk.bf16.mxu0 %vm735_vm0, %v14405_v24  ;;  %12232 = vmatprep.subr.bf16.mxu1 %v13627_v25  ;;  %v14480_v55 = vpack.c.bf16 %v1234_v33, %v1233_v31  ;;  %v2014_v31 = vld [vmem:[#allocation3 + $0x31] sm:$0xff] }
 0x147   : > { %12280 = vmatprep.subr.bf16.mxu0 %v13628_v26  ;;  %v14507_v33 = vpack.c.bf16 %v2015_v12, %v2014_v31  ;;  %v13641_v12 = vld [vmem:[%s16747_s4 + $0x80] sm:$0xff]  }
 0x148   : > { %12233 = vmatpush3.bf16.msra.mxu1 %v13627_v25  ;;  %v14462_v25 = vld [vmem:[%s14028_s24 + $0x40] sm:$0xff]  }
 0x149   : > { %12281 = vmatpush3.bf16.msra.mxu0 %v13628_v26  ;;  %12234 = vmatprep.subr.bf16.mxu1 %v13629_v50  ;;  %v14464_v26 = vpack.c.bf16 %v1232_v10, %v1231_v9  ;;  %v11445_v28 = vunpack.c.l.bf16 %v14462_v25  ;;  %v12124_v9 = vpop.f32.mrb[8].mxu1 }
 0x14a   : > { %12282 = vmatprep.subr.bf16.mxu0 %v13630_v53  ;;  %1198 = vst.msk [vmem:[#allocation3 + $0xe8] sm:$0xff] %vm735_vm0, %v12124_v9  ;;  %v1130_v10 = vpop.f32.mrb[9].mxu1  ;;  %v13640_v9 = vld [vmem:[%s16746_s3 + $0x78] sm:$0xff]  }
 0x14b   : > { %12171 = vmatmul.mubr.msk.bf16.gmra.mrb[20].mxu1 %vm735_vm0, %v14429_v21  ;;  %788 = vst.msk [vmem:[#allocation2 + $0xa0] sm:$0xff] %vm735_vm0, %v11445_v28  ;;  %1197 = vst.msk [vmem:[#allocation3 + $0xe0] sm:$0xff] %vm735_vm0, %v1130_v10  ;;  %v14495_v28 = vpack.c.bf16 %v2013_v4, %v2012_v11  ;;  %v12127_v54 = vpop.f32.mrb[10].mxu1  ;;  %v13639_v4 = vld [vmem:[%s16746_s3 + $0x58] sm:$0xff]   ;;  %v2021_v11 = vld [vmem:[#allocation3 + $0x69] sm:$0xff] }
 0x14c   : > { %12219 = vmatmul.mubr.msk.bf16.gmra.mrb[20].mxu0 %vm735_vm0, %v14431_v58  ;;  %12174 = vmatprep.mubr.msk.bf16.mxu1 %vm735_vm0, %v14433_v59  ;;  %1200 = vst.msk [vmem:[#allocation3 + $0xf8] sm:$0xff] %vm735_vm0, %v12127_v54  ;;  %v1977_v54 = vld [vmem:[#allocation2 + $0x11] sm:$0xff] }
 0x14d   : > { %12222 = vmatprep.mubr.msk.bf16.mxu0 %vm735_vm0, %v14435_v61  ;;  %12235 = vmatpush3.bf16.msra.mxu1 %v13629_v50  ;;  %v1619_v50 = vld [vmem:[#allocation2 + $0x80] sm:$0xff] }
 0x14e   : > { %12283 = vmatpush3.bf16.msra.mxu0 %v13630_v53  ;;  %12236 = vmatprep.subr.bf16.mxu1 %v13631_v1  ;;  %v1620_v53 = vld [vmem:[#allocation2 + $0x88] sm:$0xff] }
 0x14f   : > { %12284 = vmatprep.subr.bf16.mxu0 %v13632_v60  ;;  %v14482_v20 = vpack.c.bf16 %v1620_v53, %v1619_v50  ;;  %v13637_v50 = vld [vmem:[%s16746_s3 + $0x50] sm:$0xff]  }
 0x150   : > { %v13638_v53 = vld [vmem:[%s16746_s3 + $0x70] sm:$0xff]  }
 0x151   : > { %12237 = vmatpush3.bf16.msra.mxu1 %v13631_v1  ;;  %v2010_v1 = vld [vmem:[#allocation3 + $0x11] sm:$0xff] }
 0x152   : > { %12285 = vmatpush3.bf16.msra.mxu0 %v13632_v60  ;;  %12254 = vmatprep.subr.bf16.mxu1 %v13633_v13  ;;  %v2011_v60 = vld [vmem:[#allocation3 + $0x19] sm:$0xff] }
 0x153   : > { %12302 = vmatprep.subr.bf16.mxu0 %v13634_v14  ;;  %12175 = vmatmul.mubr.msk.bf16.gmra.mrb[24].mxu1 %vm735_vm0, %v14457_v15  ;;  %v2026_v62 = vpack.c.bf16 %v2011_v60, %v2010_v1 }
 0x154   : > { %12223 = vmatmul.mubr.msk.bf16.gmra.mrb[24].mxu0 %vm735_vm0, %v14459_v16  ;;  %12178 = vmatprep.mubr.msk.bf16.mxu1 %vm735_vm0, %v14464_v26 }
 0x155   : > { %12226 = vmatprep.mubr.msk.bf16.mxu0 %vm735_vm0, %v14466_v27 }
 0x15b   : > { %12179 = vmatmul.mubr.msk.bf16.gmra.mrb[28].mxu1 %vm735_vm0, %v14480_v55 }
 0x15c   : > { %12227 = vmatmul.mubr.msk.bf16.gmra.mrb[28].mxu0 %vm735_vm0, %v14482_v20  ;;  %12238 = vmatprep.mubr.msk.bf16.mxu1 %vm735_vm0, %v2026_v62 }
 0x15d   : > { %12286 = vmatprep.mubr.msk.bf16.mxu0 %vm735_vm0, %v14297_v51  ;;  %v13635_v51 = vld [vmem:[%s16746_s3 + $0x48] sm:$0xff]  }
 0x163   : > { %12239 = vmatmul.mubr.msk.bf16.vlgmr.msra.gmra.mrb[32].mxu1 %vm735_vm0, %v14495_v28 }
 0x164   : > { %12287 = vmatmul.mubr.msk.bf16.vlgmr.msra.gmra.mrb[32].mxu0 %vm735_vm0, %v14315_v63  ;;  %12255 = vmatpush3.bf16.msra.mxu1 %v13633_v13  ;;  %v2017_v63 = vld [vmem:[#allocation3 + $0x49] sm:$0xff]  ;;  %v1140_v13 = vpop.f32.mrb[11].mxu1 }
 0x165   : > { %12303 = vmatpush3.bf16.msra.mxu0 %v13634_v14  ;;  %12242 = vmatprep.mubr.msk.bf16.mxu1 %vm735_vm0, %v14507_v33  ;;  %v2019_v14 = vld [vmem:[#allocation3 + $0x59] sm:$0xff]  ;;  %1199 = vst.msk [vmem:[#allocation3 + $0xf0] sm:$0xff] %vm735_vm0, %v1140_v13  ;;  %v12130_v1 = vpop.f32.mrb[12].mxu1  ;;  %v2025_v13 = vld [vmem:[#allocation3 + $0x89] sm:$0xff] }
 0x166   : > { %12290 = vmatprep.mubr.msk.bf16.mxu0 %vm735_vm0, %v14331_v7  ;;  %12256 = vmatprep.subr.bf16.mxu1 %v13635_v51  ;;  %v2016_v7 = vld [vmem:[#allocation3 + $0x41] sm:$0xff]  ;;  %1202 = vst.msk [vmem:[#allocation3 + $0x108] sm:$0xff] %vm735_vm0, %v12130_v1  ;;  %v1150_v60 = vpop.f32.mrb[13].mxu1  ;;  %v14525_v3 = vpack.c.bf16 %v2019_v14, %v2018_v2  ;;  %v2412_v14 = vld [vmem:[#allocation3 + $0x8f] sm:$0xff]  ;;  %v2413_v1 = vld [vmem:[#allocation3 + $0x97] sm:$0xff] }
 0x167   : > { %12304 = vmatprep.subr.bf16.mxu0 %v13636_v32  ;;  %v14522_v62 = vpack.c.bf16 %v2017_v63, %v2016_v7  ;;  %1201 = vst.msk [vmem:[#allocation3 + $0x100] sm:$0xff] %vm735_vm0, %v1150_v60  ;;  %v12133_v10 = vpop.f32.mrb[14].mxu1  ;;  %v1978_v63 = vld [vmem:[#allocation2 + $0x19] sm:$0xff]  ;;  %v2024_v7 = vld [vmem:[#allocation3 + $0x81] sm:$0xff] }
 0x168   : > { %12257 = vmatpush3.bf16.msra.mxu1 %v13635_v51  ;;  %1204 = vst.msk [vmem:[#allocation3 + $0x118] sm:$0xff] %vm735_vm0, %v12133_v10  ;;  %v1160_v31 = vpop.f32.mrb[15].mxu1  ;;  %v2023_v51 = vld [vmem:[#allocation3 + $0x79] sm:$0xff]  ;;  %v1993_v60 = vpack.c.bf16 %v1978_v63, %v1977_v54  ;;  %v14561_v2 = vpack.c.bf16 %v2025_v13, %v2024_v7  ;;  %v1985_v54 = vld [vmem:[#allocation2 + $0x51] sm:$0xff]  ;;  %v1988_v7 = vld [vmem:[#allocation2 + $0x69] sm:$0xff] }
 0x169   : > { %12305 = vmatpush3.bf16.msra.mxu0 %v13636_v32  ;;  %12258 = vmatprep.subr.bf16.mxu1 %v13637_v50  ;;  %1203 = vst.msk [vmem:[#allocation3 + $0x110] sm:$0xff] %vm735_vm0, %v1160_v31  ;;  %v1982_v10 = vld [vmem:[#allocation2 + $0x39] sm:$0xff]  ;;  %v13645_v13 = vld [vmem:[%s16747_s4 + $0x90] sm:$0xff]  }
 0x16a   : > { %12306 = vmatprep.subr.bf16.mxu0 %v13638_v53  ;;  %v1986_v63 = vld [vmem:[#allocation2 + $0x59] sm:$0xff] }
 0x16b   : > { %12243 = vmatmul.mubr.msk.bf16.gmra.mrb[36].mxu1 %vm735_vm0, %v14522_v62 }
 0x16c   : > { %12291 = vmatmul.mubr.msk.bf16.gmra.mrb[36].mxu0 %vm735_vm0, %v14347_v18  ;;  %12246 = vmatprep.mubr.msk.bf16.mxu1 %vm735_vm0, %v14525_v3  ;;  %v13642_v18 = vld [vmem:[%s16747_s4 + $0xa0] sm:$0xff]  }
 0x16d   : > { %12294 = vmatprep.mubr.msk.bf16.mxu0 %vm735_vm0, %v14369_v29  ;;  %12259 = vmatpush3.bf16.msra.mxu1 %v13637_v50  ;;  %v2020_v29 = vld [vmem:[#allocation3 + $0x61] sm:$0xff]  ;;  %v2022_v50 = vld [vmem:[#allocation3 + $0x71] sm:$0xff] }
 0x16e   : > { %12307 = vmatpush3.bf16.msra.mxu0 %v13638_v53  ;;  %12260 = vmatprep.subr.bf16.mxu1 %v13639_v4  ;;  %v14549_v32 = vpack.c.bf16 %v2021_v11, %v2020_v29  ;;  %v14551_v53 = vpack.c.bf16 %v2023_v51, %v2022_v50  ;;  %v13643_v51 = vld [vmem:[%s16747_s4 + $0x88] sm:$0xff]  }
 0x16f   : > { %12308 = vmatprep.subr.bf16.mxu0 %v13640_v9  ;;  %v13644_v29 = vld [vmem:[%s16747_s4 + $0xa8] sm:$0xff]  }
 0x170   : > { %v1984_v50 = vld [vmem:[#allocation2 + $0x49] sm:$0xff] }
 0x171   : > { %12261 = vmatpush3.bf16.msra.mxu1 %v13639_v4  ;;  %v14563_v4 = vpack.c.bf16 %v2413_v1, %v2412_v14  ;;  %v13648_v14 = vld [vmem:[%s16747_s4 + $0xb8] sm:$0xff]   ;;  %v1987_v1 = vld [vmem:[#allocation2 + $0x61] sm:$0xff] }
 0x172   : > { %12309 = vmatpush3.bf16.msra.mxu0 %v13640_v9  ;;  %12326 = vmatprep.subr.bf16.mxu1 %v13641_v12  ;;  %v1981_v9 = vld [vmem:[#allocation2 + $0x31] sm:$0xff] }
 0x173   : > { %12374 = vmatprep.subr.bf16.mxu0 %v13642_v18  ;;  %12247 = vmatmul.mubr.msk.bf16.gmra.mrb[40].mxu1 %vm735_vm0, %v14549_v32  ;;  %v14574_v31 = vpack.c.bf16 %v1982_v10, %v1981_v9  ;;  %v14620_v9 = vpack.c.bf16 %v1988_v7, %v1987_v1 }
 0x174   : > { %12295 = vmatmul.mubr.msk.bf16.gmra.mrb[40].mxu0 %vm735_vm0, %v14381_v56  ;;  %12250 = vmatprep.mubr.msk.bf16.mxu1 %vm735_vm0, %v14551_v53  ;;  %v1979_v56 = vld [vmem:[#allocation2 + $0x21] sm:$0xff] }
 0x175   : > { %12298 = vmatprep.mubr.msk.bf16.mxu0 %vm735_vm0, %v14389_v5  ;;  %v1980_v5 = vld [vmem:[#allocation2 + $0x29] sm:$0xff] }
 0x176   : > { %v14572_v11 = vpack.c.bf16 %v1980_v5, %v1979_v56  ;;  %v1990_v56 = vld [vmem:[#allocation2 + $0x79] sm:$0xff] }
 0x177   : > { %v13649_v5 = vld [vmem:[%s16746_s3 + $0x80] sm:$0xff]  }
 0x17b   : > { %12251 = vmatmul.mubr.msk.bf16.gmra.mrb[44].mxu1 %vm735_vm0, %v14561_v2 }
 0x17c   : > { %12299 = vmatmul.mubr.msk.bf16.gmra.mrb[44].mxu0 %vm735_vm0, %v14563_v4  ;;  %12262 = vmatprep.mubr.msk.bf16.mxu1 %vm735_vm0, %v1993_v60  ;;  %v1989_v60 = vld [vmem:[#allocation2 + $0x71] sm:$0xff] }
 0x17d   : > { %12310 = vmatprep.mubr.msk.bf16.mxu0 %vm735_vm0, %v14399_v17  ;;  %v1983_v17 = vld [vmem:[#allocation2 + $0x41] sm:$0xff]  ;;  %v14622_v10 = vpack.c.bf16 %v1990_v56, %v1989_v60  ;;  %v2768_v56 = vld [vmem:[#allocation2 + $0x98] sm:$0xff] }
 0x17e   : > { %v11486_v60 = vld [vmem:[%s14028_s24 + $0x60] sm:$0xff]  }
 0x183   : > { %12263 = vmatmul.mubr.msk.bf16.vlgmr.msra.gmra.mrb[32].mxu1 %vm735_vm0, %v14572_v11 }
 0x184   : > { %12311 = vmatmul.mubr.msk.bf16.vlgmr.msra.gmra.mrb[32].mxu0 %vm735_vm0, %v14403_v23  ;;  %12327 = vmatpush3.bf16.msra.mxu1 %v13641_v12  ;;  %v13646_v23 = vld [vmem:[%s16747_s4 + $0xb0] sm:$0xff]   ;;  %v14596_v12 = vpack.c.bf16 %v1984_v50, %v1983_v17 }
 0x185   : > { %12375 = vmatpush3.bf16.msra.mxu0 %v13642_v18  ;;  %12266 = vmatprep.mubr.msk.bf16.mxu1 %vm735_vm0, %v14574_v31  ;;  %v14598_v18 = vpack.c.bf16 %v1986_v63, %v1985_v54  ;;  %v2379_v17 = vld [vmem:[#allocation2 + $0x8f] sm:$0xff]  ;;  %v2380_v50 = vld [vmem:[#allocation2 + $0x97] sm:$0xff] }
 0x186   : > { %12314 = vmatprep.mubr.msk.bf16.mxu0 %vm735_vm0, %v14429_v21  ;;  %12328 = vmatprep.subr.bf16.mxu1 %v13643_v51  ;;  %v13647_v21 = vld [vmem:[%s16747_s4 + $0x98] sm:$0xff]  }
 0x187   : > { %12376 = vmatprep.subr.bf16.mxu0 %v13644_v29 }
 0x188   : > { %12329 = vmatpush3.bf16.msra.mxu1 %v13643_v51  ;;  %v1991_v51 = vld [vmem:[#allocation2 + $0x81] sm:$0xff] }
 0x189   : > { %12377 = vmatpush3.bf16.msra.mxu0 %v13644_v29  ;;  %12330 = vmatprep.subr.bf16.mxu1 %v13645_v13  ;;  %v1992_v29 = vld [vmem:[#allocation2 + $0x89] sm:$0xff] }
 0x18a   : > { %12378 = vmatprep.subr.bf16.mxu0 %v13646_v23  ;;  %v14634_v54 = vpack.c.bf16 %v1992_v29, %v1991_v51  ;;  %v3935_v51 = vld [vmem:[#allocation3 + $0x38] sm:$0xff]  ;;  %v3546_v29 = vld [vmem:[#allocation3 + $0x2f] sm:$0xff] }
 0x18b   : > { %12267 = vmatmul.mubr.msk.bf16.gmra.mrb[36].mxu1 %vm735_vm0, %v14596_v12 }
 0x18c   : > { %12315 = vmatmul.mubr.msk.bf16.gmra.mrb[36].mxu0 %vm735_vm0, %v14433_v59  ;;  %12270 = vmatprep.mubr.msk.bf16.mxu1 %vm735_vm0, %v14598_v18  ;;  %v13650_v59 = vld [vmem:[%s16746_s3 + $0xa0] sm:$0xff]  }
 0x18d   : > { %12318 = vmatprep.mubr.msk.bf16.mxu0 %vm735_vm0, %v14457_v15  ;;  %12331 = vmatpush3.bf16.msra.mxu1 %v13645_v13  ;;  %v11446_v15 = vunpack.c.h.bf16 %v14462_v25  ;;  %v14636_v25 = vpack.c.bf16 %v2380_v50, %v2379_v17  ;;  %v3934_v17 = vld [vmem:[#allocation3 + $0x30] sm:$0xff] }
 0x18e   : > { %12379 = vmatpush3.bf16.msra.mxu0 %v13646_v23  ;;  %12332 = vmatprep.subr.bf16.mxu1 %v13647_v21  ;;  %v11484_v23 = vld [vmem:[%s14028_s24 + $0x50] sm:$0xff]  }
 0x18f   : > { %12380 = vmatprep.subr.bf16.mxu0 %v13648_v14  ;;  %789 = vst.msk [vmem:[#allocation2 + $0xa8] sm:$0xff] %vm735_vm0, %v11446_v15  ;;  %v11462_v15 = vunpack.c.h.bf16 %v11486_v60 }
 0x191   : > { %12333 = vmatpush3.bf16.msra.mxu1 %v13647_v21  ;;  %v11454_v21 = vunpack.c.h.bf16 %v11484_v23  ;;  %797 = vst.msk [vmem:[#allocation2 + $0xe8] sm:$0xff] %vm735_vm0, %v11462_v15  ;;  %v13672_v15 = vld [vmem:[%s16746_s3 + $0xf8] sm:$0xff]  }
 0x192   : > { %12381 = vmatpush3.bf16.msra.mxu0 %v13648_v14  ;;  %12350 = vmatprep.subr.bf16.mxu1 %v13649_v5  ;;  %v11485_v14 = vld [vmem:[%s14028_s24 + $0x58] sm:$0xff]  }
 0x193   : > { %12398 = vmatprep.subr.bf16.mxu0 %v13650_v59  ;;  %12271 = vmatmul.mubr.msk.bf16.gmra.mrb[40].mxu1 %vm735_vm0, %v14620_v9  ;;  %v11457_v1 = vunpack.c.l.bf16 %v11485_v14  ;;  %v11458_v7 = vunpack.c.h.bf16 %v11485_v14  ;;  %793 = vst.msk [vmem:[#allocation2 + $0xc8] sm:$0xff] %vm735_vm0, %v11454_v21  ;;  %v13670_v21 = vld [vmem:[%s16746_s3 + $0xf0] sm:$0xff]   ;;  %v3553_v14 = vld [vmem:[#allocation3 + $0x67] sm:$0xff] }
 0x194   : > { %12319 = vmatmul.mubr.msk.bf16.gmra.mrb[40].mxu0 %vm735_vm0, %v14464_v26  ;;  %12274 = vmatprep.mubr.msk.bf16.mxu1 %vm735_vm0, %v14622_v10  ;;  %v13651_v26 = vld [vmem:[%s16746_s3 + $0x88] sm:$0xff]  }
 0x195   : > { %12322 = vmatprep.mubr.msk.bf16.mxu0 %vm735_vm0, %v14480_v55  ;;  %v13652_v55 = vld [vmem:[%s16746_s3 + $0xa8] sm:$0xff]   ;;  %794 = vst.msk [vmem:[#allocation2 + $0xd0] sm:$0xff] %vm735_vm0, %v11457_v1  ;;  %795 = vst.msk [vmem:[#allocation2 + $0xd8] sm:$0xff] %vm735_vm0, %v11458_v7  ;;  %v3940_v1 = vld [vmem:[#allocation3 + $0x60] sm:$0xff] }
 0x196   : > { %v3943_v7 = vld [vmem:[#allocation3 + $0x78] sm:$0xff] }
 0x19b   : > { %12275 = vmatmul.mubr.msk.bf16.gmra.mrb[44].mxu1 %vm735_vm0, %v14634_v54 }
 0x19c   : > { %12323 = vmatmul.mubr.msk.bf16.gmra.mrb[44].mxu0 %vm735_vm0, %v14636_v25  ;;  %12334 = vmatprep.mubr.msk.bf16.mxu1 %vm735_vm0, %v14299_v52  ;;  %v13653_v52 = vld [vmem:[%s16746_s3 + $0x90] sm:$0xff]  }
 0x19d   : > { %12382 = vmatprep.mubr.msk.bf16.mxu0 %vm735_vm0, %v14495_v28  ;;  %v13654_v28 = vld [vmem:[%s16746_s3 + $0xb0] sm:$0xff]  }
 0x1a3   : > { %12335 = vmatmul.mubr.msk.bf16.vlgmr.msra.gmra.mrb[48].mxu1 %vm735_vm0, %v14317_v0  ;;  %v13655_v0 = vld [vmem:[%s16746_s3 + $0x98] sm:$0xff]  }
 0x1a4   : > { %12383 = vmatmul.mubr.msk.bf16.vlgmr.msra.gmra.mrb[48].mxu0 %vm735_vm0, %v14507_v33  ;;  %12351 = vmatpush3.bf16.msra.mxu1 %v13649_v5  ;;  %v13657_v33 = vld [vmem:[%s16747_s4 + $0xc0] sm:$0xff]   ;;  %v3139_v5 = vld [vmem:[#allocation2 + $0x91] sm:$0xff] }
 0x1a5   : > { %12399 = vmatpush3.bf16.msra.mxu0 %v13650_v59  ;;  %12338 = vmatprep.mubr.msk.bf16.mxu1 %vm735_vm0, %v14333_v8  ;;  %v13656_v8 = vld [vmem:[%s16746_s3 + $0xb8] sm:$0xff]  }
 0x1a6   : > { %12386 = vmatprep.mubr.msk.bf16.mxu0 %vm735_vm0, %v14522_v62  ;;  %12352 = vmatprep.subr.bf16.mxu1 %v13651_v26  ;;  %v2800_v62 = vld [vmem:[#allocation3 + $0x90] sm:$0xff]  ;;  %v3140_v59 = vld [vmem:[#allocation2 + $0x99] sm:$0xff] }
 0x1a7   : > { %12400 = vmatprep.subr.bf16.mxu0 %v13652_v55 }
 0x1a8   : > { %12353 = vmatpush3.bf16.msra.mxu1 %v13651_v26  ;;  %v3548_v26 = vld [vmem:[#allocation3 + $0x3f] sm:$0xff] }
 0x1a9   : > { %12401 = vmatpush3.bf16.msra.mxu0 %v13652_v55  ;;  %12354 = vmatprep.subr.bf16.mxu1 %v13653_v52  ;;  %v3937_v55 = vld [vmem:[#allocation3 + $0x48] sm:$0xff] }
 0x1aa   : > { %12402 = vmatprep.subr.bf16.mxu0 %v13654_v28 }
 0x1ab   : > { %12339 = vmatmul.mubr.msk.bf16.gmra.mrb[52].mxu1 %vm735_vm0, %v14349_v19  ;;  %v13658_v19 = vld [vmem:[%s16747_s4 + $0xe0] sm:$0xff]  }
 0x1ac   : > { %12387 = vmatmul.mubr.msk.bf16.gmra.mrb[52].mxu0 %vm735_vm0, %v14525_v3  ;;  %12342 = vmatprep.mubr.msk.bf16.mxu1 %vm735_vm0, %v14371_v30  ;;  %v2801_v30 = vld [vmem:[#allocation3 + $0x98] sm:$0xff] }
 0x1ad   : > { %12390 = vmatprep.mubr.msk.bf16.mxu0 %vm735_vm0, %v14549_v32  ;;  %12355 = vmatpush3.bf16.msra.mxu1 %v13653_v52  ;;  %v3172_v3 = vld [vmem:[#allocation3 + $0x91] sm:$0xff]  ;;  %v3173_v32 = vld [vmem:[#allocation3 + $0x99] sm:$0xff]  ;;  %v14694_v63 = vpack.c.bf16 %v2801_v30, %v2800_v62  ;;  %v3549_v52 = vld [vmem:[#allocation3 + $0x47] sm:$0xff] }
 0x1ae   : > { %12403 = vmatpush3.bf16.msra.mxu0 %v13654_v28  ;;  %12356 = vmatprep.subr.bf16.mxu1 %v13655_v0  ;;  %v14696_v13 = vpack.c.bf16 %v3173_v32, %v3172_v3  ;;  %v3936_v28 = vld [vmem:[#allocation3 + $0x40] sm:$0xff]  ;;  %v11488_v30 = vld [vmem:[%s14028_s24 + $0x70] sm:$0xff]  }
 0x1af   : > { %12404 = vmatprep.subr.bf16.mxu0 %v13656_v8  ;;  %v3550_v62 = vld [vmem:[#allocation3 + $0x4f] sm:$0xff]  ;;  %v3551_v3 = vld [vmem:[#allocation3 + $0x57] sm:$0xff] }
 0x1b0   : > { %v3938_v32 = vld [vmem:[#allocation3 + $0x50] sm:$0xff] }
 0x1b1   : > { %12357 = vmatpush3.bf16.msra.mxu1 %v13655_v0  ;;  %v11487_v0 = vld [vmem:[%s14028_s24 + $0x68] sm:$0xff]  }
 0x1b2   : > { %12405 = vmatpush3.bf16.msra.mxu0 %v13656_v8  ;;  %12422 = vmatprep.subr.bf16.mxu1 %v13657_v33  ;;  %v3939_v8 = vld [vmem:[#allocation3 + $0x58] sm:$0xff] }
 0x1b3   : > { %12470 = vmatprep.subr.bf16.mxu0 %v13658_v19  ;;  %12343 = vmatmul.mubr.msk.bf16.gmra.mrb[56].mxu1 %vm735_vm0, %v14383_v57  ;;  %v13659_v57 = vld [vmem:[%s16747_s4 + $0xc8] sm:$0xff]  }
 0x1b4   : > { %12391 = vmatmul.mubr.msk.bf16.gmra.mrb[56].mxu0 %vm735_vm0, %v14551_v53  ;;  %12346 = vmatprep.mubr.msk.bf16.mxu1 %vm735_vm0, %v14391_v6  ;;  %v13660_v6 = vld [vmem:[%s16747_s4 + $0xe8] sm:$0xff]   ;;  %v13662_v53 = vld [vmem:[%s16747_s4 + $0xf0] sm:$0xff]  }
 0x1b5   : > { %12394 = vmatprep.mubr.msk.bf16.mxu0 %vm735_vm0, %v14561_v2 }
 0x1bb   : > { %12347 = vmatmul.mubr.msk.bf16.gmra.mrb[60].mxu1 %vm735_vm0, %v14694_v63 }
 0x1bc   : > { %12395 = vmatmul.mubr.msk.bf16.gmra.mrb[60].mxu0 %vm735_vm0, %v14696_v13  ;;  %12358 = vmatprep.mubr.msk.bf16.mxu1 %vm735_vm0, %v14401_v22  ;;  %v13661_v22 = vld [vmem:[%s16747_s4 + $0xd0] sm:$0xff]  }
 0x1bd   : > { %12406 = vmatprep.mubr.msk.bf16.mxu0 %vm735_vm0, %v14572_v11 }
 0x1c3   : > { %12359 = vmatmul.mubr.msk.bf16.vlgmr.msra.gmra.mrb[48].mxu1 %vm735_vm0, %v14405_v24  ;;  %v11483_v24 = vld [vmem:[%s14028_s24 + $0x48] sm:$0xff]  }
 0x1c4   : > { %12407 = vmatmul.mubr.msk.bf16.vlgmr.msra.gmra.mrb[48].mxu0 %vm735_vm0, %v14574_v31  ;;  %12423 = vmatpush3.bf16.msra.mxu1 %v13657_v33  ;;  %v11449_v2 = vunpack.c.l.bf16 %v11483_v24  ;;  %v11450_v11 = vunpack.c.h.bf16 %v11483_v24  ;;  %v13664_v31 = vld [vmem:[%s16747_s4 + $0xf8] sm:$0xff]   ;;  %v11465_v33 = vunpack.c.l.bf16 %v11487_v0  ;;  %v13667_v24 = vld [vmem:[%s16746_s3 + $0xc8] sm:$0xff]  }
 0x1c5   : > { %12471 = vmatpush3.bf16.msra.mxu0 %v13658_v19  ;;  %12362 = vmatprep.mubr.msk.bf16.mxu1 %vm735_vm0, %v14431_v58  ;;  %v13663_v58 = vld [vmem:[%s16747_s4 + $0xd8] sm:$0xff]   ;;  %v11466_v19 = vunpack.c.h.bf16 %v11487_v0 }
 0x1c6   : > { %12410 = vmatprep.mubr.msk.bf16.mxu0 %vm735_vm0, %v14596_v12  ;;  %12424 = vmatprep.subr.bf16.mxu1 %v13659_v57  ;;  %790 = vst.msk [vmem:[#allocation2 + $0xb0] sm:$0xff] %vm735_vm0, %v11449_v2  ;;  %791 = vst.msk [vmem:[#allocation2 + $0xb8] sm:$0xff] %vm735_vm0, %v11450_v11  ;;  %v11453_v12 = vunpack.c.l.bf16 %v11484_v23  ;;  %v13668_v2 = vld [vmem:[%s16746_s3 + $0xe8] sm:$0xff]   ;;  %v3564_v11 = vpack.c.bf16 %v3551_v3, %v3550_v62  ;;  %v3552_v23 = vld [vmem:[#allocation3 + $0x5f] sm:$0xff] }
 0x1c7   : > { %12472 = vmatprep.subr.bf16.mxu0 %v13660_v6  ;;  %798 = vst.msk [vmem:[#allocation2 + $0xf0] sm:$0xff] %vm735_vm0, %v11465_v33  ;;  %799 = vst.msk [vmem:[#allocation2 + $0xf8] sm:$0xff] %vm735_vm0, %v11466_v19  ;;  %v3514_v0 = vld [vmem:[#allocation2 + $0x37] sm:$0xff]  ;;  %v3560_v19 = vld [vmem:[#allocation3 + $0x9f] sm:$0xff] }
 0x1c8   : > { %12425 = vmatpush3.bf16.msra.mxu1 %v13659_v57  ;;  %792 = vst.msk [vmem:[#allocation2 + $0xc0] sm:$0xff] %vm735_vm0, %v11453_v12  ;;  %v11469_v57 = vunpack.c.l.bf16 %v11488_v30  ;;  %v13669_v12 = vld [vmem:[%s16746_s3 + $0xd0] sm:$0xff]   ;;  %v3902_v33 = vld [vmem:[#allocation2 + $0x38] sm:$0xff]  ;;  %v3949_v62 = vld [vmem:[#allocation3 + $0xa8] sm:$0xff] }
 0x1c9   : > { %12473 = vmatpush3.bf16.msra.mxu0 %v13660_v6  ;;  %12426 = vmatprep.subr.bf16.mxu1 %v13661_v22  ;;  %v11470_v6 = vunpack.c.h.bf16 %v11488_v30  ;;  %v3948_v30 = vld [vmem:[#allocation3 + $0xa0] sm:$0xff] }
 0x1ca   : > { %12474 = vmatprep.subr.bf16.mxu0 %v13662_v53  ;;  %800 = vst.msk [vmem:[#allocation2 + $0x100] sm:$0xff] %vm735_vm0, %v11469_v57 }
 0x1cb   : > { %12363 = vmatmul.mubr.msk.bf16.gmra.mrb[52].mxu1 %vm735_vm0, %v14435_v61  ;;  %v13665_v61 = vld [vmem:[%s16746_s3 + $0xc0] sm:$0xff]   ;;  %801 = vst.msk [vmem:[#allocation2 + $0x108] sm:$0xff] %vm735_vm0, %v11470_v6  ;;  %v14822_v6 = vpack.c.bf16 %v3949_v62, %v3948_v30 }
 0x1cc   : > { %12411 = vmatmul.mubr.msk.bf16.gmra.mrb[52].mxu0 %vm735_vm0, %v14598_v18  ;;  %12366 = vmatprep.mubr.msk.bf16.mxu1 %vm735_vm0, %v14459_v16  ;;  %v13666_v16 = vld [vmem:[%s16746_s3 + $0xe0] sm:$0xff]   ;;  %v2767_v18 = vld [vmem:[#allocation2 + $0x90] sm:$0xff] }
 0x1cd   : > { %12414 = vmatprep.mubr.msk.bf16.mxu0 %vm735_vm0, %v14620_v9  ;;  %12427 = vmatpush3.bf16.msra.mxu1 %v13661_v22  ;;  %v11461_v9 = vunpack.c.l.bf16 %v11486_v60  ;;  %v3563_v22 = vpack.c.bf16 %v3549_v52, %v3548_v26  ;;  %v3565_v60 = vpack.c.bf16 %v3553_v14, %v3552_v23  ;;  %v3561_v52 = vld [vmem:[#allocation3 + $0xa7] sm:$0xff]  ;;  %v3527_v30 = vld [vmem:[#allocation2 + $0x9f] sm:$0xff] }
 0x1ce   : > { %12475 = vmatpush3.bf16.msra.mxu0 %v13662_v53  ;;  %12428 = vmatprep.subr.bf16.mxu1 %v13663_v58  ;;  %v3951_v53 = vpack.c.bf16 %v3937_v55, %v3936_v28  ;;  %v3513_v28 = vld [vmem:[#allocation2 + $0x2f] sm:$0xff]  ;;  %v14820_v57 = vpack.c.bf16 %v3561_v52, %v3560_v19  ;;  %v3911_v52 = vld [vmem:[#allocation2 + $0x80] sm:$0xff] }
 0x1cf   : > { %12476 = vmatprep.subr.bf16.mxu0 %v13664_v31  ;;  %796 = vst.msk [vmem:[#allocation2 + $0xe0] sm:$0xff] %vm735_vm0, %v11461_v9  ;;  %v13671_v9 = vld [vmem:[%s16746_s3 + $0xd8] sm:$0xff]   ;;  %v3529_v3 = vpack.c.bf16 %v3514_v0, %v3513_v28  ;;  %v13675_v14 = vld [vmem:[%s16747_s4 + $0x108] sm:$0xff]   ;;  %v14859_v0 = vld [vmem:[%s16746_s3 + $0x100] sm:$0xff]  }
 0x1d0   : > { %v3912_v28 = vld [vmem:[#allocation2 + $0x88] sm:$0xff] }
 0x1d1   : > { %12429 = vmatpush3.bf16.msra.mxu1 %v13663_v58  ;;  %v3952_v58 = vpack.c.bf16 %v3939_v8, %v3938_v32  ;;  %v3901_v8 = vld [vmem:[#allocation2 + $0x30] sm:$0xff]  ;;  %v3922_v19 = vpack.c.bf16 %v3912_v28, %v3911_v52  ;;  %v3528_v62 = vld [vmem:[#allocation2 + $0xa7] sm:$0xff]  ;;  %v4311_v52 = vld [vmem:[#allocation3 + $0x59] sm:$0xff] }
 0x1d2   : > { %12477 = vmatpush3.bf16.msra.mxu0 %v13664_v31  ;;  %12446 = vmatprep.subr.bf16.mxu1 %v13665_v61  ;;  %v3941_v31 = vld [vmem:[#allocation3 + $0x68] sm:$0xff]  ;;  %v3917_v32 = vpack.c.bf16 %v3902_v33, %v3901_v8  ;;  %v14864_v8 = vld [vmem:[%s16746_s3] sm:$0xff]  }
 0x1d3   : > { %12494 = vmatprep.subr.bf16.mxu0 %v13666_v16  ;;  %12367 = vmatmul.mubr.msk.bf16.gmra.mrb[56].mxu1 %vm735_vm0, %v14466_v27  ;;  %v14766_v27 = vpack.c.bf16 %v2768_v56, %v2767_v18  ;;  %v3942_v18 = vld [vmem:[#allocation3 + $0x70] sm:$0xff]  ;;  %v3953_v56 = vpack.c.bf16 %v3941_v31, %v3940_v1  ;;  %v13676_v1 = vld [vmem:[%s16747_s4 + $0x8] sm:$0xff]  }
 0x1d4   : > { %12415 = vmatmul.mubr.msk.bf16.gmra.mrb[56].mxu0 %vm735_vm0, %v14622_v10  ;;  %12370 = vmatprep.mubr.msk.bf16.mxu1 %vm735_vm0, %v14482_v20  ;;  %v14768_v10 = vpack.c.bf16 %v3140_v59, %v3139_v5  ;;  %v3547_v20 = vld [vmem:[#allocation3 + $0x37] sm:$0xff]  ;;  %v3954_v59 = vpack.c.bf16 %v3943_v7, %v3942_v18  ;;  %v3519_v7 = vld [vmem:[#allocation2 + $0x5f] sm:$0xff]  ;;  %v3908_v18 = vld [vmem:[#allocation2 + $0x68] sm:$0xff] }
 0x1d5   : > { %12418 = vmatprep.mubr.msk.bf16.mxu0 %vm735_vm0, %v14634_v54  ;;  %v3562_v50 = vpack.c.bf16 %v3547_v20, %v3546_v29  ;;  %v3950_v54 = vpack.c.bf16 %v3935_v51, %v3934_v17  ;;  %v3556_v51 = vld [vmem:[#allocation3 + $0x7f] sm:$0xff]  ;;  %v3557_v29 = vld [vmem:[#allocation3 + $0x87] sm:$0xff]  ;;  %v4773_v28 = vld [vmem:[#allocation3 + $0xaf] sm:$0xff] }
 0x1d6   : > { %v3945_v20 = vld [vmem:[#allocation3 + $0x88] sm:$0xff]  ;;  %v3944_v17 = vld [vmem:[#allocation3 + $0x80] sm:$0xff]  ;;  %v3567_v26 = vpack.c.bf16 %v3557_v29, %v3556_v51 }
 0x1d7   : > { %v3955_v55 = vpack.c.bf16 %v3945_v20, %v3944_v17 }
 0x1db   : > { %12371 = vmatmul.mubr.msk.bf16.gmra.mrb[60].mxu1 %vm735_vm0, %v14766_v27 }
 0x1dc   : > { %12419 = vmatmul.mubr.msk.bf16.gmra.mrb[60].mxu0 %vm735_vm0, %v14768_v10  ;;  %12430 = vmatprep.mubr.msk.bf16.mxu1 %vm735_vm0, %v3562_v50  ;;  %v13673_v50 = vld [vmem:[%s16747_s4 + $0x100] sm:$0xff]  }
 0x1dd   : > { %12478 = vmatprep.mubr.msk.bf16.mxu0 %vm735_vm0, %v3950_v54  ;;  %v13674_v54 = vld [vmem:[%s16747_s4] sm:$0xff]  }
 0x1e3   : > { %12431 = vmatmul.mubr.msk.bf16.vlgmr.msra.gmra.mrb[64].mxu1 %vm735_vm0, %v3563_v22  ;;  %v3903_v22 = vld [vmem:[#allocation2 + $0x40] sm:$0xff] }
 0x1e4   : > { %12479 = vmatmul.mubr.msk.bf16.vlgmr.msra.gmra.mrb[64].mxu0 %vm735_vm0, %v3951_v53  ;;  %12447 = vmatpush3.bf16.msra.mxu1 %v13665_v61  ;;  %v3554_v61 = vld [vmem:[#allocation3 + $0x6f] sm:$0xff] }
 0x1e5   : > { %12495 = vmatpush3.bf16.msra.mxu0 %v13666_v16  ;;  %12434 = vmatprep.mubr.msk.bf16.mxu1 %vm735_vm0, %v3564_v11  ;;  %v3555_v16 = vld [vmem:[#allocation3 + $0x77] sm:$0xff]  ;;  %v3904_v53 = vld [vmem:[#allocation2 + $0x48] sm:$0xff] }
 0x1e6   : > { %12482 = vmatprep.mubr.msk.bf16.mxu0 %vm735_vm0, %v3952_v58  ;;  %12448 = vmatprep.subr.bf16.mxu1 %v13667_v24  ;;  %v3566_v5 = vpack.c.bf16 %v3555_v16, %v3554_v61  ;;  %v3905_v11 = vld [vmem:[#allocation2 + $0x50] sm:$0xff]  ;;  %v3906_v58 = vld [vmem:[#allocation2 + $0x58] sm:$0xff]  ;;  %v3918_v23 = vpack.c.bf16 %v3904_v53, %v3903_v22  ;;  %v3520_v61 = vld [vmem:[#allocation2 + $0x67] sm:$0xff] }
 0x1e7   : > { %12496 = vmatprep.subr.bf16.mxu0 %v13668_v2  ;;  %v3907_v16 = vld [vmem:[#allocation2 + $0x60] sm:$0xff]  ;;  %v3532_v51 = vpack.c.bf16 %v3520_v61, %v3519_v7  ;;  %v4306_v61 = vld [vmem:[#allocation3 + $0x31] sm:$0xff] }
 0x1e8   : > { %12449 = vmatpush3.bf16.msra.mxu1 %v13667_v24  ;;  %v3517_v24 = vld [vmem:[#allocation2 + $0x4f] sm:$0xff]  ;;  %v3920_v29 = vpack.c.bf16 %v3908_v18, %v3907_v16 }
 0x1e9   : > { %12497 = vmatpush3.bf16.msra.mxu0 %v13668_v2  ;;  %12450 = vmatprep.subr.bf16.mxu1 %v13669_v12  ;;  %v3518_v2 = vld [vmem:[#allocation2 + $0x57] sm:$0xff] }
 0x1ea   : > { %12498 = vmatprep.subr.bf16.mxu0 %v13670_v21 }
 0x1eb   : > { %12435 = vmatmul.mubr.msk.bf16.gmra.mrb[68].mxu1 %vm735_vm0, %v3565_v60  ;;  %v3521_v60 = vld [vmem:[#allocation2 + $0x6f] sm:$0xff] }
 0x1ec   : > { %12483 = vmatmul.mubr.msk.bf16.gmra.mrb[68].mxu0 %vm735_vm0, %v3953_v56  ;;  %12438 = vmatprep.mubr.msk.bf16.mxu1 %vm735_vm0, %v3566_v5  ;;  %v3522_v56 = vld [vmem:[#allocation2 + $0x77] sm:$0xff] }
 0x1ed   : > { %12486 = vmatprep.mubr.msk.bf16.mxu0 %vm735_vm0, %v3954_v59  ;;  %12451 = vmatpush3.bf16.msra.mxu1 %v13669_v12  ;;  %v3531_v12 = vpack.c.bf16 %v3518_v2, %v3517_v24  ;;  %v3909_v5 = vld [vmem:[#allocation2 + $0x70] sm:$0xff]  ;;  %v3910_v59 = vld [vmem:[#allocation2 + $0x78] sm:$0xff]  ;;  %v3533_v20 = vpack.c.bf16 %v3522_v56, %v3521_v60  ;;  %v14875_v2 = vpack.c.bf16 %v3528_v62, %v3527_v30 }
 0x1ee   : > { %12499 = vmatpush3.bf16.msra.mxu0 %v13670_v21  ;;  %12452 = vmatprep.subr.bf16.mxu1 %v13671_v9  ;;  %v3919_v21 = vpack.c.bf16 %v3906_v58, %v3905_v11  ;;  %v3921_v17 = vpack.c.bf16 %v3910_v59, %v3909_v5  ;;  %v4307_v58 = vld [vmem:[#allocation3 + $0x39] sm:$0xff] }
 0x1ef   : > { %12500 = vmatprep.subr.bf16.mxu0 %v13672_v15  ;;  %v4322_v60 = vpack.c.bf16 %v4307_v58, %v4306_v61  ;;  %v14895_v5 = vld [vmem:[%s14028_s24 + $0x78] sm:$0xff]  }
 0x1f0   : > { %v11473_v59 = vunpack.c.l.bf16 %v14895_v5 }
 0x1f1   : > { %12453 = vmatpush3.bf16.msra.mxu1 %v13671_v9  ;;  %v13677_v9 = vld [vmem:[%s16747_s4 + $0x110] sm:$0xff]  }
 0x1f2   : > { %12501 = vmatpush3.bf16.msra.mxu0 %v13672_v15  ;;  %12518 = vmatprep.subr.bf16.mxu1 %v13673_v50  ;;  %v13678_v15 = vld [vmem:[%s16747_s4 + $0x10] sm:$0xff]   ;;  %802 = vst.msk [vmem:[#allocation2 + $0x110] sm:$0xff] %vm735_vm0, %v11473_v59 }
 0x1f3   : > { %12566 = vmatprep.subr.bf16.mxu0 %v13674_v54  ;;  %12439 = vmatmul.mubr.msk.bf16.gmra.mrb[72].mxu1 %vm735_vm0, %v3567_v26  ;;  %v3523_v26 = vld [vmem:[#allocation2 + $0x7f] sm:$0xff]  ;;  %v4777_v59 = vld [vmem:[#allocation3 + $0xcf] sm:$0xff] }
 0x1f4   : > { %12487 = vmatmul.mubr.msk.bf16.gmra.mrb[72].mxu0 %vm735_vm0, %v3955_v55  ;;  %12442 = vmatprep.mubr.msk.bf16.mxu1 %vm735_vm0, %v14563_v4  ;;  %v3515_v4 = vld [vmem:[#allocation2 + $0x3f] sm:$0xff]  ;;  %v3524_v55 = vld [vmem:[#allocation2 + $0x87] sm:$0xff] }
 0x1f5   : > { %12490 = vmatprep.mubr.msk.bf16.mxu0 %vm735_vm0, %v14694_v63  ;;  %v3516_v63 = vld [vmem:[#allocation2 + $0x47] sm:$0xff]  ;;  %v3534_v33 = vpack.c.bf16 %v3524_v55, %v3523_v26 }
 0x1f6   : > { %v3530_v31 = vpack.c.bf16 %v3516_v63, %v3515_v4 }
 0x1fb   : > { %12443 = vmatmul.mubr.msk.bf16.gmra.mrb[76].mxu1 %vm735_vm0, %v14820_v57 }
 0x1fc   : > { %12491 = vmatmul.mubr.msk.bf16.gmra.mrb[76].mxu0 %vm735_vm0, %v14822_v6  ;;  %12454 = vmatprep.mubr.msk.bf16.mxu1 %vm735_vm0, %v3529_v3  ;;  %v3915_v3 = vld [vmem:[#allocation2 + $0xa0] sm:$0xff] }
 0x1fd   : > { %12502 = vmatprep.mubr.msk.bf16.mxu0 %vm735_vm0, %v3917_v32  ;;  %v3916_v32 = vld [vmem:[#allocation2 + $0xa8] sm:$0xff] }
 0x1fe   : > { %v14877_v11 = vpack.c.bf16 %v3916_v32, %v3915_v3 }
 0x203   : > { %12455 = vmatmul.mubr.msk.bf16.vlgmr.msra.gmra.mrb[64].mxu1 %vm735_vm0, %v3530_v31  ;;  %v4769_v31 = vld [vmem:[#allocation3 + $0x8f] sm:$0xff] }
 0x204   : > { %12503 = vmatmul.mubr.msk.bf16.vlgmr.msra.gmra.mrb[64].mxu0 %vm735_vm0, %v3918_v23  ;;  %12519 = vmatpush3.bf16.msra.mxu1 %v13673_v50  ;;  %v13679_v50 = vld [vmem:[%s16747_s4 + $0x118] sm:$0xff]  }
 0x205   : > { %12567 = vmatpush3.bf16.msra.mxu0 %v13674_v54  ;;  %12458 = vmatprep.mubr.msk.bf16.mxu1 %vm735_vm0, %v3531_v12  ;;  %v13680_v54 = vld [vmem:[%s16747_s4 + $0x18] sm:$0xff]  }
 0x206   : > { %12506 = vmatprep.mubr.msk.bf16.mxu0 %vm735_vm0, %v3919_v21  ;;  %12520 = vmatprep.subr.bf16.mxu1 %v13675_v14  ;;  %v4770_v23 = vld [vmem:[#allocation3 + $0x97] sm:$0xff] }
 0x207   : > { %12568 = vmatprep.subr.bf16.mxu0 %v13676_v1  ;;  %v4785_v56 = vpack.c.bf16 %v4770_v23, %v4769_v31  ;;  %v4313_v23 = vld [vmem:[#allocation3 + $0x69] sm:$0xff] }
 0x208   : > { %12521 = vmatpush3.bf16.msra.mxu1 %v13675_v14 }
 0x209   : > { %12569 = vmatpush3.bf16.msra.mxu0 %v13676_v1  ;;  %12522 = vmatprep.subr.bf16.mxu1 %v13677_v9 }
 0x20a   : > { %12570 = vmatprep.subr.bf16.mxu0 %v13678_v15 }
 0x20b   : > { %12459 = vmatmul.mubr.msk.bf16.gmra.mrb[68].mxu1 %vm735_vm0, %v3532_v51  ;;  %v4309_v51 = vld [vmem:[#allocation3 + $0x49] sm:$0xff] }
 0x20c   : > { %12507 = vmatmul.mubr.msk.bf16.gmra.mrb[68].mxu0 %vm735_vm0, %v3920_v29  ;;  %12462 = vmatprep.mubr.msk.bf16.mxu1 %vm735_vm0, %v3533_v20 }
 0x20d   : > { %12510 = vmatprep.mubr.msk.bf16.mxu0 %vm735_vm0, %v3921_v17  ;;  %12523 = vmatpush3.bf16.msra.mxu1 %v13677_v9 }
 0x20e   : > { %12571 = vmatpush3.bf16.msra.mxu0 %v13678_v15  ;;  %12524 = vmatprep.subr.bf16.mxu1 %v13679_v50 }
 0x20f   : > { %12572 = vmatprep.subr.bf16.mxu0 %v13680_v54 }
 0x211   : > { %12525 = vmatpush3.bf16.msra.mxu1 %v13679_v50  ;;  %v4308_v50 = vld [vmem:[#allocation3 + $0x41] sm:$0xff] }
 0x212   : > { %12573 = vmatpush3.bf16.msra.mxu0 %v13680_v54  ;;  %12542 = vmatprep.subr.bf16.mxu1 %v14859_v0  ;;  %v4323_v32 = vpack.c.bf16 %v4309_v51, %v4308_v50 }
 0x213   : > { %12590 = vmatprep.subr.bf16.mxu0 %v14864_v8  ;;  %12463 = vmatmul.mubr.msk.bf16.gmra.mrb[72].mxu1 %vm735_vm0, %v3534_v33  ;;  %v4774_v33 = vld [vmem:[#allocation3 + $0xb7] sm:$0xff] }
 0x214   : > { %12511 = vmatmul.mubr.msk.bf16.gmra.mrb[72].mxu0 %vm735_vm0, %v3922_v19  ;;  %12466 = vmatprep.mubr.msk.bf16.mxu1 %vm735_vm0, %v14636_v25  ;;  %v4787_v31 = vpack.c.bf16 %v4774_v33, %v4773_v28 }
 0x215   : > { %12514 = vmatprep.mubr.msk.bf16.mxu0 %vm735_vm0, %v14766_v27 }
 0x216   : > { %v12168_v4 = vpop.f32.mrb[16].mxu1 }
 0x217   : > { %v12216_v63 = vpop.f32.mrb[16].mxu0  ;;  %v1575_v22 = vmul.f32 %v12168_v4, %v14037_v35  ;;  %v1510_v53 = vpop.f32.mrb[17].mxu1 }
 0x218   : > { %v1898_v24 = vpop.f32.mrb[17].mxu0  ;;  %v1573_v25 = vmul.f32 %v14035_v34, %v1510_v53  ;;  %v12169_v27 = vpop.f32.mrb[18].mxu1  ;;  %v13683_v53 = vld [vmem:[%s16746_s3 + $0x108] sm:$0xff]  }
 0x219   : > { %v12217_v12 = vpop.f32.mrb[18].mxu0  ;;  %v14880_v21 = vadd.f32 %v12216_v63, %v1575_v22  ;;  %v1513_v1 = vpop.f32.mrb[19].mxu1  ;;  %v4310_v22 = vld [vmem:[#allocation3 + $0x51] sm:$0xff] }
 0x21a   : > { %v14882_v14 = vadd.f32 %v12217_v12, %v12169_v27  ;;  %v1901_v7 = vpop.f32.mrb[19].mxu0  ;;  %v14884_v16 = vadd.f32 %v1898_v24, %v1573_v25  ;;  %v13684_v24 = vld [vmem:[%s16746_s3 + $0x8] sm:$0xff]   ;;  %v4324_v58 = vpack.c.bf16 %v4311_v52, %v4310_v22  ;;  %v13685_v25 = vld [vmem:[%s16746_s3 + $0x110] sm:$0xff]   ;;  %v13688_v22 = vld [vmem:[%s16746_s3 + $0x18] sm:$0xff]  }
 0x21b   : > { %v14886_v18 = vadd.f32 %v1901_v7, %v1513_v1  ;;  %12467 = vmatmul.mubr.msk.bf16.gmra.mrb[76].mxu1 %vm735_vm0, %v14875_v2  ;;  %v13686_v27 = vld [vmem:[%s16746_s3 + $0x10] sm:$0xff]   ;;  %v4775_v1 = vld [vmem:[#allocation3 + $0xbf] sm:$0xff] }
 0x21c   : > { %12515 = vmatmul.mubr.msk.bf16.gmra.mrb[76].mxu0 %vm735_vm0, %v14877_v11  ;;  %12526 = vmatprep.mubr.msk.bf16.mxu1 %vm735_vm0, %v4322_v60  ;;  %v4314_v52 = vld [vmem:[#allocation3 + $0x71] sm:$0xff] }
 0x21d   : > { %12574 = vmatprep.mubr.msk.bf16.mxu0 %vm735_vm0, %v4785_v56  ;;  %v4315_v56 = vld [vmem:[#allocation3 + $0x79] sm:$0xff] }
 0x21e   : > { %v12172_v9 = vpop.f32.mrb[20].mxu1 }
 0x21f   : > { %v12220_v15 = vpop.f32.mrb[20].mxu0  ;;  %v1579_v29 = vmul.f32 %v12172_v9, %v14041_v37  ;;  %v1526_v20 = vpop.f32.mrb[21].mxu1  ;;  %v4778_v9 = vld [vmem:[#allocation3 + $0xd7] sm:$0xff] }
 0x220   : > { %v1914_v17 = vpop.f32.mrb[21].mxu0  ;;  %v1577_v54 = vmul.f32 %v14039_v36, %v1526_v20  ;;  %v12173_v26 = vpop.f32.mrb[22].mxu1 }
 0x221   : > { %v12221_v55 = vpop.f32.mrb[22].mxu0  ;;  %v14901_v19 = vadd.f32 %v12220_v15, %v1579_v29  ;;  %v1529_v62 = vpop.f32.mrb[23].mxu1 }
 0x222   : > { %v14903_v30 = vadd.f32 %v12221_v55, %v12173_v26  ;;  %v1917_v3 = vpop.f32.mrb[23].mxu0  ;;  %v14905_v4 = vadd.f32 %v1914_v17, %v1577_v54 }
 0x223   : > { %v14907_v63 = vadd.f32 %v1917_v3, %v1529_v62  ;;  %12527 = vmatmul.mubr.msk.bf16.vlgmr.msra.gmra.mrb[80].mxu1 %vm735_vm0, %v4323_v32  ;;  %v4326_v62 = vpack.c.bf16 %v4315_v56, %v4314_v52  ;;  %v4789_v3 = vpack.c.bf16 %v4778_v9, %v4777_v59  ;;  %v13687_v32 = vld [vmem:[%s16746_s3 + $0x118] sm:$0xff]   ;;  %v4320_v52 = vld [vmem:[#allocation3 + $0xa1] sm:$0xff] }
 0x224   : > { %12575 = vmatmul.mubr.msk.bf16.vlgmr.msra.gmra.mrb[80].mxu0 %vm735_vm0, %v14820_v57  ;;  %12543 = vmatpush3.bf16.msra.mxu1 %v14859_v0  ;;  %v4312_v0 = vld [vmem:[#allocation3 + $0x61] sm:$0xff] }
 0x225   : > { %12591 = vmatpush3.bf16.msra.mxu0 %v14864_v8  ;;  %12530 = vmatprep.mubr.msk.bf16.mxu1 %vm735_vm0, %v4324_v58  ;;  %v4776_v8 = vld [vmem:[#allocation3 + $0xc7] sm:$0xff]  ;;  %v4325_v20 = vpack.c.bf16 %v4313_v23, %v4312_v0 }
 0x226   : > { %12578 = vmatprep.mubr.msk.bf16.mxu0 %vm735_vm0, %v4787_v31  ;;  %v12176_v57 = vpop.f32.mrb[24].mxu1  ;;  %12544 = vmatprep.subr.bf16.mxu1 %v13683_v53  ;;  %v4788_v55 = vpack.c.bf16 %v4776_v8, %v4775_v1  ;;  %v4780_v23 = vld [vmem:[#allocation3 + $0xe7] sm:$0xff] }
 0x227   : > { %v12224_v12 = vpop.f32.mrb[24].mxu0  ;;  %12592 = vmatprep.subr.bf16.mxu0 %v13684_v24  ;;  %v1583_v7 = vmul.f32 %v12176_v57, %v14045_v39  ;;  %v1542_v61 = vpop.f32.mrb[25].mxu1  ;;  %v13689_v57 = vld [vmem:[%s16747_s4 + $0x20] sm:$0xff]  }
 0x228   : > { %v1930_v60 = vpop.f32.mrb[25].mxu0  ;;  %v1581_v15 = vmul.f32 %v14043_v38, %v1542_v61  ;;  %v12177_v51 = vpop.f32.mrb[26].mxu1  ;;  %12545 = vmatpush3.bf16.msra.mxu1 %v13683_v53  ;;  %v4317_v53 = vld [vmem:[#allocation3 + $0x89] sm:$0xff] }
 0x229   : > { %v12225_v29 = vpop.f32.mrb[26].mxu0  ;;  %12593 = vmatpush3.bf16.msra.mxu0 %v13684_v24  ;;  %v14930_v17 = vadd.f32 %v12224_v12, %v1583_v7  ;;  %v1545_v54 = vpop.f32.mrb[27].mxu1  ;;  %12546 = vmatprep.subr.bf16.mxu1 %v13685_v25  ;;  %v4779_v24 = vld [vmem:[#allocation3 + $0xdf] sm:$0xff]  ;;  %v4781_v7 = vld [vmem:[#allocation3 + $0xef] sm:$0xff] }
 0x22a   : > { %v14932_v50 = vadd.f32 %v12225_v29, %v12177_v51  ;;  %v1933_v26 = vpop.f32.mrb[27].mxu0  ;;  %12594 = vmatprep.subr.bf16.mxu0 %v13686_v27  ;;  %v14934_v28 = vadd.f32 %v1930_v60, %v1581_v15  ;;  %v13690_v12 = vld [vmem:[%s16747_s4 + $0x40] sm:$0xff]  }
 0x22b   : > { %v14936_v33 = vadd.f32 %v1933_v26, %v1545_v54  ;;  %12531 = vmatmul.mubr.msk.bf16.gmra.mrb[84].mxu1 %vm735_vm0, %v4325_v20  ;;  %v4790_v20 = vpack.c.bf16 %v4780_v23, %v4779_v24  ;;  %v4783_v24 = vld [vmem:[#allocation3 + $0xff] sm:$0xff] }
 0x22c   : > { %12579 = vmatmul.mubr.msk.bf16.gmra.mrb[84].mxu0 %vm735_vm0, %v4788_v55  ;;  %12534 = vmatprep.mubr.msk.bf16.mxu1 %vm735_vm0, %v4326_v62  ;;  %v4273_v62 = vld [vmem:[#allocation2 + $0x31] sm:$0xff] }
 0x22d   : > { %12582 = vmatprep.mubr.msk.bf16.mxu0 %vm735_vm0, %v4789_v3  ;;  %12547 = vmatpush3.bf16.msra.mxu1 %v13685_v25  ;;  %v4316_v25 = vld [vmem:[#allocation3 + $0x81] sm:$0xff]  ;;  %v4274_v3 = vld [vmem:[#allocation2 + $0x39] sm:$0xff] }
 0x22e   : > { %12595 = vmatpush3.bf16.msra.mxu0 %v13686_v27  ;;  %v12180_v58 = vpop.f32.mrb[28].mxu1  ;;  %12548 = vmatprep.subr.bf16.mxu1 %v13687_v32  ;;  %v4782_v27 = vld [vmem:[#allocation3 + $0xf7] sm:$0xff]  ;;  %v4327_v59 = vpack.c.bf16 %v4317_v53, %v4316_v25  ;;  %v4321_v53 = vld [vmem:[#allocation3 + $0xa9] sm:$0xff] }
 0x22f   : > { %v12228_v31 = vpop.f32.mrb[28].mxu0  ;;  %12596 = vmatprep.subr.bf16.mxu0 %v13688_v22  ;;  %v1587_v0 = vmul.f32 %v12180_v58, %v14049_v41  ;;  %v1558_v1 = vpop.f32.mrb[29].mxu1  ;;  %v4791_v55 = vpack.c.bf16 %v4782_v27, %v4781_v7  ;;  %v4784_v58 = vld [vmem:[#allocation3 + $0x107] sm:$0xff]  ;;  %v4277_v25 = vld [vmem:[#allocation2 + $0x51] sm:$0xff]  ;;  %v4278_v7 = vld [vmem:[#allocation2 + $0x59] sm:$0xff] }
 0x230   : > { %v1946_v8 = vpop.f32.mrb[29].mxu0  ;;  %v1585_v61 = vmul.f32 %v14047_v40, %v1558_v1  ;;  %v12181_v60 = vpop.f32.mrb[30].mxu1  ;;  %v4792_v1 = vpack.c.bf16 %v4784_v58, %v4783_v24  ;;  %v4741_v27 = vld [vmem:[#allocation2 + $0xaf] sm:$0xff]  ;;  %v4746_v24 = vld [vmem:[#allocation2 + $0xd7] sm:$0xff] }
 0x231   : > { %v12229_v56 = vpop.f32.mrb[30].mxu0  ;;  %v14956_v9 = vadd.f32 %v12228_v31, %v1587_v0  ;;  %v1561_v51 = vpop.f32.mrb[31].mxu1  ;;  %12549 = vmatpush3.bf16.msra.mxu1 %v13687_v32  ;;  %v4737_v32 = vld [vmem:[#allocation2 + $0x8f] sm:$0xff]  ;;  %v4289_v31 = vpack.c.bf16 %v4274_v3, %v4273_v62  ;;  %v14969_v0 = vpack.c.bf16 %v4321_v53, %v4320_v52  ;;  %v4282_v62 = vld [vmem:[#allocation2 + $0x79] sm:$0xff] }
 0x232   : > { %v14958_v15 = vadd.f32 %v12229_v56, %v12181_v60  ;;  %v1949_v29 = vpop.f32.mrb[31].mxu0  ;;  %12597 = vmatpush3.bf16.msra.mxu0 %v13688_v22  ;;  %v14960_v54 = vadd.f32 %v1946_v8, %v1585_v61  ;;  %12614 = vmatprep.subr.bf16.mxu1 %v13689_v57  ;;  %v4738_v22 = vld [vmem:[#allocation2 + $0x97] sm:$0xff]  ;;  %v4276_v8 = vld [vmem:[#allocation2 + $0x49] sm:$0xff]  ;;  %v4291_v56 = vpack.c.bf16 %v4278_v7, %v4277_v25  ;;  %v4743_v3 = vld [vmem:[#allocation2 + $0xbf] sm:$0xff] }
 0x233   : > { %v14962_v26 = vadd.f32 %v1949_v29, %v1561_v51  ;;  %12662 = vmatprep.subr.bf16.mxu0 %v13690_v12  ;;  %12535 = vmatmul.mubr.msk.bf16.gmra.mrb[88].mxu1 %vm735_vm0, %v4327_v59  ;;  %v4753_v23 = vpack.c.bf16 %v4738_v22, %v4737_v32  ;;  %v4742_v61 = vld [vmem:[#allocation2 + $0xb7] sm:$0xff]  ;;  %v13691_v51 = vld [vmem:[%s16747_s4 + $0x28] sm:$0xff]   ;;  %v4747_v25 = vld [vmem:[#allocation2 + $0xdf] sm:$0xff] }
 0x234   : > { %12583 = vmatmul.mubr.msk.bf16.gmra.mrb[88].mxu0 %vm735_vm0, %v4790_v20  ;;  %12538 = vmatprep.mubr.msk.bf16.mxu1 %vm735_vm0, %v14696_v13  ;;  %v4275_v13 = vld [vmem:[#allocation2 + $0x41] sm:$0xff]  ;;  %v4755_v59 = vpack.c.bf16 %v4742_v61, %v4741_v27  ;;  %v4281_v52 = vld [vmem:[#allocation2 + $0x71] sm:$0xff] }
 0x235   : > { %12586 = vmatprep.mubr.msk.bf16.mxu0 %vm735_vm0, %v4791_v55  ;;  %v4290_v60 = vpack.c.bf16 %v4276_v8, %v4275_v13  ;;  %v13692_v29 = vld [vmem:[%s16747_s4 + $0x48] sm:$0xff]   ;;  %v13693_v22 = vld [vmem:[%s16747_s4 + $0x30] sm:$0xff]   ;;  %v4293_v58 = vpack.c.bf16 %v4282_v62, %v4281_v52  ;;  %v4751_v52 = vld [vmem:[#allocation2 + $0xff] sm:$0xff] }
 0x236   : > { %v4279_v20 = vld [vmem:[#allocation2 + $0x61] sm:$0xff]  ;;  %v4280_v55 = vld [vmem:[#allocation2 + $0x69] sm:$0xff]  ;;  %v4750_v61 = vld [vmem:[#allocation2 + $0xf7] sm:$0xff] }
 0x237   : > { %v4744_v32 = vld [vmem:[#allocation2 + $0xc7] sm:$0xff]  ;;  %v4745_v53 = vld [vmem:[#allocation2 + $0xcf] sm:$0xff] }
 0x238   : > { %v4283_v13 = vld [vmem:[#allocation2 + $0x81] sm:$0xff]  ;;  %v4284_v8 = vld [vmem:[#allocation2 + $0x89] sm:$0xff] }
 0x239   : > { %v4748_v7 = vld [vmem:[#allocation2 + $0xe7] sm:$0xff]  ;;  %v4749_v27 = vld [vmem:[#allocation2 + $0xef] sm:$0xff] }
 0x23a   : > { %v4752_v62 = vld [vmem:[#allocation2 + $0x107] sm:$0xff] }
 0x23b   : > { %12539 = vmatmul.mubr.msk.bf16.gmra.mrb[92].mxu1 %vm735_vm0, %v14969_v0 }
 0x23c   : > { %12587 = vmatmul.mubr.msk.bf16.gmra.mrb[92].mxu0 %vm735_vm0, %v4792_v1  ;;  %12550 = vmatprep.mubr.msk.bf16.mxu1 %vm735_vm0, %v4289_v31  ;;  %v4757_v31 = vpack.c.bf16 %v4746_v24, %v4745_v53  ;;  %v13696_v1 = vld [vmem:[%s16747_s4 + $0x58] sm:$0xff]  }
 0x23d   : > { %12598 = vmatprep.mubr.msk.bf16.mxu0 %vm735_vm0, %v4753_v23  ;;  %v13695_v23 = vld [vmem:[%s16747_s4 + $0x38] sm:$0xff]  }
 0x243   : > { %12551 = vmatmul.mubr.msk.bf16.vlgmr.msra.gmra.mrb[80].mxu1 %vm735_vm0, %v4290_v60  ;;  %v15006_v60 = vld [vmem:[%s16746_s3 + $0x20] sm:$0xff]  }
 0x244   : > { %12599 = vmatmul.mubr.msk.bf16.vlgmr.msra.gmra.mrb[80].mxu0 %vm735_vm0, %v14875_v2  ;;  %12615 = vmatpush3.bf16.msra.mxu1 %v13689_v57  ;;  %v13694_v2 = vld [vmem:[%s16747_s4 + $0x50] sm:$0xff]   ;;  %v4292_v57 = vpack.c.bf16 %v4280_v55, %v4279_v20  ;;  %v4287_v20 = vld [vmem:[#allocation2 + $0xa1] sm:$0xff] }
 0x245   : > { %12663 = vmatpush3.bf16.msra.mxu0 %v13690_v12  ;;  %12554 = vmatprep.mubr.msk.bf16.mxu1 %vm735_vm0, %v4291_v56  ;;  %v4756_v12 = vpack.c.bf16 %v4744_v32, %v4743_v3  ;;  %v15011_v56 = vld [vmem:[%s16746_s3 + $0x40] sm:$0xff]   ;;  %v4288_v55 = vld [vmem:[#allocation2 + $0xa9] sm:$0xff] }
 0x246   : > { %12602 = vmatprep.mubr.msk.bf16.mxu0 %vm735_vm0, %v4755_v59  ;;  %12616 = vmatprep.subr.bf16.mxu1 %v13691_v51  ;;  %v4294_v59 = vpack.c.bf16 %v4284_v8, %v4283_v13 }
 0x247   : > { %12664 = vmatprep.subr.bf16.mxu0 %v13692_v29 }
 0x248   : > { %12617 = vmatpush3.bf16.msra.mxu1 %v13691_v51  ;;  %v4758_v51 = vpack.c.bf16 %v4748_v7, %v4747_v25 }
 0x249   : > { %12665 = vmatpush3.bf16.msra.mxu0 %v13692_v29  ;;  %12618 = vmatprep.subr.bf16.mxu1 %v13693_v22  ;;  %v4759_v29 = vpack.c.bf16 %v4750_v61, %v4749_v27 }
 0x24a   : > { %12666 = vmatprep.subr.bf16.mxu0 %v13694_v2 }
 0x24b   : > { %12555 = vmatmul.mubr.msk.bf16.gmra.mrb[84].mxu1 %vm735_vm0, %v4292_v57 }
 0x24c   : > { %12603 = vmatmul.mubr.msk.bf16.gmra.mrb[84].mxu0 %vm735_vm0, %v4756_v12  ;;  %12558 = vmatprep.mubr.msk.bf16.mxu1 %vm735_vm0, %v4293_v58  ;;  %v15022_v12 = vpack.c.bf16 %v4288_v55, %v4287_v20  ;;  %v4760_v58 = vpack.c.bf16 %v4752_v62, %v4751_v52  ;;  %v11474_v52 = vunpack.c.h.bf16 %v14895_v5 }
 0x24d   : > { %12606 = vmatprep.mubr.msk.bf16.mxu0 %vm735_vm0, %v4757_v31  ;;  %12619 = vmatpush3.bf16.msra.mxu1 %v13693_v22  ;;  %v5155_v22 = vld [vmem:[#allocation3 + $0x90] sm:$0xff]  ;;  %v5156_v31 = vld [vmem:[#allocation3 + $0x98] sm:$0xff] }
 0x24e   : > { %12667 = vmatpush3.bf16.msra.mxu0 %v13694_v2  ;;  %12620 = vmatprep.subr.bf16.mxu1 %v13695_v23  ;;  %803 = vst.msk [vmem:[#allocation2 + $0x118] sm:$0xff] %vm735_vm0, %v11474_v52 }
 0x24f   : > { %12668 = vmatprep.subr.bf16.mxu0 %v13696_v1 }
 0x251   : > { %12621 = vmatpush3.bf16.msra.mxu1 %v13695_v23  ;;  %v5525_v23 = vld [vmem:[#allocation3 + $0x91] sm:$0xff] }
 0x252   : > { %12669 = vmatpush3.bf16.msra.mxu0 %v13696_v1  ;;  %12638 = vmatprep.subr.bf16.mxu1 %v15006_v60 }
 0x253   : > { %12686 = vmatprep.subr.bf16.mxu0 %v15011_v56  ;;  %12559 = vmatmul.mubr.msk.bf16.gmra.mrb[88].mxu1 %vm735_vm0, %v4294_v59 }
 0x254   : > { %12607 = vmatmul.mubr.msk.bf16.gmra.mrb[88].mxu0 %vm735_vm0, %v4758_v51  ;;  %12562 = vmatprep.mubr.msk.bf16.mxu1 %vm735_vm0, %v14768_v10  ;;  %v5526_v10 = vld [vmem:[#allocation3 + $0x99] sm:$0xff]  ;;  %v5171_v51 = vpack.c.bf16 %v5156_v31, %v5155_v22 }
 0x255   : > { %12610 = vmatprep.mubr.msk.bf16.mxu0 %vm735_vm0, %v4759_v29  ;;  %v5541_v29 = vpack.c.bf16 %v5526_v10, %v5525_v23  ;;  %v5160_v23 = vld [vmem:[#allocation3 + $0xb8] sm:$0xff] }
 0x256   : > { %v12264_v3 = vpop.f32.mrb[32].mxu1  ;;  %v5529_v10 = vld [vmem:[#allocation3 + $0xb1] sm:$0xff] }
 0x257   : > { %v12312_v32 = vpop.f32.mrb[32].mxu0  ;;  %v2351_v53 = vadd.f32 %v12264_v3, %v14880_v21  ;;  %v2270_v2 = vpop.f32.mrb[33].mxu1 }
 0x258   : > { %v2723_v24 = vmul.f32 %v12312_v32, %v14037_v35  ;;  %v2658_v57 = vpop.f32.mrb[33].mxu0  ;;  %v2349_v1 = vadd.f32 %v2270_v2, %v14884_v16  ;;  %v12265_v8 = vpop.f32.mrb[34].mxu1  ;;  %v5159_v2 = vld [vmem:[#allocation3 + $0xb0] sm:$0xff] }
 0x259   : > { %v2721_v13 = vmul.f32 %v14035_v34, %v2658_v57  ;;  %v12313_v25 = vpop.f32.mrb[34].mxu0  ;;  %v2336_v7 = vmul.f32 %v12265_v8, %v14053_v43  ;;  %v2273_v27 = vpop.f32.mrb[35].mxu1 }
 0x25a   : > { %v2661_v21 = vpop.f32.mrb[35].mxu0  ;;  %v15027_v61 = vadd.f32 %v2723_v24, %v2351_v53  ;;  %v2334_v59 = vmul.f32 %v14051_v42, %v2273_v27  ;;  %v13699_v27 = vld [vmem:[%s16746_s3 + $0x28] sm:$0xff]  }
 0x25b   : > { %v15030_v20 = vadd.f32 %v2721_v13, %v2349_v1  ;;  %v2352_v55 = vadd.f32 %v2336_v7, %v14882_v14  ;;  %12563 = vmatmul.mubr.msk.bf16.gmra.mrb[92].mxu1 %vm735_vm0, %v15022_v12  ;;  %v5530_v1 = vld [vmem:[#allocation3 + $0xb9] sm:$0xff] }
 0x25c   : > { %12611 = vmatmul.mubr.msk.bf16.gmra.mrb[92].mxu0 %vm735_vm0, %v4760_v58  ;;  %v2350_v16 = vadd.f32 %v2334_v59, %v14886_v18  ;;  %12622 = vmatprep.mubr.msk.bf16.mxu1 %vm735_vm0, %v5171_v51  ;;  %v15066_v51 = vpack.c.bf16 %v5160_v23, %v5159_v2 }
 0x25d   : > { %12670 = vmatprep.mubr.msk.bf16.mxu0 %vm735_vm0, %v5541_v29  ;;  %v15040_v62 = vadd.f32 %v12313_v25, %v2352_v55  ;;  %v5543_v29 = vpack.c.bf16 %v5530_v1, %v5529_v10 }
 0x25e   : > { %v15042_v3 = vadd.f32 %v2661_v21, %v2350_v16  ;;  %v12268_v32 = vpop.f32.mrb[36].mxu1  ;;  %v5161_v16 = vld [vmem:[#allocation3 + $0xc0] sm:$0xff] }
 0x25f   : > { %v12316_v22 = vpop.f32.mrb[36].mxu0  ;;  %v2355_v14 = vadd.f32 %v12268_v32, %v14901_v19  ;;  %v2286_v24 = vpop.f32.mrb[37].mxu1  ;;  %v5531_v32 = vld [vmem:[#allocation3 + $0xc1] sm:$0xff] }
 0x260   : > { %v2727_v53 = vmul.f32 %v12316_v22, %v14041_v37  ;;  %v2674_v18 = vpop.f32.mrb[37].mxu0  ;;  %v2353_v57 = vadd.f32 %v2286_v24, %v14905_v4  ;;  %v12269_v5 = vpop.f32.mrb[38].mxu1  ;;  %v13700_v4 = vld [vmem:[%s16746_s3 + $0x48] sm:$0xff]  }
 0x261   : > { %v2725_v58 = vmul.f32 %v14039_v36, %v2674_v18  ;;  %v12317_v31 = vpop.f32.mrb[38].mxu0  ;;  %v2340_v13 = vmul.f32 %v12269_v5, %v14057_v45  ;;  %v2289_v8 = vpop.f32.mrb[39].mxu1  ;;  %v5532_v22 = vld [vmem:[#allocation3 + $0xc9] sm:$0xff]  ;;  %v5534_v5 = vld [vmem:[#allocation3 + $0xd9] sm:$0xff] }
 0x262   : > { %v2677_v25 = vpop.f32.mrb[39].mxu0  ;;  %v15050_v7 = vadd.f32 %v2727_v53, %v2355_v14  ;;  %v2338_v19 = vmul.f32 %v14055_v44, %v2289_v8  ;;  %v5163_v14 = vld [vmem:[#allocation3 + $0xd0] sm:$0xff] }
 0x263   : > { %v15059_v21 = vadd.f32 %v2725_v58, %v2353_v57  ;;  %v2356_v59 = vadd.f32 %v2340_v13, %v14903_v30  ;;  %12623 = vmatmul.mubr.msk.bf16.vlgmr.msra.gmra.mrb[96].mxu1 %vm735_vm0, %v14822_v6  ;;  %v5162_v6 = vld [vmem:[#allocation3 + $0xc8] sm:$0xff]  ;;  %v13701_v30 = vld [vmem:[%s16746_s3 + $0x30] sm:$0xff]   ;;  %v5164_v57 = vld [vmem:[#allocation3 + $0xd8] sm:$0xff] }
 0x264   : > { %12671 = vmatmul.mubr.msk.bf16.vlgmr.msra.gmra.mrb[96].mxu0 %vm735_vm0, %v14969_v0  ;;  %v2354_v55 = vadd.f32 %v2338_v19, %v14907_v63  ;;  %12639 = vmatpush3.bf16.msra.mxu1 %v15006_v60  ;;  %v13702_v63 = vld [vmem:[%s16746_s3 + $0x50] sm:$0xff]   ;;  %v15088_v13 = vpack.c.bf16 %v5162_v6, %v5161_v16  ;;  %v5544_v19 = vpack.c.bf16 %v5532_v22, %v5531_v32  ;;  %v13703_v16 = vld [vmem:[%s16746_s3 + $0x38] sm:$0xff]   ;;  %v5166_v32 = vld [vmem:[#allocation3 + $0xe8] sm:$0xff] }
 0x265   : > { %12687 = vmatpush3.bf16.msra.mxu0 %v15011_v56  ;;  %v15071_v52 = vadd.f32 %v12317_v31, %v2356_v59  ;;  %12626 = vmatprep.mubr.msk.bf16.mxu1 %vm735_vm0, %v15066_v51  ;;  %v5533_v58 = vld [vmem:[#allocation3 + $0xd1] sm:$0xff] }
 0x266   : > { %12674 = vmatprep.mubr.msk.bf16.mxu0 %vm735_vm0, %v5543_v29  ;;  %v15082_v0 = vadd.f32 %v2677_v25, %v2354_v55  ;;  %v12272_v60 = vpop.f32.mrb[40].mxu1  ;;  %12640 = vmatprep.subr.bf16.mxu1 %v13699_v27  ;;  %v5545_v55 = vpack.c.bf16 %v5534_v5, %v5533_v58 }
 0x267   : > { %v12320_v56 = vpop.f32.mrb[40].mxu0  ;;  %12688 = vmatprep.subr.bf16.mxu0 %v13700_v4  ;;  %v2359_v53 = vadd.f32 %v12272_v60, %v14930_v17  ;;  %v2302_v18 = vpop.f32.mrb[41].mxu1 }
 0x268   : > { %v2731_v24 = vmul.f32 %v12320_v56, %v14045_v39  ;;  %v2690_v2 = vpop.f32.mrb[41].mxu0  ;;  %v2357_v31 = vadd.f32 %v2302_v18, %v14934_v28  ;;  %v12273_v10 = vpop.f32.mrb[42].mxu1  ;;  %12641 = vmatpush3.bf16.msra.mxu1 %v13699_v27  ;;  %v15094_v28 = vpack.c.bf16 %v5164_v57, %v5163_v14  ;;  %v13704_v27 = vld [vmem:[%s16746_s3 + $0x58] sm:$0xff]   ;;  %v5165_v56 = vld [vmem:[#allocation3 + $0xe0] sm:$0xff] }
 0x269   : > { %v2729_v23 = vmul.f32 %v14043_v38, %v2690_v2  ;;  %v12321_v1 = vpop.f32.mrb[42].mxu0  ;;  %12689 = vmatpush3.bf16.msra.mxu0 %v13700_v4  ;;  %v2344_v8 = vmul.f32 %v12273_v10, %v14061_v47  ;;  %v2305_v17 = vpop.f32.mrb[43].mxu1  ;;  %12642 = vmatprep.subr.bf16.mxu1 %v13701_v30  ;;  %v5535_v14 = vld [vmem:[#allocation3 + $0xe1] sm:$0xff]  ;;  %v5168_v57 = vld [vmem:[#allocation3 + $0xf8] sm:$0xff] }
 0x26a   : > { %v2693_v25 = vpop.f32.mrb[43].mxu0  ;;  %12690 = vmatprep.subr.bf16.mxu0 %v13702_v63  ;;  %v15091_v59 = vadd.f32 %v2731_v24, %v2359_v53  ;;  %v2342_v29 = vmul.f32 %v14059_v46, %v2305_v17  ;;  %v5536_v53 = vld [vmem:[#allocation3 + $0xe9] sm:$0xff]  ;;  %v5538_v10 = vld [vmem:[#allocation3 + $0xf9] sm:$0xff] }
 0x26b   : > { %v15102_v4 = vadd.f32 %v2729_v23, %v2357_v31  ;;  %v2360_v6 = vadd.f32 %v2344_v8, %v14932_v50  ;;  %12627 = vmatmul.mubr.msk.bf16.gmra.mrb[100].mxu1 %vm735_vm0, %v15088_v13  ;;  %v5167_v50 = vld [vmem:[#allocation3 + $0xf0] sm:$0xff] }
 0x26c   : > { %12675 = vmatmul.mubr.msk.bf16.gmra.mrb[100].mxu0 %vm735_vm0, %v5544_v19  ;;  %v2358_v60 = vadd.f32 %v2342_v29, %v14936_v33  ;;  %12630 = vmatprep.mubr.msk.bf16.mxu1 %vm735_vm0, %v15094_v28  ;;  %v15119_v33 = vld [vmem:[%s16747_s4 + $0x60] sm:$0xff]   ;;  %v5537_v23 = vld [vmem:[#allocation3 + $0xf1] sm:$0xff]  ;;  %v15130_v19 = vpack.c.bf16 %v5166_v32, %v5165_v56  ;;  %v5546_v29 = vpack.c.bf16 %v5536_v53, %v5535_v14 }
 0x26d   : > { %12678 = vmatprep.mubr.msk.bf16.mxu0 %vm735_vm0, %v5545_v55  ;;  %v15112_v22 = vadd.f32 %v12321_v1, %v2360_v6  ;;  %12643 = vmatpush3.bf16.msra.mxu1 %v13701_v30  ;;  %v15124_v30 = vld [vmem:[%s16747_s4 + $0x80] sm:$0xff]   ;;  %v5123_v14 = vld [vmem:[#allocation2 + $0x90] sm:$0xff] }
 0x26e   : > { %12691 = vmatpush3.bf16.msra.mxu0 %v13702_v63  ;;  %v15114_v24 = vadd.f32 %v2693_v25, %v2358_v60  ;;  %v12276_v18 = vpop.f32.mrb[44].mxu1  ;;  %12644 = vmatprep.subr.bf16.mxu1 %v13703_v16 }
 0x26f   : > { %v12324_v2 = vpop.f32.mrb[44].mxu0  ;;  %12692 = vmatprep.subr.bf16.mxu0 %v13704_v27  ;;  %v2363_v63 = vadd.f32 %v12276_v18, %v14956_v9  ;;  %v2318_v5 = vpop.f32.mrb[45].mxu1  ;;  %v15133_v9 = vpack.c.bf16 %v5168_v57, %v5167_v50  ;;  %v5124_v50 = vld [vmem:[#allocation2 + $0x98] sm:$0xff] }
 0x270   : > { %v2735_v58 = vmul.f32 %v12324_v2, %v14049_v41  ;;  %v2706_v31 = vpop.f32.mrb[45].mxu0  ;;  %v2361_v1 = vadd.f32 %v2318_v5, %v14960_v54  ;;  %v12277_v17 = vpop.f32.mrb[46].mxu1  ;;  %v5547_v54 = vpack.c.bf16 %v5538_v10, %v5537_v23  ;;  %v5493_v57 = vld [vmem:[#allocation2 + $0x91] sm:$0xff]  ;;  %v5539_v5 = vld [vmem:[#allocation3 + $0x101] sm:$0xff]  ;;  %v5139_v23 = vpack.c.bf16 %v5124_v50, %v5123_v14 }
 0x271   : > { %v2733_v8 = vmul.f32 %v14047_v40, %v2706_v31  ;;  %v12325_v25 = vpop.f32.mrb[46].mxu0  ;;  %v2348_v55 = vmul.f32 %v12277_v17, %v14065_v49  ;;  %v2321_v6 = vpop.f32.mrb[47].mxu1  ;;  %12645 = vmatpush3.bf16.msra.mxu1 %v13703_v16  ;;  %v5540_v31 = vld [vmem:[#allocation3 + $0x109] sm:$0xff]  ;;  %v5128_v17 = vld [vmem:[#allocation2 + $0xb8] sm:$0xff] }
 0x272   : > { %v2709_v60 = vpop.f32.mrb[47].mxu0  ;;  %12693 = vmatpush3.bf16.msra.mxu0 %v13704_v27  ;;  %v15135_v18 = vadd.f32 %v2735_v58, %v2363_v63  ;;  %v2346_v2 = vmul.f32 %v14063_v48, %v2321_v6  ;;  %12710 = vmatprep.subr.bf16.mxu1 %v15119_v33  ;;  %v5169_v27 = vld [vmem:[#allocation3 + $0x100] sm:$0xff]  ;;  %v5170_v58 = vld [vmem:[#allocation3 + $0x108] sm:$0xff]  ;;  %v5131_v14 = vld [vmem:[#allocation2 + $0xd0] sm:$0xff] }
 0x273   : > { %12758 = vmatprep.subr.bf16.mxu0 %v15124_v30  ;;  %v15140_v56 = vadd.f32 %v2733_v8, %v2361_v1  ;;  %v2364_v32 = vadd.f32 %v2348_v55, %v14958_v15  ;;  %12631 = vmatmul.mubr.msk.bf16.gmra.mrb[104].mxu1 %vm735_vm0, %v15130_v19  ;;  %v5494_v63 = vld [vmem:[#allocation2 + $0x99] sm:$0xff]  ;;  %v5548_v1 = vpack.c.bf16 %v5540_v31, %v5539_v5  ;;  %v5127_v8 = vld [vmem:[#allocation2 + $0xb0] sm:$0xff] }
 0x274   : > { %12679 = vmatmul.mubr.msk.bf16.gmra.mrb[104].mxu0 %vm735_vm0, %v5546_v29  ;;  %v2362_v16 = vadd.f32 %v2346_v2, %v14962_v26  ;;  %12634 = vmatprep.mubr.msk.bf16.mxu1 %vm735_vm0, %v15133_v9  ;;  %v5509_v10 = vpack.c.bf16 %v5494_v63, %v5493_v57  ;;  %v15154_v26 = vpack.c.bf16 %v5170_v58, %v5169_v27  ;;  %v5498_v29 = vld [vmem:[#allocation2 + $0xb9] sm:$0xff]  ;;  %v13708_v2 = vld [vmem:[%s16747_s4 + $0x88] sm:$0xff]   ;;  %v5501_v57 = vld [vmem:[#allocation2 + $0xd1] sm:$0xff] }
 0x275   : > { %12682 = vmatprep.mubr.msk.bf16.mxu0 %vm735_vm0, %v5547_v54  ;;  %v15150_v53 = vadd.f32 %v12325_v25, %v2364_v32  ;;  %v5497_v25 = vld [vmem:[#allocation2 + $0xb1] sm:$0xff]  ;;  %v15161_v55 = vpack.c.bf16 %v5128_v17, %v5127_v8  ;;  %v5129_v54 = vld [vmem:[#allocation2 + $0xc0] sm:$0xff]  ;;  %v5130_v32 = vld [vmem:[#allocation2 + $0xc8] sm:$0xff] }
 0x276   : > { %v15152_v15 = vadd.f32 %v2709_v60, %v2362_v16  ;;  %v5511_v6 = vpack.c.bf16 %v5498_v29, %v5497_v25  ;;  %v13707_v60 = vld [vmem:[%s16747_s4 + $0x68] sm:$0xff]   ;;  %v5132_v50 = vld [vmem:[#allocation2 + $0xd8] sm:$0xff]  ;;  %v5135_v25 = vld [vmem:[#allocation2 + $0xf0] sm:$0xff] }
 0x277   : > { %v5499_v16 = vld [vmem:[#allocation2 + $0xc1] sm:$0xff]  ;;  %v5500_v27 = vld [vmem:[#allocation2 + $0xc9] sm:$0xff]  ;;  %v5502_v63 = vld [vmem:[#allocation2 + $0xd9] sm:$0xff]  ;;  %v15186_v58 = vpack.c.bf16 %v5132_v50, %v5131_v14 }
 0x278   : > { %v5513_v5 = vpack.c.bf16 %v5502_v63, %v5501_v57  ;;  %v13711_v31 = vld [vmem:[%s16747_s4 + $0x78] sm:$0xff]   ;;  %v5503_v8 = vld [vmem:[#allocation2 + $0xe1] sm:$0xff]  ;;  %v5504_v17 = vld [vmem:[#allocation2 + $0xe9] sm:$0xff] }
 0x279   : > { %v5136_v29 = vld [vmem:[#allocation2 + $0xf8] sm:$0xff]  ;;  %v5137_v50 = vld [vmem:[#allocation2 + $0x100] sm:$0xff]  ;;  %v5138_v57 = vld [vmem:[#allocation2 + $0x108] sm:$0xff] }
 0x27a   : > { %v5507_v63 = vld [vmem:[#allocation2 + $0x101] sm:$0xff] }
 0x27b   : > { %12635 = vmatmul.mubr.msk.bf16.gmra.mrb[108].mxu1 %vm735_vm0, %v15154_v26 }
 0x27c   : > { %12683 = vmatmul.mubr.msk.bf16.gmra.mrb[108].mxu0 %vm735_vm0, %v5548_v1  ;;  %12646 = vmatprep.mubr.msk.bf16.mxu1 %vm735_vm0, %v5139_v23  ;;  %v13712_v23 = vld [vmem:[%s16747_s4 + $0x98] sm:$0xff]   ;;  %v5134_v1 = vld [vmem:[#allocation2 + $0xe8] sm:$0xff] }
 0x27d   : > { %12694 = vmatprep.mubr.msk.bf16.mxu0 %vm735_vm0, %v5509_v10  ;;  %v5133_v10 = vld [vmem:[#allocation2 + $0xe0] sm:$0xff] }
 0x283   : > { %12647 = vmatmul.mubr.msk.bf16.vlgmr.msra.gmra.mrb[96].mxu1 %vm735_vm0, %v14877_v11  ;;  %v13709_v11 = vld [vmem:[%s16747_s4 + $0x70] sm:$0xff]  }
 0x284   : > { %12695 = vmatmul.mubr.msk.bf16.vlgmr.msra.gmra.mrb[96].mxu0 %vm735_vm0, %v15022_v12  ;;  %12711 = vmatpush3.bf16.msra.mxu1 %v15119_v33  ;;  %v13710_v12 = vld [vmem:[%s16747_s4 + $0x90] sm:$0xff]   ;;  %v15184_v33 = vpack.c.bf16 %v5130_v32, %v5129_v54  ;;  %v15208_v54 = vld [vmem:[%s16746_s3 + $0x80] sm:$0xff]   ;;  %v15210_v32 = vpack.c.bf16 %v5134_v1, %v5133_v10 }
 0x285   : > { %12759 = vmatpush3.bf16.msra.mxu0 %v15124_v30  ;;  %12650 = vmatprep.mubr.msk.bf16.mxu1 %vm735_vm0, %v15161_v55  ;;  %v5512_v30 = vpack.c.bf16 %v5500_v27, %v5499_v16  ;;  %v5514_v16 = vpack.c.bf16 %v5504_v17, %v5503_v8  ;;  %v15212_v27 = vpack.c.bf16 %v5136_v29, %v5135_v25  ;;  %v6297_v25 = vld [vmem:[#allocation3 + $0xa0] sm:$0xff]  ;;  %v6298_v29 = vld [vmem:[#allocation3 + $0xa8] sm:$0xff] }
 0x286   : > { %12698 = vmatprep.mubr.msk.bf16.mxu0 %vm735_vm0, %v5511_v6  ;;  %12712 = vmatprep.subr.bf16.mxu1 %v13707_v60  ;;  %v5505_v6 = vld [vmem:[#allocation2 + $0xf1] sm:$0xff]  ;;  %v15223_v8 = vpack.c.bf16 %v5138_v57, %v5137_v50 }
 0x287   : > { %12760 = vmatprep.subr.bf16.mxu0 %v13708_v2 }
 0x288   : > { %12713 = vmatpush3.bf16.msra.mxu1 %v13707_v60  ;;  %v5506_v60 = vld [vmem:[#allocation2 + $0xf9] sm:$0xff] }
 0x289   : > { %12761 = vmatpush3.bf16.msra.mxu0 %v13708_v2  ;;  %12714 = vmatprep.subr.bf16.mxu1 %v13709_v11  ;;  %v15203_v2 = vld [vmem:[%s16746_s3 + $0x60] sm:$0xff]   ;;  %v5515_v14 = vpack.c.bf16 %v5506_v60, %v5505_v6 }
 0x28a   : > { %12762 = vmatprep.subr.bf16.mxu0 %v13710_v12 }
 0x28b   : > { %12651 = vmatmul.mubr.msk.bf16.gmra.mrb[100].mxu1 %vm735_vm0, %v15184_v33 }
 0x28c   : > { %12699 = vmatmul.mubr.msk.bf16.gmra.mrb[100].mxu0 %vm735_vm0, %v5512_v30  ;;  %12654 = vmatprep.mubr.msk.bf16.mxu1 %vm735_vm0, %v15186_v58 }
 0x28d   : > { %12702 = vmatprep.mubr.msk.bf16.mxu0 %vm735_vm0, %v5513_v5  ;;  %12715 = vmatpush3.bf16.msra.mxu1 %v13709_v11  ;;  %v5508_v11 = vld [vmem:[#allocation2 + $0x109] sm:$0xff]  ;;  %v5911_v5 = vld [vmem:[#allocation3 + $0x9f] sm:$0xff] }
 0x28e   : > { %12763 = vmatpush3.bf16.msra.mxu0 %v13710_v12  ;;  %12716 = vmatprep.subr.bf16.mxu1 %v13711_v31  ;;  %v5516_v17 = vpack.c.bf16 %v5508_v11, %v5507_v63  ;;  %v6313_v63 = vpack.c.bf16 %v6298_v29, %v6297_v25 }
 0x28f   : > { %12764 = vmatprep.subr.bf16.mxu0 %v13712_v23 }
 0x291   : > { %12717 = vmatpush3.bf16.msra.mxu1 %v13711_v31  ;;  %v5912_v31 = vld [vmem:[#allocation3 + $0xa7] sm:$0xff] }
 0x292   : > { %12765 = vmatpush3.bf16.msra.mxu0 %v13712_v23  ;;  %12734 = vmatprep.subr.bf16.mxu1 %v15203_v2 }
 0x293   : > { %12782 = vmatprep.subr.bf16.mxu0 %v15208_v54  ;;  %12655 = vmatmul.mubr.msk.bf16.gmra.mrb[104].mxu1 %vm735_vm0, %v15210_v32 }
 0x294   : > { %12703 = vmatmul.mubr.msk.bf16.gmra.mrb[104].mxu0 %vm735_vm0, %v5514_v16  ;;  %12658 = vmatprep.mubr.msk.bf16.mxu1 %vm735_vm0, %v15212_v27 }
 0x295   : > { %12706 = vmatprep.mubr.msk.bf16.mxu0 %vm735_vm0, %v5515_v14 }
 0x296   : > { %v12360_v12 = vpop.f32.mrb[48].mxu1 }
 0x297   : > { %v12408_v30 = vpop.f32.mrb[48].mxu0  ;;  %v3111_v23 = vadd.f32 %v12360_v12, %v15027_v61  ;;  %v3046_v10 = vpop.f32.mrb[49].mxu1  ;;  %v5927_v61 = vpack.c.bf16 %v5912_v31, %v5911_v5  ;;  %v5913_v5 = vld [vmem:[#allocation3 + $0xaf] sm:$0xff] }
 0x298   : > { %v3418_v1 = vpop.f32.mrb[49].mxu0  ;;  %v3109_v6 = vadd.f32 %v3046_v10, %v15030_v20  ;;  %v12361_v60 = vpop.f32.mrb[50].mxu1 }
 0x299   : > { %v12409_v16 = vpop.f32.mrb[50].mxu0  ;;  %v15226_v14 = vadd.f32 %v12408_v30, %v3111_v23  ;;  %v3112_v40 = vadd.f32 %v12361_v60, %v15040_v62  ;;  %v3049_v38 = vpop.f32.mrb[51].mxu1 }
 0x29a   : > { %v3484_v41 = vmul.f32 %v12409_v16, %v14053_v43  ;;  %v3421_v39 = vpop.f32.mrb[51].mxu0  ;;  %v15230_v12 = vadd.f32 %v3418_v1, %v3109_v6  ;;  %v3110_v50 = vadd.f32 %v3049_v38, %v15042_v3  ;;  %v5914_v38 = vld [vmem:[#allocation3 + $0xb7] sm:$0xff] }
 0x29b   : > { %v3482_v57 = vmul.f32 %v14051_v42, %v3421_v39  ;;  %12659 = vmatmul.mubr.msk.bf16.gmra.mrb[108].mxu1 %vm735_vm0, %v15223_v8  ;;  %v15249_v16 = vpack.c.bf16 %v5914_v38, %v5913_v5 }
 0x29c   : > { %12707 = vmatmul.mubr.msk.bf16.gmra.mrb[108].mxu0 %vm735_vm0, %v5516_v17  ;;  %v15237_v20 = vadd.f32 %v3484_v41, %v3112_v40  ;;  %12718 = vmatprep.mubr.msk.bf16.mxu1 %vm735_vm0, %v5927_v61  ;;  %v5915_v40 = vld [vmem:[#allocation3 + $0xbf] sm:$0xff]  ;;  %v5916_v41 = vld [vmem:[#allocation3 + $0xc7] sm:$0xff] }
 0x29d   : > { %12766 = vmatprep.mubr.msk.bf16.mxu0 %vm735_vm0, %v6313_v63  ;;  %v15241_v62 = vadd.f32 %v3482_v57, %v3110_v50  ;;  %v13715_v50 = vld [vmem:[%s16746_s3 + $0x68] sm:$0xff]   ;;  %v15265_v57 = vpack.c.bf16 %v5916_v41, %v5915_v40 }
 0x29e   : > { %v12364_v11 = vpop.f32.mrb[52].mxu1 }
 0x29f   : > { %v12412_v30 = vpop.f32.mrb[52].mxu0  ;;  %v3115_v39 = vadd.f32 %v12364_v11, %v15050_v7  ;;  %v3062_v3 = vpop.f32.mrb[53].mxu1 }
 0x2a0   : > { %v3434_v31 = vpop.f32.mrb[53].mxu0  ;;  %v3113_v23 = vadd.f32 %v3062_v3, %v15059_v21  ;;  %v12365_v10 = vpop.f32.mrb[54].mxu1 }
 0x2a1   : > { %v12413_v1 = vpop.f32.mrb[54].mxu0  ;;  %v15245_v17 = vadd.f32 %v12412_v30, %v3115_v39  ;;  %v3116_v25 = vadd.f32 %v12365_v10, %v15071_v52  ;;  %v3065_v6 = vpop.f32.mrb[55].mxu1  ;;  %v13716_v52 = vld [vmem:[%s16746_s3 + $0x88] sm:$0xff]   ;;  %v5918_v30 = vld [vmem:[#allocation3 + $0xd7] sm:$0xff] }
 0x2a2   : > { %v3488_v29 = vmul.f32 %v12413_v1, %v14057_v45  ;;  %v3437_v60 = vpop.f32.mrb[55].mxu0  ;;  %v15251_v61 = vadd.f32 %v3434_v31, %v3113_v23  ;;  %v3114_v7 = vadd.f32 %v3065_v6, %v15082_v0  ;;  %v5917_v0 = vld [vmem:[#allocation3 + $0xcf] sm:$0xff]  ;;  %v5919_v31 = vld [vmem:[#allocation3 + $0xdf] sm:$0xff]  ;;  %v5920_v23 = vld [vmem:[#allocation3 + $0xe7] sm:$0xff] }
 0x2a3   : > { %v3486_v21 = vmul.f32 %v14055_v44, %v3437_v60  ;;  %12719 = vmatmul.mubr.msk.bf16.vlgmr.msra.gmra.mrb[112].mxu1 %vm735_vm0, %v15249_v16  ;;  %v15285_v40 = vpack.c.bf16 %v5918_v30, %v5917_v0  ;;  %v5922_v30 = vld [vmem:[#allocation3 + $0xf7] sm:$0xff] }
 0x2a4   : > { %12767 = vmatmul.mubr.msk.bf16.vlgmr.msra.gmra.mrb[112].mxu0 %vm735_vm0, %v15066_v51  ;;  %v15267_v63 = vadd.f32 %v3488_v29, %v3116_v25  ;;  %12735 = vmatpush3.bf16.msra.mxu1 %v15203_v2  ;;  %v13717_v51 = vld [vmem:[%s16746_s3 + $0x70] sm:$0xff]  }
 0x2a5   : > { %12783 = vmatpush3.bf16.msra.mxu0 %v15208_v54  ;;  %v15271_v11 = vadd.f32 %v3486_v21, %v3114_v7  ;;  %12722 = vmatprep.mubr.msk.bf16.mxu1 %vm735_vm0, %v15265_v57  ;;  %v13718_v2 = vld [vmem:[%s16746_s3 + $0x90] sm:$0xff]   ;;  %v15295_v21 = vpack.c.bf16 %v5920_v23, %v5919_v31 }
 0x2a6   : > { %12770 = vmatprep.mubr.msk.bf16.mxu0 %vm735_vm0, %v15088_v13  ;;  %v12368_v5 = vpop.f32.mrb[56].mxu1  ;;  %12736 = vmatprep.subr.bf16.mxu1 %v13715_v50 }
 0x2a7   : > { %v12416_v54 = vpop.f32.mrb[56].mxu0  ;;  %12784 = vmatprep.subr.bf16.mxu0 %v13716_v52  ;;  %v3119_v38 = vadd.f32 %v12368_v5, %v15091_v59  ;;  %v3078_v39 = vpop.f32.mrb[57].mxu1  ;;  %v5923_v5 = vld [vmem:[#allocation3 + $0xff] sm:$0xff] }
 0x2a8   : > { %v3450_v3 = vpop.f32.mrb[57].mxu0  ;;  %v3117_v13 = vadd.f32 %v3078_v39, %v15102_v4  ;;  %v12369_v10 = vpop.f32.mrb[58].mxu1  ;;  %12737 = vmatpush3.bf16.msra.mxu1 %v13715_v50  ;;  %v13719_v50 = vld [vmem:[%s16746_s3 + $0x78] sm:$0xff]  }
 0x2a9   : > { %v12417_v1 = vpop.f32.mrb[58].mxu0  ;;  %12785 = vmatpush3.bf16.msra.mxu0 %v13716_v52  ;;  %v15287_v41 = vadd.f32 %v12416_v54, %v3119_v38  ;;  %v3120_v25 = vadd.f32 %v12369_v10, %v15112_v22  ;;  %v3081_v6 = vpop.f32.mrb[59].mxu1  ;;  %12738 = vmatprep.subr.bf16.mxu1 %v13717_v51  ;;  %v13720_v22 = vld [vmem:[%s16746_s3 + $0x98] sm:$0xff]   ;;  %v5924_v54 = vld [vmem:[#allocation3 + $0x107] sm:$0xff] }
 0x2aa   : > { %v3492_v29 = vmul.f32 %v12417_v1, %v14061_v47  ;;  %v3453_v59 = vpop.f32.mrb[59].mxu0  ;;  %12786 = vmatprep.subr.bf16.mxu0 %v13718_v2  ;;  %v15291_v60 = vadd.f32 %v3450_v3, %v3117_v13  ;;  %v3118_v4 = vadd.f32 %v3081_v6, %v15114_v24  ;;  %v5921_v24 = vld [vmem:[#allocation3 + $0xef] sm:$0xff]  ;;  %v15325_v1 = vpack.c.bf16 %v5924_v54, %v5923_v5  ;;  %v5926_v54 = vld [vmem:[#allocation3 + $0x117] sm:$0xff] }
 0x2ab   : > { %v3490_v7 = vmul.f32 %v14059_v46, %v3453_v59  ;;  %12723 = vmatmul.mubr.msk.bf16.gmra.mrb[116].mxu1 %vm735_vm0, %v15285_v40  ;;  %v15323_v10 = vpack.c.bf16 %v5922_v30, %v5921_v24  ;;  %v5880_v24 = vld [vmem:[#allocation2 + $0xa7] sm:$0xff] }
 0x2ac   : > { %12771 = vmatmul.mubr.msk.bf16.gmra.mrb[116].mxu0 %vm735_vm0, %v15094_v28  ;;  %v15307_v52 = vadd.f32 %v3492_v29, %v3120_v25  ;;  %12726 = vmatprep.mubr.msk.bf16.mxu1 %vm735_vm0, %v15295_v21  ;;  %v13721_v28 = vld [vmem:[%s16747_s4 + $0xa0] sm:$0xff]   ;;  %v6266_v5 = vld [vmem:[#allocation2 + $0xa8] sm:$0xff] }
 0x2ad   : > { %12774 = vmatprep.mubr.msk.bf16.mxu0 %vm735_vm0, %v15130_v19  ;;  %v15313_v0 = vadd.f32 %v3490_v7, %v3118_v4  ;;  %12739 = vmatpush3.bf16.msra.mxu1 %v13717_v51  ;;  %v13722_v19 = vld [vmem:[%s16747_s4 + $0xc0] sm:$0xff]  }
 0x2ae   : > { %12787 = vmatpush3.bf16.msra.mxu0 %v13718_v2  ;;  %v12372_v38 = vpop.f32.mrb[60].mxu1  ;;  %12740 = vmatprep.subr.bf16.mxu1 %v13719_v50  ;;  %v6265_v30 = vld [vmem:[#allocation2 + $0xa0] sm:$0xff] }
 0x2af   : > { %v12420_v39 = vpop.f32.mrb[60].mxu0  ;;  %12788 = vmatprep.subr.bf16.mxu0 %v13720_v22  ;;  %v3123_v3 = vadd.f32 %v12372_v38, %v15135_v18  ;;  %v3094_v31 = vpop.f32.mrb[61].mxu1  ;;  %v6311_v38 = vld [vmem:[#allocation3 + $0x110] sm:$0xff] }
 0x2b0   : > { %v3466_v23 = vpop.f32.mrb[61].mxu0  ;;  %v3121_v51 = vadd.f32 %v3094_v31, %v15140_v56  ;;  %v12373_v2 = vpop.f32.mrb[62].mxu1 }
 0x2b1   : > { %v12421_v13 = vpop.f32.mrb[62].mxu0  ;;  %v15327_v25 = vadd.f32 %v12420_v39, %v3123_v3  ;;  %v3124_v29 = vadd.f32 %v12373_v2, %v15150_v53  ;;  %v3097_v59 = vpop.f32.mrb[63].mxu1  ;;  %12741 = vmatpush3.bf16.msra.mxu1 %v13719_v50  ;;  %v5925_v50 = vld [vmem:[#allocation3 + $0x10f] sm:$0xff]  ;;  %v6312_v39 = vld [vmem:[#allocation3 + $0x118] sm:$0xff] }
 0x2b2   : > { %v3496_v6 = vmul.f32 %v12421_v13, %v14065_v49  ;;  %v3469_v4 = vpop.f32.mrb[63].mxu0  ;;  %12789 = vmatpush3.bf16.msra.mxu0 %v13720_v22  ;;  %v15331_v18 = vadd.f32 %v3466_v23, %v3121_v51  ;;  %v3122_v56 = vadd.f32 %v3097_v59, %v15152_v15  ;;  %12806 = vmatprep.subr.bf16.mxu1 %v13721_v28  ;;  %v5879_v15 = vld [vmem:[#allocation2 + $0x9f] sm:$0xff]  ;;  %v5882_v51 = vld [vmem:[#allocation2 + $0xb7] sm:$0xff]  ;;  %v5884_v13 = vld [vmem:[#allocation2 + $0xc7] sm:$0xff] }
 0x2b3   : > { %v3494_v7 = vmul.f32 %v14063_v48, %v3469_v4  ;;  %12854 = vmatprep.subr.bf16.mxu0 %v13722_v19  ;;  %12727 = vmatmul.mubr.msk.bf16.gmra.mrb[120].mxu1 %vm735_vm0, %v15323_v10  ;;  %v5895_v3 = vpack.c.bf16 %v5880_v24, %v5879_v15  ;;  %v15347_v31 = vpack.c.bf16 %v5926_v54, %v5925_v50  ;;  %v5883_v2 = vld [vmem:[#allocation2 + $0xbf] sm:$0xff]  ;;  %v13723_v59 = vld [vmem:[%s16747_s4 + $0xa8] sm:$0xff]   ;;  %v13725_v24 = vld [vmem:[%s16747_s4 + $0xb0] sm:$0xff]  }
 0x2b4   : > { %12775 = vmatmul.mubr.msk.bf16.gmra.mrb[120].mxu0 %vm735_vm0, %v15133_v9  ;;  %v15339_v53 = vadd.f32 %v3496_v6, %v3124_v29  ;;  %12730 = vmatprep.mubr.msk.bf16.mxu1 %vm735_vm0, %v15325_v1  ;;  %v6281_v9 = vpack.c.bf16 %v6266_v5, %v6265_v30  ;;  %v6320_v23 = vpack.c.bf16 %v6312_v39, %v6311_v38  ;;  %v13724_v4 = vld [vmem:[%s16747_s4 + $0xc8] sm:$0xff]   ;;  %v5887_v50 = vld [vmem:[#allocation2 + $0xdf] sm:$0xff]  ;;  %v5890_v54 = vld [vmem:[#allocation2 + $0xf7] sm:$0xff] }
 0x2b5   : > { %12778 = vmatprep.mubr.msk.bf16.mxu0 %vm735_vm0, %v15154_v26  ;;  %v15345_v22 = vadd.f32 %v3494_v7, %v3122_v56  ;;  %v5881_v26 = vld [vmem:[#allocation2 + $0xaf] sm:$0xff]  ;;  %v15356_v6 = vpack.c.bf16 %v5884_v13, %v5883_v2  ;;  %v5886_v7 = vld [vmem:[#allocation2 + $0xd7] sm:$0xff]  ;;  %v5888_v15 = vld [vmem:[#allocation2 + $0xe7] sm:$0xff] }
 0x2b6   : > { %v15354_v29 = vpack.c.bf16 %v5882_v51, %v5881_v26  ;;  %v5885_v56 = vld [vmem:[#allocation2 + $0xcf] sm:$0xff]  ;;  %v13728_v30 = vld [vmem:[%s16747_s4 + $0xd8] sm:$0xff]   ;;  %v5892_v39 = vld [vmem:[#allocation2 + $0x107] sm:$0xff] }
 0x2b7   : > { %v5889_v5 = vld [vmem:[#allocation2 + $0xef] sm:$0xff]  ;;  %v5891_v38 = vld [vmem:[#allocation2 + $0xff] sm:$0xff]  ;;  %v5894_v26 = vld [vmem:[#allocation2 + $0x117] sm:$0xff] }
 0x2b8   : > { %v6279_v51 = vld [vmem:[#allocation2 + $0x110] sm:$0xff]  ;;  %v6280_v2 = vld [vmem:[#allocation2 + $0x118] sm:$0xff] }
 0x2bb   : > { %12731 = vmatmul.mubr.msk.bf16.gmra.mrb[124].mxu1 %vm735_vm0, %v15347_v31 }
 0x2bc   : > { %12779 = vmatmul.mubr.msk.bf16.gmra.mrb[124].mxu0 %vm735_vm0, %v6320_v23  ;;  %12742 = vmatprep.mubr.msk.bf16.mxu1 %vm735_vm0, %v5895_v3  ;;  %v15399_v3 = vld [vmem:[%s16746_s3 + $0xa0] sm:$0xff]   ;;  %v5893_v23 = vld [vmem:[#allocation2 + $0x10f] sm:$0xff] }
 0x2bd   : > { %12790 = vmatprep.mubr.msk.bf16.mxu0 %vm735_vm0, %v6281_v9  ;;  %v15406_v9 = vpack.c.bf16 %v5890_v54, %v5889_v5 }
 0x2c3   : > { %12743 = vmatmul.mubr.msk.bf16.vlgmr.msra.gmra.mrb[112].mxu1 %vm735_vm0, %v15354_v29 }
 0x2c4   : > { %12791 = vmatmul.mubr.msk.bf16.vlgmr.msra.gmra.mrb[112].mxu0 %vm735_vm0, %v15161_v55  ;;  %12807 = vmatpush3.bf16.msra.mxu1 %v13721_v28  ;;  %v13726_v55 = vld [vmem:[%s16747_s4 + $0xd0] sm:$0xff]   ;;  %v15378_v28 = vpack.c.bf16 %v5886_v7, %v5885_v56 }
 0x2c5   : > { %12855 = vmatpush3.bf16.msra.mxu0 %v13722_v19  ;;  %12746 = vmatprep.mubr.msk.bf16.mxu1 %vm735_vm0, %v15356_v6  ;;  %v15380_v19 = vpack.c.bf16 %v5888_v15, %v5887_v50  ;;  %v15421_v50 = vpack.c.bf16 %v5894_v26, %v5893_v23  ;;  %v6288_v15 = vpack.c.bf16 %v6280_v2, %v6279_v51  ;;  %v6670_v2 = vld [vmem:[#allocation3 + $0xb9] sm:$0xff] }
 0x2c6   : > { %12794 = vmatprep.mubr.msk.bf16.mxu0 %vm735_vm0, %v15184_v33  ;;  %12808 = vmatprep.subr.bf16.mxu1 %v13723_v59  ;;  %v13727_v33 = vld [vmem:[%s16747_s4 + $0xb8] sm:$0xff]  }
 0x2c7   : > { %12856 = vmatprep.subr.bf16.mxu0 %v13724_v4 }
 0x2c8   : > { %12809 = vmatpush3.bf16.msra.mxu1 %v13723_v59 }
 0x2c9   : > { %12857 = vmatpush3.bf16.msra.mxu0 %v13724_v4  ;;  %12810 = vmatprep.subr.bf16.mxu1 %v13725_v24 }
 0x2ca   : > { %12858 = vmatprep.subr.bf16.mxu0 %v13726_v55 }
 0x2cb   : > { %12747 = vmatmul.mubr.msk.bf16.gmra.mrb[116].mxu1 %vm735_vm0, %v15378_v28 }
 0x2cc   : > { %12795 = vmatmul.mubr.msk.bf16.gmra.mrb[116].mxu0 %vm735_vm0, %v15186_v58  ;;  %12750 = vmatprep.mubr.msk.bf16.mxu1 %vm735_vm0, %v15380_v19  ;;  %v15404_v58 = vld [vmem:[%s16746_s3 + $0xc0] sm:$0xff]  }
 0x2cd   : > { %12798 = vmatprep.mubr.msk.bf16.mxu0 %vm735_vm0, %v15210_v32  ;;  %12811 = vmatpush3.bf16.msra.mxu1 %v13725_v24  ;;  %v15408_v32 = vpack.c.bf16 %v5892_v39, %v5891_v38  ;;  %v6668_v24 = vld [vmem:[#allocation3 + $0xa9] sm:$0xff] }
 0x2ce   : > { %12859 = vmatpush3.bf16.msra.mxu0 %v13726_v55  ;;  %12812 = vmatprep.subr.bf16.mxu1 %v13727_v33 }
 0x2cf   : > { %12860 = vmatprep.subr.bf16.mxu0 %v13728_v30 }
 0x2d1   : > { %12813 = vmatpush3.bf16.msra.mxu1 %v13727_v33 }
 0x2d2   : > { %12861 = vmatpush3.bf16.msra.mxu0 %v13728_v30  ;;  %12830 = vmatprep.subr.bf16.mxu1 %v15399_v3 }
 0x2d3   : > { %12878 = vmatprep.subr.bf16.mxu0 %v15404_v58  ;;  %12751 = vmatmul.mubr.msk.bf16.gmra.mrb[120].mxu1 %vm735_vm0, %v15406_v9 }
 0x2d4   : > { %12799 = vmatmul.mubr.msk.bf16.gmra.mrb[120].mxu0 %vm735_vm0, %v15212_v27  ;;  %12754 = vmatprep.mubr.msk.bf16.mxu1 %vm735_vm0, %v15408_v32  ;;  %v6667_v27 = vld [vmem:[#allocation3 + $0xa1] sm:$0xff] }
 0x2d5   : > { %12802 = vmatprep.mubr.msk.bf16.mxu0 %vm735_vm0, %v15223_v8 }
 0x2d6   : > { %v12456_v13 = vpop.f32.mrb[64].mxu1 }
 0x2d7   : > { %v12504_v59 = vpop.f32.mrb[64].mxu0  ;;  %v3871_v4 = vmul.f32 %v12456_v13, %v14037_v35  ;;  %v3806_v56 = vpop.f32.mrb[65].mxu1  ;;  %v6683_v35 = vpack.c.bf16 %v6668_v24, %v6667_v27  ;;  %v6671_v24 = vld [vmem:[#allocation3 + $0xc1] sm:$0xff] }
 0x2d8   : > { %v4194_v7 = vpop.f32.mrb[65].mxu0  ;;  %v3869_v55 = vmul.f32 %v14035_v34, %v3806_v56  ;;  %v12457_v33 = vpop.f32.mrb[66].mxu1 }
 0x2d9   : > { %v12505_v30 = vpop.f32.mrb[66].mxu0  ;;  %v3887_v8 = vadd.f32 %v3871_v4, %v15226_v14  ;;  %v3888_v5 = vadd.f32 %v12457_v33, %v15237_v20  ;;  %v3809_v54 = vpop.f32.mrb[67].mxu1 }
 0x2da   : > { %v4197_v38 = vpop.f32.mrb[67].mxu0  ;;  %v3885_v39 = vadd.f32 %v3869_v55, %v15230_v12  ;;  %v3886_v13 = vadd.f32 %v3809_v54, %v15241_v62  ;;  %v6669_v62 = vld [vmem:[#allocation3 + $0xb1] sm:$0xff]  ;;  %v6672_v55 = vld [vmem:[#allocation3 + $0xc9] sm:$0xff] }
 0x2db   : > { %v15428_v23 = vadd.f32 %v12504_v59, %v3887_v8  ;;  %v15430_v26 = vadd.f32 %v12505_v30, %v3888_v5  ;;  %12755 = vmatmul.mubr.msk.bf16.gmra.mrb[124].mxu1 %vm735_vm0, %v15421_v50  ;;  %v15446_v8 = vpack.c.bf16 %v6670_v2, %v6669_v62  ;;  %v16791_v2 = vld [vmem:[#allocation14_spill] sm:$0xff] }
 0x2dc   : > { %12803 = vmatmul.mubr.msk.bf16.gmra.mrb[124].mxu0 %vm735_vm0, %v6288_v15  ;;  %v15435_v51 = vadd.f32 %v4194_v7, %v3885_v39  ;;  %v15437_v14 = vadd.f32 %v4197_v38, %v3886_v13  ;;  %12814 = vmatprep.mubr.msk.bf16.mxu1 %vm735_vm0, %v6683_v35  ;;  %v13731_v38 = vld [vmem:[%s16746_s3 + $0xa8] sm:$0xff]  }
 0x2dd   : > { %12862 = vmatprep.mubr.msk.bf16.mxu0 %vm735_vm0, %v15249_v16  ;;  %v13732_v39 = vld [vmem:[%s16746_s3 + $0xc8] sm:$0xff]  }
 0x2de   : > { %v12460_v12 = vpop.f32.mrb[68].mxu1 }
 0x2df   : > { %v12508_v20 = vpop.f32.mrb[68].mxu0  ;;  %v3875_v59 = vmul.f32 %v12460_v12, %v14041_v37  ;;  %v3822_v4 = vpop.f32.mrb[69].mxu1  ;;  %v13734_v12 = vld [vmem:[%s16746_s3 + $0xd0] sm:$0xff]  }
 0x2e0   : > { %v4210_v56 = vpop.f32.mrb[69].mxu0  ;;  %v3873_v27 = vmul.f32 %v14039_v36, %v3822_v4  ;;  %v12461_v15 = vpop.f32.mrb[70].mxu1 }
 0x2e1   : > { %v12509_v7 = vpop.f32.mrb[70].mxu0  ;;  %v3891_v33 = vadd.f32 %v3875_v59, %v15245_v17  ;;  %v3892_v35 = vadd.f32 %v12461_v15, %v15267_v63  ;;  %v3825_v30 = vpop.f32.mrb[71].mxu1  ;;  %v16792_v15 = vld [vmem:[#allocation13_spill] sm:$0xff] }
 0x2e2   : > { %v4213_v16 = vpop.f32.mrb[71].mxu0  ;;  %v3889_v5 = vadd.f32 %v3873_v27, %v15251_v61  ;;  %v3890_v54 = vadd.f32 %v3825_v30, %v15271_v11  ;;  %v15464_v61 = vpack.c.bf16 %v6672_v55, %v6671_v24  ;;  %v6675_v27 = vld [vmem:[#allocation3 + $0xe1] sm:$0xff] }
 0x2e3   : > { %v15456_v13 = vadd.f32 %v12508_v20, %v3891_v33  ;;  %v15458_v17 = vadd.f32 %v12509_v7, %v3892_v35  ;;  %12815 = vmatmul.mubr.msk.bf16.vlgmr.msra.gmra.mrb[128].mxu1 %vm735_vm0, %v15446_v8 }
 0x2e4   : > { %12863 = vmatmul.mubr.msk.bf16.vlgmr.msra.gmra.mrb[128].mxu0 %vm735_vm0, %v15265_v57  ;;  %v15466_v63 = vadd.f32 %v4210_v56, %v3889_v5  ;;  %v15468_v11 = vadd.f32 %v4213_v16, %v3890_v54  ;;  %12831 = vmatpush3.bf16.msra.mxu1 %v15399_v3  ;;  %v13733_v57 = vld [vmem:[%s16746_s3 + $0xb0] sm:$0xff]  }
 0x2e5   : > { %12879 = vmatpush3.bf16.msra.mxu0 %v15404_v58  ;;  %12818 = vmatprep.mubr.msk.bf16.mxu1 %vm735_vm0, %v15464_v61  ;;  %v6673_v3 = vld [vmem:[#allocation3 + $0xd1] sm:$0xff]  ;;  %v6674_v58 = vld [vmem:[#allocation3 + $0xd9] sm:$0xff] }
 0x2e6   : > { %12866 = vmatprep.mubr.msk.bf16.mxu0 %vm735_vm0, %v15285_v40  ;;  %v12464_v20 = vpop.f32.mrb[72].mxu1  ;;  %12832 = vmatprep.subr.bf16.mxu1 %v13731_v38  ;;  %v6676_v40 = vld [vmem:[#allocation3 + $0xe9] sm:$0xff]  ;;  %v15486_v5 = vpack.c.bf16 %v6674_v58, %v6673_v3 }
 0x2e7   : > { %v12512_v62 = vpop.f32.mrb[72].mxu0  ;;  %12880 = vmatprep.subr.bf16.mxu0 %v13732_v39  ;;  %v3879_v59 = vmul.f32 %v12464_v20, %v16791_v2  ;;  %v3838_v4 = vpop.f32.mrb[73].mxu1  ;;  %v15490_v2 = vpack.c.bf16 %v6676_v40, %v6675_v27 }
 0x2e8   : > { %v4226_v56 = vpop.f32.mrb[73].mxu0  ;;  %v3877_v7 = vmul.f32 %v16792_v15, %v3838_v4  ;;  %v12465_v24 = vpop.f32.mrb[74].mxu1  ;;  %12833 = vmatpush3.bf16.msra.mxu1 %v13731_v38  ;;  %v13735_v38 = vld [vmem:[%s16746_s3 + $0xb8] sm:$0xff]   ;;  %v13738_v4 = vld [vmem:[%s16747_s4 + $0x100] sm:$0xff]  }
 0x2e9   : > { %v12513_v55 = vpop.f32.mrb[74].mxu0  ;;  %12881 = vmatpush3.bf16.msra.mxu0 %v13732_v39  ;;  %v3895_v33 = vadd.f32 %v3879_v59, %v15287_v41  ;;  %v3896_v35 = vadd.f32 %v12465_v24, %v15307_v52  ;;  %v3841_v30 = vpop.f32.mrb[75].mxu1  ;;  %12834 = vmatprep.subr.bf16.mxu1 %v13733_v57  ;;  %v13736_v41 = vld [vmem:[%s16746_s3 + $0xd8] sm:$0xff]  }
 0x2ea   : > { %v4229_v16 = vpop.f32.mrb[75].mxu0  ;;  %12882 = vmatprep.subr.bf16.mxu0 %v13734_v12  ;;  %v3893_v54 = vadd.f32 %v3877_v7, %v15291_v60  ;;  %v3894_v20 = vadd.f32 %v3841_v30, %v15313_v0  ;;  %v6678_v59 = vld [vmem:[#allocation3 + $0xf9] sm:$0xff]  ;;  %v6679_v7 = vld [vmem:[#allocation3 + $0x101] sm:$0xff] }
 0x2eb   : > { %v15498_v52 = vadd.f32 %v12512_v62, %v3895_v33  ;;  %v15500_v39 = vadd.f32 %v12513_v55, %v3896_v35  ;;  %12819 = vmatmul.mubr.msk.bf16.gmra.mrb[132].mxu1 %vm735_vm0, %v15486_v5  ;;  %v6677_v62 = vld [vmem:[#allocation3 + $0xf1] sm:$0xff] }
 0x2ec   : > { %12867 = vmatmul.mubr.msk.bf16.gmra.mrb[132].mxu0 %vm735_vm0, %v15295_v21  ;;  %v15506_v60 = vadd.f32 %v4226_v56, %v3893_v54  ;;  %v15508_v0 = vadd.f32 %v4229_v16, %v3894_v20  ;;  %12822 = vmatprep.mubr.msk.bf16.mxu1 %vm735_vm0, %v15490_v2  ;;  %v13737_v21 = vld [vmem:[%s16747_s4 + $0xe0] sm:$0xff]   ;;  %v16793_v56 = vld [vmem:[#allocation16_spill] sm:$0xff]  ;;  %v15524_v20 = vpack.c.bf16 %v6678_v59, %v6677_v62 }
 0x2ed   : > { %12870 = vmatprep.mubr.msk.bf16.mxu0 %vm735_vm0, %v15323_v10  ;;  %12835 = vmatpush3.bf16.msra.mxu1 %v13733_v57  ;;  %v6680_v57 = vld [vmem:[#allocation3 + $0x109] sm:$0xff]  ;;  %v7067_v62 = vld [vmem:[#allocation3 + $0x11f] sm:$0xff] }
 0x2ee   : > { %12883 = vmatpush3.bf16.msra.mxu0 %v13734_v12  ;;  %v12468_v3 = vpop.f32.mrb[76].mxu1  ;;  %12836 = vmatprep.subr.bf16.mxu1 %v13735_v38  ;;  %v16794_v12 = vld [vmem:[#allocation15_spill] sm:$0xff]  ;;  %v15528_v15 = vpack.c.bf16 %v6680_v57, %v6679_v7  ;;  %v6640_v7 = vld [vmem:[#allocation2 + $0xc9] sm:$0xff] }
 0x2ef   : > { %v12516_v58 = vpop.f32.mrb[76].mxu0  ;;  %12884 = vmatprep.subr.bf16.mxu0 %v13736_v41  ;;  %v3883_v27 = vmul.f32 %v12468_v3, %v16793_v56  ;;  %v3854_v40 = vpop.f32.mrb[77].mxu1 }
 0x2f0   : > { %v4242_v10 = vpop.f32.mrb[77].mxu0  ;;  %v3881_v24 = vmul.f32 %v16794_v12, %v3854_v40  ;;  %v12469_v55 = vpop.f32.mrb[78].mxu1 }
 0x2f1   : > { %v12517_v33 = vpop.f32.mrb[78].mxu0  ;;  %v3899_v35 = vadd.f32 %v3883_v27, %v15327_v25  ;;  %v3900_v30 = vadd.f32 %v12469_v55, %v15339_v53  ;;  %v3857_v16 = vpop.f32.mrb[79].mxu1  ;;  %12837 = vmatpush3.bf16.msra.mxu1 %v13735_v38  ;;  %v6636_v38 = vld [vmem:[#allocation2 + $0xa9] sm:$0xff] }
 0x2f2   : > { %v4245_v54 = vpop.f32.mrb[79].mxu0  ;;  %12885 = vmatpush3.bf16.msra.mxu0 %v13736_v41  ;;  %v3897_v3 = vadd.f32 %v3881_v24, %v15331_v18  ;;  %v3898_v56 = vadd.f32 %v3857_v16, %v15345_v22  ;;  %12902 = vmatprep.subr.bf16.mxu1 %v13737_v21  ;;  %v6681_v18 = vld [vmem:[#allocation3 + $0x111] sm:$0xff]  ;;  %v6635_v22 = vld [vmem:[#allocation2 + $0xa1] sm:$0xff]  ;;  %v6682_v41 = vld [vmem:[#allocation3 + $0x119] sm:$0xff] }
 0x2f3   : > { %12950 = vmatprep.subr.bf16.mxu0 %v13738_v4  ;;  %v15530_v40 = vadd.f32 %v12516_v58, %v3899_v35  ;;  %v15532_v12 = vadd.f32 %v12517_v33, %v3900_v30  ;;  %12823 = vmatmul.mubr.msk.bf16.gmra.mrb[136].mxu1 %vm735_vm0, %v15524_v20  ;;  %v7068_v58 = vld [vmem:[#allocation3 + $0x127] sm:$0xff]  ;;  %v6651_v59 = vpack.c.bf16 %v6636_v38, %v6635_v22  ;;  %v6642_v35 = vld [vmem:[#allocation2 + $0xd9] sm:$0xff] }
 0x2f4   : > { %12871 = vmatmul.mubr.msk.bf16.gmra.mrb[136].mxu0 %vm735_vm0, %v15325_v1  ;;  %v15538_v25 = vadd.f32 %v4242_v10, %v3897_v3  ;;  %v15540_v53 = vadd.f32 %v4245_v54, %v3898_v56  ;;  %12826 = vmatprep.mubr.msk.bf16.mxu1 %vm735_vm0, %v15528_v15  ;;  %v15546_v27 = vpack.c.bf16 %v6682_v41, %v6681_v18  ;;  %v6638_v56 = vld [vmem:[#allocation2 + $0xb9] sm:$0xff]  ;;  %v6639_v10 = vld [vmem:[#allocation2 + $0xc1] sm:$0xff]  ;;  %v6644_v16 = vld [vmem:[#allocation2 + $0xe9] sm:$0xff] }
 0x2f5   : > { %12874 = vmatprep.mubr.msk.bf16.mxu0 %vm735_vm0, %v15347_v31  ;;  %v7076_v1 = vpack.c.bf16 %v7068_v58, %v7067_v62  ;;  %v6637_v31 = vld [vmem:[#allocation2 + $0xb1] sm:$0xff]  ;;  %v15556_v24 = vpack.c.bf16 %v6640_v7, %v6639_v10  ;;  %v13739_v55 = vld [vmem:[%s16747_s4 + $0xe8] sm:$0xff]   ;;  %v6646_v22 = vld [vmem:[#allocation2 + $0xf9] sm:$0xff] }
 0x2f6   : > { %v15554_v57 = vpack.c.bf16 %v6638_v56, %v6637_v31  ;;  %v13740_v33 = vld [vmem:[%s16747_s4 + $0x108] sm:$0xff]   ;;  %v13741_v54 = vld [vmem:[%s16747_s4 + $0xf0] sm:$0xff]   ;;  %v13744_v3 = vld [vmem:[%s16747_s4 + $0x118] sm:$0xff]  }
 0x2f7   : > { %v6643_v30 = vld [vmem:[#allocation2 + $0xe1] sm:$0xff]  ;;  %v6645_v18 = vld [vmem:[#allocation2 + $0xf1] sm:$0xff]  ;;  %v6648_v41 = vld [vmem:[#allocation2 + $0x109] sm:$0xff] }
 0x2f8   : > { %v6647_v38 = vld [vmem:[#allocation2 + $0x101] sm:$0xff]  ;;  %v15606_v58 = vpack.c.bf16 %v6646_v22, %v6645_v18  ;;  %v15623_v10 = vld [vmem:[%s16748_s5] ss:$0 sm:$0xff] }
 0x2f9   : > { %v15599_v62 = vld [vmem:[%s16746_s3 + $0xe0] sm:$0xff]  }
 0x2fa   : > { %v7035_v31 = vld [vmem:[#allocation2 + $0x11f] sm:$0xff]  ;;  %v7036_v56 = vld [vmem:[#allocation2 + $0x127] sm:$0xff] }
 0x2fb   : > { %12827 = vmatmul.mubr.msk.bf16.gmra.mrb[140].mxu1 %vm735_vm0, %v15546_v27 }
 0x2fc   : > { %12875 = vmatmul.mubr.msk.bf16.gmra.mrb[140].mxu0 %vm735_vm0, %v7076_v1  ;;  %12838 = vmatprep.mubr.msk.bf16.mxu1 %vm735_vm0, %v6651_v59  ;;  %v6649_v59 = vld [vmem:[#allocation2 + $0x111] sm:$0xff]  ;;  %v6650_v1 = vld [vmem:[#allocation2 + $0x119] sm:$0xff] }
 0x2fd   : > { %12886 = vmatprep.mubr.msk.bf16.mxu0 %vm735_vm0, %v15354_v29  ;;  %v6641_v29 = vld [vmem:[#allocation2 + $0xd1] sm:$0xff] }
 0x303   : > { %12839 = vmatmul.mubr.msk.bf16.vlgmr.msra.gmra.mrb[128].mxu1 %vm735_vm0, %v15554_v57 }
 0x304   : > { %12887 = vmatmul.mubr.msk.bf16.vlgmr.msra.gmra.mrb[128].mxu0 %vm735_vm0, %v15356_v6  ;;  %12903 = vmatpush3.bf16.msra.mxu1 %v13737_v21  ;;  %v13742_v6 = vld [vmem:[%s16747_s4 + $0x110] sm:$0xff]   ;;  %v15578_v21 = vpack.c.bf16 %v6642_v35, %v6641_v29  ;;  %v15630_v35 = vpack.c.bf16 %v6650_v1, %v6649_v59 }
 0x305   : > { %12951 = vmatpush3.bf16.msra.mxu0 %v13738_v4  ;;  %12842 = vmatprep.mubr.msk.bf16.mxu1 %vm735_vm0, %v15556_v24  ;;  %v15580_v4 = vpack.c.bf16 %v6644_v16, %v6643_v30  ;;  %v7044_v30 = vpack.c.bf16 %v7036_v56, %v7035_v31  ;;  %v7440_v16 = vld [vmem:[#allocation3 + $0xb8] sm:$0xff] }
 0x306   : > { %12890 = vmatprep.mubr.msk.bf16.mxu0 %vm735_vm0, %v15378_v28  ;;  %12904 = vmatprep.subr.bf16.mxu1 %v13739_v55  ;;  %v13743_v28 = vld [vmem:[%s16747_s4 + $0xf8] sm:$0xff]  }
 0x307   : > { %12952 = vmatprep.subr.bf16.mxu0 %v13740_v33 }
 0x308   : > { %12905 = vmatpush3.bf16.msra.mxu1 %v13739_v55 }
 0x309   : > { %12953 = vmatpush3.bf16.msra.mxu0 %v13740_v33  ;;  %12906 = vmatprep.subr.bf16.mxu1 %v13741_v54 }
 0x30a   : > { %12954 = vmatprep.subr.bf16.mxu0 %v13742_v6 }
 0x30b   : > { %12843 = vmatmul.mubr.msk.bf16.gmra.mrb[132].mxu1 %vm735_vm0, %v15578_v21 }
 0x30c   : > { %12891 = vmatmul.mubr.msk.bf16.gmra.mrb[132].mxu0 %vm735_vm0, %v15380_v19  ;;  %12846 = vmatprep.mubr.msk.bf16.mxu1 %vm735_vm0, %v15580_v4  ;;  %v15604_v19 = vld [vmem:[%s16746_s3 + $0x100] sm:$0xff]  }
 0x30d   : > { %12894 = vmatprep.mubr.msk.bf16.mxu0 %vm735_vm0, %v15406_v9  ;;  %12907 = vmatpush3.bf16.msra.mxu1 %v13741_v54  ;;  %v15608_v9 = vpack.c.bf16 %v6648_v41, %v6647_v38  ;;  %v15635_v54 = vld [vmem:[%s16749_s6] ss:$0 sm:$0xff] }
 0x30e   : > { %12955 = vmatpush3.bf16.msra.mxu0 %v13742_v6  ;;  %12908 = vmatprep.subr.bf16.mxu1 %v13743_v28 }
 0x30f   : > { %12956 = vmatprep.subr.bf16.mxu0 %v13744_v3 }
 0x311   : > { %12909 = vmatpush3.bf16.msra.mxu1 %v13743_v28 }
 0x312   : > { %12957 = vmatpush3.bf16.msra.mxu0 %v13744_v3  ;;  %12926 = vmatprep.subr.bf16.mxu1 %v15599_v62 }
 0x313   : > { %12974 = vmatprep.subr.bf16.mxu0 %v15604_v19  ;;  %12847 = vmatmul.mubr.msk.bf16.gmra.mrb[136].mxu1 %vm735_vm0, %v15606_v58 }
 0x314   : > { %12895 = vmatmul.mubr.msk.bf16.gmra.mrb[136].mxu0 %vm735_vm0, %v15408_v32  ;;  %12850 = vmatprep.mubr.msk.bf16.mxu1 %vm735_vm0, %v15608_v9 }
 0x315   : > { %12898 = vmatprep.mubr.msk.bf16.mxu0 %vm735_vm0, %v15421_v50  ;;  %v7439_v50 = vld [vmem:[#allocation3 + $0xb0] sm:$0xff] }
 0x316   : > { %v12552_v7 = vpop.f32.mrb[80].mxu1  ;;  %v7455_v1 = vpack.c.bf16 %v7440_v16, %v7439_v50 }
 0x317   : > { %v15625_v55 = vpop.f32.mrb[80].mxu0  ;;  %v4647_v32 = vadd.f32 %v12552_v7, %v15428_v23  ;;  %v4566_v33 = vpop.f32.mrb[81].mxu1 }
 0x318   : > { %v15628_v29 = vpop.f32.mrb[81].mxu0  ;;  %v4645_v6 = vadd.f32 %v4566_v33, %v15435_v51  ;;  %v12553_v28 = vpop.f32.mrb[82].mxu1 }
 0x319   : > { %v15638_v3 = vpop.f32.mrb[82].mxu0  ;;  %v4669_v23 = vmul.f32 %v15623_v10, %v4647_v32  ;;  %v4632_v18 = vmul.f32 %v12553_v28, %v14053_v43  ;;  %v4569_v22 = vpop.f32.mrb[83].mxu1  ;;  %v7441_v28 = vld [vmem:[#allocation3 + $0xc0] sm:$0xff] }
 0x31a   : > { %v15642_v38 = vpop.f32.mrb[83].mxu0  ;;  %v4667_v41 = vmul.f32 %v15623_v10, %v4645_v6  ;;  %v4630_v59 = vmul.f32 %v14051_v42, %v4569_v22 }
 0x31b   : > { %v4691_v31 = vadd.f32 %v15635_v54, %v4669_v23  ;;  %v4648_v56 = vadd.f32 %v4632_v18, %v15430_v26  ;;  %12851 = vmatmul.mubr.msk.bf16.gmra.mrb[140].mxu1 %vm735_vm0, %v15630_v35 }
 0x31c   : > { %12899 = vmatmul.mubr.msk.bf16.gmra.mrb[140].mxu0 %vm735_vm0, %v7044_v30  ;;  %v4689_v51 = vadd.f32 %v15635_v54, %v4667_v41  ;;  %v4646_v7 = vadd.f32 %v4630_v59, %v15437_v14  ;;  %12910 = vmatprep.mubr.msk.bf16.mxu1 %vm735_vm0, %v7455_v1  ;;  %v7442_v30 = vld [vmem:[#allocation3 + $0xc8] sm:$0xff] }
 0x31d   : > { %12958 = vmatprep.mubr.msk.bf16.mxu0 %vm735_vm0, %v15446_v8  ;;  %v4707_v32 = vmax.f32 %v4691_v31, 0.0  ;;  %v4670_v33 = vmul.f32 %v15623_v10, %v4648_v56  ;;  %v7443_v31 = vld [vmem:[#allocation3 + $0xd0] sm:$0xff]  ;;  %v7444_v56 = vld [vmem:[#allocation3 + $0xd8] sm:$0xff] }
 0x31e   : > { %v4705_v50 = vmax.f32 %v4689_v51, 0.0  ;;  %v4668_v26 = vmul.f32 %v15623_v10, %v4646_v7  ;;  %v12556_v16 = vpop.f32.mrb[84].mxu1 }
 0x31f   : > { %v15658_v6 = vpop.f32.mrb[84].mxu0  ;;  %4723 = vst.msk [vmem:[#allocation4 + $0x30] sm:$0xff] %vm735_vm0, %v4707_v32  ;;  %v4692_v14 = vadd.f32 %v15635_v54, %v4670_v33  ;;  %v4651_v23 = vadd.f32 %v12556_v16, %v15456_v13  ;;  %v4582_v18 = vpop.f32.mrb[85].mxu1  ;;  %v7456_v16 = vpack.c.bf16 %v7442_v30, %v7441_v28  ;;  %v7457_v28 = vpack.c.bf16 %v7444_v56, %v7443_v31  ;;  %v7445_v31 = vld [vmem:[#allocation3 + $0xe0] sm:$0xff]  ;;  %v7446_v56 = vld [vmem:[#allocation3 + $0xe8] sm:$0xff] }
 0x320   : > { %v15663_v22 = vpop.f32.mrb[85].mxu0  ;;  %4721 = vst.msk [vmem:[#allocation4 + $0x20] sm:$0xff] %vm735_vm0, %v4705_v50  ;;  %v4690_v8 = vadd.f32 %v15635_v54, %v4668_v26  ;;  %v4649_v41 = vadd.f32 %v4582_v18, %v15466_v63  ;;  %v12557_v59 = vpop.f32.mrb[86].mxu1  ;;  %v13747_v63 = vld [vmem:[%s16746_s3 + $0xe8] sm:$0xff]  }
 0x321   : > { %v15668_v1 = vpop.f32.mrb[86].mxu0  ;;  %v4708_v51 = vmax.f32 %v4692_v14, 0.0  ;;  %v4673_v7 = vmul.f32 %v15623_v10, %v4651_v23  ;;  %v4636_v32 = vmul.f32 %v12557_v59, %v14057_v45  ;;  %v4585_v13 = vpop.f32.mrb[87].mxu1  ;;  %v13748_v14 = vld [vmem:[%s16746_s3 + $0x108] sm:$0xff]  }
 0x322   : > { %v15672_v33 = vpop.f32.mrb[87].mxu0  ;;  %v4706_v36 = vmax.f32 %v4690_v8, 0.0  ;;  %v4671_v50 = vmul.f32 %v15623_v10, %v4649_v41  ;;  %v4634_v26 = vmul.f32 %v14055_v44, %v4585_v13  ;;  %v7447_v13 = vld [vmem:[#allocation3 + $0xf0] sm:$0xff] }
 0x323   : > { %4724 = vst.msk [vmem:[#allocation4 + $0x38] sm:$0xff] %vm735_vm0, %v4708_v51  ;;  %v4695_v23 = vadd.f32 %v15635_v54, %v4673_v7  ;;  %v4652_v18 = vadd.f32 %v4636_v32, %v15458_v17  ;;  %12911 = vmatmul.mubr.msk.bf16.vlgmr.msra.gmra.mrb[144].mxu1 %vm735_vm0, %v7456_v16  ;;  %v13750_v17 = vld [vmem:[%s16746_s3 + $0x110] sm:$0xff]   ;;  %v7448_v16 = vld [vmem:[#allocation3 + $0xf8] sm:$0xff] }
 0x324   : > { %12959 = vmatmul.mubr.msk.bf16.vlgmr.msra.gmra.mrb[144].mxu0 %vm735_vm0, %v15464_v61  ;;  %4722 = vst.msk [vmem:[#allocation4 + $0x28] sm:$0xff] %vm735_vm0, %v4706_v36  ;;  %v4693_v30 = vadd.f32 %v15635_v54, %v4671_v50  ;;  %v4650_v8 = vadd.f32 %v4634_v26, %v15468_v11  ;;  %12927 = vmatpush3.bf16.msra.mxu1 %v15599_v62  ;;  %v13749_v36 = vld [vmem:[%s16746_s3 + $0xf0] sm:$0xff]  }
 0x325   : > { %12975 = vmatpush3.bf16.msra.mxu0 %v15604_v19  ;;  %v4711_v41 = vmax.f32 %v4695_v23, 0.0  ;;  %v4674_v59 = vmul.f32 %v15623_v10, %v4652_v18  ;;  %12914 = vmatprep.mubr.msk.bf16.mxu1 %vm735_vm0, %v7457_v28 }
 0x326   : > { %12962 = vmatprep.mubr.msk.bf16.mxu0 %vm735_vm0, %v15486_v5  ;;  %v4709_v61 = vmax.f32 %v4693_v30, 0.0  ;;  %v4672_v11 = vmul.f32 %v15623_v10, %v4650_v8  ;;  %v12560_v62 = vpop.f32.mrb[88].mxu1  ;;  %12928 = vmatprep.subr.bf16.mxu1 %v13747_v63 }
 0x327   : > { %v15704_v19 = vpop.f32.mrb[88].mxu0  ;;  %12976 = vmatprep.subr.bf16.mxu0 %v13748_v14  ;;  %4727 = vst.msk [vmem:[#allocation4 + $0x50] sm:$0xff] %vm735_vm0, %v4711_v41  ;;  %v4696_v5 = vadd.f32 %v15635_v54, %v4674_v59  ;;  %v4655_v51 = vadd.f32 %v12560_v62, %v15498_v52  ;;  %v4598_v7 = vpop.f32.mrb[89].mxu1  ;;  %v7458_v59 = vpack.c.bf16 %v7446_v56, %v7445_v31 }
 0x328   : > { %v15709_v32 = vpop.f32.mrb[89].mxu0  ;;  %4725 = vst.msk [vmem:[#allocation4 + $0x40] sm:$0xff] %vm735_vm0, %v4709_v61  ;;  %v4694_v50 = vadd.f32 %v15635_v54, %v4672_v11  ;;  %v4653_v26 = vadd.f32 %v4598_v7, %v15506_v60  ;;  %v12561_v23 = vpop.f32.mrb[90].mxu1  ;;  %12929 = vmatpush3.bf16.msra.mxu1 %v13747_v63  ;;  %v7459_v62 = vpack.c.bf16 %v7448_v16, %v7447_v13  ;;  %v13751_v63 = vld [vmem:[%s16746_s3 + $0xf8] sm:$0xff]  }
 0x329   : > { %v15714_v18 = vpop.f32.mrb[90].mxu0  ;;  %12977 = vmatpush3.bf16.msra.mxu0 %v13748_v14  ;;  %v4712_v28 = vmax.f32 %v4696_v5, 0.0  ;;  %v4677_v30 = vmul.f32 %v15623_v10, %v4655_v51  ;;  %v4640_v52 = vmul.f32 %v12561_v23, %v14061_v47  ;;  %v4601_v8 = vpop.f32.mrb[91].mxu1  ;;  %12930 = vmatprep.subr.bf16.mxu1 %v13749_v36  ;;  %v13752_v14 = vld [vmem:[%s16746_s3 + $0x118] sm:$0xff]   ;;  %v7450_v23 = vld [vmem:[#allocation3 + $0x108] sm:$0xff] }
 0x32a   : > { %v15718_v41 = vpop.f32.mrb[91].mxu0  ;;  %12978 = vmatprep.subr.bf16.mxu0 %v13750_v17  ;;  %v4710_v61 = vmax.f32 %v4694_v50, 0.0  ;;  %v4675_v11 = vmul.f32 %v15623_v10, %v4653_v26  ;;  %v4638_v60 = vmul.f32 %v14059_v46, %v4601_v8  ;;  %v7449_v26 = vld [vmem:[#allocation3 + $0x100] sm:$0xff] }
 0x32b   : > { %4728 = vst.msk [vmem:[#allocation4 + $0x58] sm:$0xff] %vm735_vm0, %v4712_v28  ;;  %v4699_v31 = vadd.f32 %v15635_v54, %v4677_v30  ;;  %v4656_v56 = vadd.f32 %v4640_v52, %v15500_v39  ;;  %12915 = vmatmul.mubr.msk.bf16.gmra.mrb[148].mxu1 %vm735_vm0, %v7458_v59 }
 0x32c   : > { %12963 = vmatmul.mubr.msk.bf16.gmra.mrb[148].mxu0 %vm735_vm0, %v15490_v2  ;;  %4726 = vst.msk [vmem:[#allocation4 + $0x48] sm:$0xff] %vm735_vm0, %v4710_v61  ;;  %v4697_v5 = vadd.f32 %v15635_v54, %v4675_v11  ;;  %v4654_v51 = vadd.f32 %v4638_v60, %v15508_v0  ;;  %12918 = vmatprep.mubr.msk.bf16.mxu1 %vm735_vm0, %v7459_v62 }
 0x32d   : > { %12966 = vmatprep.mubr.msk.bf16.mxu0 %vm735_vm0, %v15524_v20  ;;  %v4715_v7 = vmax.f32 %v4699_v31, 0.0  ;;  %v4678_v13 = vmul.f32 %v15623_v10, %v4656_v56  ;;  %12931 = vmatpush3.bf16.msra.mxu1 %v13749_v36  ;;  %v7451_v36 = vld [vmem:[#allocation3 + $0x110] sm:$0xff]  ;;  %v7460_v56 = vpack.c.bf16 %v7450_v23, %v7449_v26  ;;  %v7823_v26 = vld [vmem:[#allocation3 + $0x121] sm:$0xff] }
 0x32e   : > { %12979 = vmatpush3.bf16.msra.mxu0 %v13750_v17  ;;  %v4713_v39 = vmax.f32 %v4697_v5, 0.0  ;;  %v4676_v16 = vmul.f32 %v15623_v10, %v4654_v51  ;;  %v12564_v2 = vpop.f32.mrb[92].mxu1  ;;  %12932 = vmatprep.subr.bf16.mxu1 %v13751_v63  ;;  %v7452_v17 = vld [vmem:[#allocation3 + $0x118] sm:$0xff] }
 0x32f   : > { %v15742_v50 = vpop.f32.mrb[92].mxu0  ;;  %12980 = vmatprep.subr.bf16.mxu0 %v13752_v14  ;;  %4731 = vst.msk [vmem:[#allocation4 + $0x70] sm:$0xff] %vm735_vm0, %v4715_v7  ;;  %v4700_v0 = vadd.f32 %v15635_v54, %v4678_v13  ;;  %v4659_v20 = vadd.f32 %v12564_v2, %v15530_v40  ;;  %v4614_v28 = vpop.f32.mrb[93].mxu1  ;;  %v7454_v2 = vld [vmem:[#allocation3 + $0x128] sm:$0xff] }
 0x330   : > { %v15747_v30 = vpop.f32.mrb[93].mxu0  ;;  %4729 = vst.msk [vmem:[#allocation4 + $0x60] sm:$0xff] %vm735_vm0, %v4713_v39  ;;  %v4698_v52 = vadd.f32 %v15635_v54, %v4676_v16  ;;  %v4657_v8 = vadd.f32 %v4614_v28, %v15538_v25  ;;  %v12565_v59 = vpop.f32.mrb[94].mxu1  ;;  %v7461_v25 = vpack.c.bf16 %v7452_v17, %v7451_v36  ;;  %v7453_v16 = vld [vmem:[#allocation3 + $0x120] sm:$0xff] }
 0x331   : > { %v15752_v61 = vpop.f32.mrb[94].mxu0  ;;  %v4716_v11 = vmax.f32 %v4700_v0, 0.0  ;;  %v4681_v60 = vmul.f32 %v15623_v10, %v4659_v20  ;;  %v4644_v62 = vmul.f32 %v12565_v59, %v14065_v49  ;;  %v4617_v40 = vpop.f32.mrb[95].mxu1  ;;  %12933 = vmatpush3.bf16.msra.mxu1 %v13751_v63  ;;  %v7407_v20 = vld [vmem:[#allocation2 + $0xb0] sm:$0xff]  ;;  %v7462_v17 = vpack.c.bf16 %v7454_v2, %v7453_v16 }
 0x332   : > { %v15756_v31 = vpop.f32.mrb[95].mxu0  ;;  %12981 = vmatpush3.bf16.msra.mxu0 %v13752_v14  ;;  %v4714_v5 = vmax.f32 %v4698_v52, 0.0  ;;  %v4679_v51 = vmul.f32 %v15623_v10, %v4657_v8  ;;  %v4642_v7 = vmul.f32 %v14063_v48, %v4617_v40  ;;  %v7411_v40 = vld [vmem:[#allocation2 + $0xd0] sm:$0xff] }
 0x333   : > { %4732 = vst.msk [vmem:[#allocation4 + $0x78] sm:$0xff] %vm735_vm0, %v4716_v11  ;;  %v4703_v13 = vadd.f32 %v15635_v54, %v4681_v60  ;;  %v4660_v39 = vadd.f32 %v4644_v62, %v15532_v12  ;;  %12919 = vmatmul.mubr.msk.bf16.gmra.mrb[152].mxu1 %vm735_vm0, %v7460_v56  ;;  %v7824_v12 = vld [vmem:[#allocation3 + $0x129] sm:$0xff]  ;;  %v7409_v60 = vld [vmem:[#allocation2 + $0xc0] sm:$0xff]  ;;  %v7412_v56 = vld [vmem:[#allocation2 + $0xd8] sm:$0xff] }
 0x334   : > { %12967 = vmatmul.mubr.msk.bf16.gmra.mrb[152].mxu0 %vm735_vm0, %v15528_v15  ;;  %4730 = vst.msk [vmem:[#allocation4 + $0x68] sm:$0xff] %vm735_vm0, %v4714_v5  ;;  %v4701_v63 = vadd.f32 %v15635_v54, %v4679_v51  ;;  %v4658_v14 = vadd.f32 %v4642_v7, %v15540_v53  ;;  %12922 = vmatprep.mubr.msk.bf16.mxu1 %vm735_vm0, %v7461_v25  ;;  %v7408_v15 = vld [vmem:[#allocation2 + $0xb8] sm:$0xff]  ;;  %v7410_v62 = vld [vmem:[#allocation2 + $0xc8] sm:$0xff]  ;;  %v7413_v7 = vld [vmem:[#allocation2 + $0xe0] sm:$0xff] }
 0x335   : > { %12970 = vmatprep.mubr.msk.bf16.mxu0 %vm735_vm0, %v15546_v27  ;;  %v4719_v23 = vmax.f32 %v4703_v13, 0.0  ;;  %v4682_v0 = vmul.f32 %v15623_v10, %v4660_v39  ;;  %v7832_v52 = vpack.c.bf16 %v7824_v12, %v7823_v26  ;;  %v7423_v8 = vpack.c.bf16 %v7408_v15, %v7407_v20  ;;  %v7414_v25 = vld [vmem:[#allocation2 + $0xe8] sm:$0xff]  ;;  %v7415_v13 = vld [vmem:[#allocation2 + $0xf0] sm:$0xff]  ;;  %v7421_v12 = vld [vmem:[#allocation2 + $0x120] sm:$0xff] }
 0x336   : > { %v4717_v28 = vmax.f32 %v4701_v63, 0.0  ;;  %v4680_v36 = vmul.f32 %v15623_v10, %v4658_v14  ;;  %v7424_v5 = vpack.c.bf16 %v7410_v62, %v7409_v60  ;;  %v7425_v51 = vpack.c.bf16 %v7412_v56, %v7411_v40  ;;  %v7418_v63 = vld [vmem:[#allocation2 + $0x108] sm:$0xff]  ;;  %v7419_v14 = vld [vmem:[#allocation2 + $0x110] sm:$0xff] }
 0x337   : > { %4735 = vst.msk [vmem:[#allocation4 + $0x90] sm:$0xff] %vm735_vm0, %v4719_v23  ;;  %v4704_v53 = vadd.f32 %v15635_v54, %v4682_v0  ;;  %v7426_v39 = vpack.c.bf16 %v7414_v25, %v7413_v7  ;;  %v7791_v23 = vld [vmem:[#allocation2 + $0x121] sm:$0xff]  ;;  %v5091_v15 = vmul.f32 %v14035_v34, %v15628_v29 }
 0x338   : > { %4733 = vst.msk [vmem:[#allocation4 + $0x80] sm:$0xff] %vm735_vm0, %v4717_v28  ;;  %v4702_v27 = vadd.f32 %v15635_v54, %v4680_v36  ;;  %v16795_v0 = vld [vmem:[#allocation11_spill] sm:$0xff]  ;;  %v16796_v25 = vld [vmem:[#allocation12_spill] sm:$0xff] }
 0x339   : > { %v4720_v59 = vmax.f32 %v4704_v53, 0.0  ;;  %v5093_v20 = vmul.f32 %v15625_v55, %v16795_v0 }
 0x33a   : > { %v4718_v11 = vmax.f32 %v4702_v27, 0.0 }
 0x33b   : > { %4736 = vst.msk [vmem:[#allocation4 + $0x98] sm:$0xff] %vm735_vm0, %v4720_v59  ;;  %12923 = vmatmul.mubr.msk.bf16.gmra.mrb[156].mxu1 %vm735_vm0, %v7462_v17 }
 0x33c   : > { %12971 = vmatmul.mubr.msk.bf16.gmra.mrb[156].mxu0 %vm735_vm0, %v7832_v52  ;;  %4734 = vst.msk [vmem:[#allocation4 + $0x88] sm:$0xff] %vm735_vm0, %v4718_v11  ;;  %12934 = vmatprep.mubr.msk.bf16.mxu1 %vm735_vm0, %v7423_v8 }
 0x33d   : > { %12982 = vmatprep.mubr.msk.bf16.mxu0 %vm735_vm0, %v15554_v57  ;;  %v7416_v57 = vld [vmem:[#allocation2 + $0xf8] sm:$0xff] }
 0x33e   : > { %v7427_v16 = vpack.c.bf16 %v7416_v57, %v7415_v13  ;;  %v5095_v13 = vmul.f32 %v16796_v25, %v15663_v22 }
 0x343   : > { %12935 = vmatmul.mubr.msk.bf16.vlgmr.msra.gmra.mrb[144].mxu1 %vm735_vm0, %v7424_v5 }
 0x344   : > { %12983 = vmatmul.mubr.msk.bf16.vlgmr.msra.gmra.mrb[144].mxu0 %vm735_vm0, %v15556_v24  ;;  %12938 = vmatprep.mubr.msk.bf16.mxu1 %vm735_vm0, %v7425_v51  ;;  %v7417_v24 = vld [vmem:[#allocation2 + $0x100] sm:$0xff] }
 0x345   : > { %12986 = vmatprep.mubr.msk.bf16.mxu0 %vm735_vm0, %v15578_v21  ;;  %v7420_v21 = vld [vmem:[#allocation2 + $0x118] sm:$0xff]  ;;  %v7428_v2 = vpack.c.bf16 %v7418_v63, %v7417_v24 }
 0x346   : > { %v7429_v26 = vpack.c.bf16 %v7420_v21, %v7419_v14 }
 0x34b   : > { %12939 = vmatmul.mubr.msk.bf16.gmra.mrb[148].mxu1 %vm735_vm0, %v7426_v39 }
 0x34c   : > { %12987 = vmatmul.mubr.msk.bf16.gmra.mrb[148].mxu0 %vm735_vm0, %v15580_v4  ;;  %12942 = vmatprep.mubr.msk.bf16.mxu1 %vm735_vm0, %v7427_v16  ;;  %v7422_v4 = vld [vmem:[#allocation2 + $0x128] sm:$0xff] }
 0x34d   : > { %12990 = vmatprep.mubr.msk.bf16.mxu0 %vm735_vm0, %v15606_v58  ;;  %v7792_v58 = vld [vmem:[#allocation2 + $0x129] sm:$0xff]  ;;  %v7430_v52 = vpack.c.bf16 %v7422_v4, %v7421_v12 }
 0x34e   : > { %v7800_v27 = vpack.c.bf16 %v7792_v58, %v7791_v23 }
 0x353   : > { %12943 = vmatmul.mubr.msk.bf16.gmra.mrb[152].mxu1 %vm735_vm0, %v7428_v2 }
 0x354   : > { %12991 = vmatmul.mubr.msk.bf16.gmra.mrb[152].mxu0 %vm735_vm0, %v15608_v9  ;;  %12946 = vmatprep.mubr.msk.bf16.mxu1 %vm735_vm0, %v7429_v26 }
 0x355   : > { %12994 = vmatprep.mubr.msk.bf16.mxu0 %vm735_vm0, %v15630_v35 }
 0x356   : > { %v12648_v28 = vpop.f32.mrb[96].mxu1 }
 0x357   : > { %v12696_v36 = vpop.f32.mrb[96].mxu0  ;;  %v5479_v53 = vadd.f32 %v12648_v28, %v5093_v20  ;;  %v5414_v17 = vpop.f32.mrb[97].mxu1  ;;  %v16797_v28 = vld [vmem:[#allocation14_spill] sm:$0xff] }
 0x358   : > { %v5784_v9 = vpop.f32.mrb[97].mxu0  ;;  %v5477_v8 = vadd.f32 %v5414_v17, %v5091_v15  ;;  %v12649_v59 = vpop.f32.mrb[98].mxu1 }
 0x359   : > { %v12697_v11 = vpop.f32.mrb[98].mxu0  ;;  %v15807_v35 = vadd.f32 %v12696_v36, %v5479_v53  ;;  %v5480_v60 = vadd.f32 %v12649_v59, %v15638_v3  ;;  %v5417_v55 = vpop.f32.mrb[99].mxu1  ;;  %v5097_v3 = vmul.f32 %v15658_v6, %v14041_v37  ;;  %v5101_v36 = vmul.f32 %v15704_v19, %v16797_v28  ;;  %v16798_v53 = vld [vmem:[#allocation13_spill] sm:$0xff] }
 0x35a   : > { %v5850_v62 = vmul.f32 %v12697_v11, %v14053_v43  ;;  %v5787_v40 = vpop.f32.mrb[99].mxu0  ;;  %v15811_v56 = vadd.f32 %v5784_v9, %v5477_v8  ;;  %v5478_v29 = vadd.f32 %v5417_v55, %v15642_v38 }
 0x35b   : > { %v5848_v5 = vmul.f32 %v14051_v42, %v5787_v40  ;;  %12947 = vmatmul.mubr.msk.bf16.gmra.mrb[156].mxu1 %vm735_vm0, %v7430_v52 }
 0x35c   : > { %12995 = vmatmul.mubr.msk.bf16.gmra.mrb[156].mxu0 %vm735_vm0, %v7800_v27  ;;  %v15817_v51 = vadd.f32 %v5850_v62, %v5480_v60 }
 0x35d   : > { %v15819_v7 = vadd.f32 %v5848_v5, %v5478_v29 }
 0x35e   : > { %v12652_v57 = vpop.f32.mrb[100].mxu1 }
 0x35f   : > { %v12700_v39 = vpop.f32.mrb[100].mxu0  ;;  %v5483_v16 = vadd.f32 %v12652_v57, %v5097_v3  ;;  %v5430_v38 = vpop.f32.mrb[101].mxu1  ;;  %v16799_v57 = vld [vmem:[#allocation16_spill] sm:$0xff] }
 0x360   : > { %v5800_v24 = vpop.f32.mrb[101].mxu0  ;;  %v5481_v63 = vadd.f32 %v5430_v38, %v5095_v13  ;;  %v12653_v14 = vpop.f32.mrb[102].mxu1 }
 0x361   : > { %v12701_v21 = vpop.f32.mrb[102].mxu0  ;;  %v15825_v2 = vadd.f32 %v12700_v39, %v5483_v16  ;;  %v5484_v26 = vadd.f32 %v12653_v14, %v15668_v1  ;;  %v5433_v4 = vpop.f32.mrb[103].mxu1  ;;  %v5099_v1 = vmul.f32 %v16798_v53, %v15709_v32  ;;  %v5105_v39 = vmul.f32 %v15742_v50, %v16799_v57  ;;  %v16800_v16 = vld [vmem:[#allocation15_spill] sm:$0xff] }
 0x362   : > { %v5854_v12 = vmul.f32 %v12701_v21, %v14057_v45  ;;  %v5803_v23 = vpop.f32.mrb[103].mxu0  ;;  %v15829_v6 = vadd.f32 %v5800_v24, %v5481_v63  ;;  %v5482_v22 = vadd.f32 %v5433_v4, %v15672_v33 }
 0x363   : > { %v5852_v58 = vmul.f32 %v14055_v44, %v5803_v23 }
 0x364   : > { %v15833_v20 = vadd.f32 %v5854_v12, %v5484_v26 }
 0x365   : > { %v15835_v15 = vadd.f32 %v5852_v58, %v5482_v22 }
 0x366   : > { %v12656_v17 = vpop.f32.mrb[104].mxu1 }
 0x367   : > { %v12704_v9 = vpop.f32.mrb[104].mxu0  ;;  %v5487_v52 = vadd.f32 %v12656_v17, %v5101_v36  ;;  %v5446_v27 = vpop.f32.mrb[105].mxu1 }
 0x368   : > { %v5816_v8 = vpop.f32.mrb[105].mxu0  ;;  %v5485_v59 = vadd.f32 %v5446_v27, %v5099_v1  ;;  %v12657_v11 = vpop.f32.mrb[106].mxu1 }
 0x369   : > { %v12705_v33 = vpop.f32.mrb[106].mxu0  ;;  %v15841_v60 = vadd.f32 %v12704_v9, %v5487_v52  ;;  %v5488_v62 = vadd.f32 %v12657_v11, %v15714_v18  ;;  %v5449_v40 = vpop.f32.mrb[107].mxu1  ;;  %v5103_v18 = vmul.f32 %v16800_v16, %v15747_v30 }
 0x36a   : > { %v5858_v55 = vmul.f32 %v12705_v33, %v14061_v47  ;;  %v5819_v29 = vpop.f32.mrb[107].mxu0  ;;  %v15845_v19 = vadd.f32 %v5816_v8, %v5485_v59  ;;  %v5486_v32 = vadd.f32 %v5449_v40, %v15718_v41 }
 0x36b   : > { %v5856_v5 = vmul.f32 %v14059_v46, %v5819_v29 }
 0x36c   : > { %v15849_v3 = vadd.f32 %v5858_v55, %v5488_v62 }
 0x36d   : > { %v15851_v13 = vadd.f32 %v5856_v5, %v5486_v32 }
 0x36e   : > { %v12660_v38 = vpop.f32.mrb[108].mxu1 }
 0x36f   : > { %v12708_v24 = vpop.f32.mrb[108].mxu0  ;;  %v5491_v63 = vadd.f32 %v12660_v38, %v5105_v39  ;;  %v5462_v14 = vpop.f32.mrb[109].mxu1 }
 0x370   : > { %v5832_v21 = vpop.f32.mrb[109].mxu0  ;;  %v5489_v26 = vadd.f32 %v5462_v14, %v5103_v18  ;;  %v12661_v12 = vpop.f32.mrb[110].mxu1 }
 0x371   : > { %v12709_v41 = vpop.f32.mrb[110].mxu0  ;;  %v15857_v4 = vadd.f32 %v12708_v24, %v5491_v63  ;;  %v5492_v23 = vadd.f32 %v12661_v12, %v15752_v61  ;;  %v5465_v58 = vpop.f32.mrb[111].mxu1 }
 0x372   : > { %v5862_v22 = vmul.f32 %v12709_v41, %v14065_v49  ;;  %v5835_v36 = vpop.f32.mrb[111].mxu0  ;;  %v15861_v50 = vadd.f32 %v5832_v21, %v5489_v26  ;;  %v5490_v30 = vadd.f32 %v5465_v58, %v15756_v31 }
 0x373   : > { %v5860_v1 = vmul.f32 %v14063_v48, %v5835_v36 }
 0x374   : > { %v15865_v17 = vadd.f32 %v5862_v22, %v5492_v23 }
 0x375   : > { %v15867_v9 = vadd.f32 %v5860_v1, %v5490_v30 }
 0x396   : > { %v12744_v52 = vpop.f32.mrb[112].mxu1 }
 0x397   : > { %v12792_v27 = vpop.f32.mrb[112].mxu0  ;;  %v6235_v8 = vmul.f32 %v12744_v52, %v16795_v0  ;;  %v6170_v59 = vpop.f32.mrb[113].mxu1 }
 0x398   : > { %v6556_v61 = vpop.f32.mrb[113].mxu0  ;;  %v6233_v11 = vmul.f32 %v14035_v34, %v6170_v59  ;;  %v12745_v33 = vpop.f32.mrb[114].mxu1 }
 0x399   : > { %v12793_v62 = vpop.f32.mrb[114].mxu0  ;;  %v6251_v55 = vadd.f32 %v6235_v8, %v15807_v35  ;;  %v6252_v31 = vadd.f32 %v12745_v33, %v15817_v51  ;;  %v6173_v40 = vpop.f32.mrb[115].mxu1 }
 0x39a   : > { %v6559_v29 = vpop.f32.mrb[115].mxu0  ;;  %v6249_v32 = vadd.f32 %v6233_v11, %v15811_v56  ;;  %v6250_v5 = vadd.f32 %v6173_v40, %v15819_v7 }
 0x39b   : > { %v6621_v39 = vadd.f32 %v12792_v27, %v6251_v55  ;;  %v15875_v18 = vadd.f32 %v12793_v62, %v6252_v31 }
 0x39c   : > { %v6619_v38 = vadd.f32 %v6556_v61, %v6249_v32  ;;  %v15877_v24 = vadd.f32 %v6559_v29, %v6250_v5 }
 0x39e   : > { %v12748_v63 = vpop.f32.mrb[116].mxu1 }
 0x39f   : > { %v12796_v14 = vpop.f32.mrb[116].mxu0  ;;  %v6239_v21 = vmul.f32 %v12748_v63, %v14041_v37  ;;  %v6186_v26 = vpop.f32.mrb[117].mxu1 }
 0x3a0   : > { %v6572_v35 = vpop.f32.mrb[117].mxu0  ;;  %v6237_v51 = vmul.f32 %v16796_v25, %v6186_v26  ;;  %v12749_v12 = vpop.f32.mrb[118].mxu1 }
 0x3a1   : > { %v12797_v41 = vpop.f32.mrb[118].mxu0  ;;  %v6255_v56 = vadd.f32 %v6239_v21, %v15825_v2  ;;  %v6256_v7 = vadd.f32 %v12749_v12, %v15833_v20  ;;  %v6189_v23 = vpop.f32.mrb[119].mxu1 }
 0x3a2   : > { %v6575_v22 = vpop.f32.mrb[119].mxu0  ;;  %v6253_v58 = vadd.f32 %v6237_v51, %v15829_v6  ;;  %v6254_v36 = vadd.f32 %v6189_v23, %v15835_v15 }
 0x3a3   : > { %v6625_v30 = vadd.f32 %v12796_v14, %v6255_v56  ;;  %v15885_v1 = vadd.f32 %v12797_v41, %v6256_v7 }
 0x3a4   : > { %v15887_v52 = vadd.f32 %v6572_v35, %v6253_v58  ;;  %v15889_v27 = vadd.f32 %v6575_v22, %v6254_v36 }
 0x3a6   : > { %v12752_v8 = vpop.f32.mrb[120].mxu1 }
 0x3a7   : > { %v12800_v59 = vpop.f32.mrb[120].mxu0  ;;  %v6243_v61 = vmul.f32 %v12752_v8, %v16797_v28  ;;  %v6202_v2 = vpop.f32.mrb[121].mxu1 }
 0x3a8   : > { %v6588_v11 = vpop.f32.mrb[121].mxu0  ;;  %v6241_v20 = vmul.f32 %v16798_v53, %v6202_v2  ;;  %v12753_v33 = vpop.f32.mrb[122].mxu1 }
 0x3a9   : > { %v12801_v62 = vpop.f32.mrb[122].mxu0  ;;  %v6259_v6 = vadd.f32 %v6243_v61, %v15841_v60  ;;  %v6260_v15 = vadd.f32 %v12753_v33, %v15849_v3  ;;  %v6205_v55 = vpop.f32.mrb[123].mxu1 }
 0x3aa   : > { %v6591_v31 = vpop.f32.mrb[123].mxu0  ;;  %v6257_v40 = vadd.f32 %v6241_v20, %v15845_v19  ;;  %v6258_v29 = vadd.f32 %v6205_v55, %v15851_v13 }
 0x3ab   : > { %v15897_v32 = vadd.f32 %v12800_v59, %v6259_v6  ;;  %v15899_v5 = vadd.f32 %v12801_v62, %v6260_v15 }
 0x3ac   : > { %v15901_v63 = vadd.f32 %v6588_v11, %v6257_v40  ;;  %v15903_v14 = vadd.f32 %v6591_v31, %v6258_v29 }
 0x3ae   : > { %v12756_v21 = vpop.f32.mrb[124].mxu1 }
 0x3af   : > { %v12804_v26 = vpop.f32.mrb[124].mxu0  ;;  %v6247_v60 = vmul.f32 %v12756_v21, %v16799_v57  ;;  %v6218_v35 = vpop.f32.mrb[125].mxu1 }
 0x3b0   : > { %v6604_v3 = vpop.f32.mrb[125].mxu0  ;;  %v6245_v51 = vmul.f32 %v16800_v16, %v6218_v35  ;;  %v12757_v12 = vpop.f32.mrb[126].mxu1 }
 0x3b1   : > { %v12805_v19 = vpop.f32.mrb[126].mxu0  ;;  %v6263_v13 = vadd.f32 %v6247_v60, %v15857_v4  ;;  %v6264_v41 = vadd.f32 %v12757_v12, %v15865_v17  ;;  %v6221_v56 = vpop.f32.mrb[127].mxu1 }
 0x3b2   : > { %v6607_v7 = vpop.f32.mrb[127].mxu0  ;;  %v6261_v23 = vadd.f32 %v6245_v51, %v15861_v50  ;;  %v6262_v22 = vadd.f32 %v6221_v56, %v15867_v9 }
 0x3b3   : > { %v15911_v58 = vadd.f32 %v12804_v26, %v6263_v13  ;;  %v15913_v36 = vadd.f32 %v12805_v19, %v6264_v41 }
 0x3b4   : > { %v15915_v8 = vadd.f32 %v6604_v3, %v6261_v23  ;;  %v15917_v59 = vadd.f32 %v6607_v7, %v6262_v22 }
 0x3d6   : > { %v12840_v61 = vpop.f32.mrb[128].mxu1 }
 0x3d7   : > { %v12888_v2 = vpop.f32.mrb[128].mxu0  ;;  %v7007_v11 = vadd.f32 %v12840_v61, %v6621_v39  ;;  %v6926_v17 = vpop.f32.mrb[129].mxu1 }
 0x3d8   : > { %v7377_v4 = vmul.f32 %v12888_v2, %v16795_v0  ;;  %v7312_v20 = vpop.f32.mrb[129].mxu0  ;;  %v7005_v33 = vadd.f32 %v6926_v17, %v6619_v38  ;;  %v12841_v62 = vpop.f32.mrb[130].mxu1 }
 0x3d9   : > { %v7375_v50 = vmul.f32 %v14035_v34, %v7312_v20  ;;  %v12889_v9 = vpop.f32.mrb[130].mxu0  ;;  %v6992_v6 = vmul.f32 %v12841_v62, %v14053_v43  ;;  %v6929_v15 = vpop.f32.mrb[131].mxu1 }
 0x3da   : > { %v7315_v55 = vpop.f32.mrb[131].mxu0  ;;  %v15922_v31 = vadd.f32 %v7377_v4, %v7007_v11  ;;  %v6990_v40 = vmul.f32 %v14051_v42, %v6929_v15 }
 0x3db   : > { %v15925_v29 = vadd.f32 %v7375_v50, %v7005_v33  ;;  %v7008_v39 = vadd.f32 %v6992_v6, %v15875_v18 }
 0x3dc   : > { %v7006_v0 = vadd.f32 %v6990_v40, %v15877_v24 }
 0x3dd   : > { %v15929_v21 = vadd.f32 %v12889_v9, %v7008_v39 }
 0x3de   : > { %v15931_v38 = vadd.f32 %v7315_v55, %v7006_v0  ;;  %v12844_v26 = vpop.f32.mrb[132].mxu1 }
 0x3df   : > { %v12892_v60 = vpop.f32.mrb[132].mxu0  ;;  %v7011_v35 = vadd.f32 %v12844_v26, %v6625_v30  ;;  %v6942_v51 = vpop.f32.mrb[133].mxu1 }
 0x3e0   : > { %v7381_v3 = vmul.f32 %v12892_v60, %v14041_v37  ;;  %v7328_v12 = vpop.f32.mrb[133].mxu0  ;;  %v7009_v19 = vadd.f32 %v6942_v51, %v15887_v52  ;;  %v12845_v41 = vpop.f32.mrb[134].mxu1 }
 0x3e1   : > { %v7379_v13 = vmul.f32 %v16796_v25, %v7328_v12  ;;  %v12893_v56 = vpop.f32.mrb[134].mxu0  ;;  %v6996_v18 = vmul.f32 %v12845_v41, %v14057_v45  ;;  %v6945_v24 = vpop.f32.mrb[135].mxu1 }
 0x3e2   : > { %v7331_v7 = vpop.f32.mrb[135].mxu0  ;;  %v15937_v23 = vadd.f32 %v7381_v3, %v7011_v35  ;;  %v6994_v22 = vmul.f32 %v14055_v44, %v6945_v24 }
 0x3e3   : > { %v15940_v61 = vadd.f32 %v7379_v13, %v7009_v19  ;;  %v7012_v30 = vadd.f32 %v6996_v18, %v15885_v1 }
 0x3e4   : > { %v7010_v2 = vadd.f32 %v6994_v22, %v15889_v27 }
 0x3e5   : > { %v15944_v11 = vadd.f32 %v12893_v56, %v7012_v30 }
 0x3e6   : > { %v15946_v52 = vadd.f32 %v7331_v7, %v7010_v2  ;;  %v12848_v25 = vpop.f32.mrb[136].mxu1 }
 0x3e7   : > { %v12896_v4 = vpop.f32.mrb[136].mxu0  ;;  %v7015_v17 = vadd.f32 %v12848_v25, %v15897_v32  ;;  %v6958_v33 = vpop.f32.mrb[137].mxu1 }
 0x3e8   : > { %v7385_v20 = vmul.f32 %v12896_v4, %v16797_v28  ;;  %v7344_v50 = vpop.f32.mrb[137].mxu0  ;;  %v7013_v62 = vadd.f32 %v6958_v33, %v15901_v63  ;;  %v12849_v6 = vpop.f32.mrb[138].mxu1 }
 0x3e9   : > { %v7383_v9 = vmul.f32 %v16798_v53, %v7344_v50  ;;  %v12897_v1 = vpop.f32.mrb[138].mxu0  ;;  %v7000_v27 = vmul.f32 %v12849_v6, %v14061_v47  ;;  %v6961_v15 = vpop.f32.mrb[139].mxu1 }
 0x3ea   : > { %v7347_v55 = vpop.f32.mrb[139].mxu0  ;;  %v15953_v40 = vadd.f32 %v7385_v20, %v7015_v17  ;;  %v6998_v39 = vmul.f32 %v14059_v46, %v6961_v15 }
 0x3eb   : > { %v15956_v0 = vadd.f32 %v7383_v9, %v7013_v62  ;;  %v7016_v28 = vadd.f32 %v7000_v27, %v15899_v5 }
 0x3ec   : > { %v7014_v32 = vadd.f32 %v6998_v39, %v15903_v14 }
 0x3ed   : > { %v15960_v26 = vadd.f32 %v12897_v1, %v7016_v28 }
 0x3ee   : > { %v15962_v63 = vadd.f32 %v7347_v55, %v7014_v32  ;;  %v12852_v53 = vpop.f32.mrb[140].mxu1 }
 0x3ef   : > { %v12900_v60 = vpop.f32.mrb[140].mxu0  ;;  %v7019_v35 = vadd.f32 %v12852_v53, %v15911_v58  ;;  %v6974_v51 = vpop.f32.mrb[141].mxu1 }
 0x3f0   : > { %v7389_v3 = vmul.f32 %v12900_v60, %v16799_v57  ;;  %v7360_v12 = vpop.f32.mrb[141].mxu0  ;;  %v7017_v19 = vadd.f32 %v6974_v51, %v15915_v8  ;;  %v12853_v41 = vpop.f32.mrb[142].mxu1 }
 0x3f1   : > { %v7387_v13 = vmul.f32 %v16800_v16, %v7360_v12  ;;  %v12901_v5 = vpop.f32.mrb[142].mxu0  ;;  %v7004_v14 = vmul.f32 %v12853_v41, %v14065_v49  ;;  %v6977_v56 = vpop.f32.mrb[143].mxu1 }
 0x3f2   : > { %v7363_v18 = vpop.f32.mrb[143].mxu0  ;;  %v15969_v24 = vadd.f32 %v7389_v3, %v7019_v35  ;;  %v7002_v7 = vmul.f32 %v14063_v48, %v6977_v56 }
 0x3f3   : > { %v15972_v22 = vadd.f32 %v7387_v13, %v7017_v19  ;;  %v7020_v57 = vadd.f32 %v7004_v14, %v15913_v36 }
 0x3f4   : > { %v7018_v58 = vadd.f32 %v7002_v7, %v15917_v59 }
 0x3f5   : > { %v15976_v30 = vadd.f32 %v12901_v5, %v7020_v57 }
 0x3f6   : > { %v15978_v8 = vadd.f32 %v7363_v18, %v7018_v58 }
 0x416   : > { %v12936_v16 = vpop.f32.mrb[144].mxu1 }
 0x417   : > { %v12984_v2 = vpop.f32.mrb[144].mxu0  ;;  %v7763_v25 = vadd.f32 %v12936_v16, %v15922_v31  ;;  %v7698_v4 = vpop.f32.mrb[145].mxu1 }
 0x418   : > { %v8068_v17 = vpop.f32.mrb[145].mxu0  ;;  %v7761_v20 = vadd.f32 %v7698_v4, %v15925_v29  ;;  %v12937_v33 = vpop.f32.mrb[146].mxu1  ;;  %v16006_v4 = vld [vmem:[%s16748_s5] ss:$0 sm:$0xff] }
 0x419   : > { %v12985_v50 = vpop.f32.mrb[146].mxu0  ;;  %v8149_v62 = vadd.f32 %v12984_v2, %v7763_v25  ;;  %v7764_v9 = vadd.f32 %v12937_v33, %v15929_v21  ;;  %v7701_v59 = vpop.f32.mrb[147].mxu1 }
 0x41a   : > { %v8134_v36 = vmul.f32 %v12985_v50, %v14053_v43  ;;  %v8071_v6 = vpop.f32.mrb[147].mxu0  ;;  %v8147_v1 = vadd.f32 %v8068_v17, %v7761_v20  ;;  %v7762_v27 = vadd.f32 %v7701_v59, %v15931_v38 }
 0x41b   : > { %v8132_v15 = vmul.f32 %v14051_v42, %v8071_v6  ;;  %v8165_v31 = vmul.f32 %v15623_v10, %v8149_v62 }
 0x41c   : > { %v8150_v55 = vadd.f32 %v8134_v36, %v7764_v9  ;;  %v8163_v39 = vmul.f32 %v15623_v10, %v8147_v1  ;;  %v16018_v1 = vld [vmem:[%s16749_s6] ss:$0 sm:$0xff] }
 0x41d   : > { %v8148_v29 = vadd.f32 %v8132_v15, %v7762_v27  ;;  %v8181_v28 = vadd.f32 %v15635_v54, %v8165_v31 }
 0x41e   : > { %v8166_v32 = vmul.f32 %v15623_v10, %v8150_v55  ;;  %v8179_v21 = vadd.f32 %v15635_v54, %v8163_v39  ;;  %v12940_v60 = vpop.f32.mrb[148].mxu1 }
 0x41f   : > { %v8164_v53 = vmul.f32 %v15623_v10, %v8148_v29  ;;  %v12988_v35 = vpop.f32.mrb[148].mxu0  ;;  %v8197_v3 = vmax.f32 %v8181_v28, 0.0  ;;  %v7767_v51 = vadd.f32 %v12940_v60, %v15937_v23  ;;  %v7714_v12 = vpop.f32.mrb[149].mxu1 }
 0x420   : > { %v8182_v38 = vadd.f32 %v15635_v54, %v8166_v32  ;;  %v8084_v19 = vpop.f32.mrb[149].mxu0  ;;  %v8195_v13 = vmax.f32 %v8179_v21, 0.0  ;;  %v7765_v5 = vadd.f32 %v7714_v12, %v15940_v61  ;;  %v12941_v14 = vpop.f32.mrb[150].mxu1 }
 0x421   : > { %v8180_v41 = vadd.f32 %v15635_v54, %v8164_v53  ;;  %v12989_v56 = vpop.f32.mrb[150].mxu0  ;;  %8213 = vst.msk [vmem:[#allocation4 + $0xb0] sm:$0xff] %vm735_vm0, %v8197_v3  ;;  %v8153_v10 = vadd.f32 %v12988_v35, %v7767_v51  ;;  %v7768_v7 = vadd.f32 %v12941_v14, %v15944_v11  ;;  %v7717_v58 = vpop.f32.mrb[151].mxu1 }
 0x422   : > { %v8198_v18 = vmax.f32 %v8182_v38, 0.0  ;;  %v8138_v57 = vmul.f32 %v12989_v56, %v14057_v45  ;;  %v8087_v16 = vpop.f32.mrb[151].mxu0  ;;  %8211 = vst.msk [vmem:[#allocation4 + $0xa0] sm:$0xff] %vm735_vm0, %v8195_v13  ;;  %v8151_v2 = vadd.f32 %v8084_v19, %v7765_v5  ;;  %v7766_v25 = vadd.f32 %v7717_v58, %v15946_v52 }
 0x423   : > { %v8196_v23 = vmax.f32 %v8180_v41, 0.0  ;;  %v8136_v61 = vmul.f32 %v14055_v44, %v8087_v16  ;;  %v8169_v11 = vmul.f32 %v16006_v4, %v8153_v10 }
 0x424   : > { %8214 = vst.msk [vmem:[#allocation4 + $0xb8] sm:$0xff] %vm735_vm0, %v8198_v18  ;;  %v8154_v17 = vadd.f32 %v8138_v57, %v7768_v7  ;;  %v8167_v20 = vmul.f32 %v16006_v4, %v8151_v2 }
 0x425   : > { %8212 = vst.msk [vmem:[#allocation4 + $0xa8] sm:$0xff] %vm735_vm0, %v8196_v23  ;;  %v8152_v33 = vadd.f32 %v8136_v61, %v7766_v25  ;;  %v8185_v50 = vadd.f32 %v15635_v54, %v8169_v11 }
 0x426   : > { %v8170_v52 = vmul.f32 %v16006_v4, %v8154_v17  ;;  %v8183_v62 = vadd.f32 %v15635_v54, %v8167_v20  ;;  %v12944_v36 = vpop.f32.mrb[152].mxu1 }
 0x427   : > { %v8168_v9 = vmul.f32 %v16006_v4, %v8152_v33  ;;  %v12992_v59 = vpop.f32.mrb[152].mxu0  ;;  %v8201_v6 = vmax.f32 %v8185_v50, 0.0  ;;  %v7771_v15 = vadd.f32 %v12944_v36, %v15953_v40  ;;  %v7730_v31 = vpop.f32.mrb[153].mxu1 }
 0x428   : > { %v8186_v27 = vadd.f32 %v16018_v1, %v8170_v52  ;;  %v8100_v55 = vpop.f32.mrb[153].mxu0  ;;  %v8199_v39 = vmax.f32 %v8183_v62, 0.0  ;;  %v7769_v54 = vadd.f32 %v7730_v31, %v15956_v0  ;;  %v12945_v28 = vpop.f32.mrb[154].mxu1 }
 0x429   : > { %v8184_v29 = vadd.f32 %v16018_v1, %v8168_v9  ;;  %v12993_v32 = vpop.f32.mrb[154].mxu0  ;;  %8217 = vst.msk [vmem:[#allocation4 + $0xd0] sm:$0xff] %vm735_vm0, %v8201_v6  ;;  %v8157_v53 = vadd.f32 %v12992_v59, %v7771_v15  ;;  %v7772_v60 = vadd.f32 %v12945_v28, %v15960_v26  ;;  %v7733_v3 = vpop.f32.mrb[155].mxu1 }
 0x42a   : > { %v8202_v21 = vmax.f32 %v8186_v27, 0.0  ;;  %v8142_v35 = vmul.f32 %v12993_v32, %v14061_v47  ;;  %v8103_v38 = vpop.f32.mrb[155].mxu0  ;;  %8215 = vst.msk [vmem:[#allocation4 + $0xc0] sm:$0xff] %vm735_vm0, %v8199_v39  ;;  %v8155_v51 = vadd.f32 %v8100_v55, %v7769_v54  ;;  %v7770_v12 = vadd.f32 %v7733_v3, %v15962_v63 }
 0x42b   : > { %v8200_v40 = vmax.f32 %v8184_v29, 0.0  ;;  %v8140_v0 = vmul.f32 %v14059_v46, %v8103_v38  ;;  %v8173_v19 = vmul.f32 %v16006_v4, %v8157_v53 }
 0x42c   : > { %8218 = vst.msk [vmem:[#allocation4 + $0xd8] sm:$0xff] %vm735_vm0, %v8202_v21  ;;  %v8158_v13 = vadd.f32 %v8142_v35, %v7772_v60  ;;  %v8171_v26 = vmul.f32 %v16006_v4, %v8155_v51 }
 0x42d   : > { %8216 = vst.msk [vmem:[#allocation4 + $0xc8] sm:$0xff] %vm735_vm0, %v8200_v40  ;;  %v8156_v41 = vadd.f32 %v8140_v0, %v7770_v12  ;;  %v8189_v5 = vadd.f32 %v16018_v1, %v8173_v19 }
 0x42e   : > { %v8174_v14 = vmul.f32 %v16006_v4, %v8158_v13  ;;  %v8187_v56 = vadd.f32 %v16018_v1, %v8171_v26  ;;  %v12948_v18 = vpop.f32.mrb[156].mxu1 }
 0x42f   : > { %v8172_v63 = vmul.f32 %v16006_v4, %v8156_v41  ;;  %v12996_v10 = vpop.f32.mrb[156].mxu0  ;;  %v8205_v7 = vmax.f32 %v8189_v5, 0.0  ;;  %v7775_v58 = vadd.f32 %v12948_v18, %v15969_v24  ;;  %v7746_v16 = vpop.f32.mrb[157].mxu1 }
 0x430   : > { %v8190_v57 = vadd.f32 %v16018_v1, %v8174_v14  ;;  %v8116_v23 = vpop.f32.mrb[157].mxu0  ;;  %v8203_v2 = vmax.f32 %v8187_v56, 0.0  ;;  %v7773_v61 = vadd.f32 %v7746_v16, %v15972_v22  ;;  %v12949_v11 = vpop.f32.mrb[158].mxu1 }
 0x431   : > { %v8188_v25 = vadd.f32 %v16018_v1, %v8172_v63  ;;  %v12997_v17 = vpop.f32.mrb[158].mxu0  ;;  %8221 = vst.msk [vmem:[#allocation4 + $0xf0] sm:$0xff] %vm735_vm0, %v8205_v7  ;;  %v8161_v33 = vadd.f32 %v12996_v10, %v7775_v58  ;;  %v7776_v50 = vadd.f32 %v12949_v11, %v15976_v30  ;;  %v7749_v62 = vpop.f32.mrb[159].mxu1 }
 0x432   : > { %v8206_v20 = vmax.f32 %v8190_v57, 0.0  ;;  %v8146_v52 = vmul.f32 %v12997_v17, %v14065_v49  ;;  %v8119_v9 = vpop.f32.mrb[159].mxu0  ;;  %8219 = vst.msk [vmem:[#allocation4 + $0xe0] sm:$0xff] %vm735_vm0, %v8203_v2  ;;  %v8159_v36 = vadd.f32 %v8116_v23, %v7773_v61  ;;  %v7774_v59 = vadd.f32 %v7749_v62, %v15978_v8 }
 0x433   : > { %v8204_v24 = vmax.f32 %v8188_v25, 0.0  ;;  %v8144_v22 = vmul.f32 %v14063_v48, %v8119_v9  ;;  %v8177_v6 = vmul.f32 %v16006_v4, %v8161_v33 }
 0x434   : > { %8222 = vst.msk [vmem:[#allocation4 + $0xf8] sm:$0xff] %vm735_vm0, %v8206_v20  ;;  %v8162_v27 = vadd.f32 %v8146_v52, %v7776_v50  ;;  %v8175_v30 = vmul.f32 %v16006_v4, %v8159_v36 }
 0x435   : > { %8220 = vst.msk [vmem:[#allocation4 + $0xe8] sm:$0xff] %vm735_vm0, %v8204_v24  ;;  %v8160_v15 = vadd.f32 %v8144_v22, %v7774_v59  ;;  %v8193_v31 = vadd.f32 %v16018_v1, %v8177_v6 }
 0x436   : > { %v8178_v55 = vmul.f32 %v16006_v4, %v8162_v27  ;;  %v8191_v39 = vadd.f32 %v16018_v1, %v8175_v30 }
 0x437   : > { %v8176_v8 = vmul.f32 %v16006_v4, %v8160_v15  ;;  %v8209_v29 = vmax.f32 %v8193_v31, 0.0 }
 0x438   : > { %v8194_v54 = vadd.f32 %v16018_v1, %v8178_v55  ;;  %v8207_v28 = vmax.f32 %v8191_v39, 0.0 }
 0x439   : > { %v8192_v32 = vadd.f32 %v16018_v1, %v8176_v8  ;;  %8225 = vst.msk [vmem:[#allocation4 + $0x110] sm:$0xff] %vm735_vm0, %v8209_v29 }
 0x43a   : > { %v8210_v21 = vmax.f32 %v8194_v54, 0.0  ;;  %8223 = vst.msk [vmem:[#allocation4 + $0x100] sm:$0xff] %vm735_vm0, %v8207_v28 }
 0x43b   : > { %v8208_v53 = vmax.f32 %v8192_v32, 0.0 }
 0x43c   : > { %8226 = vst.msk [vmem:[#allocation4 + $0x118] sm:$0xff] %vm735_vm0, %v8210_v21 }
 0x43d   : > { %8224 = vst.msk [vmem:[#allocation4 + $0x108] sm:$0xff] %vm735_vm0, %v8208_v53 }
 0x43e PF: > { %v13755_v4 = vld [vmem:[%s16750_s7] sm:$0xff]   ;;  %s11402_s12 = sshll.u32 %s13869_s16, 7  ;;  %v13756_v1 = vld [vmem:[%s16750_s7 + $0x8] sm:$0xff]   ;;  %v13757_v60 = vld [vmem:[%s16750_s7 + $0x10] sm:$0xff]   ;;  %vm8288_vm1 = vcmask 523264   ;;  %s11395_s24 = sshll.u32 %s13869_s16, 4 }
 0x43f   : > { %12998 = vmatprep.subr.bf16.mxu0 %v13755_v4  ;;  %13526 = vmatprep.subr.bf16.mxu1 %v13755_v4  ;;  %s16072_s0 = scalar_lea.vmem [#allocation4], %s11402_s12  ;;  %v13758_v0 = vld [vmem:[%s16750_s7 + $0x18] sm:$0xff]   ;;  %v13759_v5 = vld [vmem:[%s16750_s7 + $0x20] sm:$0xff]   ;;  %v13761_v58 = vld [vmem:[%s16750_s7 + $0x28] sm:$0xff]   ;;  %s11396_s1 = sshll.u32 %s13873_s17, 5 }
 0x440   : > { %12999 = vmatpush3.bf16.msra.mxu0 %v13755_v4  ;;  %13530 = vmatpush3.bf16.msra.mxu1 %v13755_v4  ;;  %v13760_v14 = vld [vmem:[%s16750_s7 + $0x40] sm:$0xff]   ;;  %v13762_v16 = vld [vmem:[%s16750_s7 + $0x48] sm:$0xff]   ;;  %v13763_v20 = vld [vmem:[%s16750_s7 + $0x30] sm:$0xff]   ;;  %s10182_s16 = sadd.s32 %s11396_s1, %s11395_s24  ;;  %s10185_s28 = sshll.u32 %s14068_s23, 4  ;;  %s16681_s28 = int_to_ptr.vmem [resolvable:$true] %s10185_s28 }
 0x441   : > { %13000 = vmatprep.subr.bf16.mxu0 %v13756_v1  ;;  %13527 = vmatprep.subr.bf16.mxu1 %v13756_v1  ;;  %v13764_v33 = vld [vmem:[%s16750_s7 + $0x50] sm:$0xff]   ;;  %v13765_v59 = vld [vmem:[%s16750_s7 + $0x38] sm:$0xff]   ;;  %v13767_v39 = vld [vmem:[%s16750_s7 + $0x60] sm:$0xff]   ;;  %s11397_s17 = sshll.u32 %s10182_s16, 7  ;;  %s16807_s12 = sand.u32 1, %s13861_s14  }
 0x442   : > { %v13766_v22 = vld [vmem:[%s16750_s7 + $0x58] sm:$0xff]   ;;  %v13768_v8 = vld [vmem:[%s16750_s7 + $0x80] sm:$0xff]   ;;  %s16679_s30 = scalar_lea.hbm %s16753_s10, %s11397_s17  ;;  %s13791_s21 = scalar_lea.vmem %s16681_s28, 2048 }
 0x443   : > { %p13792_p0 = scmp.ne.s32.totalorder %s16681_s28, %s13791_s21  ;;  %s13889_s22 = smov [#allocation5]  }
 0x444   : > { %v11060_v35 = vld [vmem:[%s16072_s0 + $0xf] sm:$0xff]  ;;  %v11061_v3 = vld [vmem:[%s16072_s0 + $0x17] sm:$0xff]  ;;  %13001 = vmatpush3.bf16.msra.mxu0 %v13756_v1  ;;  %13531 = vmatpush3.bf16.msra.mxu1 %v13756_v1  ;;  %v11062_v19 = vld [vmem:[%s16072_s0 + $0x1f] sm:$0xff]  ;;  %s13795_s25 = sshll.u32 %s13889_s22, 4  ;;  %s13796_s25 = int_to_ptr.vmem [resolvable:$false] %s13795_s25 }
 0x445   : > { %v11068_v38 = vld [vmem:[%s16072_s0 + $0x4f] sm:$0xff]  ;;  %v8248_v40 = vpack.c.bf16 %v11061_v3, %v11060_v35  ;;  %v11069_v51 = vld [vmem:[%s16072_s0 + $0x57] sm:$0xff]  ;;  %13002 = vmatprep.subr.bf16.mxu0 %v13757_v60  ;;  %13528 = vmatprep.subr.bf16.mxu1 %v13757_v60  ;;  %v11063_v13 = vld [vmem:[%s16072_s0 + $0x27] sm:$0xff]  ;;  %p13793_p1 = pnand %p13792_p0, %p13998_p3  ;;  %s13797_s24 = scalar_lea.vmem %s13796_s25, 4096 }
 0x446   : > { %v16078_v12 = vpack.c.bf16 %v11069_v51, %v11068_v38  ;;  %v11070_v26 = vld [vmem:[%s16072_s0 + $0x5f] sm:$0xff]  ;;  %v11071_v41 = vld [vmem:[%s16072_s0 + $0x67] sm:$0xff]  ;;  %v11064_v56 = vld [vmem:[%s16072_s0 + $0x2f] sm:$0xff]  ;;  %v16099_v10 = vpack.c.bf16 %v11063_v13, %v11062_v19  ;;  %p13798_p4 = scmp.lt.s32.totalorder %s16681_s28, %s13796_s25  ;;  %p13799_p5 = scmp.lt.s32.totalorder %s13797_s24, %s13791_s21 }
 0x447   : > { %13006 = vmatprep.mubr.msk.bf16.mxu0 %vm8288_vm1, %v8248_v40  ;;  %v11065_v63 = vld [vmem:[%s16072_s0 + $0x37] sm:$0xff]  ;;  %v11072_v18 = vld [vmem:[%s16072_s0 + $0x6f] sm:$0xff]  ;;  %v16101_v7 = vpack.c.bf16 %v11071_v41, %v11070_v26  ;;  %v11066_v25 = vld [vmem:[%s16072_s0 + $0x3f] sm:$0xff]  ;;  %p13794_p2 = pneg %p13793_p1 }
 0x448   : > { %13014 = vmatprep.mubr.msk.bf16.mxu1 %vm8288_vm1, %v16078_v12  ;;  %13003 = vmatpush3.bf16.msra.mxu0 %v13757_v60  ;;  %v11073_v57 = vld [vmem:[%s16072_s0 + $0x77] sm:$0xff]  ;;  %v16110_v23 = vpack.c.bf16 %v11065_v63, %v11064_v56  ;;  %v11067_v61 = vld [vmem:[%s16072_s0 + $0x47] sm:$0xff]  ;;  %v11074_v11 = vld [vmem:[%s16072_s0 + $0x7f] sm:$0xff]  ;;  %p13800_p6 = por %p13799_p5, %p13798_p4 }
 0x449   : > { %13532 = vmatpush3.bf16.msra.mxu1 %v13757_v60  ;;  %13004 = vmatprep.subr.bf16.mxu0 %v13758_v0  ;;  %v16112_v2 = vpack.c.bf16 %v11073_v57, %v11072_v18  ;;  %v11075_v17 = vld [vmem:[%s16072_s0 + $0x87] sm:$0xff]  ;;  %v11090_v50 = vld [vmem:[%s16072_s0 + $0x10] sm:$0xff]  ;;  %v16133_v52 = vpack.c.bf16 %v11067_v61, %v11066_v25  ;;  %v11091_v9 = vld [vmem:[%s16072_s0 + $0x18] sm:$0xff] }
 0x44a   : > { %13529 = vmatprep.subr.bf16.mxu1 %v13758_v0  ;;  %v16135_v62 = vpack.c.bf16 %v11075_v17, %v11074_v11  ;;  %v11128_v24 = vld [vmem:[%s16072_s0 + $0x11] sm:$0xff]  ;;  %v11129_v36 = vld [vmem:[%s16072_s0 + $0x19] sm:$0xff]  ;;  %v8459_v6 = vpack.c.bf16 %v11091_v9, %v11090_v50  ;;  %v11093_v15 = vld [vmem:[%s16072_s0 + $0x28] sm:$0xff]  ;;  %p13801_p7 = pnand %p13800_p6, %p13794_p2 }
 0x44b   : > { %v8655_v27 = vpack.c.bf16 %v11129_v36, %v11128_v24  ;;  %v11092_v30 = vld [vmem:[%s16072_s0 + $0x20] sm:$0xff]  ;;  %v11131_v55 = vld [vmem:[%s16072_s0 + $0x29] sm:$0xff]  ;;  %v11095_v54 = vld [vmem:[%s16072_s0 + $0x38] sm:$0xff] }
 0x44c   : > { %13005 = vmatpush3.bf16.msra.mxu0 %v13758_v0  ;;  %v11130_v31 = vld [vmem:[%s16072_s0 + $0x21] sm:$0xff]  ;;  %v11094_v29 = vld [vmem:[%s16072_s0 + $0x30] sm:$0xff]  ;;  %v11133_v32 = vld [vmem:[%s16072_s0 + $0x39] sm:$0xff]  ;;  %v16166_v21 = vpack.c.bf16 %v11093_v15, %v11092_v30 }
 0x44d   : > { %13533 = vmatpush3.bf16.msra.mxu1 %v13758_v0  ;;  %13046 = vmatprep.subr.bf16.mxu0 %v13760_v14  ;;  %v11132_v28 = vld [vmem:[%s16072_s0 + $0x31] sm:$0xff]  ;;  %v16168_v53 = vpack.c.bf16 %v11131_v55, %v11130_v31  ;;  %v16170_v4 = vpack.c.bf16 %v11095_v54, %v11094_v29  ;;  %v11096_v60 = vld [vmem:[%s16072_s0 + $0x40] sm:$0xff]  ;;  %v11097_v35 = vld [vmem:[%s16072_s0 + $0x48] sm:$0xff] }
 0x44e   : > { %13022 = vmatprep.subr.bf16.mxu1 %v13759_v5  ;;  %v16172_v1 = vpack.c.bf16 %v11133_v32, %v11132_v28  ;;  %v11134_v3 = vld [vmem:[%s16072_s0 + $0x41] sm:$0xff]  ;;  %v11135_v38 = vld [vmem:[%s16072_s0 + $0x49] sm:$0xff]  ;;  %v11099_v19 = vld [vmem:[%s16072_s0 + $0x58] sm:$0xff] }
 0x44f   : > { %13007 = vmatmul.mubr.msk.bf16.vlgmr.msra.gmra.mrb[0].mxu0 %vm8288_vm1, %v16099_v10  ;;  %v13769_v40 = vld [vmem:[%s16750_s7 + $0x68] sm:$0xff]   ;;  %v11098_v0 = vld [vmem:[%s16072_s0 + $0x50] sm:$0xff]  ;;  %v11137_v26 = vld [vmem:[%s16072_s0 + $0x59] sm:$0xff]  ;;  %v16204_v56 = vpack.c.bf16 %v11135_v38, %v11134_v3 }
 0x450   : > { %13015 = vmatmul.mubr.msk.bf16.vlgmr.msra.gmra.mrb[0].mxu1 %vm8288_vm1, %v16101_v7  ;;  %13047 = vmatpush3.bf16.msra.mxu0 %v13760_v14  ;;  %v13770_v51 = vld [vmem:[%s16750_s7 + $0x88] sm:$0xff]   ;;  %v11136_v13 = vld [vmem:[%s16072_s0 + $0x51] sm:$0xff]  ;;  %v16202_v14 = vpack.c.bf16 %v11097_v35, %v11096_v60  ;;  %v16206_v63 = vpack.c.bf16 %v11099_v19, %v11098_v0  ;;  %v11141_v50 = vld [vmem:[%s16072_s0 + $0x79] sm:$0xff] }
 0x451   : > { %13023 = vmatpush3.bf16.msra.mxu1 %v13759_v5  ;;  %13048 = vmatprep.subr.bf16.mxu0 %v13762_v16  ;;  %v13771_v41 = vld [vmem:[%s16750_s7 + $0x70] sm:$0xff]   ;;  %v16208_v18 = vpack.c.bf16 %v11137_v26, %v11136_v13  ;;  %v13773_v57 = vld [vmem:[%s16750_s7 + $0x78] sm:$0xff]   ;;  %v11138_v25 = vld [vmem:[%s16072_s0 + $0x61] sm:$0xff] }
 0x452   : > { %13024 = vmatprep.subr.bf16.mxu1 %v13761_v58  ;;  %13010 = vmatprep.mubr.msk.bf16.mxu0 %vm8288_vm1, %v16110_v23  ;;  %v13772_v5 = vld [vmem:[%s16750_s7 + $0x90] sm:$0xff]   ;;  %v13774_v11 = vld [vmem:[%s16750_s7 + $0x98] sm:$0xff]   ;;  %v13775_v9 = vld [vmem:[%s16750_s7 + $0xa0] sm:$0xff]  }
 0x453   : > { %13018 = vmatprep.mubr.msk.bf16.mxu1 %vm8288_vm1, %v16112_v2  ;;  %v11139_v61 = vld [vmem:[%s16072_s0 + $0x69] sm:$0xff]  ;;  %v13776_v24 = vld [vmem:[%s16750_s7 + $0xc0] sm:$0xff]   ;;  %v13781_v28 = vld [vmem:[%s16750_s7 + $0xb8] sm:$0xff]  }
 0x454   : > { %13049 = vmatpush3.bf16.msra.mxu0 %v13762_v16  ;;  %v11101_v16 = vld [vmem:[%s16072_s0 + $0x68] sm:$0xff]  ;;  %v11102_v17 = vld [vmem:[%s16072_s0 + $0x70] sm:$0xff]  ;;  %v13782_v32 = vld [vmem:[%s16750_s7 + $0xd8] sm:$0xff]  }
 0x455   : > { %13025 = vmatpush3.bf16.msra.mxu1 %v13761_v58  ;;  %13050 = vmatprep.subr.bf16.mxu0 %v13764_v33  ;;  %v11100_v58 = vld [vmem:[%s16072_s0 + $0x60] sm:$0xff]  ;;  %v11105_v30 = vld [vmem:[%s16072_s0 + $0x88] sm:$0xff]  ;;  %v13780_v54 = vld [vmem:[%s16750_s7 + $0xd0] sm:$0xff]  }
 0x456   : > { %13026 = vmatprep.subr.bf16.mxu1 %v13763_v20  ;;  %v16238_v36 = vpack.c.bf16 %v11101_v16, %v11100_v58  ;;  %v11142_v15 = vld [vmem:[%s16072_s0 + $0x81] sm:$0xff]  ;;  %v11143_v31 = vld [vmem:[%s16072_s0 + $0x89] sm:$0xff]  ;;  %v11181_v3 = vld [vmem:[%s16072_s0 + $0x97] sm:$0xff] }
 0x457   : > { %13011 = vmatmul.mubr.msk.bf16.gmra.mrb[4].mxu0 %vm8288_vm1, %v16133_v52  ;;  %v13778_v29 = vld [vmem:[%s16750_s7 + $0xc8] sm:$0xff]   ;;  %v13784_v60 = vld [vmem:[%s16750_s7 + $0x100] sm:$0xff]   ;;  %v11218_v38 = vld [vmem:[%s16072_s0 + $0x90] sm:$0xff] }
 0x458   : > { %13019 = vmatmul.mubr.msk.bf16.gmra.mrb[4].mxu1 %vm8288_vm1, %v16135_v62  ;;  %13051 = vmatpush3.bf16.msra.mxu0 %v13764_v33  ;;  %v11140_v33 = vld [vmem:[%s16072_s0 + $0x71] sm:$0xff]  ;;  %v13785_v19 = vld [vmem:[%s16750_s7 + $0xe8] sm:$0xff]   ;;  %v11257_v26 = vld [vmem:[%s16072_s0 + $0x99] sm:$0xff] }
 0x459   : > { %13027 = vmatpush3.bf16.msra.mxu1 %v13763_v20  ;;  %13052 = vmatprep.subr.bf16.mxu0 %v13766_v22  ;;  %v11103_v20 = vld [vmem:[%s16072_s0 + $0x78] sm:$0xff]  ;;  %v11180_v35 = vld [vmem:[%s16072_s0 + $0x8f] sm:$0xff] }
 0x45a   : > { %13028 = vmatprep.subr.bf16.mxu1 %v13765_v59  ;;  %13030 = vmatprep.mubr.msk.bf16.mxu1 %vm8288_vm1, %v8459_v6  ;;  %v16244_v6 = vpack.c.bf16 %v11141_v50, %v11140_v33  ;;  %v13786_v13 = vld [vmem:[%s16750_s7 + $0x108] sm:$0xff]  }
 0x45b   : > { %13054 = vmatprep.mubr.msk.bf16.mxu0 %vm8288_vm1, %v8655_v27  ;;  %v11104_v27 = vld [vmem:[%s16072_s0 + $0x80] sm:$0xff] }
 0x45c   : > { %13053 = vmatpush3.bf16.msra.mxu0 %v13766_v22  ;;  %v16242_v22 = vpack.c.bf16 %v11103_v20, %v11102_v17  ;;  %v16258_v55 = vpack.c.bf16 %v11105_v30, %v11104_v27  ;;  %v16801_v27 = vld [vmem:[#allocation11_spill] sm:$0xff] }
 0x45d   : > { %13029 = vmatpush3.bf16.msra.mxu1 %v13765_v59  ;;  %13094 = vmatprep.subr.bf16.mxu0 %v13768_v8  ;;  %v16240_v59 = vpack.c.bf16 %v11139_v61, %v11138_v25 }
 0x45e   : > { %13070 = vmatprep.subr.bf16.mxu1 %v13767_v39 }
 0x45f   : > { %13055 = vmatmul.mubr.msk.bf16.vlgmr.msra.gmra.mrb[8].mxu0 %vm8288_vm1, %v16168_v53 }
 0x460   : > { %13031 = vmatmul.mubr.msk.bf16.vlgmr.msra.gmra.mrb[8].mxu1 %vm8288_vm1, %v16166_v21  ;;  %13095 = vmatpush3.bf16.msra.mxu0 %v13768_v8  ;;  %v13777_v8 = vld [vmem:[%s16750_s7 + $0xa8] sm:$0xff]  }
 0x461   : > { %13071 = vmatpush3.bf16.msra.mxu1 %v13767_v39  ;;  %13034 = vmatprep.mubr.msk.bf16.mxu1 %vm8288_vm1, %v16170_v4  ;;  %v16260_v39 = vpack.c.bf16 %v11143_v31, %v11142_v15 }
 0x462   : > { %13058 = vmatprep.mubr.msk.bf16.mxu0 %vm8288_vm1, %v16172_v1  ;;  %13072 = vmatprep.subr.bf16.mxu1 %v13769_v40 }
 0x463   : > { %13096 = vmatprep.subr.bf16.mxu0 %v13770_v51 }
 0x464   : > { %13097 = vmatpush3.bf16.msra.mxu0 %v13770_v51  ;;  %v8876_v51 = vpack.c.bf16 %v11181_v3, %v11180_v35 }
 0x465   : > { %13073 = vmatpush3.bf16.msra.mxu1 %v13769_v40  ;;  %13098 = vmatprep.subr.bf16.mxu0 %v13772_v5  ;;  %v11219_v40 = vld [vmem:[%s16072_s0 + $0x98] sm:$0xff] }
 0x466   : > { %13074 = vmatprep.subr.bf16.mxu1 %v13771_v41  ;;  %v9087_v0 = vpack.c.bf16 %v11219_v40, %v11218_v38 }
 0x467   : > { %13059 = vmatmul.mubr.msk.bf16.gmra.mrb[12].mxu0 %vm8288_vm1, %v16204_v56 }
 0x468   : > { %13035 = vmatmul.mubr.msk.bf16.gmra.mrb[12].mxu1 %vm8288_vm1, %v16202_v14  ;;  %13062 = vmatprep.mubr.msk.bf16.mxu0 %vm8288_vm1, %v16208_v18 }
 0x469   : > { %13038 = vmatprep.mubr.msk.bf16.mxu1 %vm8288_vm1, %v16206_v63  ;;  %13075 = vmatpush3.bf16.msra.mxu1 %v13771_v41  ;;  %v11295_v41 = vld [vmem:[%s16072_s0 + $0xa7] sm:$0xff] }
 0x46a   : > { %13099 = vmatpush3.bf16.msra.mxu0 %v13772_v5  ;;  %13076 = vmatprep.subr.bf16.mxu1 %v13773_v57 }
 0x46b   : > { %13100 = vmatprep.subr.bf16.mxu0 %v13774_v11 }
 0x46d   : > { %13077 = vmatpush3.bf16.msra.mxu1 %v13773_v57 }
 0x46e   : > { %13101 = vmatpush3.bf16.msra.mxu0 %v13774_v11  ;;  %13118 = vmatprep.subr.bf16.mxu1 %v13775_v9 }
 0x46f   : > { %13142 = vmatprep.subr.bf16.mxu0 %v13776_v24  ;;  %13063 = vmatmul.mubr.msk.bf16.gmra.mrb[16].mxu0 %vm8288_vm1, %v16240_v59 }
 0x470   : > { %13039 = vmatmul.mubr.msk.bf16.gmra.mrb[16].mxu1 %vm8288_vm1, %v16238_v36  ;;  %13066 = vmatprep.mubr.msk.bf16.mxu0 %vm8288_vm1, %v16244_v6 }
 0x471   : > { %13042 = vmatprep.mubr.msk.bf16.mxu1 %vm8288_vm1, %v16242_v22 }
 0x477   : > { %13067 = vmatmul.mubr.msk.bf16.gmra.mrb[20].mxu0 %vm8288_vm1, %v16260_v39 }
 0x478   : > { %13043 = vmatmul.mubr.msk.bf16.gmra.mrb[20].mxu1 %vm8288_vm1, %v16258_v55  ;;  %13102 = vmatprep.mubr.msk.bf16.mxu0 %vm8288_vm1, %v16166_v21  ;;  %v13783_v21 = vld [vmem:[%s16750_s7 + $0xe0] sm:$0xff]  }
 0x479   : > { %13078 = vmatprep.mubr.msk.bf16.mxu1 %vm8288_vm1, %v16099_v10  ;;  %v13779_v10 = vld [vmem:[%s16750_s7 + $0xb0] sm:$0xff]  }
 0x47f   : > { %13103 = vmatmul.mubr.msk.bf16.vlgmr.msra.gmra.mrb[24].mxu0 %vm8288_vm1, %v16170_v4 }
 0x480   : > { %13079 = vmatmul.mubr.msk.bf16.vlgmr.msra.gmra.mrb[24].mxu1 %vm8288_vm1, %v16110_v23  ;;  %13143 = vmatpush3.bf16.msra.mxu0 %v13776_v24 }
 0x481   : > { %13119 = vmatpush3.bf16.msra.mxu1 %v13775_v9  ;;  %13082 = vmatprep.mubr.msk.bf16.mxu1 %vm8288_vm1, %v16133_v52 }
 0x482   : > { %13106 = vmatprep.mubr.msk.bf16.mxu0 %vm8288_vm1, %v16202_v14  ;;  %13120 = vmatprep.subr.bf16.mxu1 %v13777_v8 }
 0x483   : > { %13144 = vmatprep.subr.bf16.mxu0 %v13778_v29 }
 0x484   : > { %13145 = vmatpush3.bf16.msra.mxu0 %v13778_v29 }
 0x485   : > { %13121 = vmatpush3.bf16.msra.mxu1 %v13777_v8  ;;  %13146 = vmatprep.subr.bf16.mxu0 %v13780_v54 }
 0x486   : > { %13122 = vmatprep.subr.bf16.mxu1 %v13779_v10 }
 0x487   : > { %13107 = vmatmul.mubr.msk.bf16.gmra.mrb[28].mxu0 %vm8288_vm1, %v16206_v63 }
 0x488   : > { %13083 = vmatmul.mubr.msk.bf16.gmra.mrb[28].mxu1 %vm8288_vm1, %v16078_v12  ;;  %13110 = vmatprep.mubr.msk.bf16.mxu0 %vm8288_vm1, %v16238_v36 }
 0x489   : > { %13086 = vmatprep.mubr.msk.bf16.mxu1 %vm8288_vm1, %v16101_v7  ;;  %13123 = vmatpush3.bf16.msra.mxu1 %v13779_v10 }
 0x48a   : > { %13147 = vmatpush3.bf16.msra.mxu0 %v13780_v54  ;;  %13124 = vmatprep.subr.bf16.mxu1 %v13781_v28 }
 0x48b   : > { %13148 = vmatprep.subr.bf16.mxu0 %v13782_v32 }
 0x48d   : > { %13125 = vmatpush3.bf16.msra.mxu1 %v13781_v28 }
 0x48e   : > { %13149 = vmatpush3.bf16.msra.mxu0 %v13782_v32  ;;  %13166 = vmatprep.subr.bf16.mxu1 %v13783_v21 }
 0x48f   : > { %13190 = vmatprep.subr.bf16.mxu0 %v13784_v60  ;;  %13111 = vmatmul.mubr.msk.bf16.gmra.mrb[32].mxu0 %vm8288_vm1, %v16242_v22 }
 0x490   : > { %13087 = vmatmul.mubr.msk.bf16.gmra.mrb[32].mxu1 %vm8288_vm1, %v16112_v2  ;;  %13114 = vmatprep.mubr.msk.bf16.mxu0 %vm8288_vm1, %v16258_v55 }
 0x491   : > { %13090 = vmatprep.mubr.msk.bf16.mxu1 %vm8288_vm1, %v16135_v62 }
 0x497   : > { %13115 = vmatmul.mubr.msk.bf16.gmra.mrb[36].mxu0 %vm8288_vm1, %v9087_v0 }
 0x498   : > { %13091 = vmatmul.mubr.msk.bf16.gmra.mrb[36].mxu1 %vm8288_vm1, %v8876_v51  ;;  %13150 = vmatprep.mubr.msk.bf16.mxu0 %vm8288_vm1, %v16110_v23  ;;  %v13787_v23 = vld [vmem:[%s16750_s7 + $0xf0] sm:$0xff]  }
 0x499   : > { %13126 = vmatprep.mubr.msk.bf16.mxu1 %vm8288_vm1, %v16168_v53  ;;  %v13788_v53 = vld [vmem:[%s16750_s7 + $0x110] sm:$0xff]  }
 0x49f   : > { %13151 = vmatmul.mubr.msk.bf16.vlgmr.msra.gmra.mrb[40].mxu0 %vm8288_vm1, %v16133_v52  ;;  %v13789_v52 = vld [vmem:[%s16750_s7 + $0xf8] sm:$0xff]  }
 0x4a0   : > { %13127 = vmatmul.mubr.msk.bf16.vlgmr.msra.gmra.mrb[40].mxu1 %vm8288_vm1, %v16172_v1  ;;  %13191 = vmatpush3.bf16.msra.mxu0 %v13784_v60 }
 0x4a1   : > { %13167 = vmatpush3.bf16.msra.mxu1 %v13783_v21  ;;  %13130 = vmatprep.mubr.msk.bf16.mxu1 %vm8288_vm1, %v16204_v56 }
 0x4a2   : > { %13154 = vmatprep.mubr.msk.bf16.mxu0 %vm8288_vm1, %v16078_v12  ;;  %13168 = vmatprep.subr.bf16.mxu1 %v13785_v19  ;;  %v13790_v12 = vld [vmem:[%s16750_s7 + $0x118] sm:$0xff]  }
 0x4a3   : > { %13192 = vmatprep.subr.bf16.mxu0 %v13786_v13 }
 0x4a4   : > { %13193 = vmatpush3.bf16.msra.mxu0 %v13786_v13 }
 0x4a5   : > { %13169 = vmatpush3.bf16.msra.mxu1 %v13785_v19  ;;  %13194 = vmatprep.subr.bf16.mxu0 %v13788_v53 }
 0x4a6   : > { %13170 = vmatprep.subr.bf16.mxu1 %v13787_v23 }
 0x4a7   : > { %13155 = vmatmul.mubr.msk.bf16.gmra.mrb[44].mxu0 %vm8288_vm1, %v16101_v7  ;;  %v11256_v7 = vld [vmem:[%s16072_s0 + $0x91] sm:$0xff] }
 0x4a8   : > { %13131 = vmatmul.mubr.msk.bf16.gmra.mrb[44].mxu1 %vm8288_vm1, %v16208_v18  ;;  %13158 = vmatprep.mubr.msk.bf16.mxu0 %vm8288_vm1, %v16112_v2  ;;  %v11294_v2 = vld [vmem:[%s16072_s0 + $0x9f] sm:$0xff]  ;;  %v9283_v5 = vpack.c.bf16 %v11257_v26, %v11256_v7 }
 0x4a9   : > { %13134 = vmatprep.mubr.msk.bf16.mxu1 %vm8288_vm1, %v16240_v59  ;;  %13171 = vmatpush3.bf16.msra.mxu1 %v13787_v23  ;;  %v9497_v57 = vpack.c.bf16 %v11295_v41, %v11294_v2  ;;  %v16802_v23 = vld [vmem:[#allocation12_spill] sm:$0xff] }
 0x4aa   : > { %13195 = vmatpush3.bf16.msra.mxu0 %v13788_v53  ;;  %13172 = vmatprep.subr.bf16.mxu1 %v13789_v52 }
 0x4ab   : > { %13196 = vmatprep.subr.bf16.mxu0 %v13790_v12 }
 0x4ad   : > { %13173 = vmatpush3.bf16.msra.mxu1 %v13789_v52 }
 0x4ae   : > { %13197 = vmatpush3.bf16.msra.mxu0 %v13790_v12 }
 0x4af   : > { %13159 = vmatmul.mubr.msk.bf16.gmra.mrb[48].mxu0 %vm8288_vm1, %v16135_v62  ;;  %v11332_v62 = vld [vmem:[%s16072_s0 + $0xa0] sm:$0xff] }
 0x4b0   : > { %13135 = vmatmul.mubr.msk.bf16.gmra.mrb[48].mxu1 %vm8288_vm1, %v16244_v6  ;;  %13162 = vmatprep.mubr.msk.bf16.mxu0 %vm8288_vm1, %v8876_v51 }
 0x4b1   : > { %13138 = vmatprep.mubr.msk.bf16.mxu1 %vm8288_vm1, %v16260_v39 }
 0x4b7   : > { %13163 = vmatmul.mubr.msk.bf16.gmra.mrb[52].mxu0 %vm8288_vm1, %v9497_v57 }
 0x4b8   : > { %13139 = vmatmul.mubr.msk.bf16.gmra.mrb[52].mxu1 %vm8288_vm1, %v9283_v5  ;;  %13198 = vmatprep.mubr.msk.bf16.mxu0 %vm8288_vm1, %v16172_v1  ;;  %v11370_v1 = vld [vmem:[%s16072_s0 + $0xa1] sm:$0xff] }
 0x4b9   : > { %13174 = vmatprep.mubr.msk.bf16.mxu1 %vm8288_vm1, %v16170_v4  ;;  %v11333_v4 = vld [vmem:[%s16072_s0 + $0xa8] sm:$0xff] }
 0x4bf   : > { %13199 = vmatmul.mubr.msk.bf16.vlgmr.msra.gmra.mrb[56].mxu0 %vm8288_vm1, %v16204_v56  ;;  %v9708_v56 = vpack.c.bf16 %v11333_v4, %v11332_v62 }
 0x4c0   : > { %13175 = vmatmul.mubr.msk.bf16.vlgmr.msra.gmra.mrb[56].mxu1 %vm8288_vm1, %v16202_v14  ;;  %13202 = vmatprep.mubr.msk.bf16.mxu0 %vm8288_vm1, %v16208_v18  ;;  %v11371_v14 = vld [vmem:[%s16072_s0 + $0xa9] sm:$0xff]  ;;  %s16691_s0 = scalar_lea.sflag [#allocation6], %s16807_s12 }
 0x4c1   : > { %13178 = vmatprep.mubr.msk.bf16.mxu1 %vm8288_vm1, %v16206_v63  ;;  %v9904_v63 = vpack.c.bf16 %v11371_v14, %v11370_v1 }
 0x4c7   : > { %13203 = vmatmul.mubr.msk.bf16.gmra.mrb[60].mxu0 %vm8288_vm1, %v16240_v59 }
 0x4c8   : > { %13179 = vmatmul.mubr.msk.bf16.gmra.mrb[60].mxu1 %vm8288_vm1, %v16238_v36  ;;  %13206 = vmatprep.mubr.msk.bf16.mxu0 %vm8288_vm1, %v16244_v6 }
 0x4c9   : > { %13182 = vmatprep.mubr.msk.bf16.mxu1 %vm8288_vm1, %v16242_v22 }
 0x4cf   : > { %13207 = vmatmul.mubr.msk.bf16.gmra.mrb[64].mxu0 %vm8288_vm1, %v16260_v39 }
 0x4d0   : > { %13183 = vmatmul.mubr.msk.bf16.gmra.mrb[64].mxu1 %vm8288_vm1, %v16258_v55  ;;  %13210 = vmatprep.mubr.msk.bf16.mxu0 %vm8288_vm1, %v9283_v5 }
 0x4d1   : > { %13186 = vmatprep.mubr.msk.bf16.mxu1 %vm8288_vm1, %v9087_v0 }
 0x4d7   : > { %13211 = vmatmul.mubr.msk.bf16.gmra.mrb[68].mxu0 %vm8288_vm1, %v9904_v63 }
 0x4d8   : > { %13187 = vmatmul.mubr.msk.bf16.gmra.mrb[68].mxu1 %vm8288_vm1, %v9708_v56 }
 0x522   : > { %v13008_v18 = vpop.f32.mrb[0].mxu0 }
 0x523   : > { %v13016_v58 = vpop.f32.mrb[0].mxu1  ;;  %v8347_v16 = vpop.f32.mrb[1].mxu0  ;;  %v8412_v30 = vmul.f32 %v13008_v18, %v16801_v27 }
 0x524   : > { %v8379_v25 = vpop.f32.mrb[1].mxu1  ;;  %v13009_v61 = vpop.f32.mrb[2].mxu0  ;;  %v8410_v15 = vmul.f32 %v14035_v34, %v8347_v16 }
 0x525   : > { %v13017_v11 = vpop.f32.mrb[2].mxu1  ;;  %v8350_v17 = vpop.f32.mrb[3].mxu0 }
 0x526   : > { %v16407_v20 = vpop.f32.mrb[3].mxu1 }
 0x52a   : > { %v13012_v33 = vpop.f32.mrb[4].mxu0 }
 0x52b   : > { %v16409_v50 = vpop.f32.mrb[4].mxu1  ;;  %v8363_v9 = vpop.f32.mrb[5].mxu0  ;;  %v8416_v13 = vmul.f32 %v13012_v33, %v14041_v37  ;;  %v16803_v33 = vld [vmem:[#allocation14_spill] sm:$0xff] }
 0x52c   : > { %v16411_v24 = vpop.f32.mrb[5].mxu1  ;;  %v13013_v36 = vpop.f32.mrb[6].mxu0  ;;  %v8414_v53 = vmul.f32 %v16802_v23, %v8363_v9  ;;  %v8420_v9 = vmul.f32 %v13016_v58, %v16803_v33 }
 0x52d   : > { %v16413_v59 = vpop.f32.mrb[6].mxu1  ;;  %v8366_v22 = vpop.f32.mrb[7].mxu0 }
 0x52e   : > { %v16415_v6 = vpop.f32.mrb[7].mxu1 }
 0x532   : > { %v13056_v55 = vpop.f32.mrb[8].mxu0 }
 0x533   : > { %v13032_v31 = vpop.f32.mrb[8].mxu1  ;;  %v8754_v29 = vpop.f32.mrb[9].mxu0 }
 0x534   : > { %v8623_v39 = vadd.f32 %v13032_v31, %v8412_v30  ;;  %v8558_v8 = vpop.f32.mrb[9].mxu1  ;;  %v13057_v28 = vpop.f32.mrb[10].mxu0  ;;  %v16804_v30 = vld [vmem:[#allocation13_spill] sm:$0xff] }
 0x535   : > { %v8621_v10 = vadd.f32 %v8558_v8, %v8410_v15  ;;  %v13033_v54 = vpop.f32.mrb[10].mxu1  ;;  %v8820_v60 = vmul.f32 %v13057_v28, %v14053_v43  ;;  %v8757_v3 = vpop.f32.mrb[11].mxu0  ;;  %v8418_v15 = vmul.f32 %v16804_v30, %v8379_v25 }
 0x536   : > { %v16419_v32 = vadd.f32 %v13056_v55, %v8623_v39  ;;  %v8624_v21 = vadd.f32 %v13033_v54, %v13009_v61  ;;  %v8561_v35 = vpop.f32.mrb[11].mxu1  ;;  %v8818_v51 = vmul.f32 %v14051_v42, %v8757_v3 }
 0x537   : > { %v16422_v38 = vadd.f32 %v8754_v29, %v8621_v10  ;;  %v8622_v40 = vadd.f32 %v8561_v35, %v8350_v17 }
 0x538   : > { %v16425_v0 = vadd.f32 %v8820_v60, %v8624_v21 }
 0x539   : > { %v16427_v19 = vadd.f32 %v8818_v51, %v8622_v40 }
 0x53a   : > { %v13060_v12 = vpop.f32.mrb[12].mxu0 }
 0x53b   : > { %v13036_v52 = vpop.f32.mrb[12].mxu1  ;;  %v8770_v2 = vpop.f32.mrb[13].mxu0 }
 0x53c   : > { %v8627_v7 = vadd.f32 %v13036_v52, %v8416_v13  ;;  %v8574_v26 = vpop.f32.mrb[13].mxu1  ;;  %v13061_v57 = vpop.f32.mrb[14].mxu0  ;;  %v16805_v13 = vld [vmem:[#allocation16_spill] sm:$0xff]  ;;  %v16806_v52 = vld [vmem:[#allocation15_spill] sm:$0xff] }
 0x53d   : > { %v8625_v41 = vadd.f32 %v8574_v26, %v8414_v53  ;;  %v13037_v5 = vpop.f32.mrb[14].mxu1  ;;  %v8824_v1 = vmul.f32 %v13061_v57, %v14057_v45  ;;  %v8773_v56 = vpop.f32.mrb[15].mxu0  ;;  %v8424_v53 = vmul.f32 %v16409_v50, %v16805_v13 }
 0x53e   : > { %v16431_v62 = vadd.f32 %v13060_v12, %v8627_v7  ;;  %v8628_v4 = vadd.f32 %v13037_v5, %v13013_v36  ;;  %v8577_v14 = vpop.f32.mrb[15].mxu1  ;;  %v8822_v16 = vmul.f32 %v14055_v44, %v8773_v56 }
 0x53f   : > { %v16434_v63 = vadd.f32 %v8770_v2, %v8625_v41  ;;  %v8626_v18 = vadd.f32 %v8577_v14, %v8366_v22 }
 0x540   : > { %v16437_v61 = vadd.f32 %v8824_v1, %v8628_v4 }
 0x541   : > { %v16439_v17 = vadd.f32 %v8822_v16, %v8626_v18 }
 0x542   : > { %v13064_v55 = vpop.f32.mrb[16].mxu0 }
 0x543   : > { %v13040_v31 = vpop.f32.mrb[16].mxu1  ;;  %v8786_v8 = vpop.f32.mrb[17].mxu0 }
 0x544   : > { %v8631_v36 = vadd.f32 %v13040_v31, %v8420_v9  ;;  %v8590_v39 = vpop.f32.mrb[17].mxu1  ;;  %v13065_v54 = vpop.f32.mrb[18].mxu0 }
 0x545   : > { %v8629_v29 = vadd.f32 %v8590_v39, %v8418_v15  ;;  %v13041_v10 = vpop.f32.mrb[18].mxu1  ;;  %v8828_v21 = vmul.f32 %v13065_v54, %v14061_v47  ;;  %v8789_v35 = vpop.f32.mrb[19].mxu0 }
 0x546   : > { %v16443_v28 = vadd.f32 %v13064_v55, %v8631_v36  ;;  %v8632_v22 = vadd.f32 %v13041_v10, %v13017_v11  ;;  %v8593_v60 = vpop.f32.mrb[19].mxu1  ;;  %v8826_v25 = vmul.f32 %v14059_v46, %v8789_v35  ;;  %v8422_v11 = vmul.f32 %v16806_v52, %v16411_v24 }
 0x547   : > { %v16446_v3 = vadd.f32 %v8786_v8, %v8629_v29  ;;  %v8630_v58 = vadd.f32 %v8593_v60, %v16407_v20 }
 0x548   : > { %v16450_v40 = vadd.f32 %v8828_v21, %v8632_v22 }
 0x549   : > { %v16452_v51 = vadd.f32 %v8826_v25, %v8630_v58 }
 0x54a   : > { %v13068_v7 = vpop.f32.mrb[20].mxu0 }
 0x54b   : > { %v13044_v12 = vpop.f32.mrb[20].mxu1  ;;  %v8802_v41 = vpop.f32.mrb[21].mxu0 }
 0x54c   : > { %v8635_v26 = vadd.f32 %v13044_v12, %v8424_v53  ;;  %v8606_v2 = vpop.f32.mrb[21].mxu1  ;;  %v13069_v20 = vpop.f32.mrb[22].mxu0 }
 0x54d   : > { %v8633_v5 = vadd.f32 %v8606_v2, %v8422_v11  ;;  %v13045_v57 = vpop.f32.mrb[22].mxu1  ;;  %v8832_v14 = vmul.f32 %v13069_v20, %v14065_v49  ;;  %v8805_v18 = vpop.f32.mrb[23].mxu0 }
 0x54e   : > { %v16458_v4 = vadd.f32 %v13068_v7, %v8635_v26  ;;  %v8636_v1 = vadd.f32 %v13045_v57, %v16413_v59  ;;  %v8609_v56 = vpop.f32.mrb[23].mxu1  ;;  %v8830_v16 = vmul.f32 %v14063_v48, %v8805_v18 }
 0x54f   : > { %v16462_v50 = vadd.f32 %v8802_v41, %v8633_v5  ;;  %v8634_v24 = vadd.f32 %v8609_v56, %v16415_v6 }
 0x550   : > { %v16466_v9 = vadd.f32 %v8832_v14, %v8636_v1 }
 0x551   : > { %v16468_v15 = vadd.f32 %v8830_v16, %v8634_v24 }
 0x552   : > { %v13104_v55 = vpop.f32.mrb[24].mxu0 }
 0x553   : > { %v13080_v31 = vpop.f32.mrb[24].mxu1  ;;  %v9179_v59 = vpop.f32.mrb[25].mxu0 }
 0x554   : > { %v9033_v36 = vmul.f32 %v13080_v31, %v16801_v27  ;;  %v8968_v39 = vpop.f32.mrb[25].mxu1  ;;  %v13105_v10 = vpop.f32.mrb[26].mxu0 }
 0x555   : > { %v9031_v8 = vmul.f32 %v14035_v34, %v8968_v39  ;;  %v13081_v29 = vpop.f32.mrb[26].mxu1  ;;  %v9182_v21 = vpop.f32.mrb[27].mxu0 }
 0x556   : > { %v9049_v54 = vadd.f32 %v9033_v36, %v16419_v32  ;;  %v9050_v6 = vadd.f32 %v13081_v29, %v16425_v0  ;;  %v8971_v22 = vpop.f32.mrb[27].mxu1 }
 0x557   : > { %v9047_v60 = vadd.f32 %v9031_v8, %v16422_v38  ;;  %v9048_v35 = vadd.f32 %v8971_v22, %v16427_v19 }
 0x558   : > { %v9244_v58 = vadd.f32 %v13104_v55, %v9049_v54  ;;  %v16476_v25 = vadd.f32 %v13105_v10, %v9050_v6 }
 0x559   : > { %v9242_v53 = vadd.f32 %v9179_v59, %v9047_v60  ;;  %v16478_v11 = vadd.f32 %v9182_v21, %v9048_v35 }
 0x55a   : > { %v13108_v7 = vpop.f32.mrb[28].mxu0 }
 0x55b   : > { %v13084_v12 = vpop.f32.mrb[28].mxu1  ;;  %v9195_v32 = vpop.f32.mrb[29].mxu0 }
 0x55c   : > { %v9037_v26 = vmul.f32 %v13084_v12, %v14041_v37  ;;  %v8984_v2 = vpop.f32.mrb[29].mxu1  ;;  %v13109_v5 = vpop.f32.mrb[30].mxu0 }
 0x55d   : > { %v9035_v0 = vmul.f32 %v16802_v23, %v8984_v2  ;;  %v13085_v41 = vpop.f32.mrb[30].mxu1  ;;  %v9198_v20 = vpop.f32.mrb[31].mxu0 }
 0x55e   : > { %v9053_v38 = vadd.f32 %v9037_v26, %v16431_v62  ;;  %v9054_v19 = vadd.f32 %v13085_v41, %v16437_v61  ;;  %v8987_v57 = vpop.f32.mrb[31].mxu1 }
 0x55f   : > { %v9051_v1 = vadd.f32 %v9035_v0, %v16434_v63  ;;  %v9052_v14 = vadd.f32 %v8987_v57, %v16439_v17 }
 0x560   : > { %v9248_v56 = vadd.f32 %v13108_v7, %v9053_v38  ;;  %v16486_v18 = vadd.f32 %v13109_v5, %v9054_v19 }
 0x561   : > { %v16488_v24 = vadd.f32 %v9195_v32, %v9051_v1  ;;  %v16490_v16 = vadd.f32 %v9198_v20, %v9052_v14 }
 0x562   : > { %v13112_v55 = vpop.f32.mrb[32].mxu0 }
 0x563   : > { %v13088_v31 = vpop.f32.mrb[32].mxu1  ;;  %v9211_v39 = vpop.f32.mrb[33].mxu0 }
 0x564   : > { %v9041_v36 = vmul.f32 %v13088_v31, %v16803_v33  ;;  %v9000_v62 = vpop.f32.mrb[33].mxu1  ;;  %v13113_v8 = vpop.f32.mrb[34].mxu0 }
 0x565   : > { %v9039_v61 = vmul.f32 %v16804_v30, %v9000_v62  ;;  %v13089_v59 = vpop.f32.mrb[34].mxu1  ;;  %v9214_v10 = vpop.f32.mrb[35].mxu0 }
 0x566   : > { %v9057_v63 = vadd.f32 %v9041_v36, %v16443_v28  ;;  %v9058_v17 = vadd.f32 %v13089_v59, %v16450_v40  ;;  %v9003_v29 = vpop.f32.mrb[35].mxu1 }
 0x567   : > { %v9055_v54 = vadd.f32 %v9039_v61, %v16446_v3  ;;  %v9056_v6 = vadd.f32 %v9003_v29, %v16452_v51 }
 0x568   : > { %v16498_v22 = vadd.f32 %v13112_v55, %v9057_v63  ;;  %v16500_v21 = vadd.f32 %v13113_v8, %v9058_v17 }
 0x569   : > { %v16502_v60 = vadd.f32 %v9211_v39, %v9055_v54  ;;  %v16504_v35 = vadd.f32 %v9214_v10, %v9056_v6 }
 0x56a   : > { %v13116_v7 = vpop.f32.mrb[36].mxu0 }
 0x56b   : > { %v13092_v12 = vpop.f32.mrb[36].mxu1  ;;  %v9227_v40 = vpop.f32.mrb[37].mxu0 }
 0x56c   : > { %v9045_v28 = vmul.f32 %v13092_v12, %v16805_v13  ;;  %v9016_v26 = vpop.f32.mrb[37].mxu1  ;;  %v13117_v3 = vpop.f32.mrb[38].mxu0 }
 0x56d   : > { %v9043_v2 = vmul.f32 %v16806_v52, %v9016_v26  ;;  %v13093_v32 = vpop.f32.mrb[38].mxu1  ;;  %v9230_v5 = vpop.f32.mrb[39].mxu0 }
 0x56e   : > { %v9061_v51 = vadd.f32 %v9045_v28, %v16458_v4  ;;  %v9062_v0 = vadd.f32 %v13093_v32, %v16466_v9  ;;  %v9019_v41 = vpop.f32.mrb[39].mxu1 }
 0x56f   : > { %v9059_v38 = vadd.f32 %v9043_v2, %v16462_v50  ;;  %v9060_v19 = vadd.f32 %v9019_v41, %v16468_v15 }
 0x570   : > { %v16512_v57 = vadd.f32 %v13116_v7, %v9061_v51  ;;  %v16514_v20 = vadd.f32 %v13117_v3, %v9062_v0 }
 0x571   : > { %v16516_v1 = vadd.f32 %v9227_v40, %v9059_v38  ;;  %v16518_v14 = vadd.f32 %v9230_v5, %v9060_v19 }
 0x572   : > { %v13152_v55 = vpop.f32.mrb[40].mxu0 }
 0x573   : > { %v13128_v31 = vpop.f32.mrb[40].mxu1  ;;  %v9654_v4 = vmul.f32 %v13152_v55, %v16801_v27  ;;  %v9589_v62 = vpop.f32.mrb[41].mxu0 }
 0x574   : > { %v9456_v36 = vadd.f32 %v13128_v31, %v9244_v58  ;;  %v9375_v9 = vpop.f32.mrb[41].mxu1  ;;  %v9652_v50 = vmul.f32 %v14035_v34, %v9589_v62  ;;  %v13153_v15 = vpop.f32.mrb[42].mxu0 }
 0x575   : > { %v9454_v39 = vadd.f32 %v9375_v9, %v9242_v53  ;;  %v13129_v61 = vpop.f32.mrb[42].mxu1  ;;  %v9592_v63 = vpop.f32.mrb[43].mxu0 }
 0x576   : > { %v9441_v59 = vmul.f32 %v13129_v61, %v14053_v43  ;;  %v9378_v8 = vpop.f32.mrb[43].mxu1  ;;  %v16523_v17 = vadd.f32 %v9654_v4, %v9456_v36 }
 0x577   : > { %v9439_v29 = vmul.f32 %v14051_v42, %v9378_v8  ;;  %v16526_v10 = vadd.f32 %v9652_v50, %v9454_v39 }
 0x578   : > { %v9457_v58 = vadd.f32 %v9441_v59, %v16476_v25 }
 0x579   : > { %v9455_v27 = vadd.f32 %v9439_v29, %v16478_v11 }
 0x57a   : > { %v16530_v54 = vadd.f32 %v13153_v15, %v9457_v58  ;;  %v13156_v6 = vpop.f32.mrb[44].mxu0 }
 0x57b   : > { %v16532_v53 = vadd.f32 %v9592_v63, %v9455_v27  ;;  %v13132_v34 = vpop.f32.mrb[44].mxu1  ;;  %v9658_v7 = vmul.f32 %v13156_v6, %v14041_v37  ;;  %v9605_v26 = vpop.f32.mrb[45].mxu0 }
 0x57c   : > { %v9460_v12 = vadd.f32 %v13132_v34, %v9248_v56  ;;  %v9391_v28 = vpop.f32.mrb[45].mxu1  ;;  %v9656_v2 = vmul.f32 %v16802_v23, %v9605_v26  ;;  %v13157_v3 = vpop.f32.mrb[46].mxu0 }
 0x57d   : > { %v9458_v40 = vadd.f32 %v9391_v28, %v16488_v24  ;;  %v13133_v32 = vpop.f32.mrb[46].mxu1  ;;  %v9608_v51 = vpop.f32.mrb[47].mxu0 }
 0x57e   : > { %v9445_v25 = vmul.f32 %v13133_v32, %v14057_v45  ;;  %v9394_v11 = vpop.f32.mrb[47].mxu1  ;;  %v16538_v0 = vadd.f32 %v9658_v7, %v9460_v12 }
 0x57f   : > { %v9443_v41 = vmul.f32 %v14055_v44, %v9394_v11  ;;  %v16541_v5 = vadd.f32 %v9656_v2, %v9458_v40 }
 0x580   : > { %v9461_v37 = vadd.f32 %v9445_v25, %v16486_v18 }
 0x581   : > { %v9459_v56 = vadd.f32 %v9443_v41, %v16490_v16 }
 0x582   : > { %v16545_v38 = vadd.f32 %v13157_v3, %v9461_v37  ;;  %v13160_v19 = vpop.f32.mrb[48].mxu0 }
 0x583   : > { %v16547_v24 = vadd.f32 %v9608_v51, %v9459_v56  ;;  %v13136_v23 = vpop.f32.mrb[48].mxu1  ;;  %v9662_v55 = vmul.f32 %v13160_v19, %v16803_v33  ;;  %v9621_v4 = vpop.f32.mrb[49].mxu0  ;;  %v16585_v56 = vld [vmem:[%s16751_s8] ss:$0 sm:$0xff] }
 0x584   : > { %v9464_v31 = vadd.f32 %v13136_v23, %v16498_v22  ;;  %v9407_v36 = vpop.f32.mrb[49].mxu1  ;;  %v9660_v62 = vmul.f32 %v16804_v30, %v9621_v4  ;;  %v13161_v18 = vpop.f32.mrb[50].mxu0 }
 0x585   : > { %v9462_v9 = vadd.f32 %v9407_v36, %v16502_v60  ;;  %v13137_v39 = vpop.f32.mrb[50].mxu1  ;;  %v9624_v61 = vpop.f32.mrb[51].mxu0 }
 0x586   : > { %v9449_v16 = vmul.f32 %v13137_v39, %v14061_v47  ;;  %v9410_v50 = vpop.f32.mrb[51].mxu1  ;;  %v16554_v15 = vadd.f32 %v9662_v55, %v9464_v31 }
 0x587   : > { %v9447_v59 = vmul.f32 %v14059_v46, %v9410_v50  ;;  %v16557_v8 = vadd.f32 %v9660_v62, %v9462_v9 }
 0x588   : > { %v9465_v33 = vadd.f32 %v9449_v16, %v16500_v21 }
 0x589   : > { %v9463_v22 = vadd.f32 %v9447_v59, %v16504_v35 }
 0x58a   : > { %v16561_v63 = vadd.f32 %v13161_v18, %v9465_v33  ;;  %v13164_v29 = vpop.f32.mrb[52].mxu0 }
 0x58b   : > { %v16563_v60 = vadd.f32 %v9624_v61, %v9463_v22  ;;  %v13140_v30 = vpop.f32.mrb[52].mxu1  ;;  %v9666_v27 = vmul.f32 %v13164_v29, %v16805_v13  ;;  %v9637_v6 = vpop.f32.mrb[53].mxu0 }
 0x58c   : > { %v9468_v58 = vadd.f32 %v13140_v30, %v16512_v57  ;;  %v9423_v34 = vpop.f32.mrb[53].mxu1  ;;  %v9664_v7 = vmul.f32 %v16806_v52, %v9637_v6  ;;  %v13165_v21 = vpop.f32.mrb[54].mxu0 }
 0x58d   : > { %v9466_v12 = vadd.f32 %v9423_v34, %v16516_v1  ;;  %v13141_v28 = vpop.f32.mrb[54].mxu1  ;;  %v9640_v40 = vpop.f32.mrb[55].mxu0 }
 0x58e   : > { %v9453_v35 = vmul.f32 %v13141_v28, %v14065_v49  ;;  %v9426_v26 = vpop.f32.mrb[55].mxu1  ;;  %v16570_v2 = vadd.f32 %v9666_v27, %v9468_v58 }
 0x58f   : > { %v9451_v32 = vmul.f32 %v14063_v48, %v9426_v26  ;;  %v16573_v3 = vadd.f32 %v9664_v7, %v9466_v12 }
 0x590   : > { %v9469_v13 = vadd.f32 %v9453_v35, %v16514_v20 }
 0x591   : > { %v9467_v57 = vadd.f32 %v9451_v32, %v16518_v14 }
 0x592   : > { %v16577_v25 = vadd.f32 %v13165_v21, %v9469_v13  ;;  %v13200_v11 = vpop.f32.mrb[56].mxu0 }
 0x593   : > { %v16579_v1 = vadd.f32 %v9640_v40, %v9467_v57  ;;  %v13176_v52 = vpop.f32.mrb[56].mxu1  ;;  %v9996_v37 = vpop.f32.mrb[57].mxu0 }
 0x594   : > { %v9865_v51 = vadd.f32 %v13176_v52, %v16523_v17  ;;  %v9800_v41 = vpop.f32.mrb[57].mxu1  ;;  %v13201_v19 = vpop.f32.mrb[58].mxu0  ;;  %v16593_v17 = vld [vmem:[%s16752_s9] ss:$0 sm:$0xff] }
 0x595   : > { %v9863_v23 = vadd.f32 %v9800_v41, %v16526_v10  ;;  %v13177_v20 = vpop.f32.mrb[58].mxu1  ;;  %v10062_v55 = vmul.f32 %v13201_v19, %v14053_v43  ;;  %v9999_v4 = vpop.f32.mrb[59].mxu0 }
 0x596   : > { %v10077_v14 = vadd.f32 %v13200_v11, %v9865_v51  ;;  %v9866_v31 = vadd.f32 %v13177_v20, %v16530_v54  ;;  %v9803_v36 = vpop.f32.mrb[59].mxu1  ;;  %v10060_v39 = vmul.f32 %v14051_v42, %v9999_v4 }
 0x597   : > { %v10075_v9 = vadd.f32 %v9996_v37, %v9863_v23  ;;  %v9864_v62 = vadd.f32 %v9803_v36, %v16532_v53 }
 0x598   : > { %v10100_v10 = vmul.f32 %v16585_v56, %v10077_v14  ;;  %v10078_v18 = vadd.f32 %v10062_v55, %v9866_v31 }
 0x599   : > { %v10098_v16 = vmul.f32 %v16585_v56, %v10075_v9  ;;  %v10076_v54 = vadd.f32 %v10060_v39, %v9864_v62 }
 0x59a   : > { %v10123_v43 = vadd.f32 %v16593_v17, %v10100_v10  ;;  %v10101_v50 = vmul.f32 %v16585_v56, %v10078_v18  ;;  %v13204_v22 = vpop.f32.mrb[60].mxu0 }
 0x59b   : > { %v10121_v61 = vadd.f32 %v16593_v17, %v10098_v16  ;;  %v10099_v59 = vmul.f32 %v16585_v56, %v10076_v54  ;;  %v13180_v33 = vpop.f32.mrb[60].mxu1  ;;  %v10012_v58 = vpop.f32.mrb[61].mxu0 }
 0x59c   : > { %v10139_v53 = vmax.f32 %v10123_v43, 0.0  ;;  %v10124_v42 = vadd.f32 %v16593_v17, %v10101_v50  ;;  %v9869_v30 = vadd.f32 %v13180_v33, %v16538_v0  ;;  %v9816_v29 = vpop.f32.mrb[61].mxu1  ;;  %v13205_v7 = vpop.f32.mrb[62].mxu0 }
 0x59d   : > { %v10137_v27 = vmax.f32 %v10121_v61, 0.0  ;;  %v10122_v34 = vadd.f32 %v16593_v17, %v10099_v59  ;;  %v9867_v6 = vadd.f32 %v9816_v29, %v16541_v5  ;;  %v13181_v12 = vpop.f32.mrb[62].mxu1  ;;  %v10066_v26 = vmul.f32 %v13205_v7, %v14057_v45  ;;  %v10015_v40 = vpop.f32.mrb[63].mxu0 }
 0x59e   : > { %10155 = vst.msk [vmem:[%s14068_s23 + $0x10] sm:$0xff] %vm8288_vm1, %v10139_v53  ;;  %v10140_v28 = vmax.f32 %v10124_v42, 0.0  ;;  %v10081_v21 = vadd.f32 %v13204_v22, %v9869_v30  ;;  %v9870_v35 = vadd.f32 %v13181_v12, %v16545_v38  ;;  %v9819_v0 = vpop.f32.mrb[63].mxu1  ;;  %v10064_v5 = vmul.f32 %v14055_v44, %v10015_v40 }
 0x59f   : > { %10153 = vst.msk [vmem:[%s14068_s23] sm:$0xff] %vm8288_vm1, %v10137_v27  ;;  %v10138_v32 = vmax.f32 %v10122_v34, 0.0  ;;  %v10079_v13 = vadd.f32 %v10012_v58, %v9867_v6  ;;  %v9868_v57 = vadd.f32 %v9819_v0, %v16547_v24 }
 0x5a0   : > { %10156 = vst.msk [vmem:[%s14068_s23 + $0x18] sm:$0xff] %vm8288_vm1, %v10140_v28  ;;  %v10104_v52 = vmul.f32 %v16585_v56, %v10081_v21  ;;  %v10082_v11 = vadd.f32 %v10066_v26, %v9870_v35 }
 0x5a1   : > { %10154 = vst.msk [vmem:[%s14068_s23 + $0x8] sm:$0xff] %vm8288_vm1, %v10138_v32  ;;  %v10102_v38 = vmul.f32 %v16585_v56, %v10079_v13  ;;  %v10080_v45 = vadd.f32 %v10064_v5, %v9868_v57 }
 0x5a2   : > { %v10127_v51 = vadd.f32 %v16593_v17, %v10104_v52  ;;  %v10105_v41 = vmul.f32 %v16585_v56, %v10082_v11  ;;  %v13208_v23 = vpop.f32.mrb[64].mxu0 }
 0x5a3   : > { %v10125_v37 = vadd.f32 %v16593_v17, %v10102_v38  ;;  %v10103_v24 = vmul.f32 %v16585_v56, %v10080_v45  ;;  %v13184_v44 = vpop.f32.mrb[64].mxu1  ;;  %v10028_v55 = vpop.f32.mrb[65].mxu0 }
 0x5a4   : > { %v10143_v20 = vmax.f32 %v10127_v51, 0.0  ;;  %v10128_v19 = vadd.f32 %v16593_v17, %v10105_v41  ;;  %v9873_v14 = vadd.f32 %v13184_v44, %v16554_v15  ;;  %v9832_v31 = vpop.f32.mrb[65].mxu1  ;;  %v13209_v39 = vpop.f32.mrb[66].mxu0 }
 0x5a5   : > { %v10141_v36 = vmax.f32 %v10125_v37, 0.0  ;;  %v10126_v4 = vadd.f32 %v16593_v17, %v10103_v24  ;;  %v9871_v9 = vadd.f32 %v9832_v31, %v16557_v8  ;;  %v13185_v62 = vpop.f32.mrb[66].mxu1  ;;  %v10070_v54 = vmul.f32 %v13209_v39, %v14061_v47  ;;  %v10031_v43 = vpop.f32.mrb[67].mxu0 }
 0x5a6   : > { %10159 = vst.msk [vmem:[%s14068_s23 + $0x30] sm:$0xff] %vm8288_vm1, %v10143_v20  ;;  %v10144_v10 = vmax.f32 %v10128_v19, 0.0  ;;  %v10085_v18 = vadd.f32 %v13208_v23, %v9873_v14  ;;  %v9874_v16 = vadd.f32 %v13185_v62, %v16561_v63  ;;  %v9835_v15 = vpop.f32.mrb[67].mxu1  ;;  %v10068_v8 = vmul.f32 %v14059_v46, %v10031_v43 }
 0x5a7   : > { %10157 = vst.msk [vmem:[%s14068_s23 + $0x20] sm:$0xff] %vm8288_vm1, %v10141_v36  ;;  %v10142_v50 = vmax.f32 %v10126_v4, 0.0  ;;  %v10083_v61 = vadd.f32 %v10028_v55, %v9871_v9  ;;  %v9872_v59 = vadd.f32 %v9835_v15, %v16563_v60 }
 0x5a8   : > { %10160 = vst.msk [vmem:[%s14068_s23 + $0x38] sm:$0xff] %vm8288_vm1, %v10144_v10  ;;  %v10108_v33 = vmul.f32 %v16585_v56, %v10085_v18  ;;  %v10086_v22 = vadd.f32 %v10070_v54, %v9874_v16 }
 0x5a9   : > { %10158 = vst.msk [vmem:[%s14068_s23 + $0x28] sm:$0xff] %vm8288_vm1, %v10142_v50  ;;  %v10106_v63 = vmul.f32 %v16585_v56, %v10083_v61  ;;  %v10084_v47 = vadd.f32 %v10068_v8, %v9872_v59 }
 0x5aa   : > { %v10131_v53 = vadd.f32 %v16593_v17, %v10108_v33  ;;  %v10109_v42 = vmul.f32 %v16585_v56, %v10086_v22  ;;  %v13212_v29 = vpop.f32.mrb[68].mxu0 }
 0x5ab   : > { %v10129_v60 = vadd.f32 %v16593_v17, %v10106_v63  ;;  %v10107_v46 = vmul.f32 %v16585_v56, %v10084_v47  ;;  %v13188_v30 = vpop.f32.mrb[68].mxu1  ;;  %v10044_v12 = vpop.f32.mrb[69].mxu0 }
 0x5ac   : > { %v10147_v58 = vmax.f32 %v10131_v53, 0.0  ;;  %v10132_v27 = vadd.f32 %v16593_v17, %v10109_v42  ;;  %v9877_v34 = vadd.f32 %v13188_v30, %v16570_v2  ;;  %v9848_v6 = vpop.f32.mrb[69].mxu1  ;;  %v13213_v26 = vpop.f32.mrb[70].mxu0 }
 0x5ad   : > { %v10145_v7 = vmax.f32 %v10129_v60, 0.0  ;;  %v10130_v28 = vadd.f32 %v16593_v17, %v10107_v46  ;;  %v9875_v21 = vadd.f32 %v9848_v6, %v16573_v3  ;;  %v13189_v35 = vpop.f32.mrb[70].mxu1  ;;  %v10074_v32 = vmul.f32 %v13213_v26, %v14065_v49  ;;  %v10047_v57 = vpop.f32.mrb[71].mxu0 }
 0x5ae   : > { %10163 = vst.msk [vmem:[%s14068_s23 + $0x50] sm:$0xff] %vm8288_vm1, %v10147_v58  ;;  %v10148_v0 = vmax.f32 %v10132_v27, 0.0  ;;  %v10089_v40 = vadd.f32 %v13212_v29, %v9877_v34  ;;  %v9878_v2 = vadd.f32 %v13189_v35, %v16577_v25  ;;  %v9851_v13 = vpop.f32.mrb[71].mxu1  ;;  %v10072_v11 = vmul.f32 %v14063_v48, %v10047_v57 }
 0x5af   : > { %10161 = vst.msk [vmem:[%s14068_s23 + $0x40] sm:$0xff] %vm8288_vm1, %v10145_v7  ;;  %v10146_v5 = vmax.f32 %v10130_v28, 0.0  ;;  %v10087_v3 = vadd.f32 %v10044_v12, %v9875_v21  ;;  %v9876_v52 = vadd.f32 %v9851_v13, %v16579_v1 }
 0x5b0   : > { %10164 = vst.msk [vmem:[%s14068_s23 + $0x58] sm:$0xff] %vm8288_vm1, %v10148_v0  ;;  %v10112_v38 = vmul.f32 %v16585_v56, %v10089_v40  ;;  %v10090_v45 = vadd.f32 %v10074_v32, %v9878_v2 }
 0x5b1   : > { %10162 = vst.msk [vmem:[%s14068_s23 + $0x48] sm:$0xff] %vm8288_vm1, %v10146_v5  ;;  %v10110_v49 = vmul.f32 %v16585_v56, %v10087_v3  ;;  %v10088_v25 = vadd.f32 %v10072_v11, %v9876_v52 }
 0x5b2   : > { %v10135_v51 = vadd.f32 %v16593_v17, %v10112_v38  ;;  %v10113_v1 = vmul.f32 %v16585_v56, %v10090_v45 }
 0x5b3   : > { %v10133_v48 = vadd.f32 %v16593_v17, %v10110_v49  ;;  %v10111_v41 = vmul.f32 %v16585_v56, %v10088_v25 }
 0x5b4   : > { %v10151_v37 = vmax.f32 %v10135_v51, 0.0  ;;  %v10136_v24 = vadd.f32 %v16593_v17, %v10113_v1 }
 0x5b5   : > { %v10149_v44 = vmax.f32 %v10133_v48, 0.0  ;;  %v10134_v23 = vadd.f32 %v16593_v17, %v10111_v41 }
 0x5b6   : > { %10167 = vst.msk [vmem:[%s14068_s23 + $0x70] sm:$0xff] %vm8288_vm1, %v10151_v37  ;;  %v10152_v20 = vmax.f32 %v10136_v24, 0.0 }
 0x5b7   : > { %10165 = vst.msk [vmem:[%s14068_s23 + $0x60] sm:$0xff] %vm8288_vm1, %v10149_v44  ;;  %v10150_v56 = vmax.f32 %v10134_v23, 0.0 }
 0x5b8   : > { %10168 = vst.msk [vmem:[%s14068_s23 + $0x78] sm:$0xff] %vm8288_vm1, %v10152_v20 }
 0x5b9   : > { %10166 = vst.msk [vmem:[%s14068_s23 + $0x68] sm:$0xff] %vm8288_vm1, %v10150_v56 }
 0x5ba   : > { %13804 = shalt.err (!%p13801_p7)
}
 0x5bb   : > { %s13805_s23 = scalar_lea.hbm %s16679_s30, 2048  ;;  %s13809_s17 = scalar_lea.hbm %s16753_s10, 8192 }
 0x5bc   : > { %p13806_p9 = scmp.ne.s32.totalorder %s16679_s30, %s13805_s23  ;;  %p13810_p12 = scmp.lt.u32.totalorder %s16679_s30, %s16753_s10 }
 0x5bd   : > { %p13811_p13 = scmp.lt.u32.totalorder %s13809_s17, %s13805_s23  ;;  %p13813_p1 = scmp.lt.u32.totalorder %s13805_s23, %s16679_s30 }
 0x5be   : > { %p13807_p10 = pnand %p13806_p9, %p13998_p3 }
 0x5bf   : > { %p13812_p0 = por %p13811_p13, %p13810_p12 }
 0x5c0   : > { %p13808_p11 = pneg %p13807_p10 }
 0x5c1   : > { %p13814_p2 = por %p13813_p1, %p13812_p0 }
 0x5c3   : > { %p13815_p4 = pnand %p13814_p2, %p13808_p11 }
 0x5c5   : > { %13818 = shalt.err (!%p13815_p4)
}
 0x5c6   : > { %s13890_s12 = smov 128   ;;  %s13891_s21 = smov 8  }
 0x5c7   : > { %13534 = dma.vmem_to_hbm [thread:$0]  (%p13998_p3), %s16681_s28, 2048, %s16679_s30, %s16691_s0, %s13890_s12, %s13890_s12, %s13891_s21  }
 0x5c8 PF: > { %p13540_p5 = scmp.ge.s32.totalorder %s13885_s20, 2  ;;  %s10200_s22 = sand.u32 1, %s13857_s13  }
 0x5c9   : > { %s10201_s25 = scalar_lea.sflag [#allocation6], %s10200_s22 }
 0x5ca   : > { %p13537_p6 = pnand %p13540_p5, %p14007_p8 }
 0x5cc   : > { %13852 = dma.done.wait (!%p13537_p6), %s10201_s25, 2048  }
 0x5cd   : > { %13854 = vsyncadd (!%p13537_p6), %s10201_s25, 4294965248  ;;  %s23_s20 = sadd.s32 1, %s13885_s20   ;;  %s16808_s17 = sld [smem:[#allocation8_spill]] }
 0x5ce   : > { %p20_p7 = scmp.ge.s32.totalorder %s23_s20, 6   ;;  %s16809_s26 = sld [smem:[#allocation9_spill]] }
 0x5cf   : > { %s16810_s19 = sld [smem:[#allocation10_spill]]  ;;  %s16811_s13 = smov %s13861_s14 }
 0x5d0   : > { %s16812_s14 = smov %s13865_s15  ;;  %s16813_s15 = smov %s14016_s11 }
 0x5d1   : > { %s16814_s16 = smov %s13877_s18  ;;  %22 = sbr.rel (!%p20_p7) target bundleno = 8 (0x8), region = 135 }
 0x5d4   : > { %s16815_s18 = smov %s16809_s26 }
 0x5d8   :  { %10206 = vsyncpa [#allocation6], 1 }
 0x5d9   :  { %10208 = vsyncpa [#allocation6 + $0x1], 1 }

</bundles_post_ra>
